<compile_context>
chip_gen: v6e
topology: v6e:2x2x1
jax: 0.10.0
libtpu: 0.0.40
codegen_flags: <defaults>
</compile_context>

<pallas_src>
import functools

import jax
import jax.numpy as jnp
from jax.experimental import pallas as pl
from jax.experimental.pallas import tpu as pltpu

EPS = 1e-5                       # nn.BatchNorm2d default
LANE = 128                       # channel padding quantum (TPU lane width)
_VMEM_LIMIT = 48 * 1024 * 1024   # < v7x 64 MiB physical VMEM, > default scoped


def _round_up(x, m):
    return (x + m - 1) // m * m


# ----------------------------- Pallas kernels -------------------------------
def _conv3x3_stats_kernel(*refs, ho, wo, stride, with_shortcut):
    """3x3 conv (input already zero-padded) as 9 shifted MXU matmuls.

    Emits the raw conv output (bf16) plus per-channel (sum, sum-of-squares)
    partials for the two-pass BatchNorm.  Optionally also computes the fused
    1x1 shortcut conv, which is exactly the centre tap of the 3x3 stencil.
    """
    if with_shortcut:
        x_ref, w_ref, wsc_ref, y_ref, ysc_ref, st_ref, stsc_ref = refs
    else:
        x_ref, w_ref, y_ref, st_ref = refs

    cin = x_ref.shape[-1]
    cout = w_ref.shape[-1]
    acc = jnp.zeros((ho * wo, cout), jnp.float32)
    sc_acc = None

    for t in range(9):                       # static unroll over the 3x3 taps
        kh, kw = t // 3, t % 3
        if stride == 1:
            tap = x_ref[0, kh:kh + ho, kw:kw + wo, :]
        else:
            # TODO(synk): stride>1 path uses strided ref reads; only the
            # stride=1 path is exercised by the self-test below.
            tap = x_ref[0, pl.ds(kh, ho, stride), pl.ds(kw, wo, stride), :]
        tap2d = tap.reshape(ho * wo, cin)
        acc = acc + jnp.dot(tap2d, w_ref[t], preferred_element_type=jnp.float32)
        if with_shortcut and t == 4:         # centre tap == (strided) raw input
            sc_acc = jnp.dot(tap2d, wsc_ref[...],
                             preferred_element_type=jnp.float32)

    y_ref[0] = acc.astype(y_ref.dtype)
    st_ref[0] = jnp.concatenate(
        [jnp.sum(acc, axis=0, keepdims=True),
         jnp.sum(acc * acc, axis=0, keepdims=True)], axis=0)
    if with_shortcut:
        ysc_ref[0] = sc_acc.astype(ysc_ref.dtype)
        stsc_ref[0] = jnp.concatenate(
            [jnp.sum(sc_acc, axis=0, keepdims=True),
             jnp.sum(sc_acc * sc_acc, axis=0, keepdims=True)], axis=0)


def _bn_add_relu_kernel(*refs, conv_shortcut):
    """Final fuse: bn2-apply + shortcut (bn_sc-apply or identity) + add + ReLU."""
    if conv_shortcut:
        y2_ref, ysc_ref, s2_ref, b2_ref, ssc_ref, bsc_ref, o_ref = refs
        shortcut = ysc_ref[0].astype(jnp.float32) * ssc_ref[...] + bsc_ref[...]
    else:
        y2_ref, xid_ref, s2_ref, b2_ref, o_ref = refs
        shortcut = xid_ref[0].astype(jnp.float32)
    y = y2_ref[0].astype(jnp.float32) * s2_ref[...] + b2_ref[...]
    o_ref[0] = jnp.maximum(y + shortcut, 0.0)


# ------------------------------ pallas_call glue -----------------------------
def _conv_stats_call(xpad, w, wsc, *, stride, ho, wo):
    n, hp, wp, cin = xpad.shape
    cout = w.shape[-1]
    m1 = ho * wo
    with_sc = wsc is not None

    kern = functools.partial(_conv3x3_stats_kernel, ho=ho, wo=wo,
                             stride=stride, with_shortcut=with_sc)

    inputs = [xpad, w]
    in_specs = [pl.BlockSpec((1, hp, wp, cin), lambda i: (i, 0, 0, 0)),
                pl.BlockSpec((9, cin, cout), lambda i: (0, 0, 0))]
    if with_sc:
        inputs.append(wsc)
        in_specs.append(pl.BlockSpec((cin, cout), lambda i: (0, 0)))

    y_shape = jax.ShapeDtypeStruct((n, m1, cout), jnp.bfloat16)
    y_spec = pl.BlockSpec((1, m1, cout), lambda i: (i, 0, 0))
    st_shape = jax.ShapeDtypeStruct((n, 2, cout), jnp.float32)
    st_spec = pl.BlockSpec((1, 2, cout), lambda i: (i, 0, 0))
    if with_sc:
        out_shape = (y_shape, y_shape, st_shape, st_shape)
        out_specs = (y_spec, y_spec, st_spec, st_spec)
    else:
        out_shape = (y_shape, st_shape)
        out_specs = (y_spec, st_spec)

    n_mats = 9 + (1 if with_sc else 0)
    cost = pl.CostEstimate(
        flops=2 * n * m1 * cin * cout * n_mats,
        transcendentals=0,
        bytes_accessed=(xpad.size + w.size) * 2
        + (wsc.size * 2 if with_sc else 0)
        + n * m1 * cout * 2 * (2 if with_sc else 1)
        + n * 2 * cout * 4 * (2 if with_sc else 1))

    return pl.pallas_call(
        kern,
        grid=(n,),
        in_specs=in_specs,
        out_specs=out_specs,
        out_shape=out_shape,
        compiler_params=pltpu.CompilerParams(
            dimension_semantics=("parallel",),
            vmem_limit_bytes=_VMEM_LIMIT),
        cost_estimate=cost,
    )(*inputs)


def _bn_add_relu_call(y2, shortcut, scale2, shift2, scalesc=None, shiftsc=None):
    n, m1, cout = y2.shape
    conv_sc = scalesc is not None
    kern = functools.partial(_bn_add_relu_kernel, conv_shortcut=conv_sc)

    row_spec = pl.BlockSpec((1, m1, cout), lambda i: (i, 0, 0))
    vec_spec = pl.BlockSpec((1, cout), lambda i: (0, 0))

    inputs = [y2, shortcut, scale2, shift2]
    in_specs = [row_spec, row_spec, vec_spec, vec_spec]
    if conv_sc:
        inputs += [scalesc, shiftsc]
        in_specs += [vec_spec, vec_spec]

    cost = pl.CostEstimate(
        flops=6 * n * m1 * cout, transcendentals=0,
        bytes_accessed=y2.size * 2
        + shortcut.size * shortcut.dtype.itemsize
        + n * m1 * cout * 4)

    return pl.pallas_call(
        kern,
        grid=(n,),
        in_specs=in_specs,
        out_specs=row_spec,
        out_shape=jax.ShapeDtypeStruct((n, m1, cout), jnp.float32),
        compiler_params=pltpu.CompilerParams(
            dimension_semantics=("parallel",),
            vmem_limit_bytes=_VMEM_LIMIT),
        cost_estimate=cost,
    )(*inputs)


def _bn_coeffs(stats, count, gamma, beta):
    """Fold per-step (sum, sumsq) partials into BN scale/shift (training mode)."""
    total = jnp.sum(stats, axis=0)                      # (2, C)
    mean = total[0:1, :] / count
    var = jnp.maximum(total[1:2, :] / count - mean * mean, 0.0)  # biased var
    scale = gamma * jax.lax.rsqrt(var + EPS)
    shift = beta - mean * scale
    return scale, shift


# ------------------------------- BasicBlock ----------------------------------
def init_basic_block_params(key, in_planes, planes):
    ks = jax.random.split(key, 9)
    f32 = jnp.float32
    return {
        "w1": 0.1 * jax.random.normal(ks[0], (planes, in_planes, 3, 3), f32),
        "g1": 1.0 + 0.1 * jax.random.normal(ks[1], (planes,), f32),
        "b1": 0.1 * jax.random.normal(ks[2], (planes,), f32),
        "w2": 0.1 * jax.random.normal(ks[3], (planes, planes, 3, 3), f32),
        "g2": 1.0 + 0.1 * jax.random.normal(ks[4], (planes,), f32),
        "b2": 0.1 * jax.random.normal(ks[5], (planes,), f32),
        "wsc": 0.1 * jax.random.normal(ks[6], (planes, in_planes, 1, 1), f32),
        "gsc": 1.0 + 0.1 * jax.random.normal(ks[7], (planes,), f32),
        "bsc": 0.1 * jax.random.normal(ks[8], (planes,), f32),
    }


def basic_block_forward(x_nchw, params, stride):
    in_planes = x_nchw.shape[1]
    planes = params["w1"].shape[0]
    conv_shortcut = (stride != 1) or (in_planes != planes)

    n, _, h, w = x_nchw.shape
    ho = (h - 1) // stride + 1
    wo = (w - 1) // stride + 1
    m1 = ho * wo
    cip = _round_up(in_planes, LANE)
    cop = _round_up(planes, LANE)
    f32, bf16 = jnp.float32, jnp.bfloat16

    # NCHW -> NHWC, pad channels to a lane multiple, zero-pad the 3x3 halo.
    x_nhwc = jnp.transpose(x_nchw, (0, 2, 3, 1)).astype(f32)
    x_cpad = jnp.pad(x_nhwc, ((0, 0), (0, 0), (0, 0), (0, cip - in_planes)))
    xpad = jnp.pad(x_cpad, ((0, 0), (1, 1), (1, 1), (0, 0))).astype(bf16)

    def prep_w3x3(w_oihw, ci, co, cip_, cop_):
        wk = jnp.transpose(w_oihw, (2, 3, 1, 0)).reshape(9, ci, co)
        return jnp.pad(wk, ((0, 0), (0, cip_ - ci), (0, cop_ - co))).astype(bf16)

    def prep_vec(v, c, cpad):
        return jnp.pad(v.astype(f32), (0, cpad - c)).reshape(1, cpad)

    w1 = prep_w3x3(params["w1"], in_planes, planes, cip, cop)
    w2 = prep_w3x3(params["w2"], planes, planes, cop, cop)
    g1, b1 = prep_vec(params["g1"], planes, cop), prep_vec(params["b1"], planes, cop)
    g2, b2 = prep_vec(params["g2"], planes, cop), prep_vec(params["b2"], planes, cop)

    # ---- stage 1: conv1 (+ fused 1x1 shortcut conv) + BN partial stats ------
    if conv_shortcut:
        wsc = jnp.pad(params["wsc"][:, :, 0, 0].T,
                      ((0, cip - in_planes), (0, cop - planes))).astype(bf16)
        y1raw, yscraw, st1, stsc = _conv_stats_call(
            xpad, w1, wsc, stride=stride, ho=ho, wo=wo)
    else:
        y1raw, st1 = _conv_stats_call(xpad, w1, None, stride=stride, ho=ho, wo=wo)

    # ---- fold BN1 + ReLU + re-pad halo for conv2 (cheap fused elementwise) ---
    scale1, shift1 = _bn_coeffs(st1, n * m1, g1, b1)
    y1act = jnp.maximum(y1raw.astype(f32) * scale1 + shift1, 0.0)
    y1pad = jnp.pad(y1act.reshape(n, ho, wo, cop),
                    ((0, 0), (1, 1), (1, 1), (0, 0))).astype(bf16)

    # ---- stage 2: conv2 + BN partial stats -----------------------------------
    y2raw, st2 = _conv_stats_call(y1pad, w2, None, stride=1, ho=ho, wo=wo)
    scale2, shift2 = _bn_coeffs(st2, n * m1, g2, b2)

    # ---- stage 3: bn2-apply + shortcut + add + ReLU (fused Pallas kernel) ----
    if conv_shortcut:
        gsc = prep_vec(params["gsc"], planes, cop)
        bsc = prep_vec(params["bsc"], planes, cop)
        scalesc, shiftsc = _bn_coeffs(stsc, n * m1, gsc, bsc)
        out = _bn_add_relu_call(y2raw, yscraw, scale2, shift2, scalesc, shiftsc)
    else:
        xid = x_cpad.reshape(n, m1, cop)     # identity => stride==1, cip==cop
        out = _bn_add_relu_call(y2raw, xid, scale2, shift2)

    out = out.reshape(n, ho, wo, cop)[:, :, :, :planes]
    return jnp.transpose(out, (0, 3, 1, 2))  # back to NCHW


# ------------------------------ pure-JAX reference ---------------------------
def reference_forward(x, params, stride, in_planes, planes):
    prec = jax.lax.Precision.HIGHEST

    def conv(x, w, s):
        pad = w.shape[2] // 2
        return jax.lax.conv_general_dilated(
            x, w, (s, s), ((pad, pad), (pad, pad)),
            dimension_numbers=("NCHW", "OIHW", "NCHW"), precision=prec)

    def bn(y, g, b):
        mean = jnp.mean(y, axis=(0, 2, 3), keepdims=True)
        var = jnp.mean((y - mean) ** 2, axis=(0, 2, 3), keepdims=True)
        return (y - mean) / jnp.sqrt(var + EPS) * g.reshape(1, -1, 1, 1) \
            + b.reshape(1, -1, 1, 1)

    out = jax.nn.relu(bn(conv(x, params["w1"], stride), params["g1"], params["b1"]))
    out = bn(conv(out, params["w2"], 1), params["g2"], params["b2"])
    if stride != 1 or in_planes != planes:
        sc = bn(conv(x, params["wsc"], stride), params["gsc"], params["bsc"])
    else:
        sc = x
    return jax.nn.relu(out + sc)


if __name__ == "__main__":
    key = jax.random.PRNGKey(0)
    fwd = jax.jit(basic_block_forward, static_argnums=2)

    configs = [
        (4, 8, 1),   # in_planes != planes -> 1x1-conv + BN shortcut branch
        (8, 8, 1),   # identity-shortcut branch
    ]
    for idx, (in_planes, planes, stride) in enumerate(configs):
        kx, kp = jax.random.split(jax.random.fold_in(key, idx))
        x = jax.random.normal(kx, (2, in_planes, 16, 16), jnp.float32)
        params = init_basic_block_params(kp, in_planes, planes)

        out = jax.block_until_ready(fwd(x, params, stride))
        ref = reference_forward(x, params, stride, in_planes, planes)
        assert out.shape == ref.shape, (out.shape, ref.shape)

        max_err = float(jnp.max(jnp.abs(out - ref)))
        mean_err = float(jnp.mean(jnp.abs(out - ref)))
        # bf16 MXU inputs (f32 accumulate) vs f32 HIGHEST reference.
        assert max_err < 1e-1, (idx, max_err)
        assert mean_err < 1e-2, (idx, mean_err)

    print("KERNEL_OK")
</pallas_src>

<mosaic_0001>
module attributes {stable_mosaic.version = 11 : i64} {
  func.func @_conv3x3_stats_kernel(%arg0: i32, %arg1: memref<1x18x18x128xbf16, #tpu.memory_space<vmem>>, %arg2: memref<9x128x128xbf16, #tpu.memory_space<vmem>>, %arg3: memref<128x128xbf16, #tpu.memory_space<vmem>>, %arg4: memref<1x256x128xbf16, #tpu.memory_space<vmem>>, %arg5: memref<1x256x128xbf16, #tpu.memory_space<vmem>>, %arg6: memref<1x2x128xf32, #tpu.memory_space<vmem>>, %arg7: memref<1x2x128xf32, #tpu.memory_space<vmem>>) attributes {dimension_semantics = [#tpu.dimension_semantics<parallel>], iteration_bounds = array<i64: 2>, scalar_prefetch = 0 : i64, scratch_operands = 0 : i64, tpu.core_type = #tpu.core_type<tc>, window_params = [{transform_indices = @transform_0, window_bounds = array<i64: 1, 18, 18, 128>}, {pipeline_mode = #tpu.pipeline_mode<synchronous>, transform_indices = @transform_1, window_bounds = array<i64: 9, 128, 128>}, {pipeline_mode = #tpu.pipeline_mode<synchronous>, transform_indices = @transform_2, window_bounds = array<i64: 128, 128>}, {transform_indices = @transform_3, window_bounds = array<i64: 1, 256, 128>}, {transform_indices = @transform_4, window_bounds = array<i64: 1, 256, 128>}, {transform_indices = @transform_5, window_bounds = array<i64: 1, 2, 128>}, {transform_indices = @transform_6, window_bounds = array<i64: 1, 2, 128>}]} {
    %cst = arith.constant 0.000000e+00 : f32
    %0 = vector.broadcast %cst : f32 to vector<256x128xf32>
    %c0 = arith.constant 0 : index
    %c0_0 = arith.constant 0 : index
    %c0_1 = arith.constant 0 : index
    %c0_2 = arith.constant 0 : index
    %1 = vector.load %arg1[%c0, %c0_0, %c0_1, %c0_2] : memref<1x18x18x128xbf16, #tpu.memory_space<vmem>>, vector<1x16x16x128xbf16>
    %2 = vector.shape_cast %1 : vector<1x16x16x128xbf16> to vector<16x16x128xbf16>
    %3 = vector.shape_cast %2 : vector<16x16x128xbf16> to vector<256x128xbf16>
    %c0_3 = arith.constant 0 : index
    %c0_4 = arith.constant 0 : index
    %c0_5 = arith.constant 0 : index
    %4 = vector.load %arg2[%c0_3, %c0_4, %c0_5] : memref<9x128x128xbf16, #tpu.memory_space<vmem>>, vector<1x128x128xbf16>
    %5 = vector.shape_cast %4 : vector<1x128x128xbf16> to vector<128x128xbf16>
    %cst_6 = arith.constant dense<0.000000e+00> : vector<256x128xf32>
    %6 = tpu.matmul %3, %5, %cst_6 {dimension_numbers = #tpu.dot_dimension_numbers<[1], [0], [0], [1], [0, 0, 1, 1], [], []>} : vector<256x128xbf16>, vector<128x128xbf16>, vector<256x128xf32> -> vector<256x128xf32>
    %7 = arith.addf %0, %6 : vector<256x128xf32>
    %c0_7 = arith.constant 0 : index
    %c0_8 = arith.constant 0 : index
    %c1 = arith.constant 1 : index
    %c0_9 = arith.constant 0 : index
    %8 = vector.load %arg1[%c0_7, %c0_8, %c1, %c0_9] : memref<1x18x18x128xbf16, #tpu.memory_space<vmem>>, vector<1x16x16x128xbf16>
    %9 = vector.shape_cast %8 : vector<1x16x16x128xbf16> to vector<16x16x128xbf16>
    %10 = vector.shape_cast %9 : vector<16x16x128xbf16> to vector<256x128xbf16>
    %c1_10 = arith.constant 1 : index
    %c0_11 = arith.constant 0 : index
    %c0_12 = arith.constant 0 : index
    %11 = vector.load %arg2[%c1_10, %c0_11, %c0_12] : memref<9x128x128xbf16, #tpu.memory_space<vmem>>, vector<1x128x128xbf16>
    %12 = vector.shape_cast %11 : vector<1x128x128xbf16> to vector<128x128xbf16>
    %cst_13 = arith.constant dense<0.000000e+00> : vector<256x128xf32>
    %13 = tpu.matmul %10, %12, %cst_13 {dimension_numbers = #tpu.dot_dimension_numbers<[1], [0], [0], [1], [0, 0, 1, 1], [], []>} : vector<256x128xbf16>, vector<128x128xbf16>, vector<256x128xf32> -> vector<256x128xf32>
    %14 = arith.addf %7, %13 : vector<256x128xf32>
    %c0_14 = arith.constant 0 : index
    %c0_15 = arith.constant 0 : index
    %c2 = arith.constant 2 : index
    %c0_16 = arith.constant 0 : index
    %15 = vector.load %arg1[%c0_14, %c0_15, %c2, %c0_16] : memref<1x18x18x128xbf16, #tpu.memory_space<vmem>>, vector<1x16x16x128xbf16>
    %16 = vector.shape_cast %15 : vector<1x16x16x128xbf16> to vector<16x16x128xbf16>
    %17 = vector.shape_cast %16 : vector<16x16x128xbf16> to vector<256x128xbf16>
    %c2_17 = arith.constant 2 : index
    %c0_18 = arith.constant 0 : index
    %c0_19 = arith.constant 0 : index
    %18 = vector.load %arg2[%c2_17, %c0_18, %c0_19] : memref<9x128x128xbf16, #tpu.memory_space<vmem>>, vector<1x128x128xbf16>
    %19 = vector.shape_cast %18 : vector<1x128x128xbf16> to vector<128x128xbf16>
    %cst_20 = arith.constant dense<0.000000e+00> : vector<256x128xf32>
    %20 = tpu.matmul %17, %19, %cst_20 {dimension_numbers = #tpu.dot_dimension_numbers<[1], [0], [0], [1], [0, 0, 1, 1], [], []>} : vector<256x128xbf16>, vector<128x128xbf16>, vector<256x128xf32> -> vector<256x128xf32>
    %21 = arith.addf %14, %20 : vector<256x128xf32>
    %c0_21 = arith.constant 0 : index
    %c1_22 = arith.constant 1 : index
    %c0_23 = arith.constant 0 : index
    %c0_24 = arith.constant 0 : index
    %22 = vector.load %arg1[%c0_21, %c1_22, %c0_23, %c0_24] : memref<1x18x18x128xbf16, #tpu.memory_space<vmem>>, vector<1x16x16x128xbf16>
    %23 = vector.shape_cast %22 : vector<1x16x16x128xbf16> to vector<16x16x128xbf16>
    %24 = vector.shape_cast %23 : vector<16x16x128xbf16> to vector<256x128xbf16>
    %c3 = arith.constant 3 : index
    %c0_25 = arith.constant 0 : index
    %c0_26 = arith.constant 0 : index
    %25 = vector.load %arg2[%c3, %c0_25, %c0_26] : memref<9x128x128xbf16, #tpu.memory_space<vmem>>, vector<1x128x128xbf16>
    %26 = vector.shape_cast %25 : vector<1x128x128xbf16> to vector<128x128xbf16>
    %cst_27 = arith.constant dense<0.000000e+00> : vector<256x128xf32>
    %27 = tpu.matmul %24, %26, %cst_27 {dimension_numbers = #tpu.dot_dimension_numbers<[1], [0], [0], [1], [0, 0, 1, 1], [], []>} : vector<256x128xbf16>, vector<128x128xbf16>, vector<256x128xf32> -> vector<256x128xf32>
    %28 = arith.addf %21, %27 : vector<256x128xf32>
    %c0_28 = arith.constant 0 : index
    %c1_29 = arith.constant 1 : index
    %c1_30 = arith.constant 1 : index
    %c0_31 = arith.constant 0 : index
    %29 = vector.load %arg1[%c0_28, %c1_29, %c1_30, %c0_31] : memref<1x18x18x128xbf16, #tpu.memory_space<vmem>>, vector<1x16x16x128xbf16>
    %30 = vector.shape_cast %29 : vector<1x16x16x128xbf16> to vector<16x16x128xbf16>
    %31 = vector.shape_cast %30 : vector<16x16x128xbf16> to vector<256x128xbf16>
    %c4 = arith.constant 4 : index
    %c0_32 = arith.constant 0 : index
    %c0_33 = arith.constant 0 : index
    %32 = vector.load %arg2[%c4, %c0_32, %c0_33] : memref<9x128x128xbf16, #tpu.memory_space<vmem>>, vector<1x128x128xbf16>
    %33 = vector.shape_cast %32 : vector<1x128x128xbf16> to vector<128x128xbf16>
    %cst_34 = arith.constant dense<0.000000e+00> : vector<256x128xf32>
    %34 = tpu.matmul %31, %33, %cst_34 {dimension_numbers = #tpu.dot_dimension_numbers<[1], [0], [0], [1], [0, 0, 1, 1], [], []>} : vector<256x128xbf16>, vector<128x128xbf16>, vector<256x128xf32> -> vector<256x128xf32>
    %35 = arith.addf %28, %34 : vector<256x128xf32>
    %c0_35 = arith.constant 0 : index
    %c0_36 = arith.constant 0 : index
    %36 = vector.load %arg3[%c0_35, %c0_36] : memref<128x128xbf16, #tpu.memory_space<vmem>>, vector<128x128xbf16>
    %cst_37 = arith.constant dense<0.000000e+00> : vector<256x128xf32>
    %37 = tpu.matmul %31, %36, %cst_37 {dimension_numbers = #tpu.dot_dimension_numbers<[1], [0], [0], [1], [0, 0, 1, 1], [], []>} : vector<256x128xbf16>, vector<128x128xbf16>, vector<256x128xf32> -> vector<256x128xf32>
    %c0_38 = arith.constant 0 : index
    %c1_39 = arith.constant 1 : index
    %c2_40 = arith.constant 2 : index
    %c0_41 = arith.constant 0 : index
    %38 = vector.load %arg1[%c0_38, %c1_39, %c2_40, %c0_41] : memref<1x18x18x128xbf16, #tpu.memory_space<vmem>>, vector<1x16x16x128xbf16>
    %39 = vector.shape_cast %38 : vector<1x16x16x128xbf16> to vector<16x16x128xbf16>
    %40 = vector.shape_cast %39 : vector<16x16x128xbf16> to vector<256x128xbf16>
    %c5 = arith.constant 5 : index
    %c0_42 = arith.constant 0 : index
    %c0_43 = arith.constant 0 : index
    %41 = vector.load %arg2[%c5, %c0_42, %c0_43] : memref<9x128x128xbf16, #tpu.memory_space<vmem>>, vector<1x128x128xbf16>
    %42 = vector.shape_cast %41 : vector<1x128x128xbf16> to vector<128x128xbf16>
    %cst_44 = arith.constant dense<0.000000e+00> : vector<256x128xf32>
    %43 = tpu.matmul %40, %42, %cst_44 {dimension_numbers = #tpu.dot_dimension_numbers<[1], [0], [0], [1], [0, 0, 1, 1], [], []>} : vector<256x128xbf16>, vector<128x128xbf16>, vector<256x128xf32> -> vector<256x128xf32>
    %44 = arith.addf %35, %43 : vector<256x128xf32>
    %c0_45 = arith.constant 0 : index
    %c2_46 = arith.constant 2 : index
    %c0_47 = arith.constant 0 : index
    %c0_48 = arith.constant 0 : index
    %45 = vector.load %arg1[%c0_45, %c2_46, %c0_47, %c0_48] : memref<1x18x18x128xbf16, #tpu.memory_space<vmem>>, vector<1x16x16x128xbf16>
    %46 = vector.shape_cast %45 : vector<1x16x16x128xbf16> to vector<16x16x128xbf16>
    %47 = vector.shape_cast %46 : vector<16x16x128xbf16> to vector<256x128xbf16>
    %c6 = arith.constant 6 : index
    %c0_49 = arith.constant 0 : index
    %c0_50 = arith.constant 0 : index
    %48 = vector.load %arg2[%c6, %c0_49, %c0_50] : memref<9x128x128xbf16, #tpu.memory_space<vmem>>, vector<1x128x128xbf16>
    %49 = vector.shape_cast %48 : vector<1x128x128xbf16> to vector<128x128xbf16>
    %cst_51 = arith.constant dense<0.000000e+00> : vector<256x128xf32>
    %50 = tpu.matmul %47, %49, %cst_51 {dimension_numbers = #tpu.dot_dimension_numbers<[1], [0], [0], [1], [0, 0, 1, 1], [], []>} : vector<256x128xbf16>, vector<128x128xbf16>, vector<256x128xf32> -> vector<256x128xf32>
    %51 = arith.addf %44, %50 : vector<256x128xf32>
    %c0_52 = arith.constant 0 : index
    %c2_53 = arith.constant 2 : index
    %c1_54 = arith.constant 1 : index
    %c0_55 = arith.constant 0 : index
    %52 = vector.load %arg1[%c0_52, %c2_53, %c1_54, %c0_55] : memref<1x18x18x128xbf16, #tpu.memory_space<vmem>>, vector<1x16x16x128xbf16>
    %53 = vector.shape_cast %52 : vector<1x16x16x128xbf16> to vector<16x16x128xbf16>
    %54 = vector.shape_cast %53 : vector<16x16x128xbf16> to vector<256x128xbf16>
    %c7 = arith.constant 7 : index
    %c0_56 = arith.constant 0 : index
    %c0_57 = arith.constant 0 : index
    %55 = vector.load %arg2[%c7, %c0_56, %c0_57] : memref<9x128x128xbf16, #tpu.memory_space<vmem>>, vector<1x128x128xbf16>
    %56 = vector.shape_cast %55 : vector<1x128x128xbf16> to vector<128x128xbf16>
    %cst_58 = arith.constant dense<0.000000e+00> : vector<256x128xf32>
    %57 = tpu.matmul %54, %56, %cst_58 {dimension_numbers = #tpu.dot_dimension_numbers<[1], [0], [0], [1], [0, 0, 1, 1], [], []>} : vector<256x128xbf16>, vector<128x128xbf16>, vector<256x128xf32> -> vector<256x128xf32>
    %58 = arith.addf %51, %57 : vector<256x128xf32>
    %c0_59 = arith.constant 0 : index
    %c2_60 = arith.constant 2 : index
    %c2_61 = arith.constant 2 : index
    %c0_62 = arith.constant 0 : index
    %59 = vector.load %arg1[%c0_59, %c2_60, %c2_61, %c0_62] : memref<1x18x18x128xbf16, #tpu.memory_space<vmem>>, vector<1x16x16x128xbf16>
    %60 = vector.shape_cast %59 : vector<1x16x16x128xbf16> to vector<16x16x128xbf16>
    %61 = vector.shape_cast %60 : vector<16x16x128xbf16> to vector<256x128xbf16>
    %c8 = arith.constant 8 : index
    %c0_63 = arith.constant 0 : index
    %c0_64 = arith.constant 0 : index
    %62 = vector.load %arg2[%c8, %c0_63, %c0_64] : memref<9x128x128xbf16, #tpu.memory_space<vmem>>, vector<1x128x128xbf16>
    %63 = vector.shape_cast %62 : vector<1x128x128xbf16> to vector<128x128xbf16>
    %cst_65 = arith.constant dense<0.000000e+00> : vector<256x128xf32>
    %64 = tpu.matmul %61, %63, %cst_65 {dimension_numbers = #tpu.dot_dimension_numbers<[1], [0], [0], [1], [0, 0, 1, 1], [], []>} : vector<256x128xbf16>, vector<128x128xbf16>, vector<256x128xf32> -> vector<256x128xf32>
    %65 = arith.addf %58, %64 : vector<256x128xf32>
    %66 = arith.truncf %65 : vector<256x128xf32> to vector<256x128xbf16>
    %c0_66 = arith.constant 0 : index
    %c0_67 = arith.constant 0 : index
    %c0_68 = arith.constant 0 : index
    %67 = vector.load %arg4[%c0_66, %c0_67, %c0_68] : memref<1x256x128xbf16, #tpu.memory_space<vmem>>, vector<1x256x128xbf16>
    %68 = vector.shape_cast %67 : vector<1x256x128xbf16> to vector<256x128xbf16>
    %69 = vector.shape_cast %66 : vector<256x128xbf16> to vector<1x256x128xbf16>
    tpu.vector_store %arg4[%c0_66, %c0_67, %c0_68], %69 {strides = array<i32>} : memref<1x256x128xbf16, #tpu.memory_space<vmem>>, vector<1x256x128xbf16>,
    %cst_69 = arith.constant dense<0.000000e+00> : vector<128xf32>
    %70 = vector.multi_reduction <add>, %65, %cst_69 [0] : vector<256x128xf32> to vector<128xf32>
    %71 = vector.shape_cast %70 : vector<128xf32> to vector<1x128xf32>
    %72 = arith.mulf %65, %65 : vector<256x128xf32>
    %cst_70 = arith.constant dense<0.000000e+00> : vector<128xf32>
    %73 = vector.multi_reduction <add>, %72, %cst_70 [0] : vector<256x128xf32> to vector<128xf32>
    %74 = vector.shape_cast %73 : vector<128xf32> to vector<1x128xf32>
    %75 = tpu.concatenate %71, %74 in 0 : vector<1x128xf32>, vector<1x128xf32> -> vector<2x128xf32>
    %c0_71 = arith.constant 0 : index
    %c0_72 = arith.constant 0 : index
    %c0_73 = arith.constant 0 : index
    %76 = vector.load %arg6[%c0_71, %c0_72, %c0_73] : memref<1x2x128xf32, #tpu.memory_space<vmem>>, vector<1x2x128xf32>
    %77 = vector.shape_cast %76 : vector<1x2x128xf32> to vector<2x128xf32>
    %78 = vector.shape_cast %75 : vector<2x128xf32> to vector<1x2x128xf32>
    tpu.vector_store %arg6[%c0_71, %c0_72, %c0_73], %78 {strides = array<i32>} : memref<1x2x128xf32, #tpu.memory_space<vmem>>, vector<1x2x128xf32>,
    %79 = arith.truncf %37 : vector<256x128xf32> to vector<256x128xbf16>
    %c0_74 = arith.constant 0 : index
    %c0_75 = arith.constant 0 : index
    %c0_76 = arith.constant 0 : index
    %80 = vector.load %arg5[%c0_74, %c0_75, %c0_76] : memref<1x256x128xbf16, #tpu.memory_space<vmem>>, vector<1x256x128xbf16>
    %81 = vector.shape_cast %80 : vector<1x256x128xbf16> to vector<256x128xbf16>
    %82 = vector.shape_cast %79 : vector<256x128xbf16> to vector<1x256x128xbf16>
    tpu.vector_store %arg5[%c0_74, %c0_75, %c0_76], %82 {strides = array<i32>} : memref<1x256x128xbf16, #tpu.memory_space<vmem>>, vector<1x256x128xbf16>,
    %cst_77 = arith.constant dense<0.000000e+00> : vector<128xf32>
    %83 = vector.multi_reduction <add>, %37, %cst_77 [0] : vector<256x128xf32> to vector<128xf32>
    %84 = vector.shape_cast %83 : vector<128xf32> to vector<1x128xf32>
    %85 = arith.mulf %37, %37 : vector<256x128xf32>
    %cst_78 = arith.constant dense<0.000000e+00> : vector<128xf32>
    %86 = vector.multi_reduction <add>, %85, %cst_78 [0] : vector<256x128xf32> to vector<128xf32>
    %87 = vector.shape_cast %86 : vector<128xf32> to vector<1x128xf32>
    %88 = tpu.concatenate %84, %87 in 0 : vector<1x128xf32>, vector<1x128xf32> -> vector<2x128xf32>
    %c0_79 = arith.constant 0 : index
    %c0_80 = arith.constant 0 : index
    %c0_81 = arith.constant 0 : index
    %89 = vector.load %arg7[%c0_79, %c0_80, %c0_81] : memref<1x2x128xf32, #tpu.memory_space<vmem>>, vector<1x2x128xf32>
    %90 = vector.shape_cast %89 : vector<1x2x128xf32> to vector<2x128xf32>
    %91 = vector.shape_cast %88 : vector<2x128xf32> to vector<1x2x128xf32>
    tpu.vector_store %arg7[%c0_79, %c0_80, %c0_81], %91 {strides = array<i32>} : memref<1x2x128xf32, #tpu.memory_space<vmem>>, vector<1x2x128xf32>,
    return
  }
  func.func @transform_0(%arg0: i32) -> (i32, i32, i32, i32) {
    %c0_i32 = arith.constant 0 : i32
    %c0_i32_0 = arith.constant 0 : i32
    %c0_i32_1 = arith.constant 0 : i32
    %c0_i32_2 = arith.constant 0 : i32
    return %arg0, %c0_i32, %c0_i32_0, %c0_i32_1 : i32, i32, i32, i32
  }
  func.func @transform_1(%arg0: i32) -> (i32, i32, i32) {
    %c0_i32 = arith.constant 0 : i32
    %c0_i32_0 = arith.constant 0 : i32
    %c0_i32_1 = arith.constant 0 : i32
    %c0_i32_2 = arith.constant 0 : i32
    return %c0_i32, %c0_i32_0, %c0_i32_1 : i32, i32, i32
  }
  func.func @transform_2(%arg0: i32) -> (i32, i32) {
    %c0_i32 = arith.constant 0 : i32
    %c0_i32_0 = arith.constant 0 : i32
    %c0_i32_1 = arith.constant 0 : i32
    return %c0_i32, %c0_i32_0 : i32, i32
  }
  func.func @transform_3(%arg0: i32) -> (i32, i32, i32) {
    %c0_i32 = arith.constant 0 : i32
    %c0_i32_0 = arith.constant 0 : i32
    %c0_i32_1 = arith.constant 0 : i32
    return %arg0, %c0_i32, %c0_i32_0 : i32, i32, i32
  }
  func.func @transform_4(%arg0: i32) -> (i32, i32, i32) {
    %c0_i32 = arith.constant 0 : i32
    %c0_i32_0 = arith.constant 0 : i32
    %c0_i32_1 = arith.constant 0 : i32
    return %arg0, %c0_i32, %c0_i32_0 : i32, i32, i32
  }
  func.func @transform_5(%arg0: i32) -> (i32, i32, i32) {
    %c0_i32 = arith.constant 0 : i32
    %c0_i32_0 = arith.constant 0 : i32
    %c0_i32_1 = arith.constant 0 : i32
    return %arg0, %c0_i32, %c0_i32_0 : i32, i32, i32
  }
  func.func @transform_6(%arg0: i32) -> (i32, i32, i32) {
    %c0_i32 = arith.constant 0 : i32
    %c0_i32_0 = arith.constant 0 : i32
    %c0_i32_1 = arith.constant 0 : i32
    return %arg0, %c0_i32, %c0_i32_0 : i32, i32, i32
  }
}

module attributes {stable_mosaic.version = 11 : i64} {
  func.func @_conv3x3_stats_kernel(%arg0: i32, %arg1: memref<1x18x18x128xbf16, #tpu.memory_space<vmem>>, %arg2: memref<9x128x128xbf16, #tpu.memory_space<vmem>>, %arg3: memref<1x256x128xbf16, #tpu.memory_space<vmem>>, %arg4: memref<1x2x128xf32, #tpu.memory_space<vmem>>) attributes {dimension_semantics = [#tpu.dimension_semantics<parallel>], iteration_bounds = array<i64: 2>, scalar_prefetch = 0 : i64, scratch_operands = 0 : i64, tpu.core_type = #tpu.core_type<tc>, window_params = [{transform_indices = @transform_0, window_bounds = array<i64: 1, 18, 18, 128>}, {pipeline_mode = #tpu.pipeline_mode<synchronous>, transform_indices = @transform_1, window_bounds = array<i64: 9, 128, 128>}, {transform_indices = @transform_2, window_bounds = array<i64: 1, 256, 128>}, {transform_indices = @transform_3, window_bounds = array<i64: 1, 2, 128>}]} {
    %cst = arith.constant 0.000000e+00 : f32
    %0 = vector.broadcast %cst : f32 to vector<256x128xf32>
    %c0 = arith.constant 0 : index
    %c0_0 = arith.constant 0 : index
    %c0_1 = arith.constant 0 : index
    %c0_2 = arith.constant 0 : index
    %1 = vector.load %arg1[%c0, %c0_0, %c0_1, %c0_2] : memref<1x18x18x128xbf16, #tpu.memory_space<vmem>>, vector<1x16x16x128xbf16>
    %2 = vector.shape_cast %1 : vector<1x16x16x128xbf16> to vector<16x16x128xbf16>
    %3 = vector.shape_cast %2 : vector<16x16x128xbf16> to vector<256x128xbf16>
    %c0_3 = arith.constant 0 : index
    %c0_4 = arith.constant 0 : index
    %c0_5 = arith.constant 0 : index
    %4 = vector.load %arg2[%c0_3, %c0_4, %c0_5] : memref<9x128x128xbf16, #tpu.memory_space<vmem>>, vector<1x128x128xbf16>
    %5 = vector.shape_cast %4 : vector<1x128x128xbf16> to vector<128x128xbf16>
    %cst_6 = arith.constant dense<0.000000e+00> : vector<256x128xf32>
    %6 = tpu.matmul %3, %5, %cst_6 {dimension_numbers = #tpu.dot_dimension_numbers<[1], [0], [0], [1], [0, 0, 1, 1], [], []>} : vector<256x128xbf16>, vector<128x128xbf16>, vector<256x128xf32> -> vector<256x128xf32>
    %7 = arith.addf %0, %6 : vector<256x128xf32>
    %c0_7 = arith.constant 0 : index
    %c0_8 = arith.constant 0 : index
    %c1 = arith.constant 1 : index
    %c0_9 = arith.constant 0 : index
    %8 = vector.load %arg1[%c0_7, %c0_8, %c1, %c0_9] : memref<1x18x18x128xbf16, #tpu.memory_space<vmem>>, vector<1x16x16x128xbf16>
    %9 = vector.shape_cast %8 : vector<1x16x16x128xbf16> to vector<16x16x128xbf16>
    %10 = vector.shape_cast %9 : vector<16x16x128xbf16> to vector<256x128xbf16>
    %c1_10 = arith.constant 1 : index
    %c0_11 = arith.constant 0 : index
    %c0_12 = arith.constant 0 : index
    %11 = vector.load %arg2[%c1_10, %c0_11, %c0_12] : memref<9x128x128xbf16, #tpu.memory_space<vmem>>, vector<1x128x128xbf16>
    %12 = vector.shape_cast %11 : vector<1x128x128xbf16> to vector<128x128xbf16>
    %cst_13 = arith.constant dense<0.000000e+00> : vector<256x128xf32>
    %13 = tpu.matmul %10, %12, %cst_13 {dimension_numbers = #tpu.dot_dimension_numbers<[1], [0], [0], [1], [0, 0, 1, 1], [], []>} : vector<256x128xbf16>, vector<128x128xbf16>, vector<256x128xf32> -> vector<256x128xf32>
    %14 = arith.addf %7, %13 : vector<256x128xf32>
    %c0_14 = arith.constant 0 : index
    %c0_15 = arith.constant 0 : index
    %c2 = arith.constant 2 : index
    %c0_16 = arith.constant 0 : index
    %15 = vector.load %arg1[%c0_14, %c0_15, %c2, %c0_16] : memref<1x18x18x128xbf16, #tpu.memory_space<vmem>>, vector<1x16x16x128xbf16>
    %16 = vector.shape_cast %15 : vector<1x16x16x128xbf16> to vector<16x16x128xbf16>
    %17 = vector.shape_cast %16 : vector<16x16x128xbf16> to vector<256x128xbf16>
    %c2_17 = arith.constant 2 : index
    %c0_18 = arith.constant 0 : index
    %c0_19 = arith.constant 0 : index
    %18 = vector.load %arg2[%c2_17, %c0_18, %c0_19] : memref<9x128x128xbf16, #tpu.memory_space<vmem>>, vector<1x128x128xbf16>
    %19 = vector.shape_cast %18 : vector<1x128x128xbf16> to vector<128x128xbf16>
    %cst_20 = arith.constant dense<0.000000e+00> : vector<256x128xf32>
    %20 = tpu.matmul %17, %19, %cst_20 {dimension_numbers = #tpu.dot_dimension_numbers<[1], [0], [0], [1], [0, 0, 1, 1], [], []>} : vector<256x128xbf16>, vector<128x128xbf16>, vector<256x128xf32> -> vector<256x128xf32>
    %21 = arith.addf %14, %20 : vector<256x128xf32>
    %c0_21 = arith.constant 0 : index
    %c1_22 = arith.constant 1 : index
    %c0_23 = arith.constant 0 : index
    %c0_24 = arith.constant 0 : index
    %22 = vector.load %arg1[%c0_21, %c1_22, %c0_23, %c0_24] : memref<1x18x18x128xbf16, #tpu.memory_space<vmem>>, vector<1x16x16x128xbf16>
    %23 = vector.shape_cast %22 : vector<1x16x16x128xbf16> to vector<16x16x128xbf16>
    %24 = vector.shape_cast %23 : vector<16x16x128xbf16> to vector<256x128xbf16>
    %c3 = arith.constant 3 : index
    %c0_25 = arith.constant 0 : index
    %c0_26 = arith.constant 0 : index
    %25 = vector.load %arg2[%c3, %c0_25, %c0_26] : memref<9x128x128xbf16, #tpu.memory_space<vmem>>, vector<1x128x128xbf16>
    %26 = vector.shape_cast %25 : vector<1x128x128xbf16> to vector<128x128xbf16>
    %cst_27 = arith.constant dense<0.000000e+00> : vector<256x128xf32>
    %27 = tpu.matmul %24, %26, %cst_27 {dimension_numbers = #tpu.dot_dimension_numbers<[1], [0], [0], [1], [0, 0, 1, 1], [], []>} : vector<256x128xbf16>, vector<128x128xbf16>, vector<256x128xf32> -> vector<256x128xf32>
    %28 = arith.addf %21, %27 : vector<256x128xf32>
    %c0_28 = arith.constant 0 : index
    %c1_29 = arith.constant 1 : index
    %c1_30 = arith.constant 1 : index
    %c0_31 = arith.constant 0 : index
    %29 = vector.load %arg1[%c0_28, %c1_29, %c1_30, %c0_31] : memref<1x18x18x128xbf16, #tpu.memory_space<vmem>>, vector<1x16x16x128xbf16>
    %30 = vector.shape_cast %29 : vector<1x16x16x128xbf16> to vector<16x16x128xbf16>
    %31 = vector.shape_cast %30 : vector<16x16x128xbf16> to vector<256x128xbf16>
    %c4 = arith.constant 4 : index
    %c0_32 = arith.constant 0 : index
    %c0_33 = arith.constant 0 : index
    %32 = vector.load %arg2[%c4, %c0_32, %c0_33] : memref<9x128x128xbf16, #tpu.memory_space<vmem>>, vector<1x128x128xbf16>
    %33 = vector.shape_cast %32 : vector<1x128x128xbf16> to vector<128x128xbf16>
    %cst_34 = arith.constant dense<0.000000e+00> : vector<256x128xf32>
    %34 = tpu.matmul %31, %33, %cst_34 {dimension_numbers = #tpu.dot_dimension_numbers<[1], [0], [0], [1], [0, 0, 1, 1], [], []>} : vector<256x128xbf16>, vector<128x128xbf16>, vector<256x128xf32> -> vector<256x128xf32>
    %35 = arith.addf %28, %34 : vector<256x128xf32>
    %c0_35 = arith.constant 0 : index
    %c1_36 = arith.constant 1 : index
    %c2_37 = arith.constant 2 : index
    %c0_38 = arith.constant 0 : index
    %36 = vector.load %arg1[%c0_35, %c1_36, %c2_37, %c0_38] : memref<1x18x18x128xbf16, #tpu.memory_space<vmem>>, vector<1x16x16x128xbf16>
    %37 = vector.shape_cast %36 : vector<1x16x16x128xbf16> to vector<16x16x128xbf16>
    %38 = vector.shape_cast %37 : vector<16x16x128xbf16> to vector<256x128xbf16>
    %c5 = arith.constant 5 : index
    %c0_39 = arith.constant 0 : index
    %c0_40 = arith.constant 0 : index
    %39 = vector.load %arg2[%c5, %c0_39, %c0_40] : memref<9x128x128xbf16, #tpu.memory_space<vmem>>, vector<1x128x128xbf16>
    %40 = vector.shape_cast %39 : vector<1x128x128xbf16> to vector<128x128xbf16>
    %cst_41 = arith.constant dense<0.000000e+00> : vector<256x128xf32>
    %41 = tpu.matmul %38, %40, %cst_41 {dimension_numbers = #tpu.dot_dimension_numbers<[1], [0], [0], [1], [0, 0, 1, 1], [], []>} : vector<256x128xbf16>, vector<128x128xbf16>, vector<256x128xf32> -> vector<256x128xf32>
    %42 = arith.addf %35, %41 : vector<256x128xf32>
    %c0_42 = arith.constant 0 : index
    %c2_43 = arith.constant 2 : index
    %c0_44 = arith.constant 0 : index
    %c0_45 = arith.constant 0 : index
    %43 = vector.load %arg1[%c0_42, %c2_43, %c0_44, %c0_45] : memref<1x18x18x128xbf16, #tpu.memory_space<vmem>>, vector<1x16x16x128xbf16>
    %44 = vector.shape_cast %43 : vector<1x16x16x128xbf16> to vector<16x16x128xbf16>
    %45 = vector.shape_cast %44 : vector<16x16x128xbf16> to vector<256x128xbf16>
    %c6 = arith.constant 6 : index
    %c0_46 = arith.constant 0 : index
    %c0_47 = arith.constant 0 : index
    %46 = vector.load %arg2[%c6, %c0_46, %c0_47] : memref<9x128x128xbf16, #tpu.memory_space<vmem>>, vector<1x128x128xbf16>
    %47 = vector.shape_cast %46 : vector<1x128x128xbf16> to vector<128x128xbf16>
    %cst_48 = arith.constant dense<0.000000e+00> : vector<256x128xf32>
    %48 = tpu.matmul %45, %47, %cst_48 {dimension_numbers = #tpu.dot_dimension_numbers<[1], [0], [0], [1], [0, 0, 1, 1], [], []>} : vector<256x128xbf16>, vector<128x128xbf16>, vector<256x128xf32> -> vector<256x128xf32>
    %49 = arith.addf %42, %48 : vector<256x128xf32>
    %c0_49 = arith.constant 0 : index
    %c2_50 = arith.constant 2 : index
    %c1_51 = arith.constant 1 : index
    %c0_52 = arith.constant 0 : index
    %50 = vector.load %arg1[%c0_49, %c2_50, %c1_51, %c0_52] : memref<1x18x18x128xbf16, #tpu.memory_space<vmem>>, vector<1x16x16x128xbf16>
    %51 = vector.shape_cast %50 : vector<1x16x16x128xbf16> to vector<16x16x128xbf16>
    %52 = vector.shape_cast %51 : vector<16x16x128xbf16> to vector<256x128xbf16>
    %c7 = arith.constant 7 : index
    %c0_53 = arith.constant 0 : index
    %c0_54 = arith.constant 0 : index
    %53 = vector.load %arg2[%c7, %c0_53, %c0_54] : memref<9x128x128xbf16, #tpu.memory_space<vmem>>, vector<1x128x128xbf16>
    %54 = vector.shape_cast %53 : vector<1x128x128xbf16> to vector<128x128xbf16>
    %cst_55 = arith.constant dense<0.000000e+00> : vector<256x128xf32>
    %55 = tpu.matmul %52, %54, %cst_55 {dimension_numbers = #tpu.dot_dimension_numbers<[1], [0], [0], [1], [0, 0, 1, 1], [], []>} : vector<256x128xbf16>, vector<128x128xbf16>, vector<256x128xf32> -> vector<256x128xf32>
    %56 = arith.addf %49, %55 : vector<256x128xf32>
    %c0_56 = arith.constant 0 : index
    %c2_57 = arith.constant 2 : index
    %c2_58 = arith.constant 2 : index
    %c0_59 = arith.constant 0 : index
    %57 = vector.load %arg1[%c0_56, %c2_57, %c2_58, %c0_59] : memref<1x18x18x128xbf16, #tpu.memory_space<vmem>>, vector<1x16x16x128xbf16>
    %58 = vector.shape_cast %57 : vector<1x16x16x128xbf16> to vector<16x16x128xbf16>
    %59 = vector.shape_cast %58 : vector<16x16x128xbf16> to vector<256x128xbf16>
    %c8 = arith.constant 8 : index
    %c0_60 = arith.constant 0 : index
    %c0_61 = arith.constant 0 : index
    %60 = vector.load %arg2[%c8, %c0_60, %c0_61] : memref<9x128x128xbf16, #tpu.memory_space<vmem>>, vector<1x128x128xbf16>
    %61 = vector.shape_cast %60 : vector<1x128x128xbf16> to vector<128x128xbf16>
    %cst_62 = arith.constant dense<0.000000e+00> : vector<256x128xf32>
    %62 = tpu.matmul %59, %61, %cst_62 {dimension_numbers = #tpu.dot_dimension_numbers<[1], [0], [0], [1], [0, 0, 1, 1], [], []>} : vector<256x128xbf16>, vector<128x128xbf16>, vector<256x128xf32> -> vector<256x128xf32>
    %63 = arith.addf %56, %62 : vector<256x128xf32>
    %64 = arith.truncf %63 : vector<256x128xf32> to vector<256x128xbf16>
    %c0_63 = arith.constant 0 : index
    %c0_64 = arith.constant 0 : index
    %c0_65 = arith.constant 0 : index
    %65 = vector.load %arg3[%c0_63, %c0_64, %c0_65] : memref<1x256x128xbf16, #tpu.memory_space<vmem>>, vector<1x256x128xbf16>
    %66 = vector.shape_cast %65 : vector<1x256x128xbf16> to vector<256x128xbf16>
    %67 = vector.shape_cast %64 : vector<256x128xbf16> to vector<1x256x128xbf16>
    tpu.vector_store %arg3[%c0_63, %c0_64, %c0_65], %67 {strides = array<i32>} : memref<1x256x128xbf16, #tpu.memory_space<vmem>>, vector<1x256x128xbf16>,
    %cst_66 = arith.constant dense<0.000000e+00> : vector<128xf32>
    %68 = vector.multi_reduction <add>, %63, %cst_66 [0] : vector<256x128xf32> to vector<128xf32>
    %69 = vector.shape_cast %68 : vector<128xf32> to vector<1x128xf32>
    %70 = arith.mulf %63, %63 : vector<256x128xf32>
    %cst_67 = arith.constant dense<0.000000e+00> : vector<128xf32>
    %71 = vector.multi_reduction <add>, %70, %cst_67 [0] : vector<256x128xf32> to vector<128xf32>
    %72 = vector.shape_cast %71 : vector<128xf32> to vector<1x128xf32>
    %73 = tpu.concatenate %69, %72 in 0 : vector<1x128xf32>, vector<1x128xf32> -> vector<2x128xf32>
    %c0_68 = arith.constant 0 : index
    %c0_69 = arith.constant 0 : index
    %c0_70 = arith.constant 0 : index
    %74 = vector.load %arg4[%c0_68, %c0_69, %c0_70] : memref<1x2x128xf32, #tpu.memory_space<vmem>>, vector<1x2x128xf32>
    %75 = vector.shape_cast %74 : vector<1x2x128xf32> to vector<2x128xf32>
    %76 = vector.shape_cast %73 : vector<2x128xf32> to vector<1x2x128xf32>
    tpu.vector_store %arg4[%c0_68, %c0_69, %c0_70], %76 {strides = array<i32>} : memref<1x2x128xf32, #tpu.memory_space<vmem>>, vector<1x2x128xf32>,
    return
  }
  func.func @transform_0(%arg0: i32) -> (i32, i32, i32, i32) {
    %c0_i32 = arith.constant 0 : i32
    %c0_i32_0 = arith.constant 0 : i32
    %c0_i32_1 = arith.constant 0 : i32
    %c0_i32_2 = arith.constant 0 : i32
    return %arg0, %c0_i32, %c0_i32_0, %c0_i32_1 : i32, i32, i32, i32
  }
  func.func @transform_1(%arg0: i32) -> (i32, i32, i32) {
    %c0_i32 = arith.constant 0 : i32
    %c0_i32_0 = arith.constant 0 : i32
    %c0_i32_1 = arith.constant 0 : i32
    %c0_i32_2 = arith.constant 0 : i32
    return %c0_i32, %c0_i32_0, %c0_i32_1 : i32, i32, i32
  }
  func.func @transform_2(%arg0: i32) -> (i32, i32, i32) {
    %c0_i32 = arith.constant 0 : i32
    %c0_i32_0 = arith.constant 0 : i32
    %c0_i32_1 = arith.constant 0 : i32
    return %arg0, %c0_i32, %c0_i32_0 : i32, i32, i32
  }
  func.func @transform_3(%arg0: i32) -> (i32, i32, i32) {
    %c0_i32 = arith.constant 0 : i32
    %c0_i32_0 = arith.constant 0 : i32
    %c0_i32_1 = arith.constant 0 : i32
    return %arg0, %c0_i32, %c0_i32_0 : i32, i32, i32
  }
}

module attributes {stable_mosaic.version = 11 : i64} {
  func.func @_bn_add_relu_kernel(%arg0: i32, %arg1: memref<1x256x128xbf16, #tpu.memory_space<vmem>>, %arg2: memref<1x256x128xbf16, #tpu.memory_space<vmem>>, %arg3: memref<1x128xf32, #tpu.memory_space<vmem>>, %arg4: memref<1x128xf32, #tpu.memory_space<vmem>>, %arg5: memref<1x128xf32, #tpu.memory_space<vmem>>, %arg6: memref<1x128xf32, #tpu.memory_space<vmem>>, %arg7: memref<1x256x128xf32, #tpu.memory_space<vmem>>) attributes {dimension_semantics = [#tpu.dimension_semantics<parallel>], iteration_bounds = array<i64: 2>, scalar_prefetch = 0 : i64, scratch_operands = 0 : i64, tpu.core_type = #tpu.core_type<tc>, window_params = [{transform_indices = @transform_0, window_bounds = array<i64: 1, 256, 128>}, {transform_indices = @transform_1, window_bounds = array<i64: 1, 256, 128>}, {pipeline_mode = #tpu.pipeline_mode<synchronous>, transform_indices = @transform_2, window_bounds = array<i64: 1, 128>}, {pipeline_mode = #tpu.pipeline_mode<synchronous>, transform_indices = @transform_3, window_bounds = array<i64: 1, 128>}, {pipeline_mode = #tpu.pipeline_mode<synchronous>, transform_indices = @transform_4, window_bounds = array<i64: 1, 128>}, {pipeline_mode = #tpu.pipeline_mode<synchronous>, transform_indices = @transform_5, window_bounds = array<i64: 1, 128>}, {transform_indices = @transform_6, window_bounds = array<i64: 1, 256, 128>}]} {
    %c0 = arith.constant 0 : index
    %c0_0 = arith.constant 0 : index
    %c0_1 = arith.constant 0 : index
    %0 = vector.load %arg2[%c0, %c0_0, %c0_1] : memref<1x256x128xbf16, #tpu.memory_space<vmem>>, vector<1x256x128xbf16>
    %1 = vector.shape_cast %0 : vector<1x256x128xbf16> to vector<256x128xbf16>
    %2 = arith.extf %1 : vector<256x128xbf16> to vector<256x128xf32>
    %c0_2 = arith.constant 0 : index
    %c0_3 = arith.constant 0 : index
    %3 = vector.load %arg5[%c0_2, %c0_3] : memref<1x128xf32, #tpu.memory_space<vmem>>, vector<1x128xf32>
    %4 = vector.broadcast %3 : vector<1x128xf32> to vector<256x128xf32>
    %5 = arith.mulf %2, %4 : vector<256x128xf32>
    %c0_4 = arith.constant 0 : index
    %c0_5 = arith.constant 0 : index
    %6 = vector.load %arg6[%c0_4, %c0_5] : memref<1x128xf32, #tpu.memory_space<vmem>>, vector<1x128xf32>
    %7 = vector.broadcast %6 : vector<1x128xf32> to vector<256x128xf32>
    %8 = arith.addf %5, %7 : vector<256x128xf32>
    %c0_6 = arith.constant 0 : index
    %c0_7 = arith.constant 0 : index
    %c0_8 = arith.constant 0 : index
    %9 = vector.load %arg1[%c0_6, %c0_7, %c0_8] : memref<1x256x128xbf16, #tpu.memory_space<vmem>>, vector<1x256x128xbf16>
    %10 = vector.shape_cast %9 : vector<1x256x128xbf16> to vector<256x128xbf16>
    %11 = arith.extf %10 : vector<256x128xbf16> to vector<256x128xf32>
    %c0_9 = arith.constant 0 : index
    %c0_10 = arith.constant 0 : index
    %12 = vector.load %arg3[%c0_9, %c0_10] : memref<1x128xf32, #tpu.memory_space<vmem>>, vector<1x128xf32>
    %13 = vector.broadcast %12 : vector<1x128xf32> to vector<256x128xf32>
    %14 = arith.mulf %11, %13 : vector<256x128xf32>
    %c0_11 = arith.constant 0 : index
    %c0_12 = arith.constant 0 : index
    %15 = vector.load %arg4[%c0_11, %c0_12] : memref<1x128xf32, #tpu.memory_space<vmem>>, vector<1x128xf32>
    %16 = vector.broadcast %15 : vector<1x128xf32> to vector<256x128xf32>
    %17 = arith.addf %14, %16 : vector<256x128xf32>
    %18 = arith.addf %17, %8 : vector<256x128xf32>
    %cst = arith.constant 0.000000e+00 : f32
    %19 = vector.broadcast %cst : f32 to vector<256x128xf32>
    %20 = arith.maximumf %18, %19 : vector<256x128xf32>
    %c0_13 = arith.constant 0 : index
    %c0_14 = arith.constant 0 : index
    %c0_15 = arith.constant 0 : index
    %21 = vector.load %arg7[%c0_13, %c0_14, %c0_15] : memref<1x256x128xf32, #tpu.memory_space<vmem>>, vector<1x256x128xf32>
    %22 = vector.shape_cast %21 : vector<1x256x128xf32> to vector<256x128xf32>
    %23 = vector.shape_cast %20 : vector<256x128xf32> to vector<1x256x128xf32>
    tpu.vector_store %arg7[%c0_13, %c0_14, %c0_15], %23 {strides = array<i32>} : memref<1x256x128xf32, #tpu.memory_space<vmem>>, vector<1x256x128xf32>,
    return
  }
  func.func @transform_0(%arg0: i32) -> (i32, i32, i32) {
    %c0_i32 = arith.constant 0 : i32
    %c0_i32_0 = arith.constant 0 : i32
    %c0_i32_1 = arith.constant 0 : i32
    return %arg0, %c0_i32, %c0_i32_0 : i32, i32, i32
  }
  func.func @transform_1(%arg0: i32) -> (i32, i32, i32) {
    %c0_i32 = arith.constant 0 : i32
    %c0_i32_0 = arith.constant 0 : i32
    %c0_i32_1 = arith.constant 0 : i32
    return %arg0, %c0_i32, %c0_i32_0 : i32, i32, i32
  }
  func.func @transform_2(%arg0: i32) -> (i32, i32) {
    %c0_i32 = arith.constant 0 : i32
    %c0_i32_0 = arith.constant 0 : i32
    %c0_i32_1 = arith.constant 0 : i32
    return %c0_i32, %c0_i32_0 : i32, i32
  }
  func.func @transform_3(%arg0: i32) -> (i32, i32) {
    %c0_i32 = arith.constant 0 : i32
    %c0_i32_0 = arith.constant 0 : i32
    %c0_i32_1 = arith.constant 0 : i32
    return %c0_i32, %c0_i32_0 : i32, i32
  }
  func.func @transform_4(%arg0: i32) -> (i32, i32) {
    %c0_i32 = arith.constant 0 : i32
    %c0_i32_0 = arith.constant 0 : i32
    %c0_i32_1 = arith.constant 0 : i32
    return %c0_i32, %c0_i32_0 : i32, i32
  }
  func.func @transform_5(%arg0: i32) -> (i32, i32) {
    %c0_i32 = arith.constant 0 : i32
    %c0_i32_0 = arith.constant 0 : i32
    %c0_i32_1 = arith.constant 0 : i32
    return %c0_i32, %c0_i32_0 : i32, i32
  }
  func.func @transform_6(%arg0: i32) -> (i32, i32, i32) {
    %c0_i32 = arith.constant 0 : i32
    %c0_i32_0 = arith.constant 0 : i32
    %c0_i32_1 = arith.constant 0 : i32
    return %arg0, %c0_i32, %c0_i32_0 : i32, i32, i32
  }
}

</mosaic_0001>

<bundles_post_ra>
// kernel: basic_block_forward.5
= control target key start
LH: loop header
LB: loop body
LE: loop exit
PB: predicated region body
PF: predicated region fallthrough
CT: control target
= control target key end

     0   :  { %s948_s21 = smov 0   ;;  %s1190_s0 = inlined_call_operand.vmem [shape: bf16[2,256,128], index: 0, kind: input, shape index: {}]   ;;  %s1191_s1 = inlined_call_operand.vmem [shape: bf16[2,256,128], index: 1, kind: input, shape index: {}]   ;;  %s1192_s2 = inlined_call_operand.vmem [shape: f32[1,128], index: 2, kind: input, shape index: {}]   ;;  %s1193_s3 = inlined_call_operand.vmem [shape: f32[1,128], index: 3, kind: input, shape index: {}]   ;;  %s1194_s4 = inlined_call_operand.vmem [shape: f32[1,128], index: 4, kind: input, shape index: {}]   ;;  %s1195_s5 = inlined_call_operand.vmem [shape: f32[1,128], index: 5, kind: input, shape index: {}]   ;;  %s1196_s6 = inlined_call_operand.vmem [shape: f32[2,256,128], index: 6, kind: output, shape index: {}]  }
   0x1 LB: > { %s719_s22 = sadd.s32 4294967295, %s911_s21   ;;  %p723_p0 = scmp.ge.s32.totalorder %s911_s21, 1  ;;  %s911_s21 = sphi %s948_s21, %s16_s21  }
   0x2   : > { %p222_p1 = scmp.lt.s32.totalorder %s911_s21, 3 }
   0x4   : > { %p223_p2 = pnand %p723_p0, %p222_p1 }
   0x5   : > { %p257_p3 = scmp.lt.s32.totalorder (!%p223_p2), %s719_s22, 1 }
   0x6   : > { %226 = sbr.rel (%p223_p2) target bundleno = 86 (0x56), region = 44 }
   0xb   : > { %s1198_s22 = smov (!%p257_p3, %s719_s22), 1  ;;  %v972_v0 = vld [vmem:[%s1194_s4] ss:$0 sm:$0xff] }
   0xc   : > { %s736_s23 = sshll.u32 %s1198_s22, 7  ;;  %v977_v1 = vld [vmem:[%s1192_s2] ss:$0 sm:$0xff]  ;;  %s738_s14 = sshll.u32 %s1198_s22, 8 }
   0xd   : > { %s962_s26 = scalar_lea.vmem %s1190_s0, %s736_s23  ;;  %s967_s29 = scalar_lea.vmem %s1191_s1, %s736_s23  ;;  %v986_v10 = vld [vmem:[%s1195_s5] ss:$0 sm:$0xff] }
   0xe   : > { %v740_v2 = vld [vmem:[%s967_s29] sm:$0xff]   ;;  %v867_v4 = vld [vmem:[%s967_s29 + $0x8] sm:$0xff]   ;;  %v868_v24 = vld [vmem:[%s967_s29 + $0x10] sm:$0xff]   ;;  %s1015_s17 = scalar_lea.vmem %s1196_s6, %s738_s14 }
   0xf   : > { %v804_v3 = vld [vmem:[%s962_s26] sm:$0xff]   ;;  %v741_v5 = vunpack.c.l.bf16 %v740_v2  ;;  %v742_v7 = vunpack.c.h.bf16 %v740_v2  ;;  %v882_v9 = vld [vmem:[%s962_s26 + $0x8] sm:$0xff]   ;;  %v745_v12 = vunpack.c.l.bf16 %v867_v4  ;;  %v746_v14 = vunpack.c.h.bf16 %v867_v4  ;;  %v883_v25 = vld [vmem:[%s962_s26 + $0x10] sm:$0xff]  }
  0x10   : > { %v805_v6 = vunpack.c.l.bf16 %v804_v3  ;;  %v806_v8 = vunpack.c.h.bf16 %v804_v3  ;;  %v991_v11 = vld [vmem:[%s1193_s3] ss:$0 sm:$0xff]  ;;  %v809_v13 = vunpack.c.l.bf16 %v882_v9  ;;  %v810_v15 = vunpack.c.h.bf16 %v882_v9  ;;  %v869_v42 = vld [vmem:[%s967_s29 + $0x18] sm:$0xff]  }
  0x11   : > { %v343_v16 = vmul.f32 %v741_v5, %v972_v0  ;;  %v344_v18 = vmul.f32 %v742_v7, %v972_v0  ;;  %v345_v20 = vmul.f32 %v745_v12, %v972_v0  ;;  %v346_v22 = vmul.f32 %v746_v14, %v972_v0  ;;  %v884_v43 = vld [vmem:[%s962_s26 + $0x18] sm:$0xff]   ;;  %v870_v52 = vld [vmem:[%s967_s29 + $0x20] sm:$0xff]   ;;  %v871_v14 = vld [vmem:[%s967_s29 + $0x28] sm:$0xff]  }
  0x12   : > { %v485_v17 = vmul.f32 %v805_v6, %v977_v1  ;;  %v486_v19 = vmul.f32 %v806_v8, %v977_v1  ;;  %v487_v21 = vmul.f32 %v809_v13, %v977_v1  ;;  %v488_v23 = vmul.f32 %v810_v15, %v977_v1  ;;  %v885_v57 = vld [vmem:[%s962_s26 + $0x20] sm:$0xff]   ;;  %v886_v15 = vld [vmem:[%s962_s26 + $0x28] sm:$0xff]  }
  0x13   : > { %v382_v26 = vadd.f32 %v986_v10, %v343_v16  ;;  %v383_v28 = vadd.f32 %v986_v10, %v344_v18  ;;  %v384_v30 = vadd.f32 %v986_v10, %v345_v20  ;;  %v385_v32 = vadd.f32 %v986_v10, %v346_v22 }
  0x14   : > { %v524_v27 = vadd.f32 %v991_v11, %v485_v17  ;;  %v525_v29 = vadd.f32 %v991_v11, %v486_v19  ;;  %v526_v31 = vadd.f32 %v991_v11, %v487_v21  ;;  %v527_v33 = vadd.f32 %v991_v11, %v488_v23 }
  0x15   : > { %v749_v36 = vunpack.c.l.bf16 %v868_v24  ;;  %v813_v37 = vunpack.c.l.bf16 %v883_v25  ;;  %v750_v40 = vunpack.c.h.bf16 %v868_v24  ;;  %v814_v41 = vunpack.c.h.bf16 %v883_v25 }
  0x16   : > { %v556_v34 = vadd.f32 %v524_v27, %v382_v26  ;;  %v557_v35 = vadd.f32 %v525_v29, %v383_v28  ;;  %v558_v38 = vadd.f32 %v526_v31, %v384_v30  ;;  %v559_v39 = vadd.f32 %v527_v33, %v385_v32  ;;  %v872_v32 = vld [vmem:[%s967_s29 + $0x30] sm:$0xff]  }
  0x17   : > { %v347_v46 = vmul.f32 %v749_v36, %v972_v0  ;;  %v489_v47 = vmul.f32 %v813_v37, %v977_v1  ;;  %v348_v50 = vmul.f32 %v750_v40, %v972_v0  ;;  %v490_v51 = vmul.f32 %v814_v41, %v977_v1  ;;  %v887_v37 = vld [vmem:[%s962_s26 + $0x30] sm:$0xff]  }
  0x18   : > { %v588_v44 = vmax.f32 %v556_v34, 0.0  ;;  %v589_v45 = vmax.f32 %v557_v35, 0.0  ;;  %v590_v48 = vmax.f32 %v558_v38, 0.0  ;;  %v591_v49 = vmax.f32 %v559_v39, 0.0 }
  0x19   : > { %v386_v53 = vadd.f32 %v986_v10, %v347_v46  ;;  %v528_v54 = vadd.f32 %v991_v11, %v489_v47  ;;  %v753_v55 = vunpack.c.l.bf16 %v869_v42  ;;  %v817_v56 = vunpack.c.l.bf16 %v884_v43  ;;  %v873_v46 = vld [vmem:[%s967_s29 + $0x38] sm:$0xff]  }
  0x1a   : > { %620 = vst [vmem:[%s1015_s17] sm:$0xff] %v588_v44  ;;  %621 = vst [vmem:[%s1015_s17 + $0x8] sm:$0xff] %v589_v45  ;;  %v387_v58 = vadd.f32 %v986_v10, %v348_v50  ;;  %v529_v59 = vadd.f32 %v991_v11, %v490_v51  ;;  %v754_v60 = vunpack.c.h.bf16 %v869_v42  ;;  %v818_v61 = vunpack.c.h.bf16 %v884_v43 }
  0x1b   : > { %622 = vst [vmem:[%s1015_s17 + $0x10] sm:$0xff] %v590_v48  ;;  %623 = vst [vmem:[%s1015_s17 + $0x18] sm:$0xff] %v591_v49  ;;  %v560_v62 = vadd.f32 %v528_v54, %v386_v53  ;;  %v349_v63 = vmul.f32 %v753_v55, %v972_v0  ;;  %v491_v2 = vmul.f32 %v817_v56, %v977_v1  ;;  %v757_v3 = vunpack.c.l.bf16 %v870_v52  ;;  %v888_v55 = vld [vmem:[%s962_s26 + $0x38] sm:$0xff]  }
  0x1c   : > { %v561_v4 = vadd.f32 %v529_v59, %v387_v58  ;;  %v350_v5 = vmul.f32 %v754_v60, %v972_v0  ;;  %v492_v6 = vmul.f32 %v818_v61, %v977_v1  ;;  %v821_v7 = vunpack.c.l.bf16 %v885_v57 }
  0x1d   : > { %v592_v8 = vmax.f32 %v560_v62, 0.0  ;;  %v388_v9 = vadd.f32 %v986_v10, %v349_v63  ;;  %v530_v12 = vadd.f32 %v991_v11, %v491_v2  ;;  %v351_v13 = vmul.f32 %v757_v3, %v972_v0 }
  0x1e   : > { %v593_v16 = vmax.f32 %v561_v4, 0.0  ;;  %v389_v17 = vadd.f32 %v986_v10, %v350_v5  ;;  %v531_v18 = vadd.f32 %v991_v11, %v492_v6  ;;  %v493_v19 = vmul.f32 %v821_v7, %v977_v1  ;;  %v874_v6 = vld [vmem:[%s967_s29 + $0x40] sm:$0xff]  }
  0x1f   : > { %624 = vst [vmem:[%s1015_s17 + $0x20] sm:$0xff] %v592_v8  ;;  %v562_v20 = vadd.f32 %v530_v12, %v388_v9  ;;  %v390_v21 = vadd.f32 %v986_v10, %v351_v13  ;;  %v758_v22 = vunpack.c.h.bf16 %v870_v52  ;;  %v822_v23 = vunpack.c.h.bf16 %v885_v57  ;;  %v889_v13 = vld [vmem:[%s962_s26 + $0x40] sm:$0xff]  }
  0x20   : > { %625 = vst [vmem:[%s1015_s17 + $0x28] sm:$0xff] %v593_v16  ;;  %v563_v24 = vadd.f32 %v531_v18, %v389_v17  ;;  %v532_v25 = vadd.f32 %v991_v11, %v493_v19  ;;  %v761_v26 = vunpack.c.l.bf16 %v871_v14  ;;  %v825_v27 = vunpack.c.l.bf16 %v886_v15 }
  0x21   : > { %v594_v28 = vmax.f32 %v562_v20, 0.0  ;;  %v352_v29 = vmul.f32 %v758_v22, %v972_v0  ;;  %v494_v30 = vmul.f32 %v822_v23, %v977_v1  ;;  %v762_v31 = vunpack.c.h.bf16 %v871_v14 }
  0x22   : > { %v595_v33 = vmax.f32 %v563_v24, 0.0  ;;  %v564_v34 = vadd.f32 %v532_v25, %v390_v21  ;;  %v353_v35 = vmul.f32 %v761_v26, %v972_v0  ;;  %v495_v36 = vmul.f32 %v825_v27, %v977_v1  ;;  %v875_v26 = vld [vmem:[%s967_s29 + $0x48] sm:$0xff]  }
  0x23   : > { %626 = vst [vmem:[%s1015_s17 + $0x30] sm:$0xff] %v594_v28  ;;  %v391_v38 = vadd.f32 %v986_v10, %v352_v29  ;;  %v533_v39 = vadd.f32 %v991_v11, %v494_v30  ;;  %v354_v40 = vmul.f32 %v762_v31, %v972_v0  ;;  %v826_v41 = vunpack.c.h.bf16 %v886_v15  ;;  %v890_v27 = vld [vmem:[%s962_s26 + $0x48] sm:$0xff]  }
  0x24   : > { %627 = vst [vmem:[%s1015_s17 + $0x38] sm:$0xff] %v595_v33  ;;  %v596_v42 = vmax.f32 %v564_v34, 0.0  ;;  %v392_v43 = vadd.f32 %v986_v10, %v353_v35  ;;  %v534_v44 = vadd.f32 %v991_v11, %v495_v36  ;;  %v765_v45 = vunpack.c.l.bf16 %v872_v32 }
  0x25   : > { %v565_v47 = vadd.f32 %v533_v39, %v391_v38  ;;  %v393_v48 = vadd.f32 %v986_v10, %v354_v40  ;;  %v496_v49 = vmul.f32 %v826_v41, %v977_v1  ;;  %v829_v50 = vunpack.c.l.bf16 %v887_v37  ;;  %v876_v40 = vld [vmem:[%s967_s29 + $0x50] sm:$0xff]  }
  0x26   : > { %628 = vst [vmem:[%s1015_s17 + $0x40] sm:$0xff] %v596_v42  ;;  %v566_v51 = vadd.f32 %v534_v44, %v392_v43  ;;  %v355_v52 = vmul.f32 %v765_v45, %v972_v0  ;;  %v766_v53 = vunpack.c.h.bf16 %v872_v32  ;;  %v830_v54 = vunpack.c.h.bf16 %v887_v37  ;;  %v891_v45 = vld [vmem:[%s962_s26 + $0x50] sm:$0xff]  }
  0x27   : > { %v597_v56 = vmax.f32 %v565_v47, 0.0  ;;  %v535_v57 = vadd.f32 %v991_v11, %v496_v49  ;;  %v497_v58 = vmul.f32 %v829_v50, %v977_v1  ;;  %v769_v59 = vunpack.c.l.bf16 %v873_v46 }
  0x28   : > { %v598_v60 = vmax.f32 %v566_v51, 0.0  ;;  %v394_v61 = vadd.f32 %v986_v10, %v355_v52  ;;  %v356_v62 = vmul.f32 %v766_v53, %v972_v0  ;;  %v498_v63 = vmul.f32 %v830_v54, %v977_v1 }
  0x29   : > { %629 = vst [vmem:[%s1015_s17 + $0x48] sm:$0xff] %v597_v56  ;;  %v567_v2 = vadd.f32 %v535_v57, %v393_v48  ;;  %v536_v3 = vadd.f32 %v991_v11, %v497_v58  ;;  %v357_v4 = vmul.f32 %v769_v59, %v972_v0  ;;  %v833_v5 = vunpack.c.l.bf16 %v888_v55 }
  0x2a   : > { %630 = vst [vmem:[%s1015_s17 + $0x50] sm:$0xff] %v598_v60  ;;  %v395_v7 = vadd.f32 %v986_v10, %v356_v62  ;;  %v537_v8 = vadd.f32 %v991_v11, %v498_v63  ;;  %v770_v9 = vunpack.c.h.bf16 %v873_v46  ;;  %v834_v12 = vunpack.c.h.bf16 %v888_v55  ;;  %v877_v62 = vld [vmem:[%s967_s29 + $0x58] sm:$0xff]  }
  0x2b   : > { %v599_v14 = vmax.f32 %v567_v2, 0.0  ;;  %v568_v15 = vadd.f32 %v536_v3, %v394_v61  ;;  %v396_v16 = vadd.f32 %v986_v10, %v357_v4  ;;  %v499_v17 = vmul.f32 %v833_v5, %v977_v1  ;;  %v892_v5 = vld [vmem:[%s962_s26 + $0x58] sm:$0xff]  }
  0x2c   : > { %v569_v18 = vadd.f32 %v537_v8, %v395_v7  ;;  %v358_v19 = vmul.f32 %v770_v9, %v972_v0  ;;  %v500_v20 = vmul.f32 %v834_v12, %v977_v1  ;;  %v773_v21 = vunpack.c.l.bf16 %v874_v6 }
  0x2d   : > { %631 = vst [vmem:[%s1015_s17 + $0x58] sm:$0xff] %v599_v14  ;;  %v600_v22 = vmax.f32 %v568_v15, 0.0  ;;  %v538_v23 = vadd.f32 %v991_v11, %v499_v17  ;;  %v837_v24 = vunpack.c.l.bf16 %v889_v13  ;;  %v774_v25 = vunpack.c.h.bf16 %v874_v6 }
  0x2e   : > { %v601_v28 = vmax.f32 %v569_v18, 0.0  ;;  %v397_v29 = vadd.f32 %v986_v10, %v358_v19  ;;  %v539_v30 = vadd.f32 %v991_v11, %v500_v20  ;;  %v359_v31 = vmul.f32 %v773_v21, %v972_v0  ;;  %v878_v20 = vld [vmem:[%s967_s29 + $0x60] sm:$0xff]  }
  0x2f   : > { %632 = vst [vmem:[%s1015_s17 + $0x60] sm:$0xff] %v600_v22  ;;  %v570_v32 = vadd.f32 %v538_v23, %v396_v16  ;;  %v501_v33 = vmul.f32 %v837_v24, %v977_v1  ;;  %v360_v34 = vmul.f32 %v774_v25, %v972_v0  ;;  %v838_v35 = vunpack.c.h.bf16 %v889_v13  ;;  %v893_v25 = vld [vmem:[%s962_s26 + $0x60] sm:$0xff]  }
  0x30   : > { %633 = vst [vmem:[%s1015_s17 + $0x68] sm:$0xff] %v601_v28  ;;  %v571_v36 = vadd.f32 %v539_v30, %v397_v29  ;;  %v398_v37 = vadd.f32 %v986_v10, %v359_v31  ;;  %v777_v38 = vunpack.c.l.bf16 %v875_v26  ;;  %v841_v39 = vunpack.c.l.bf16 %v890_v27 }
  0x31   : > { %v602_v41 = vmax.f32 %v570_v32, 0.0  ;;  %v540_v42 = vadd.f32 %v991_v11, %v501_v33  ;;  %v399_v43 = vadd.f32 %v986_v10, %v360_v34  ;;  %v502_v44 = vmul.f32 %v838_v35, %v977_v1  ;;  %v879_v34 = vld [vmem:[%s967_s29 + $0x68] sm:$0xff]  }
  0x32   : > { %v603_v46 = vmax.f32 %v571_v36, 0.0  ;;  %v361_v47 = vmul.f32 %v777_v38, %v972_v0  ;;  %v503_v48 = vmul.f32 %v841_v39, %v977_v1  ;;  %v778_v49 = vunpack.c.h.bf16 %v875_v26 }
  0x33   : > { %634 = vst [vmem:[%s1015_s17 + $0x70] sm:$0xff] %v602_v41  ;;  %v572_v50 = vadd.f32 %v540_v42, %v398_v37  ;;  %v541_v51 = vadd.f32 %v991_v11, %v502_v44  ;;  %v842_v52 = vunpack.c.h.bf16 %v890_v27  ;;  %v781_v53 = vunpack.c.l.bf16 %v876_v40 }
  0x34   : > { %635 = vst [vmem:[%s1015_s17 + $0x78] sm:$0xff] %v603_v46  ;;  %v400_v54 = vadd.f32 %v986_v10, %v361_v47  ;;  %v542_v55 = vadd.f32 %v991_v11, %v503_v48  ;;  %v362_v56 = vmul.f32 %v778_v49, %v972_v0  ;;  %v845_v57 = vunpack.c.l.bf16 %v891_v45 }
  0x35   : > { %v604_v58 = vmax.f32 %v572_v50, 0.0  ;;  %v573_v59 = vadd.f32 %v541_v51, %v399_v43  ;;  %v504_v60 = vmul.f32 %v842_v52, %v977_v1  ;;  %v363_v61 = vmul.f32 %v781_v53, %v972_v0  ;;  %v894_v43 = vld [vmem:[%s962_s26 + $0x68] sm:$0xff]  }
  0x36   : > { %v574_v63 = vadd.f32 %v542_v55, %v400_v54  ;;  %v401_v2 = vadd.f32 %v986_v10, %v362_v56  ;;  %v505_v3 = vmul.f32 %v845_v57, %v977_v1  ;;  %v782_v4 = vunpack.c.h.bf16 %v876_v40  ;;  %v880_v56 = vld [vmem:[%s967_s29 + $0x70] sm:$0xff]  }
  0x37   : > { %636 = vst [vmem:[%s1015_s17 + $0x80] sm:$0xff] %v604_v58  ;;  %v605_v6 = vmax.f32 %v573_v59, 0.0  ;;  %v543_v7 = vadd.f32 %v991_v11, %v504_v60  ;;  %v402_v8 = vadd.f32 %v986_v10, %v363_v61  ;;  %v846_v9 = vunpack.c.h.bf16 %v891_v45  ;;  %v895_v57 = vld [vmem:[%s962_s26 + $0x70] sm:$0xff]  }
  0x38   : > { %v606_v12 = vmax.f32 %v574_v63, 0.0  ;;  %v544_v13 = vadd.f32 %v991_v11, %v505_v3  ;;  %v364_v14 = vmul.f32 %v782_v4, %v972_v0  ;;  %v785_v15 = vunpack.c.l.bf16 %v877_v62 }
  0x39   : > { %637 = vst [vmem:[%s1015_s17 + $0x88] sm:$0xff] %v605_v6  ;;  %v575_v16 = vadd.f32 %v543_v7, %v401_v2  ;;  %v506_v17 = vmul.f32 %v846_v9, %v977_v1  ;;  %v849_v18 = vunpack.c.l.bf16 %v892_v5  ;;  %v786_v19 = vunpack.c.h.bf16 %v877_v62 }
  0x3a   : > { %638 = vst [vmem:[%s1015_s17 + $0x90] sm:$0xff] %v606_v12  ;;  %v576_v21 = vadd.f32 %v544_v13, %v402_v8  ;;  %v403_v22 = vadd.f32 %v986_v10, %v364_v14  ;;  %v365_v23 = vmul.f32 %v785_v15, %v972_v0  ;;  %v850_v24 = vunpack.c.h.bf16 %v892_v5  ;;  %v881_v14 = vld [vmem:[%s967_s29 + $0x78] sm:$0xff]  }
  0x3b   : > { %v607_v26 = vmax.f32 %v575_v16, 0.0  ;;  %v545_v27 = vadd.f32 %v991_v11, %v506_v17  ;;  %v507_v28 = vmul.f32 %v849_v18, %v977_v1  ;;  %v366_v29 = vmul.f32 %v786_v19, %v972_v0  ;;  %v896_v15 = vld [vmem:[%s962_s26 + $0x78] sm:$0xff]  }
  0x3c   : > { %v608_v30 = vmax.f32 %v576_v21, 0.0  ;;  %v404_v31 = vadd.f32 %v986_v10, %v365_v23  ;;  %v508_v32 = vmul.f32 %v850_v24, %v977_v1  ;;  %v789_v33 = vunpack.c.l.bf16 %v878_v20 }
  0x3d   : > { %639 = vst [vmem:[%s1015_s17 + $0x98] sm:$0xff] %v607_v26  ;;  %v577_v35 = vadd.f32 %v545_v27, %v403_v22  ;;  %v546_v36 = vadd.f32 %v991_v11, %v507_v28  ;;  %v405_v37 = vadd.f32 %v986_v10, %v366_v29  ;;  %v853_v38 = vunpack.c.l.bf16 %v893_v25 }
  0x3e   : > { %640 = vst [vmem:[%s1015_s17 + $0xa0] sm:$0xff] %v608_v30  ;;  %v547_v39 = vadd.f32 %v991_v11, %v508_v32  ;;  %v367_v40 = vmul.f32 %v789_v33, %v972_v0  ;;  %v790_v41 = vunpack.c.h.bf16 %v878_v20  ;;  %v854_v42 = vunpack.c.h.bf16 %v893_v25 }
  0x3f   : > { %v609_v44 = vmax.f32 %v577_v35, 0.0  ;;  %v578_v45 = vadd.f32 %v546_v36, %v404_v31  ;;  %v509_v46 = vmul.f32 %v853_v38, %v977_v1  ;;  %v793_v47 = vunpack.c.l.bf16 %v879_v34 }
  0x40   : > { %v579_v48 = vadd.f32 %v547_v39, %v405_v37  ;;  %v406_v49 = vadd.f32 %v986_v10, %v367_v40  ;;  %v368_v50 = vmul.f32 %v790_v41, %v972_v0  ;;  %v510_v51 = vmul.f32 %v854_v42, %v977_v1 }
  0x41   : > { %641 = vst [vmem:[%s1015_s17 + $0xa8] sm:$0xff] %v609_v44  ;;  %v610_v52 = vmax.f32 %v578_v45, 0.0  ;;  %v548_v53 = vadd.f32 %v991_v11, %v509_v46  ;;  %v369_v54 = vmul.f32 %v793_v47, %v972_v0  ;;  %v857_v55 = vunpack.c.l.bf16 %v894_v43 }
  0x42   : > { %v611_v58 = vmax.f32 %v579_v48, 0.0  ;;  %v407_v59 = vadd.f32 %v986_v10, %v368_v50  ;;  %v549_v60 = vadd.f32 %v991_v11, %v510_v51  ;;  %v794_v61 = vunpack.c.h.bf16 %v879_v34 }
  0x43   : > { %642 = vst [vmem:[%s1015_s17 + $0xb0] sm:$0xff] %v610_v52  ;;  %v580_v62 = vadd.f32 %v548_v53, %v406_v49  ;;  %v408_v63 = vadd.f32 %v986_v10, %v369_v54  ;;  %v511_v2 = vmul.f32 %v857_v55, %v977_v1  ;;  %v858_v3 = vunpack.c.h.bf16 %v894_v43 }
  0x44   : > { %643 = vst [vmem:[%s1015_s17 + $0xb8] sm:$0xff] %v611_v58  ;;  %v581_v4 = vadd.f32 %v549_v60, %v407_v59  ;;  %v370_v5 = vmul.f32 %v794_v61, %v972_v0  ;;  %v797_v6 = vunpack.c.l.bf16 %v880_v56  ;;  %v861_v7 = vunpack.c.l.bf16 %v895_v57 }
  0x45   : > { %v612_v8 = vmax.f32 %v580_v62, 0.0  ;;  %v550_v9 = vadd.f32 %v991_v11, %v511_v2  ;;  %v512_v12 = vmul.f32 %v858_v3, %v977_v1  ;;  %v798_v13 = vunpack.c.h.bf16 %v880_v56 }
  0x46   : > { %v613_v16 = vmax.f32 %v581_v4, 0.0  ;;  %v409_v17 = vadd.f32 %v986_v10, %v370_v5  ;;  %v371_v18 = vmul.f32 %v797_v6, %v972_v0  ;;  %v513_v19 = vmul.f32 %v861_v7, %v977_v1 }
  0x47   : > { %644 = vst [vmem:[%s1015_s17 + $0xc0] sm:$0xff] %v612_v8  ;;  %v582_v20 = vadd.f32 %v550_v9, %v408_v63  ;;  %v551_v21 = vadd.f32 %v991_v11, %v512_v12  ;;  %v372_v22 = vmul.f32 %v798_v13, %v972_v0  ;;  %v862_v23 = vunpack.c.h.bf16 %v895_v57 }
  0x48   : > { %645 = vst [vmem:[%s1015_s17 + $0xc8] sm:$0xff] %v613_v16  ;;  %v410_v24 = vadd.f32 %v986_v10, %v371_v18  ;;  %v552_v25 = vadd.f32 %v991_v11, %v513_v19  ;;  %v801_v26 = vunpack.c.l.bf16 %v881_v14  ;;  %v865_v27 = vunpack.c.l.bf16 %v896_v15 }
  0x49   : > { %v614_v28 = vmax.f32 %v582_v20, 0.0  ;;  %v583_v29 = vadd.f32 %v551_v21, %v409_v17  ;;  %v411_v30 = vadd.f32 %v986_v10, %v372_v22  ;;  %v514_v31 = vmul.f32 %v862_v23, %v977_v1 }
  0x4a   : > { %v584_v32 = vadd.f32 %v552_v25, %v410_v24  ;;  %v373_v33 = vmul.f32 %v801_v26, %v972_v0  ;;  %v515_v34 = vmul.f32 %v865_v27, %v977_v1  ;;  %v802_v35 = vunpack.c.h.bf16 %v881_v14 }
  0x4b   : > { %646 = vst [vmem:[%s1015_s17 + $0xd0] sm:$0xff] %v614_v28  ;;  %v615_v36 = vmax.f32 %v583_v29, 0.0  ;;  %v553_v37 = vadd.f32 %v991_v11, %v514_v31  ;;  %v866_v38 = vunpack.c.h.bf16 %v896_v15 }
  0x4c   : > { %v616_v39 = vmax.f32 %v584_v32, 0.0  ;;  %v412_v40 = vadd.f32 %v986_v10, %v373_v33  ;;  %v554_v41 = vadd.f32 %v991_v11, %v515_v34  ;;  %v374_v42 = vmul.f32 %v802_v35, %v972_v0 }
  0x4d   : > { %647 = vst [vmem:[%s1015_s17 + $0xd8] sm:$0xff] %v615_v36  ;;  %v585_v43 = vadd.f32 %v553_v37, %v411_v30  ;;  %v516_v44 = vmul.f32 %v866_v38, %v977_v1 }
  0x4e   : > { %648 = vst [vmem:[%s1015_s17 + $0xe0] sm:$0xff] %v616_v39  ;;  %v586_v45 = vadd.f32 %v554_v41, %v412_v40  ;;  %v413_v46 = vadd.f32 %v986_v10, %v374_v42 }
  0x4f   : > { %v617_v47 = vmax.f32 %v585_v43, 0.0  ;;  %v555_v48 = vadd.f32 %v991_v11, %v516_v44 }
  0x50   : > { %v618_v49 = vmax.f32 %v586_v45, 0.0 }
  0x51   : > { %649 = vst [vmem:[%s1015_s17 + $0xe8] sm:$0xff] %v617_v47  ;;  %v587_v50 = vadd.f32 %v555_v48, %v413_v46 }
  0x52   : > { %650 = vst [vmem:[%s1015_s17 + $0xf0] sm:$0xff] %v618_v49 }
  0x53   : > { %v619_v51 = vmax.f32 %v587_v50, 0.0 }
  0x55   : > { %651 = vst [vmem:[%s1015_s17 + $0xf8] sm:$0xff] %v619_v51 }
  0x56 PF: > { %s16_s21 = sadd.s32 1, %s911_s21  }
  0x57   : > { %p13_p4 = scmp.ge.s32.totalorder %s16_s21, 4  }
  0x59   :  { %15 = sbr.rel (!%p13_p4) target bundleno = 1 (0x1), region = 77 }

// kernel: basic_block_forward.3
= control target key start
LH: loop header
LB: loop body
LE: loop exit
PB: predicated region body
PF: predicated region fallthrough
CT: control target
= control target key end

     0   :  { %s7834_s21 = smov 0   ;;  %s10540_s0 = inlined_call_operand.vmem [shape: bf16[2,18,18,128], index: 0, kind: input, shape index: {}]   ;;  %s10541_s1 = inlined_call_operand.vmem [shape: bf16[9,128,128], index: 1, kind: input, shape index: {}]   ;;  %s10542_s2 = inlined_call_operand.vmem [shape: bf16[128,128], index: 2, kind: input, shape index: {}]   ;;  %s10543_s3 = inlined_call_operand.vmem [shape: bf16[2,256,128], index: 3, kind: output, shape index: {0}]   ;;  %s10544_s4 = inlined_call_operand.vmem [shape: bf16[2,256,128], index: 4, kind: output, shape index: {1}]   ;;  %s10545_s5 = inlined_call_operand.vmem [shape: f32[2,2,128], index: 5, kind: output, shape index: {2}]   ;;  %s10546_s6 = inlined_call_operand.vmem [shape: f32[2,2,128], index: 6, kind: output, shape index: {3}]  }
   0x1 LB: > { %s6007_s22 = sadd.s32 4294967295, %s7797_s21   ;;  %p6011_p0 = scmp.ge.s32.totalorder %s7797_s21, 1  ;;  %s7797_s21 = sphi %s7834_s21, %s17_s21  }
   0x2   : > { %p219_p1 = scmp.lt.s32.totalorder %s7797_s21, 3 }
   0x4   : > { %p220_p2 = pnand %p6011_p0, %p219_p1 }
   0x6   : > { %223 = sbr.rel (%p220_p2) target bundleno = 590 (0x24e), region = 32 }
   0xb   : > { %v7662_v0 = vld [vmem:[%s10541_s1 + $0x78] sm:$0xff]   ;;  %p262_p3 = scmp.lt.s32.totalorder %s6007_s22, 1  ;;  %v7664_v2 = vld [vmem:[%s10541_s1 + $0x70] sm:$0xff]   ;;  %v7666_v4 = vld [vmem:[%s10541_s1 + $0x68] sm:$0xff]   ;;  %vm350_vm0 = vsmask.f32 3328 }
   0xc   : > { %v7663_v1 = vld [vmem:[%s10541_s1 + $0x38] sm:$0xff]   ;;  %7173 = vmatprep.subr.bf16.mxu0 %v7662_v0  ;;  %v7665_v3 = vld [vmem:[%s10541_s1 + $0x30] sm:$0xff]   ;;  %v7667_v5 = vld [vmem:[%s10541_s1 + $0x28] sm:$0xff]   ;;  %vm351_vm1 = vsmask.f32 7440  ;;  %vm1380_vm3 = vcmask 1042432  }
   0xd   : > { %7221 = vmatprep.subr.bf16.mxu1 %v7663_v1  ;;  %7174 = vmatpush3.bf16.msra.mxu0 %v7662_v0  ;;  %s10719_s22 = smov (!%p262_p3, %s6007_s22), 1  ;;  %v7668_v6 = vld [vmem:[%s10541_s1 + $0x60] sm:$0xff]   ;;  %v7670_v8 = vld [vmem:[%s10541_s1 + $0x58] sm:$0xff]   ;;  %v7672_v10 = vld [vmem:[%s10541_s1 + $0x50] sm:$0xff]   ;;  %vm1381_vm4 = vcmask 1046532   ;;  %vm5586_vm6 = vcmask 1040384  }
   0xe   : > { %7222 = vmatpush3.bf16.msra.mxu1 %v7663_v1  ;;  %7175 = vmatprep.subr.bf16.mxu0 %v7664_v2  ;;  %v7669_v7 = vld [vmem:[%s10541_s1 + $0x20] sm:$0xff]   ;;  %s7653_s15 = smul.u32 216, %s10719_s22  ;;  %v7671_v9 = vld [vmem:[%s10541_s1 + $0x18] sm:$0xff]   ;;  %v7673_v11 = vld [vmem:[%s10541_s1 + $0x10] sm:$0xff]   ;;  %s6017_s18 = sshll.u32 %s10719_s22, 1 }
   0xf   : > { %7223 = vmatprep.subr.bf16.mxu1 %v7665_v3  ;;  %v7674_v17 = vld [vmem:[%s10541_s1 + $0x48] sm:$0xff]   ;;  %v7676_v37 = vld [vmem:[%s10541_s1 + $0x40] sm:$0xff]   ;;  %vm7922_vm2 = vmor %vm350_vm0, %vm351_vm1  ;;  %s284_s23 = scalar_lea.vmem %s10546_s6, %s6017_s18  ;;  %s280_s30 = scalar_lea.vmem %s10545_s5, %s6017_s18 }
  0x10   : > { %s7878_s24 = scalar_lea.vmem %s10540_s0, %s7653_s15  ;;  %v7675_v32 = vld [vmem:[%s10541_s1 + $0x8] sm:$0xff]   ;;  %v7677_v52 = vld [vmem:[%s10541_s1] sm:$0xff]   ;;  %vm8276_vm5 = vmor %vm1380_vm3, %vm1381_vm4 }
  0x11   : > { %7176 = vmatpush3.bf16.msra.mxu0 %v7664_v2  ;;  %v286_v12 = vld [vmem:[%s7878_s24] sm:$0xf]  ;;  %v7888_v13 = vld [vmem:[%s7878_s24 + $0x4] sm:$0xf]  ;;  %v7891_v14 = vld [vmem:[%s7878_s24 + $0x8] sm:$0x1] }
  0x12   : > { %7224 = vmatpush3.bf16.msra.mxu1 %v7665_v3  ;;  %7177 = vmatprep.subr.bf16.mxu0 %v7666_v4  ;;  %v354_v15 = vshrl.u32 %v286_v12, 16  ;;  %v357_v16 = vshll.u32 %v286_v12, 16  ;;  %v363_v18 = vshll.u32 %v7888_v13, 16  ;;  %v367_v19 = vshrl.u32 %v7888_v13, 16  ;;  %v7901_v22 = vld [vmem:[%s7878_s24 + $0xc] sm:$0xf] }
  0x13   : > { %7225 = vmatprep.subr.bf16.mxu1 %v7667_v5  ;;  %v373_v20 = vshll.u32 %v7891_v14, 16  ;;  %v1388_v21 = vrot.slane %v7891_v14, 5  ;;  %v6059_v25 = vcombine.low %v286_v12, %v7888_v13  ;;  %v7905_v26 = vld [vmem:[%s7878_s24 + $0x10] sm:$0xf]  ;;  %v7908_v27 = vld [vmem:[%s7878_s24 + $0x14] sm:$0x1] }
  0x14   : > { %v356_v23 = vrot.slane %v354_v15, 4  ;;  %v359_v24 = vrot.slane %v357_v16, 5  ;;  %v365_v28 = vrot.slane %v363_v18, 5  ;;  %v369_v29 = vrot.slane %v367_v19, 4  ;;  %v7931_v50 = vld [vmem:[%s7878_s24 + $0x18] sm:$0xf] }
  0x15   : > { %7178 = vmatpush3.bf16.msra.mxu0 %v7666_v4  ;;  %v375_v30 = vrot.slane %v373_v20, 5  ;;  %v378_v31 = vshrl.u32 %v7901_v22, 16  ;;  %7237 = vmatprep.mubr.bf16.mxu1 %v6059_v25  ;;  %v381_v34 = vshll.u32 %v7901_v22, 16  ;;  %v387_v35 = vshll.u32 %v7905_v26, 16  ;;  %v7934_v51 = vld [vmem:[%s7878_s24 + $0x1c] sm:$0xf] }
  0x16   : > { %7226 = vmatpush3.bf16.msra.mxu1 %v7667_v5  ;;  %7179 = vmatprep.subr.bf16.mxu0 %v7668_v6  ;;  %v360_v33 = vor.u32 %v359_v24, %v356_v23  ;;  %v391_v36 = vshrl.u32 %v7905_v26, 16  ;;  %v370_v39 = vor.u32 %v369_v29, %v365_v28  ;;  %v397_v41 = vshll.u32 %v7908_v27, 16  ;;  %v7942_v56 = vld [vmem:[%s7878_s24 + $0x20] sm:$0x1]  ;;  %v7946_v58 = vld [vmem:[%s7878_s24 + $0x24] sm:$0xf] }
  0x17   : > { %7227 = vmatprep.subr.bf16.mxu1 %v7669_v7  ;;  %v380_v40 = vrot.slane %v378_v31, 4  ;;  %v383_v44 = vrot.slane %v381_v34, 5  ;;  %v389_v45 = vrot.slane %v387_v35, 5  ;;  %v6060_v49 = vcombine.low %v7901_v22, %v7905_v26  ;;  %v7954_v63 = vld [vmem:[%s7878_s24 + $0x28] sm:$0xf]  ;;  %v7680_v3 = vld [vmem:[%s10541_s1 + $0xb8] sm:$0xff]  }
  0x18   : > { %v361_v43 = vrot.slane %v360_v33, 4  ;;  %v393_v46 = vrot.slane %v391_v36, 4  ;;  %v371_v47 = vrot.slane %v370_v39, 4  ;;  %v399_v48 = vrot.slane %v397_v41, 5  ;;  %v7960_v5 = vld [vmem:[%s7878_s24 + $0x2c] sm:$0x1] }
  0x19   : > { %7180 = vmatpush3.bf16.msra.mxu0 %v7668_v6  ;;  %v384_v54 = vor.u32 %v383_v44, %v380_v40  ;;  %v402_v57 = vshrl.u32 %v7931_v50, 16  ;;  %v405_v60 = vshll.u32 %v7931_v50, 16  ;;  %v411_v61 = vshll.u32 %v7934_v51, 16  ;;  %v7681_v12 = vld [vmem:[%s10541_s1 + $0xf8] sm:$0xff]   ;;  %v7974_v23 = vld [vmem:[%s7878_s24 + $0x30] sm:$0xf] }
  0x1a   : > { %7228 = vmatpush3.bf16.msra.mxu1 %v7669_v7  ;;  %7181 = vmatprep.subr.bf16.mxu0 %v7670_v8  ;;  %v366_v53 = vsel %vm7922_vm2, %v361_v43, %v365_v28  ;;  %v394_v55 = vor.u32 %v393_v46, %v389_v45  ;;  %v376_v59 = vsel %vm7922_vm2, %v371_v47, %v375_v30  ;;  %v415_v62 = vshrl.u32 %v7934_v51, 16  ;;  %v7684_v34 = vld [vmem:[%s10541_s1 + $0xb0] sm:$0xff]   ;;  %v7989_v40 = vld [vmem:[%s7878_s24 + $0x38] sm:$0x1] }
  0x1b   : > { %7229 = vmatprep.subr.bf16.mxu1 %v7671_v9  ;;  %v6035_v0 = vcombine.low %v366_v53, %v376_v59  ;;  %v385_v1 = vrot.slane %v384_v54, 4  ;;  %v404_v4 = vrot.slane %v402_v57, 4  ;;  %v407_v6 = vrot.slane %v405_v60, 5  ;;  %v7986_v35 = vld [vmem:[%s7878_s24 + $0x34] sm:$0xf]  ;;  %v7688_v57 = vld [vmem:[%s10541_s1 + $0xa8] sm:$0xff]  }
  0x1c   : > { %v395_v2 = vrot.slane %v394_v55, 4  ;;  %v413_v7 = vrot.slane %v411_v61, 5  ;;  %v6061_v15 = vcombine.low %v7931_v50, %v7934_v51  ;;  %v426_v16 = vshrl.u32 %v7946_v58, 16  ;;  %v7685_v46 = vld [vmem:[%s10541_s1 + $0xf0] sm:$0xff]   ;;  %v8007_v55 = vld [vmem:[%s7878_s24 + $0x40] sm:$0xf] }
  0x1d   : > { %7182 = vmatpush3.bf16.msra.mxu0 %v7670_v8  ;;  %v417_v8 = vrot.slane %v415_v62, 4  ;;  %7189 = vmatprep.mubr.bf16.mxu0 %v6035_v0  ;;  %v408_v18 = vor.u32 %v407_v6, %v404_v4  ;;  %v429_v25 = vshll.u32 %v7946_v58, 16  ;;  %v435_v28 = vshll.u32 %v7954_v63, 16  ;;  %v1336_v42 = vld [vmem:[%s7878_s24 + $0x30] sm:$0xe] }
  0x1e   : > { %7230 = vmatpush3.bf16.msra.mxu1 %v7671_v9  ;;  %7183 = vmatprep.subr.bf16.mxu0 %v7672_v10  ;;  %v421_v9 = vshll.u32 %v7942_v56, 16  ;;  %v428_v24 = vrot.slane %v426_v16, 4  ;;  %v439_v29 = vshrl.u32 %v7954_v63, 16  ;;  %v6062_v33 = vcombine.low %v7946_v58, %v7954_v63 }
  0x1f   : > { %7231 = vmatprep.subr.bf16.mxu1 %v7673_v11  ;;  %v418_v19 = vor.u32 %v417_v8, %v413_v7  ;;  %v409_v30 = vrot.slane %v408_v18, 4  ;;  %v431_v36 = vrot.slane %v429_v25, 5  ;;  %v450_v41 = vshrl.u32 %v7974_v23, 16  ;;  %v8022_v8 = vld [vmem:[%s7878_s24 + $0x44] sm:$0x1] }
  0x20   : > { %v423_v20 = vrot.slane %v421_v9, 5  ;;  %v441_v39 = vrot.slane %v439_v29, 4  ;;  %v453_v47 = vshll.u32 %v7974_v23, 16  ;;  %v459_v60 = vshll.u32 %v7986_v35, 16 }
  0x21   : > { %7184 = vmatpush3.bf16.msra.mxu0 %v7672_v10  ;;  %v390_v10 = vsel %vm7922_vm2, %v385_v1, %v389_v45  ;;  %v419_v31 = vrot.slane %v418_v19, 4  ;;  %v414_v43 = vsel %vm7922_vm2, %v409_v30, %v413_v7  ;;  %v452_v54 = vrot.slane %v450_v41, 4  ;;  %v8044_v30 = vld [vmem:[%s7878_s24 + $0x50] sm:$0x1] }
  0x22   : > { %7232 = vmatpush3.bf16.msra.mxu1 %v7673_v11  ;;  %7185 = vmatprep.subr.bf16.mxu0 %v7674_v17  ;;  %v400_v11 = vsel %vm7922_vm2, %v395_v2, %v399_v48  ;;  %v8001_v48 = vld [vmem:[%s7878_s24 + $0x3c] sm:$0xf]  ;;  %v455_v59 = vrot.slane %v453_v47, 5  ;;  %v463_v22 = vshrl.u32 %v7986_v35, 16  ;;  %v6063_v0 = vcombine.low %v7974_v23, %v7986_v35  ;;  %v7689_v2 = vld [vmem:[%s10541_s1 + $0xe8] sm:$0xff]   ;;  %v7692_v23 = vld [vmem:[%s10541_s1 + $0xa0] sm:$0xff]  }
  0x23   : > { %7233 = vmatprep.subr.bf16.mxu1 %v7675_v32  ;;  %v424_v44 = vsel %vm7922_vm2, %v419_v31, %v423_v20  ;;  %v474_v1 = vshrl.u32 %v8001_v48, 16  ;;  %v461_v4 = vrot.slane %v459_v60, 5  ;;  %v483_v19 = vshll.u32 %v8007_v55, 16  ;;  %v8034_v20 = vld [vmem:[%s7878_s24 + $0x4c] sm:$0xf]  ;;  %v7693_v31 = vld [vmem:[%s10541_s1 + $0xe0] sm:$0xff]  }
  0x24   : > { %v6037_v50 = vcombine.low %v414_v43, %v424_v44  ;;  %v465_v6 = vrot.slane %v463_v22, 4  ;;  %v487_v25 = vshrl.u32 %v8007_v55, 16  ;;  %v6064_v29 = vcombine.low %v8001_v48, %v8007_v55 }
  0x25   : > { %7186 = vmatpush3.bf16.msra.mxu0 %v7674_v17  ;;  %v6036_v17 = vcombine.low %v390_v10, %v400_v11  ;;  %v476_v11 = vrot.slane %v474_v1, 4  ;;  %v507_v58 = vshll.u32 %v8034_v20, 16 }
  0x26   : > { %7234 = vmatpush3.bf16.msra.mxu1 %v7675_v32  ;;  %7187 = vmatprep.subr.bf16.mxu0 %v7676_v37  ;;  %v445_v32 = vshll.u32 %v7960_v5, 16  ;;  %v466_v18 = vor.u32 %v465_v6, %v461_v4  ;;  %v489_v43 = vrot.slane %v487_v25, 4 }
  0x27   : > { %7235 = vmatprep.subr.bf16.mxu1 %v7677_v52  ;;  %v509_v60 = vrot.slane %v507_v58, 5 }
  0x28   : > { %v447_v45 = vrot.slane %v445_v32, 5 }
  0x29   : > { %7188 = vmatpush3.bf16.msra.mxu0 %v7676_v37  ;;  %v437_v37 = vrot.slane %v435_v28, 5  ;;  %v493_v28 = vshll.u32 %v8022_v8, 16 }
  0x2a   : > { %7236 = vmatpush3.bf16.msra.mxu1 %v7677_v52  ;;  %7269 = vmatprep.subr.bf16.mxu0 %v7680_v3  ;;  %v432_v52 = vor.u32 %v431_v36, %v428_v24  ;;  %v485_v36 = vrot.slane %v483_v19, 5  ;;  %v7701_v19 = vld [vmem:[%s10541_s1 + $0xd0] sm:$0xff]  }
  0x2b   : > { %7317 = vmatprep.subr.bf16.mxu1 %v7681_v12  ;;  %v442_v53 = vor.u32 %v441_v39, %v437_v37  ;;  %v8053_v39 = vld [vmem:[%s7878_s24 + $0x54] sm:$0xf]  ;;  %v495_v44 = vrot.slane %v493_v28, 5 }
  0x2c   : > { %7190 = vmatmul.mubr.bf16.vlgmr.msra.gmra.mxu0 %v6036_v17  ;;  %v433_v61 = vrot.slane %v432_v52, 4 }
  0x2d   : > { %7238 = vmatmul.mubr.bf16.vlgmr.msra.gmra.mxu1 %v6060_v49  ;;  %7270 = vmatpush3.bf16.msra.mxu0 %v7680_v3  ;;  %v469_v49 = vshll.u32 %v7989_v40, 16  ;;  %v443_v62 = vrot.slane %v442_v53, 4  ;;  %v456_v3 = vor.u32 %v455_v59, %v452_v54  ;;  %v490_v54 = vor.u32 %v489_v43, %v485_v36  ;;  %v8070_v59 = vld [vmem:[%s7878_s24 + $0x58] sm:$0xf] }
  0x2e   : > { %7318 = vmatpush3.bf16.msra.mxu1 %v7681_v12  ;;  %7241 = vmatprep.mubr.bf16.mxu1 %v6061_v15  ;;  %v438_v9 = vsel %vm7922_vm2, %v433_v61, %v437_v37  ;;  %v477_v12 = vshll.u32 %v8001_v48, 16  ;;  %v8030_v15 = vld [vmem:[%s7878_s24 + $0x48] sm:$0xf] }
  0x2f   : > { %7193 = vmatprep.mubr.bf16.mxu0 %v6037_v50  ;;  %7271 = vmatprep.subr.bf16.mxu0 %v7684_v34  ;;  %v471_v7 = vrot.slane %v469_v49, 5  ;;  %v448_v10 = vsel %vm7922_vm2, %v443_v62, %v447_v45  ;;  %v457_v17 = vrot.slane %v456_v3, 4  ;;  %v498_v37 = vshrl.u32 %v8030_v15, 16  ;;  %v7697_v50 = vld [vmem:[%s10541_s1 + $0xd8] sm:$0xff]  }
  0x30   : > { %7319 = vmatprep.subr.bf16.mxu1 %v7685_v46  ;;  %v6038_v16 = vcombine.low %v438_v9, %v448_v10  ;;  %v479_v24 = vrot.slane %v477_v12, 5  ;;  %v501_v45 = vshll.u32 %v8030_v15, 16  ;;  %v517_v49 = vshll.u32 %v8044_v30, 16  ;;  %v8084_v10 = vld [vmem:[%s7878_s24 + $0x60] sm:$0xf] }
  0x31   : > { %7272 = vmatpush3.bf16.msra.mxu0 %v7684_v34  ;;  %v462_v32 = vsel %vm7922_vm2, %v457_v17, %v461_v4  ;;  %v467_v34 = vrot.slane %v466_v18, 4  ;;  %v500_v48 = vrot.slane %v498_v37, 4  ;;  %v6065_v61 = vcombine.low %v8030_v15, %v8034_v20  ;;  %v8093_v18 = vld [vmem:[%s7878_s24 + $0x64] sm:$0xf] }
  0x32   : > { %7320 = vmatpush3.bf16.msra.mxu1 %v7685_v46  ;;  %7273 = vmatprep.subr.bf16.mxu0 %v7688_v57  ;;  %v480_v41 = vor.u32 %v479_v24, %v476_v11  ;;  %v7696_v46 = vld [vmem:[%s10541_s1 + $0x98] sm:$0xff]   ;;  %v522_v3 = vshrl.u32 %v8053_v39, 16  ;;  %v519_v6 = vrot.slane %v517_v49, 5  ;;  %v531_v9 = vshll.u32 %v8070_v59, 16  ;;  %v7700_v11 = vld [vmem:[%s10541_s1 + $0x90] sm:$0xff]  }
  0x33   : > { %7321 = vmatprep.subr.bf16.mxu1 %v7689_v2  ;;  %v472_v47 = vsel %vm7922_vm2, %v467_v34, %v471_v7  ;;  %v525_v7 = vshll.u32 %v8053_v39, 16  ;;  %v535_v17 = vshrl.u32 %v8070_v59, 16  ;;  %v6066_v37 = vcombine.low %v8053_v39, %v8070_v59  ;;  %v8115_v39 = vld [vmem:[%s7878_s24 + $0x6c] sm:$0xf] }
  0x34   : > { %7194 = vmatmul.mubr.bf16.gmra.mxu0 %v6038_v16  ;;  %v6039_v52 = vcombine.low %v462_v32, %v472_v47  ;;  %v481_v53 = vrot.slane %v480_v41, 4  ;;  %v524_v16 = vrot.slane %v522_v3, 4  ;;  %v533_v28 = vrot.slane %v531_v9, 5 }
  0x35   : > { %7242 = vmatmul.mubr.bf16.gmra.mxu1 %v6062_v33  ;;  %7274 = vmatpush3.bf16.msra.mxu0 %v7688_v57  ;;  %v511_v33 = vshrl.u32 %v8034_v20, 16  ;;  %v503_v57 = vrot.slane %v501_v45, 5  ;;  %v527_v25 = vrot.slane %v525_v7, 5  ;;  %v537_v34 = vrot.slane %v535_v17, 4  ;;  %v8137_v7 = vld [vmem:[%s7878_s24 + $0x78] sm:$0xf] }
  0x36   : > { %7245 = vmatprep.mubr.bf16.mxu1 %v6063_v0  ;;  %7322 = vmatpush3.bf16.msra.mxu1 %v7689_v2  ;;  %v486_v62 = vsel %vm7922_vm2, %v481_v53, %v485_v36  ;;  %v491_v0 = vrot.slane %v490_v54, 4  ;;  %v8078_v2 = vld [vmem:[%s7878_s24 + $0x5c] sm:$0x1]  ;;  %v549_v45 = vshll.u32 %v8084_v10, 16 }
  0x37   : > { %7275 = vmatprep.subr.bf16.mxu0 %v7692_v23  ;;  %7323 = vmatprep.subr.bf16.mxu1 %v7693_v31  ;;  %v513_v22 = vrot.slane %v511_v33, 4  ;;  %v504_v1 = vor.u32 %v503_v57, %v500_v48  ;;  %v541_v36 = vshll.u32 %v8078_v2, 16  ;;  %v528_v43 = vor.u32 %v527_v25, %v524_v16 }
  0x38   : > { %7197 = vmatprep.mubr.bf16.mxu0 %v6039_v52  ;;  %v496_v12 = vsel %vm7922_vm2, %v491_v0, %v495_v44  ;;  %v8109_v44 = vld [vmem:[%s7878_s24 + $0x68] sm:$0x1]  ;;  %v538_v48 = vor.u32 %v537_v34, %v533_v28  ;;  %v555_v33 = vshll.u32 %v8093_v18, 16  ;;  %v551_v54 = vrot.slane %v549_v45, 5  ;;  %v7708_v0 = vld [vmem:[%s10541_s1 + $0x80] sm:$0xff]  }
  0x39   : > { %7276 = vmatpush3.bf16.msra.mxu0 %v7692_v23  ;;  %v514_v4 = vor.u32 %v513_v22, %v509_v60  ;;  %v505_v15 = vrot.slane %v504_v1, 4  ;;  %v6040_v23 = vcombine.low %v486_v62, %v496_v12  ;;  %v543_v58 = vrot.slane %v541_v36, 5  ;;  %v8128_v62 = vld [vmem:[%s7878_s24 + $0x74] sm:$0x1]  ;;  %v8149_v36 = vld [vmem:[%s7878_s24 + $0x7c] sm:$0xf] }
  0x3a   : > { %7324 = vmatpush3.bf16.msra.mxu1 %v7693_v31  ;;  %7277 = vmatprep.subr.bf16.mxu0 %v7696_v46  ;;  %v7704_v31 = vld [vmem:[%s10541_s1 + $0x88] sm:$0xff]   ;;  %v529_v52 = vrot.slane %v528_v43, 4  ;;  %v559_v57 = vshrl.u32 %v8093_v18, 16  ;;  %v539_v22 = vrot.slane %v538_v48, 4  ;;  %v557_v49 = vrot.slane %v555_v33, 5 }
  0x3b   : > { %7325 = vmatprep.subr.bf16.mxu1 %v7697_v50  ;;  %v515_v24 = vrot.slane %v514_v4, 4  ;;  %v510_v32 = vsel %vm7922_vm2, %v505_v15, %v509_v60  ;;  %v8122_v60 = vld [vmem:[%s7878_s24 + $0x70] sm:$0xf]  ;;  %v7709_v15 = vld [vmem:[%s10541_s1 + $0xc0] sm:$0xff]   ;;  %v589_v34 = vshll.u32 %v8128_v62, 16  ;;  %v594_v43 = vshrl.u32 %v8137_v7, 16 }
  0x3c   : > { %7198 = vmatmul.mubr.bf16.gmra.mxu0 %v6040_v23  ;;  %v534_v1 = vsel %vm7922_vm2, %v529_v52, %v533_v28  ;;  %v561_v4 = vrot.slane %v559_v57, 4  ;;  %v544_v9 = vsel %vm7922_vm2, %v539_v22, %v543_v58  ;;  %v579_v12 = vshll.u32 %v8122_v60, 16  ;;  %v8162_v48 = vld [vmem:[%s7878_s24 + $0x80] sm:$0x1]  ;;  %v8175_v57 = vld [vmem:[%s10542_s2 + $0x38] sm:$0xff]  }
  0x3d   : > { %7246 = vmatmul.mubr.bf16.gmra.mxu1 %v6064_v29  ;;  %7278 = vmatpush3.bf16.msra.mxu0 %v7696_v46  ;;  %v520_v41 = vsel %vm7922_vm2, %v515_v24, %v519_v6  ;;  %v546_v29 = vshrl.u32 %v8084_v10, 16  ;;  %v7705_v46 = vld [vmem:[%s10541_s1 + $0xc8] sm:$0xff]   ;;  %v570_v6 = vshrl.u32 %v8115_v39, 16  ;;  %v6042_v16 = vcombine.low %v534_v1, %v544_v9 }
  0x3e   : > { %7249 = vmatprep.mubr.bf16.mxu1 %v6065_v61  ;;  %v6041_v47 = vcombine.low %v510_v32, %v520_v41  ;;  %7326 = vmatpush3.bf16.msra.mxu1 %v7697_v50  ;;  %v565_v61 = vshll.u32 %v8109_v44, 16  ;;  %v6067_v50 = vcombine.low %v8084_v10, %v8093_v18  ;;  %v562_v23 = vor.u32 %v561_v4, %v557_v49 }
  0x3f   : > { %7279 = vmatprep.subr.bf16.mxu0 %v7700_v11  ;;  %v548_v53 = vrot.slane %v546_v29, 4  ;;  %7327 = vmatprep.subr.bf16.mxu1 %v7701_v19  ;;  %v572_v24 = vrot.slane %v570_v6, 4  ;;  %v581_v28 = vrot.slane %v579_v12, 5  ;;  %v583_v32 = vshrl.u32 %v8122_v60, 16  ;;  %v8159_v29 = vld [vmem:[%s10541_s1 + $0x138] sm:$0xff]  }
  0x40   : > { %7201 = vmatprep.mubr.bf16.mxu0 %v6041_v47  ;;  %v567_v10 = vrot.slane %v565_v61, 5  ;;  %v563_v41 = vrot.slane %v562_v23, 4  ;;  %v597_v58 = vshll.u32 %v8137_v7, 16  ;;  %v603_v52 = vshll.u32 %v8149_v36, 16 }
  0x41   : > { %7280 = vmatpush3.bf16.msra.mxu0 %v7700_v11  ;;  %v552_v3 = vor.u32 %v551_v54, %v548_v53  ;;  %v573_v11 = vshll.u32 %v8115_v39, 16  ;;  %v585_v47 = vrot.slane %v583_v32, 4  ;;  %v607_v53 = vshrl.u32 %v8149_v36, 16  ;;  %v8170_v54 = vld [vmem:[%s7878_s24 + $0x84] sm:$0xf] }
  0x42   : > { %7281 = vmatprep.subr.bf16.mxu0 %v7704_v31  ;;  %7328 = vmatpush3.bf16.msra.mxu1 %v7701_v19  ;;  %v568_v33 = vsel %vm7922_vm2, %v563_v41, %v567_v10  ;;  %v599_v61 = vrot.slane %v597_v58, 5  ;;  %v605_v1 = vrot.slane %v603_v52, 5  ;;  %v613_v4 = vshll.u32 %v8162_v48, 16  ;;  %v310_v32 = vld [vmem:[%s7878_s24 + $0x90] sm:$0xf] }
  0x43   : > { %v553_v17 = vrot.slane %v552_v3, 4  ;;  %7329 = vmatprep.subr.bf16.mxu1 %v7705_v46  ;;  %v575_v25 = vrot.slane %v573_v11, 5  ;;  %v609_v3 = vrot.slane %v607_v53, 4  ;;  %v6069_v6 = vcombine.low %v8137_v7, %v8149_v36 }
  0x44   : > { %7202 = vmatmul.mubr.bf16.gmra.mxu0 %v6042_v16  ;;  %v618_v12 = vshrl.u32 %v8170_v54, 16  ;;  %v615_v16 = vrot.slane %v613_v4, 5  ;;  %v621_v23 = vshll.u32 %v8170_v54, 16 }
  0x45   : > { %7250 = vmatmul.mubr.bf16.gmra.mxu1 %v6066_v37  ;;  %7282 = vmatpush3.bf16.msra.mxu0 %v7704_v31  ;;  %v558_v19 = vsel %vm7922_vm2, %v553_v17, %v557_v49  ;;  %v6068_v37 = vcombine.low %v8115_v39, %v8122_v60  ;;  %v576_v45 = vor.u32 %v575_v25, %v572_v24  ;;  %v591_v31 = vrot.slane %v589_v34, 5  ;;  %v8188_v17 = vld [vmem:[%s7878_s24 + $0x8c] sm:$0x1] }
  0x46   : > { %7253 = vmatprep.mubr.bf16.mxu1 %v6067_v50  ;;  %7330 = vmatpush3.bf16.msra.mxu1 %v7705_v46  ;;  %v596_v39 = vrot.slane %v594_v43, 4  ;;  %v6043_v22 = vcombine.low %v558_v19, %v568_v33  ;;  %v586_v46 = vor.u32 %v585_v47, %v581_v28  ;;  %v8178_v50 = vld [vmem:[%s7878_s24 + $0x88] sm:$0xf]  ;;  %v623_v41 = vrot.slane %v621_v23, 5  ;;  %v8206_v33 = vld [vmem:[%s7878_s24 + $0x98] sm:$0x1] }
  0x47   : > { %7283 = vmatprep.subr.bf16.mxu0 %v7708_v0  ;;  %7331 = vmatprep.subr.bf16.mxu1 %v7709_v15  ;;  %v577_v49 = vrot.slane %v576_v45, 4  ;;  %v627_v7 = vshll.u32 %v8178_v50, 16  ;;  %v8198_v45 = vld [vmem:[%s7878_s24 + $0x94] sm:$0xf]  ;;  %v6070_v58 = vcombine.low %v8170_v54, %v8178_v50 }
  0x48   : > { %7205 = vmatprep.mubr.bf16.mxu0 %v6043_v22  ;;  %v587_v10 = vrot.slane %v586_v46, 4  ;;  %v600_v11 = vor.u32 %v599_v61, %v596_v39  ;;  %v8209_v39 = vld [vmem:[%s7878_s24 + $0x9c] sm:$0xf]  ;;  %v642_v22 = vshrl.u32 %v310_v32, 16  ;;  %v8214_v46 = vld [vmem:[%s7878_s24 + $0xa0] sm:$0xf]  ;;  %v6071_v23 = vcombine.low %v310_v32, %v8198_v45 }
  0x49   : > { %7284 = vmatpush3.bf16.msra.mxu0 %v7708_v0  ;;  %v582_v9 = vsel %vm7922_vm2, %v577_v49, %v581_v28  ;;  %v610_v0 = vor.u32 %v609_v3, %v605_v1  ;;  %v620_v28 = vrot.slane %v618_v12, 4  ;;  %v629_v43 = vrot.slane %v627_v7, 5  ;;  %v314_v7 = vld [vmem:[%s7878_s24 + $0xa8] sm:$0xf] }
  0x4a   : > { %7365 = vmatprep.subr.bf16.mxu0 %v8159_v29  ;;  %7332 = vmatpush3.bf16.msra.mxu1 %v7709_v15  ;;  %v592_v24 = vsel %vm7922_vm2, %v587_v10, %v591_v31  ;;  %v601_v25 = vrot.slane %v600_v11, 4  ;;  %v631_v15 = vshrl.u32 %v8178_v50, 16  ;;  %v645_v49 = vshll.u32 %v310_v32, 16  ;;  %v8219_v11 = vld [vmem:[%s7878_s24 + $0xa4] sm:$0x1] }
  0x4b   : > { %7413 = vmatprep.subr.bf16.mxu1 %v8175_v57  ;;  %v6044_v34 = vcombine.low %v582_v9, %v592_v24  ;;  %v611_v19 = vrot.slane %v610_v0, 4  ;;  %v624_v53 = vor.u32 %v623_v41, %v620_v28  ;;  %v651_v54 = vshll.u32 %v8198_v45, 16 }
  0x4c   : > { %v606_v47 = vsel %vm7922_vm2, %v601_v25, %v605_v1  ;;  %v633_v31 = vrot.slane %v631_v15, 4  ;;  %v647_v9 = vrot.slane %v645_v49, 5  ;;  %v655_v10 = vshrl.u32 %v8198_v45, 16 }
  0x4d   : > { %7254 = vmatmul.mubr.bf16.gmra.mxu1 %v6068_v37  ;;  %v637_v37 = vshll.u32 %v8188_v17, 16  ;;  %7206 = vmatmul.mubr.bf16.gmra.mxu0 %v6044_v34  ;;  %v616_v52 = vsel %vm7922_vm2, %v611_v19, %v615_v16  ;;  %v625_v4 = vrot.slane %v624_v53, 4  ;;  %v653_v0 = vrot.slane %v651_v54, 5 }
  0x4e   : > { %7257 = vmatprep.mubr.bf16.mxu1 %v6069_v6  ;;  %v6045_v61 = vcombine.low %v606_v47, %v616_v52  ;;  %v634_v1 = vor.u32 %v633_v31, %v629_v43  ;;  %v644_v6 = vrot.slane %v642_v22, 4  ;;  %v661_v16 = vshll.u32 %v8206_v33, 16  ;;  %v8232_v31 = vld [vmem:[%s7878_s24 + $0xac] sm:$0xf] }
  0x4f   : > { %v639_v3 = vrot.slane %v637_v37, 5  ;;  %v630_v24 = vsel %vm7922_vm2, %v625_v4, %v629_v43  ;;  %v657_v28 = vrot.slane %v655_v10, 4  ;;  %v666_v15 = vshrl.u32 %v8209_v39, 16 }
  0x50   : > { %7209 = vmatprep.mubr.bf16.mxu0 %v6045_v61  ;;  %v635_v12 = vrot.slane %v634_v1, 4  ;;  %v648_v25 = vor.u32 %v647_v9, %v644_v6  ;;  %v663_v19 = vrot.slane %v661_v16, 5  ;;  %v669_v41 = vshll.u32 %v8209_v39, 16  ;;  %v8237_v61 = vld [vmem:[%s7878_s24 + $0xb0] sm:$0x1] }
  0x51   : > { %v675_v47 = vshll.u32 %v8214_v46, 16  ;;  %v658_v43 = vor.u32 %v657_v28, %v653_v0  ;;  %v668_v52 = vrot.slane %v666_v15, 4  ;;  %v685_v49 = vshll.u32 %v8219_v11, 16  ;;  %v8244_v6 = vld [vmem:[%s7878_s24 + $0xb4] sm:$0xf] }
  0x52   : > { %v640_v34 = vsel %vm7922_vm2, %v635_v12, %v639_v3  ;;  %v649_v37 = vrot.slane %v648_v25, 4  ;;  %v671_v53 = vrot.slane %v669_v41, 5  ;;  %v6072_v54 = vcombine.low %v8209_v39, %v8214_v46  ;;  %v8251_v28 = vld [vmem:[%s7878_s24 + $0xb8] sm:$0xf] }
  0x53   : > { %v6046_v32 = vcombine.low %v630_v24, %v640_v34  ;;  %v677_v22 = vrot.slane %v675_v47, 5  ;;  %v659_v3 = vrot.slane %v658_v43, 4  ;;  %v690_v4 = vshrl.u32 %v314_v7, 16 }
  0x54   : > { %v654_v1 = vsel %vm7922_vm2, %v649_v37, %v653_v0  ;;  %v672_v9 = vor.u32 %v671_v53, %v668_v52  ;;  %v687_v12 = vrot.slane %v685_v49, 5  ;;  %v693_v16 = vshll.u32 %v314_v7, 16 }
  0x55   : > { %7258 = vmatmul.mubr.bf16.gmra.mxu1 %v6070_v58  ;;  %v679_v58 = vshrl.u32 %v8214_v46, 16  ;;  %7210 = vmatmul.mubr.bf16.gmra.mxu0 %v6046_v32  ;;  %v692_v24 = vrot.slane %v690_v4, 4  ;;  %v699_v25 = vshll.u32 %v8232_v31, 16  ;;  %v703_v0 = vshrl.u32 %v8232_v31, 16 }
  0x56   : > { %7261 = vmatprep.mubr.bf16.mxu1 %v6071_v23  ;;  %v664_v23 = vsel %vm7922_vm2, %v659_v3, %v663_v19  ;;  %v673_v15 = vrot.slane %v672_v9, 4  ;;  %v695_v41 = vrot.slane %v693_v16, 5  ;;  %v709_v37 = vshll.u32 %v8237_v61, 16  ;;  %v8256_v19 = vld [vmem:[%s7878_s24 + $0xbc] sm:$0x1] }
  0x57   : > { %v681_v10 = vrot.slane %v679_v58, 4  ;;  %v6047_v39 = vcombine.low %v654_v1, %v664_v23  ;;  %v701_v47 = vrot.slane %v699_v25, 5  ;;  %v705_v32 = vrot.slane %v703_v0, 4  ;;  %v1332_v1 = vld [vmem:[%s7878_s24] sm:$0xe] }
  0x58   : > { %v6073_v43 = vcombine.low %v314_v7, %v8232_v31  ;;  %v678_v52 = vsel %vm7922_vm2, %v673_v15, %v677_v22  ;;  %v696_v58 = vor.u32 %v695_v41, %v692_v24  ;;  %v714_v49 = vshrl.u32 %v8244_v6, 16  ;;  %v7710_v15 = vld [vmem:[%s7878_s24 + $0xc] sm:$0xff]  }
  0x59   : > { %v682_v34 = vor.u32 %v681_v10, %v677_v22  ;;  %7213 = vmatprep.mubr.bf16.mxu0 %v6047_v39  ;;  %v706_v3 = vor.u32 %v705_v32, %v701_v47  ;;  %v711_v4 = vrot.slane %v709_v37, 5  ;;  %v717_v9 = vshll.u32 %v8244_v6, 16  ;;  %v1333_v10 = vld [vmem:[%s7878_s24 + $0xc] sm:$0xe] }
  0x5a   : > { %v723_v7 = vshll.u32 %v8251_v28, 16  ;;  %v697_v22 = vrot.slane %v696_v58, 4  ;;  %v716_v23 = vrot.slane %v714_v49, 4  ;;  %v733_v32 = vshll.u32 %v8256_v19, 16 }
  0x5b   : > { %v683_v53 = vrot.slane %v682_v34, 4  ;;  %v707_v25 = vrot.slane %v706_v3, 4  ;;  %v719_v0 = vrot.slane %v717_v9, 5  ;;  %v6074_v37 = vcombine.low %v8244_v6, %v8251_v28 }
  0x5c   : > { %v725_v39 = vrot.slane %v723_v7, 5  ;;  %v702_v34 = vsel %vm7922_vm2, %v697_v22, %v701_v47  ;;  %v6083_v47 = vrot.slane %v1332_v1, 9  ;;  %v1385_v58 = vrot.slane %v7888_v13, 5  ;;  %v1335_v7 = vld [vmem:[%s7878_s24 + $0x24] sm:$0xe] }
  0x5d   : > { %7262 = vmatmul.mubr.bf16.gmra.mxu1 %v6072_v54  ;;  %v688_v16 = vsel %vm7922_vm2, %v683_v53, %v687_v12  ;;  %v727_v54 = vshrl.u32 %v8251_v28, 16  ;;  %v720_v53 = vor.u32 %v719_v0, %v716_v23  ;;  %v735_v9 = vrot.slane %v733_v32, 5  ;;  %v1338_v32 = vld [vmem:[%s7878_s24 + $0x48] sm:$0xe] }
  0x5e   : > { %7265 = vmatprep.mubr.bf16.mxu1 %v6073_v43  ;;  %v6048_v24 = vcombine.low %v678_v52, %v688_v16  ;;  %v1334_v43 = vld [vmem:[%s7878_s24 + $0x18] sm:$0xe]  ;;  %v712_v52 = vsel %vm7922_vm2, %v707_v25, %v711_v4  ;;  %v6084_v6 = vrot.slane %v1333_v10, 9  ;;  %v1386_v22 = vsel %vm8276_vm5, %v6083_v47, %v1385_v58 }
  0x5f   : > { %v729_v41 = vrot.slane %v727_v54, 4  ;;  %v6049_v49 = vcombine.low %v702_v34, %v712_v52  ;;  %v721_v16 = vrot.slane %v720_v53, 4  ;;  %v1387_v54 = vrot.slane %v1385_v58, 4  ;;  %v1337_v34 = vld [vmem:[%s7878_s24 + $0x3c] sm:$0xe] }
  0x60   : > { %7214 = vmatmul.mubr.bf16.gmra.mxu0 %v6048_v24  ;;  %v1392_v24 = vrot.slane %v7905_v26, 5  ;;  %v6085_v13 = vrot.slane %v1334_v43, 9  ;;  %v1399_v1 = vrot.slane %v7934_v51, 5  ;;  %v1402_v10 = vrot.slane %v7942_v56, 5  ;;  %v7714_v43 = vld [vmem:[%s7878_s24 + $0x24] sm:$0xff]  }
  0x61   : > { %v730_v3 = vor.u32 %v729_v41, %v725_v39  ;;  %7217 = vmatprep.mubr.bf16.mxu0 %v6049_v49  ;;  %v726_v23 = vsel %vm7922_vm2, %v721_v16, %v725_v39  ;;  %v1389_v26 = vsel %vm8276_vm5, %v1387_v54, %v1388_v21  ;;  %v7711_v41 = vld [vmem:[%s7878_s24 + $0x18] sm:$0xff]   ;;  %v6086_v52 = vrot.slane %v1335_v7, 9 }
  0x62   : > { %v8299_v25 = vsel %vm8276_vm5, %v6084_v6, %v1392_v24  ;;  %v1394_v0 = vrot.slane %v1392_v24, 4  ;;  %v6115_v56 = vcombine.low %v1386_v22, %v1389_v26  ;;  %v8307_v39 = vsel %vm8276_vm5, %v6085_v13, %v1399_v1 }
  0x63   : > { %v731_v4 = vrot.slane %v730_v3, 4  ;;  %v1401_v14 = vrot.slane %v1399_v1, 4  ;;  %v1406_v53 = vrot.slane %v7954_v63, 5  ;;  %v1409_v49 = vrot.slane %v7960_v5, 5  ;;  %v7717_v3 = vld [vmem:[%s10542_s2 + $0x30] sm:$0xff]  }
  0x64   : > { %v1413_v16 = vrot.slane %v7986_v35, 5  ;;  %v1416_v5 = vrot.slane %v7989_v40, 5  ;;  %v6088_v22 = vrot.slane %v1337_v34, 9  ;;  %v1420_v54 = vrot.slane %v8007_v55, 5 }
  0x65   : > { %7266 = vmatmul.mubr.bf16.gmra.mxu1 %v6074_v37  ;;  %v736_v51 = vsel %vm7922_vm2, %v731_v4, %v735_v9  ;;  %v1403_v58 = vsel %vm8276_vm5, %v1401_v14, %v1402_v10  ;;  %v6087_v9 = vrot.slane %v1336_v42, 9  ;;  %v8327_v7 = vsel %vm8276_vm5, %v6086_v52, %v1406_v53  ;;  %v1340_v10 = vld [vmem:[%s7878_s24 + $0x60] sm:$0xe] }
  0x66   : > { %7333 = vmatprep.mubr.bf16.mxu1 %v7710_v15  ;;  %v6050_v21 = vcombine.low %v726_v23, %v736_v51  ;;  %v10558_v15 = vrot.slane %v7908_v27, 5  ;;  %v1339_v27 = vld [vmem:[%s7878_s24 + $0x54] sm:$0xe]  ;;  %v6117_v6 = vcombine.low %v8307_v39, %v1403_v58  ;;  %v1408_v63 = vrot.slane %v1406_v53, 4  ;;  %v1341_v39 = vld [vmem:[%s7878_s24 + $0x6c] sm:$0xe] }
  0x67   : > { %v1423_v42 = vrot.slane %v8022_v8, 5  ;;  %v8339_v4 = vsel %vm8276_vm5, %v6087_v9, %v1413_v16  ;;  %v1415_v13 = vrot.slane %v1413_v16, 4  ;;  %v6089_v1 = vrot.slane %v1338_v32, 9  ;;  %v7716_v23 = vld [vmem:[%s10541_s1 + $0x130] sm:$0xff]  }
  0x68   : > { %v1396_v37 = vsel %vm8276_vm5, %v1394_v0, %v10558_v15  ;;  %7218 = vmatmul.mubr.bf16.gmra.mxu0 %v6050_v21  ;;  %v8335_v24 = vsel %vm8276_vm5, %v1408_v63, %v1409_v49  ;;  %v8345_v40 = vsel %vm8276_vm5, %v6088_v22, %v1420_v54  ;;  %v1422_v55 = vrot.slane %v1420_v54, 4  ;;  %v1342_v63 = vld [vmem:[%s7878_s24 + $0x78] sm:$0xe]  ;;  %v1343_v54 = vld [vmem:[%s7878_s24 + $0x84] sm:$0xe] }
  0x69   : > { %v6116_v47 = vcombine.low %v8299_v25, %v1396_v37  ;;  %7285 = vmatprep.mubr.bf16.mxu0 %v6115_v56  ;;  %v6118_v35 = vcombine.low %v8327_v7, %v8335_v24  ;;  %v1427_v8 = vrot.slane %v8034_v20, 5  ;;  %v8355_v26 = vsel %vm8276_vm5, %v1415_v13, %v1416_v5  ;;  %v7715_v20 = vld [vmem:[%s7878_s24 + $0x30] sm:$0xff]   ;;  %v7721_v56 = vld [vmem:[%s10542_s2 + $0x28] sm:$0xff]  }
  0x6a   : > { %v1430_v25 = vrot.slane %v8044_v30, 5  ;;  %v6090_v0 = vrot.slane %v1339_v27, 9  ;;  %v1434_v34 = vrot.slane %v8070_v59, 5  ;;  %v6119_v51 = vcombine.low %v8339_v4, %v8355_v26  ;;  %v7718_v59 = vld [vmem:[%s7878_s24 + $0x3c] sm:$0xff]   ;;  %v1346_v4 = vld [vmem:[%s7878_s24 + $0xa8] sm:$0xe] }
  0x6b   : > { %v1429_v30 = vrot.slane %v1427_v8, 4  ;;  %v1437_v15 = vrot.slane %v8078_v2, 5  ;;  %v6091_v52 = vrot.slane %v1340_v10, 9  ;;  %v1441_v53 = vrot.slane %v8093_v18, 5 }
  0x6c   : > { %v8379_v32 = vsel %vm8276_vm5, %v6090_v0, %v1434_v34  ;;  %v1436_v21 = vrot.slane %v1434_v34, 4  ;;  %v1444_v58 = vrot.slane %v8109_v44, 5  ;;  %v6092_v9 = vrot.slane %v1341_v39, 9 }
  0x6d   : > { %7334 = vmatmul.mubr.bf16.vlgmr.msra.gmra.mxu1 %v7711_v41  ;;  %v8371_v41 = vsel %vm8276_vm5, %v6089_v1, %v1427_v8  ;;  %v8384_v37 = vsel %vm8276_vm5, %v1429_v30, %v1430_v25  ;;  %v1448_v27 = vrot.slane %v8122_v60, 5  ;;  %v8403_v44 = vsel %vm8276_vm5, %v6091_v52, %v1441_v53  ;;  %v7720_v60 = vld [vmem:[%s10541_s1 + $0x128] sm:$0xff]   ;;  %v7733_v52 = vld [vmem:[%s10542_s2 + $0x10] sm:$0xff]  }
  0x6e   : > { %7414 = vmatpush3.bf16.msra.mxu1 %v8175_v57  ;;  %7337 = vmatprep.mubr.bf16.mxu1 %v7714_v43  ;;  %v8364_v57 = vsel %vm8276_vm5, %v1422_v55, %v1423_v42  ;;  %v7725_v43 = vld [vmem:[%s10542_s2 + $0x20] sm:$0xff]   ;;  %v6121_v49 = vcombine.low %v8371_v41, %v8384_v37  ;;  %v8395_v2 = vsel %vm8276_vm5, %v1436_v21, %v1437_v15  ;;  %v6093_v16 = vrot.slane %v1342_v63, 9  ;;  %v7719_v8 = vld [vmem:[%s7878_s24 + $0x48] sm:$0xff]   ;;  %v7728_v21 = vld [vmem:[%s10541_s1 + $0x118] sm:$0xff]  }
  0x6f   : > { %7415 = vmatprep.subr.bf16.mxu1 %v7717_v3  ;;  %v6120_v14 = vcombine.low %v8345_v40, %v8364_v57  ;;  %v6122_v18 = vcombine.low %v8379_v32, %v8395_v2  ;;  %v1455_v5 = vrot.slane %v8149_v36, 5  ;;  %v1458_v22 = vrot.slane %v8162_v48, 5  ;;  %v7724_v36 = vld [vmem:[%s10541_s1 + $0x120] sm:$0xff]   ;;  %v7729_v48 = vld [vmem:[%s10542_s2 + $0x18] sm:$0xff]   ;;  %v7736_v41 = vld [vmem:[%s10541_s1 + $0x108] sm:$0xff]  }
  0x70   : > { %7286 = vmatmul.mubr.bf16.vlgmr.msra.gmra.mxu0 %v6116_v47  ;;  %v1443_v47 = vrot.slane %v1441_v53, 4  ;;  %v1462_v42 = vrot.slane %v8178_v50, 5  ;;  %v1465_v13 = vrot.slane %v8188_v17, 5  ;;  %v6094_v25 = vrot.slane %v1343_v54, 9  ;;  %v7741_v57 = vld [vmem:[%s10542_s2] sm:$0xff]   ;;  %v8589_v2 = vld [vmem:[%s10541_s1 + $0x178] sm:$0xff]  }
  0x71   : > { %7366 = vmatpush3.bf16.msra.mxu0 %v8159_v29  ;;  %7289 = vmatprep.mubr.bf16.mxu0 %v6117_v6  ;;  %v8412_v29 = vsel %vm8276_vm5, %v6092_v9, %v1448_v27  ;;  %v1450_v6 = vrot.slane %v1448_v27, 4  ;;  %v8437_v50 = vsel %vm8276_vm5, %v6093_v16, %v1455_v5  ;;  %v1457_v17 = vrot.slane %v1455_v5, 4  ;;  %v1345_v9 = vld [vmem:[%s7878_s24 + $0x9c] sm:$0xe]  ;;  %v1347_v16 = vld [vmem:[%s7878_s24 + $0xb4] sm:$0xe] }
  0x72   : > { %7416 = vmatpush3.bf16.msra.mxu1 %v7717_v3  ;;  %v1451_v3 = vrot.slane %v8128_v62, 5  ;;  %7367 = vmatprep.subr.bf16.mxu0 %v7716_v23  ;;  %v8417_v62 = vsel %vm8276_vm5, %v1443_v47, %v1444_v58  ;;  %v1464_v0 = vrot.slane %v1462_v42, 4  ;;  %v1469_v53 = vrot.slane %v8198_v45, 5  ;;  %v6229_v37 = vld [vmem:[%s7878_s24 + $0x54] sm:$0xf] }
  0x73   : > { %7417 = vmatprep.subr.bf16.mxu1 %v7721_v56  ;;  %v6123_v1 = vcombine.low %v8403_v44, %v8417_v62  ;;  %v8444_v34 = vsel %vm8276_vm5, %v1457_v17, %v1458_v22  ;;  %v1472_v58 = vrot.slane %v8206_v33, 5  ;;  %v1476_v7 = vrot.slane %v8214_v46, 5  ;;  %v6211_v17 = vld [vmem:[%s7878_s24 + $0xc] sm:$0xf] }
  0x74   : > { %v8430_v55 = vsel %vm8276_vm5, %v1450_v6, %v1451_v3  ;;  %v6125_v30 = vcombine.low %v8437_v50, %v8444_v34  ;;  %v8456_v39 = vsel %vm8276_vm5, %v1464_v0, %v1465_v13  ;;  %v6096_v24 = vrot.slane %v1345_v9, 9  ;;  %v7723_v3 = vld [vmem:[%s7878_s24 + $0x60] sm:$0xff]   ;;  %v6214_v0 = vld [vmem:[%s7878_s24 + $0x18] sm:$0xf] }
  0x75   : > { %7338 = vmatmul.mubr.bf16.gmra.mxu1 %v7715_v20  ;;  %7368 = vmatpush3.bf16.msra.mxu0 %v7716_v23  ;;  %v6124_v10 = vcombine.low %v8412_v29, %v8430_v55  ;;  %v1344_v20 = vld [vmem:[%s7878_s24 + $0x90] sm:$0xe]  ;;  %v8452_v23 = vsel %vm8276_vm5, %v6094_v25, %v1462_v42  ;;  %v1471_v45 = vrot.slane %v1469_v53, 4  ;;  %v1478_v33 = vrot.slane %v1476_v7, 4  ;;  %v6226_v55 = vld [vmem:[%s7878_s24 + $0x48] sm:$0xf] }
  0x76   : > { %7341 = vmatprep.mubr.bf16.mxu1 %v7718_v59  ;;  %7418 = vmatpush3.bf16.msra.mxu1 %v7721_v56  ;;  %v7722_v56 = vld [vmem:[%s7878_s24 + $0x54] sm:$0xff]   ;;  %v6095_v59 = vrot.slane %v1344_v20, 9  ;;  %v6126_v15 = vcombine.low %v8452_v23, %v8456_v39  ;;  %v8483_v46 = vsel %vm8276_vm5, %v6096_v24, %v1476_v7  ;;  %v6097_v27 = vrot.slane %v1346_v4, 9  ;;  %v6232_v34 = vld [vmem:[%s7878_s24 + $0x60] sm:$0xf] }
  0x77   : > { %7419 = vmatprep.subr.bf16.mxu1 %v7725_v43  ;;  %7369 = vmatprep.subr.bf16.mxu0 %v7720_v60  ;;  %v8491_v26 = vsel %vm8276_vm5, %v1471_v45, %v1472_v58  ;;  %v1483_v47 = vrot.slane %v8232_v31, 5  ;;  %v1486_v6 = vrot.slane %v8237_v61, 5  ;;  %v1490_v5 = vrot.slane %v8251_v28, 5  ;;  %v7737_v31 = vld [vmem:[%s10542_s2 + $0x8] sm:$0xff]   ;;  %v7727_v58 = vld [vmem:[%s7878_s24 + $0x78] sm:$0xff]  }
  0x78   : > { %7290 = vmatmul.mubr.bf16.gmra.mxu0 %v6118_v35  ;;  %v1479_v35 = vrot.slane %v8219_v11, 5  ;;  %v7732_v11 = vld [vmem:[%s10541_s1 + $0x110] sm:$0xff]   ;;  %v6098_v42 = vrot.slane %v1347_v16, 9  ;;  %v1493_v13 = vrot.slane %v8256_v19, 5  ;;  %v2253_v25 = vshrl.u32 %v6211_v17, 16 }
  0x79   : > { %7293 = vmatprep.mubr.bf16.mxu0 %v6119_v51  ;;  %7370 = vmatpush3.bf16.msra.mxu0 %v7720_v60  ;;  %v8511_v22 = vsel %vm8276_vm5, %v6097_v27, %v1483_v47  ;;  %v1485_v54 = vrot.slane %v1483_v47, 4  ;;  %v1492_v61 = vrot.slane %v1490_v5, 4  ;;  %v2280_v7 = vshll.u32 %v6214_v0, 16  ;;  %v7738_v19 = vld [vmem:[%s7878_s24 + $0xb4] sm:$0xff]  }
  0x7a   : > { %7420 = vmatpush3.bf16.msra.mxu1 %v7725_v43  ;;  %7371 = vmatprep.subr.bf16.mxu0 %v7724_v36  ;;  %v8479_v43 = vsel %vm8276_vm5, %v6095_v59, %v1469_v53  ;;  %v8495_v51 = vsel %vm8276_vm5, %v1478_v33, %v1479_v35  ;;  %v8554_v59 = vld [vmem:[%s7878_s24 + $0x1c] sm:$0xf]  ;;  %v2277_v53 = vshrl.u32 %v6214_v0, 16  ;;  %v2255_v9 = vrot.slane %v2253_v25, 4  ;;  %v8598_v25 = vld [vmem:[%s7878_s24 + $0x2c] sm:$0x1] }
  0x7b   : > { %7421 = vmatprep.subr.bf16.mxu1 %v7729_v48  ;;  %v6127_v63 = vcombine.low %v8479_v43, %v8491_v26  ;;  %v8520_v28 = vsel %vm8276_vm5, %v1485_v54, %v1486_v6  ;;  %v8534_v40 = vsel %vm8276_vm5, %v1492_v61, %v1493_v13  ;;  %v2286_v24 = vshll.u32 %v8554_v59, 16  ;;  %v8566_v33 = vld [vmem:[%s10541_s1 + $0x1b8] sm:$0xff]   ;;  %v7730_v6 = vld [vmem:[%s7878_s24 + $0x84] sm:$0xff]   ;;  %v6216_v54 = vld [vmem:[%s7878_s24 + $0x20] sm:$0x1] }
  0x7c   : > { %v2290_v35 = vshrl.u32 %v8554_v59, 16  ;;  %v2282_v47 = vrot.slane %v2280_v7, 5 }
  0x7d   : > { %7342 = vmatmul.mubr.bf16.gmra.mxu1 %v7719_v8  ;;  %7372 = vmatpush3.bf16.msra.mxu0 %v7724_v36  ;;  %v7726_v36 = vld [vmem:[%s7878_s24 + $0x6c] sm:$0xff]   ;;  %v8543_v8 = vld [vmem:[%s7878_s24 + $0x14] sm:$0x1]  ;;  %v8575_v16 = vrot.slane %v2286_v24, 5 }
  0x7e   : > { %7345 = vmatprep.mubr.bf16.mxu1 %v7722_v56  ;;  %7422 = vmatpush3.bf16.msra.mxu1 %v7729_v48  ;;  %v8524_v48 = vsel %vm8276_vm5, %v6098_v42, %v1490_v5  ;;  %v2292_v5 = vrot.slane %v2290_v35, 4  ;;  %v6223_v35 = vld [vmem:[%s7878_s24 + $0x3c] sm:$0xf] }
  0x7f   : > { %7423 = vmatprep.subr.bf16.mxu1 %v7733_v52  ;;  %7373 = vmatprep.subr.bf16.mxu0 %v7728_v21 }
  0x80   : > { %7294 = vmatmul.mubr.bf16.gmra.mxu0 %v6120_v14  ;;  %v8540_v14 = vld [vmem:[%s7878_s24 + $0x10] sm:$0xf] }
  0x81   : > { %7297 = vmatprep.mubr.bf16.mxu0 %v6121_v49  ;;  %7374 = vmatpush3.bf16.msra.mxu0 %v7728_v21  ;;  %v2256_v49 = vshll.u32 %v6211_v17, 16  ;;  %v2262_v20 = vshll.u32 %v8540_v14, 16  ;;  %v2266_v56 = vshrl.u32 %v8540_v14, 16  ;;  %v7740_v21 = vld [vmem:[%s10541_s1 + $0x100] sm:$0xff]   ;;  %v2293_v17 = vor.u32 %v2292_v5, %v8575_v16 }
  0x82   : > { %7424 = vmatpush3.bf16.msra.mxu1 %v7733_v52  ;;  %7375 = vmatprep.subr.bf16.mxu0 %v7732_v11  ;;  %v2272_v52 = vshll.u32 %v8543_v8, 16 }
  0x83   : > { %7425 = vmatprep.subr.bf16.mxu1 %v7737_v31  ;;  %v2258_v45 = vrot.slane %v2256_v49, 5  ;;  %v8568_v4 = vrot.slane %v2262_v20, 5  ;;  %v2268_v27 = vrot.slane %v2266_v56, 4  ;;  %v7731_v49 = vld [vmem:[%s7878_s24 + $0x90] sm:$0xff]  }
  0x84   : > { %v8584_v32 = vrot.slane %v2272_v52, 5  ;;  %v8605_v52 = vld [vmem:[%s7878_s24 + $0x34] sm:$0xf] }
  0x85   : > { %7346 = vmatmul.mubr.bf16.gmra.mxu1 %v7723_v3  ;;  %7376 = vmatpush3.bf16.msra.mxu0 %v7732_v11  ;;  %v2279_v11 = vrot.slane %v2277_v53, 4  ;;  %v6217_v3 = vld [vmem:[%s7878_s24 + $0x24] sm:$0xf]  ;;  %v2259_v13 = vor.u32 %v2258_v45, %v2255_v9  ;;  %v2269_v44 = vor.u32 %v2268_v27, %v8568_v4  ;;  %v8608_v53 = vld [vmem:[%s7878_s24 + $0x38] sm:$0x1]  ;;  %v7734_v45 = vld [vmem:[%s7878_s24 + $0x9c] sm:$0xff]  }
  0x86   : > { %7349 = vmatprep.mubr.bf16.mxu1 %v7726_v36  ;;  %7426 = vmatpush3.bf16.msra.mxu1 %v7737_v31  ;;  %v8578_v31 = vld [vmem:[%s7878_s24 + $0x28] sm:$0xf]  ;;  %v2301_v42 = vshrl.u32 %v6217_v3, 16  ;;  %v6220_v36 = vld [vmem:[%s7878_s24 + $0x30] sm:$0xf]  ;;  %v8621_v27 = vrot.slane %v2293_v17, 4 }
  0x87   : > { %7427 = vmatprep.subr.bf16.mxu1 %v7741_v57  ;;  %7377 = vmatprep.subr.bf16.mxu0 %v7736_v41  ;;  %v2283_v62 = vor.u32 %v2282_v47, %v2279_v11  ;;  %v2314_v61 = vshrl.u32 %v8578_v31, 16  ;;  %v2325_v20 = vshrl.u32 %v6220_v36, 16  ;;  %v8601_v56 = vrot.slane %v2259_v13, 4 }
  0x88   : > { %7298 = vmatmul.mubr.bf16.gmra.mxu0 %v6122_v18  ;;  %v2304_v18 = vshll.u32 %v6217_v3, 16  ;;  %v8610_v9 = vrot.slane %v2269_v44, 4  ;;  %v2320_v47 = vshll.u32 %v8598_v25, 16  ;;  %v8627_v3 = vld [vmem:[%s7878_s24 + $0x40] sm:$0xf]  ;;  %v2338_v29 = vshrl.u32 %v8605_v52, 16 }
  0x89   : > { %7301 = vmatprep.mubr.bf16.mxu0 %v6123_v1  ;;  %7378 = vmatpush3.bf16.msra.mxu0 %v7736_v41  ;;  %v2310_v1 = vshll.u32 %v8578_v31, 16  ;;  %v2303_v41 = vrot.slane %v2301_v42, 4  ;;  %v8612_v7 = vrot.slane %v2283_v62, 4  ;;  %v2327_v5 = vrot.slane %v2325_v20, 4  ;;  %v8650_v44 = vld [vmem:[%s7878_s24 + $0x4c] sm:$0xf] }
  0x8a   : > { %7428 = vmatpush3.bf16.msra.mxu1 %v7741_v57  ;;  %7379 = vmatprep.subr.bf16.mxu0 %v7740_v21  ;;  %v2296_v57 = vshll.u32 %v6216_v54, 16  ;;  %v2306_v0 = vrot.slane %v2304_v18, 5  ;;  %v2334_v54 = vshll.u32 %v8605_v52, 16  ;;  %v2344_v42 = vshll.u32 %v8608_v53, 16  ;;  %v8662_v20 = vld [vmem:[%s7878_s24 + $0x44] sm:$0x1] }
  0x8b   : > { %7509 = vmatprep.subr.bf16.mxu1 %v8566_v33  ;;  %v8614_v24 = vrot.slane %v2310_v1, 5  ;;  %v2349_v13 = vshrl.u32 %v6223_v35, 16  ;;  %v2352_v18 = vshll.u32 %v6223_v35, 16  ;;  %v8652_v62 = vrot.slane %v2320_v47, 5 }
  0x8c   : > { %v8623_v11 = vrot.slane %v2296_v57, 5  ;;  %v2358_v1 = vshll.u32 %v8627_v3, 16  ;;  %v2373_v17 = vshrl.u32 %v6226_v55, 16  ;;  %v7735_v57 = vld [vmem:[%s7878_s24 + $0xa8] sm:$0xff]  }
  0x8d   : > { %7350 = vmatmul.mubr.bf16.gmra.mxu1 %v7727_v58  ;;  %7380 = vmatpush3.bf16.msra.mxu0 %v7740_v21  ;;  %v2328_v58 = vshll.u32 %v6220_v36, 16  ;;  %v2316_v21 = vrot.slane %v2314_v61, 4  ;;  %v2362_v61 = vshrl.u32 %v8627_v3, 16  ;;  %v2354_v35 = vrot.slane %v2352_v18, 5 }
  0x8e   : > { %7353 = vmatprep.mubr.bf16.mxu1 %v7730_v6  ;;  %7461 = vmatprep.subr.bf16.mxu0 %v8589_v2  ;;  %v2307_v6 = vor.u32 %v2306_v0, %v2303_v41  ;;  %v2340_v0 = vrot.slane %v2338_v29, 4  ;;  %v2382_v29 = vshll.u32 %v8650_v44, 16 }
  0x8f   : > { %v2317_v36 = vor.u32 %v2316_v21, %v8614_v24  ;;  %v2351_v21 = vrot.slane %v2349_v13, 4  ;;  %v2364_v47 = vrot.slane %v2362_v61, 4  ;;  %v2375_v13 = vrot.slane %v2373_v17, 4 }
  0x90   : > { %7302 = vmatmul.mubr.bf16.gmra.mxu0 %v6124_v10  ;;  %v2330_v10 = vrot.slane %v2328_v58, 5  ;;  %v8657_v41 = vrot.slane %v2307_v6, 4  ;;  %v2376_v58 = vshll.u32 %v6226_v55, 16  ;;  %v8670_v6 = vrot.slane %v2344_v42, 5 }
  0x91   : > { %7305 = vmatprep.mubr.bf16.mxu0 %v6125_v30  ;;  %v8668_v30 = vrot.slane %v2317_v36, 4  ;;  %v2368_v55 = vshll.u32 %v8662_v20, 16  ;;  %v8682_v36 = vld [vmem:[%s7878_s24 + $0x58] sm:$0xf]  ;;  %v8692_v39 = vrot.slane %v2382_v29, 5  ;;  %v2355_v42 = vor.u32 %v2354_v35, %v2351_v21 }
  0x92   : > { %v2331_v50 = vor.u32 %v2330_v10, %v2327_v5  ;;  %v2378_v18 = vrot.slane %v2376_v58, 5  ;;  %10560 = vst [vmem:[#allocation3_spill] sm:$0xff] %v8682_v36  ;;  %v2299_v5 = vsel %vm7922_vm2, %v8621_v27, %v8623_v11  ;;  %v2397_v10 = vshrl.u32 %v6229_v37, 16 }
  0x93   : > { %v2400_v58 = vshll.u32 %v6229_v37, 16  ;;  %v2410_v27 = vshrl.u32 %v8682_v36, 16  ;;  %v2370_v37 = vrot.slane %v2368_v55, 5  ;;  %v10561_v55 = vcombine.low %v8483_v46, %v8495_v51 }
  0x94   : > { %v2399_v26 = vrot.slane %v2397_v10, 4  ;;  %v2332_v11 = vrot.slane %v2331_v50, 4 }
  0x95   : > { %7354 = vmatmul.mubr.bf16.gmra.mxu1 %v7731_v49  ;;  %v8659_v49 = vrot.slane %v2334_v54, 5  ;;  %v8673_v54 = vld [vmem:[%s7878_s24 + $0x50] sm:$0x1]  ;;  %v2402_v35 = vrot.slane %v2400_v58, 5 }
  0x96   : > { %7357 = vmatprep.mubr.bf16.mxu1 %v7734_v45  ;;  %v8664_v45 = vrot.slane %v2358_v1, 5  ;;  %10559 = vst [vmem:[#allocation2_spill] sm:$0xff] %v8673_v54  ;;  %v2386_v1 = vshrl.u32 %v8650_v44, 16  ;;  %v2392_v43 = vshll.u32 %v8673_v54, 16  ;;  %v8707_v54 = vld [vmem:[%s7878_s24 + $0x64] sm:$0xf] }
  0x97   : > { %v2341_v23 = vor.u32 %v2340_v0, %v8659_v49  ;;  %v2379_v0 = vor.u32 %v2378_v18, %v2375_v13  ;;  %v2403_v10 = vor.u32 %v2402_v35, %v2399_v26  ;;  %v6235_v26 = vld [vmem:[%s7878_s24 + $0x6c] sm:$0xf]  ;;  %v8775_v35 = vld [vmem:[%s7878_s24 + $0x7c] sm:$0xf] }
  0x98   : > { %7306 = vmatmul.mubr.bf16.gmra.mxu0 %v6126_v15  ;;  %v8695_v15 = vld [vmem:[%s7878_s24 + $0x5c] sm:$0x1]  ;;  %v2365_v61 = vor.u32 %v2364_v47, %v8664_v45  ;;  %v2388_v17 = vrot.slane %v2386_v1, 4  ;;  %v2356_v1 = vrot.slane %v2355_v42, 4  ;;  %v2394_v13 = vrot.slane %v2392_v43, 5 }
  0x99   : > { %7309 = vmatprep.mubr.bf16.mxu0 %v6127_v63  ;;  %v2406_v63 = vshll.u32 %v8682_v36, 16  ;;  %v2342_v47 = vrot.slane %v2341_v23, 4  ;;  %v2416_v60 = vshll.u32 %v8695_v15, 16  ;;  %v2421_v36 = vshrl.u32 %v6232_v34, 16 }
  0x9a   : > { %v2389_v21 = vor.u32 %v2388_v17, %v8692_v39  ;;  %v2366_v50 = vrot.slane %v2365_v61, 4  ;;  %v8712_v17 = vld [vmem:[%s7878_s24 + $0x68] sm:$0x1]  ;;  %v2424_v23 = vshll.u32 %v6232_v34, 16  ;;  %v10562_v42 = vsel %vm7922_vm2, %v8610_v9, %v8584_v32 }
  0x9b   : > { %v8703_v29 = vrot.slane %v2406_v63, 5  ;;  %v10563_v61 = vsel %vm7922_vm2, %v8601_v56, %v8568_v4  ;;  %v10564_v34 = vsel %vm7922_vm2, %v8612_v7, %v8575_v16  ;;  %v2380_v46 = vrot.slane %v2379_v0, 4 }
  0x9c   : > { %v6275_v58 = vcombine.low %v10563_v61, %v10562_v42  ;;  %v8732_v43 = vcombine.low %v10564_v34, %v2299_v5  ;;  %v2390_v51 = vrot.slane %v2389_v21, 4  ;;  %v10565_v32 = vcombine.low %v8511_v22, %v8520_v28  ;;  %v7745_v34 = vld [vmem:[%s10541_s1 + $0x1b0] sm:$0xff]  }
  0x9d   : > { %7358 = vmatmul.mubr.bf16.gmra.mxu1 %v7735_v57  ;;  %v2412_v57 = vrot.slane %v2410_v27, 4  ;;  %v2313_v4 = vsel %vm7922_vm2, %v8657_v41, %v8614_v24  ;;  %v2404_v56 = vrot.slane %v2403_v10, 4  ;;  %v2430_v9 = vshll.u32 %v8707_v54, 16  ;;  %v8758_v41 = vld [vmem:[%s7878_s24 + $0x70] sm:$0xf] }
  0x9e   : > { %7361 = vmatprep.mubr.bf16.mxu1 %v7738_v19  ;;  %v7739_v19 = vld [vmem:[%s7878_s24 + $0xc0] sm:$0xff]   ;;  %v2434_v16 = vshrl.u32 %v8707_v54, 16  ;;  %v2418_v5 = vrot.slane %v2416_v60, 5  ;;  %v2423_v63 = vrot.slane %v2421_v36, 4  ;;  %v2426_v27 = vrot.slane %v2424_v23, 5 }
  0x9f   : > { %v2413_v18 = vor.u32 %v2412_v57, %v8703_v29  ;;  %v2323_v22 = vsel %vm7922_vm2, %v8668_v30, %v8652_v62  ;;  %v2337_v28 = vsel %vm7922_vm2, %v2332_v11, %v8659_v49  ;;  %v2347_v24 = vsel %vm7922_vm2, %v2342_v47, %v8670_v6  ;;  %v6238_v6 = vld [vmem:[%s7878_s24 + $0x78] sm:$0xf] }
  0xa0   : > { %7310 = vmatmul.mubr.bf16.gmra.mxu0 %v10561_v55  ;;  %v2361_v60 = vsel %vm7922_vm2, %v2356_v1, %v8664_v45  ;;  %v2371_v36 = vsel %vm7922_vm2, %v2366_v50, %v2370_v37  ;;  %v2385_v30 = vsel %vm7922_vm2, %v2380_v46, %v8692_v39  ;;  %v2395_v62 = vsel %vm7922_vm2, %v2390_v51, %v2394_v13  ;;  %v8780_v37 = vld [vmem:[%s7878_s24 + $0x74] sm:$0x1]  ;;  %v6241_v13 = vld [vmem:[%s7878_s24 + $0x84] sm:$0xf] }
  0xa1   : > { %7313 = vmatprep.mubr.bf16.mxu0 %v10565_v32  ;;  %v2414_v7 = vrot.slane %v2413_v18, 4  ;;  %v2440_v49 = vshll.u32 %v8712_v17, 16  ;;  %v2409_v45 = vsel %vm7922_vm2, %v2404_v56, %v8703_v29  ;;  %v8772_v11 = vrot.slane %v2430_v9, 5 }
  0xa2   : > { %v2436_v0 = vrot.slane %v2434_v16, 4  ;;  %v2445_v21 = vshrl.u32 %v6235_v26, 16  ;;  %v2427_v47 = vor.u32 %v2426_v27, %v2423_v63  ;;  %v2448_v57 = vshll.u32 %v6235_v26, 16 }
  0xa3   : > { %v2419_v39 = vsel %vm7922_vm2, %v2414_v7, %v2418_v5  ;;  %v2454_v1 = vshll.u32 %v8758_v41, 16  ;;  %v6277_v10 = vcombine.low %v2313_v4, %v2323_v22  ;;  %v2458_v29 = vshrl.u32 %v8758_v41, 16  ;;  %v8814_v7 = vld [vmem:[%s7878_s24 + $0x80] sm:$0x1] }
  0xa4   : > { %v2469_v50 = vshrl.u32 %v6238_v6, 16  ;;  %v10566_v18 = vcombine.low %v8524_v48, %v8534_v40  ;;  %v8790_v23 = vcombine.low %v2361_v60, %v2371_v36  ;;  %v8792_v55 = vcombine.low %v2385_v30, %v2395_v62  ;;  %v6244_v60 = vld [vmem:[%s7878_s24 + $0x90] sm:$0xf] }
  0xa5   : > { %7362 = vmatmul.mubr.bf16.gmra.mxu1 %v7739_v19  ;;  %v8783_v19 = vcombine.low %v2337_v28, %v2347_v24  ;;  %v2472_v42 = vshll.u32 %v6238_v6, 16  ;;  %v2478_v61 = vshll.u32 %v8775_v35, 16  ;;  %v8798_v46 = vcombine.low %v2409_v45, %v2419_v39  ;;  %v8824_v6 = vld [vmem:[%s7878_s24 + $0x94] sm:$0xf]  ;;  %v7747_v45 = vld [vmem:[%s10541_s1 + $0x1a8] sm:$0xff]  }
  0xa6   : > { %7429 = vmatprep.mubr.bf16.mxu1 %v6275_v58  ;;  %v2437_v51 = vor.u32 %v2436_v0, %v8772_v11  ;;  %v8801_v48 = vrot.slane %v2440_v49, 5  ;;  %v2482_v40 = vshrl.u32 %v8775_v35, 16  ;;  %v8804_v26 = vrot.slane %v2427_v47, 4  ;;  %v8839_v47 = vld [vmem:[%s7878_s24 + $0x8c] sm:$0x1] }
  0xa7   : > { %v2447_v32 = vrot.slane %v2445_v21, 4  ;;  %v2450_v4 = vrot.slane %v2448_v57, 5  ;;  %v2464_v56 = vshll.u32 %v8780_v37, 16  ;;  %v8811_v9 = vrot.slane %v2454_v1, 5 }
  0xa8   : > { %7314 = vmatmul.mubr.bf16.gmra.mxu0 %v10566_v18  ;;  %v2460_v16 = vrot.slane %v2458_v29, 4  ;;  %v2493_v5 = vshrl.u32 %v6241_v13, 16  ;;  %v2496_v63 = vshll.u32 %v6241_v13, 16  ;;  %v2471_v27 = vrot.slane %v2469_v50, 4 }
  0xa9   : > { %7381 = vmatprep.mubr.bf16.mxu0 %v6275_v58  ;;  %v8808_v58 = vld [vmem:[%s7878_s24 + $0x88] sm:$0xf]  ;;  %v2474_v22 = vrot.slane %v2472_v42, 5  ;;  %v8817_v28 = vrot.slane %v2478_v61, 5  ;;  %v2484_v24 = vrot.slane %v2482_v40, 4  ;;  %v8820_v36 = vrot.slane %v2437_v51, 4 }
  0xaa   : > { %v2495_v30 = vrot.slane %v2493_v5, 4  ;;  %v2498_v62 = vrot.slane %v2496_v63, 5  ;;  %v2502_v49 = vshll.u32 %v8808_v58, 16  ;;  %v2433_v0 = vsel %vm7922_vm2, %v8804_v26, %v8772_v11  ;;  %v6247_v51 = vld [vmem:[%s7878_s24 + $0x9c] sm:$0xf]  ;;  %v7749_v40 = vld [vmem:[%s10541_s1 + $0x1a0] sm:$0xff]  }
  0xab   : > { %v2451_v21 = vor.u32 %v2450_v4, %v2447_v32  ;;  %v8836_v39 = vrot.slane %v2464_v56, 5  ;;  %v2506_v57 = vshrl.u32 %v8808_v58, 16  ;;  %v2461_v1 = vor.u32 %v2460_v16, %v8811_v9  ;;  %v8857_v4 = vld [vmem:[%s7878_s24 + $0x98] sm:$0x1]  ;;  %v7746_v56 = vld [vmem:[%s10541_s1 + $0x168] sm:$0xff]  }
  0xac   : > { %v2488_v29 = vshll.u32 %v8814_v7, 16  ;;  %v2517_v50 = vshrl.u32 %v6244_v60, 16  ;;  %v2520_v13 = vshll.u32 %v6244_v60, 16  ;;  %v2475_v18 = vor.u32 %v2474_v22, %v2471_v27  ;;  %10567 = vst [vmem:[#allocation4_spill] sm:$0xff] %v8857_v4  ;;  %v8875_v60 = vld [vmem:[%s7878_s24 + $0xa0] sm:$0xf] }
  0xad   : > { %7430 = vmatmul.mubr.bf16.vlgmr.msra.gmra.mxu1 %v8732_v43  ;;  %v2485_v11 = vor.u32 %v2484_v24, %v8817_v28  ;;  %v2526_v42 = vshll.u32 %v8824_v6, 16  ;;  %v2530_v61 = vshrl.u32 %v8824_v6, 16  ;;  %v2499_v26 = vor.u32 %v2498_v62, %v2495_v30  ;;  %10568 = vst [vmem:[#allocation5_spill] sm:$0xff] %v8875_v60 }
  0xae   : > { %7510 = vmatpush3.bf16.msra.mxu1 %v8566_v33  ;;  %7433 = vmatprep.mubr.bf16.mxu1 %v6277_v10  ;;  %v7744_v33 = vld [vmem:[%s10541_s1 + $0x170] sm:$0xff]   ;;  %v8853_v32 = vrot.slane %v2502_v49, 5  ;;  %v2519_v16 = vrot.slane %v2517_v50, 4  ;;  %v2522_v5 = vrot.slane %v2520_v13, 5  ;;  %v8869_v63 = vrot.slane %v2461_v1, 4  ;;  %v7748_v49 = vld [vmem:[%s10541_s1 + $0x160] sm:$0xff]  }
  0xaf   : > { %7511 = vmatprep.subr.bf16.mxu1 %v7745_v34  ;;  %v8872_v22 = vrot.slane %v2526_v42, 5  ;;  %v2532_v24 = vrot.slane %v2530_v61, 4  ;;  %v2541_v30 = vshrl.u32 %v6247_v51, 16  ;;  %v2544_v62 = vshll.u32 %v6247_v51, 16  ;;  %v6250_v50 = vld [vmem:[%s7878_s24 + $0xa8] sm:$0xf] }
  0xb0   : > { %7382 = vmatmul.mubr.bf16.vlgmr.msra.gmra.mxu0 %v8732_v43  ;;  %v2508_v43 = vrot.slane %v2506_v57, 4  ;;  %v8885_v57 = vrot.slane %v2499_v26, 4  ;;  %v2536_v13 = vshll.u32 %v8857_v4, 16  ;;  %v8898_v42 = vld [vmem:[%s7878_s24 + $0xac] sm:$0xf]  ;;  %v7753_v26 = vld [vmem:[%s10541_s1 + $0x190] sm:$0xff]  }
  0xb1   : > { %7462 = vmatpush3.bf16.msra.mxu0 %v8589_v2  ;;  %7385 = vmatprep.mubr.bf16.mxu0 %v6277_v10  ;;  %v2443_v2 = vsel %vm7922_vm2, %v8820_v36, %v8801_v48  ;;  %v8866_v10 = vrot.slane %v2451_v21, 4  ;;  %v8878_v48 = vrot.slane %v2475_v18, 4  ;;  %v8880_v36 = vrot.slane %v2488_v29, 5  ;;  %v7751_v29 = vld [vmem:[%s10541_s1 + $0x198] sm:$0xff]   ;;  %10569 = vst [vmem:[#allocation6_spill] sm:$0xff] %v8898_v42 }
  0xb2   : > { %7512 = vmatpush3.bf16.msra.mxu1 %v7745_v34  ;;  %v2512_v34 = vshll.u32 %v8839_v47, 16  ;;  %7463 = vmatprep.subr.bf16.mxu0 %v7744_v33  ;;  %v2486_v21 = vrot.slane %v2485_v11, 4  ;;  %v2509_v1 = vor.u32 %v2508_v43, %v8853_v32  ;;  %v2550_v18 = vshll.u32 %v8875_v60, 16 }
  0xb3   : > { %7513 = vmatprep.subr.bf16.mxu1 %v7747_v45  ;;  %v2554_v11 = vshrl.u32 %v8875_v60, 16  ;;  %v8900_v61 = vcombine.low %v2433_v0, %v2443_v2  ;;  %v2533_v51 = vor.u32 %v2532_v24, %v8872_v22  ;;  %v2543_v43 = vrot.slane %v2541_v30, 4  ;;  %v6256_v24 = vld [vmem:[%s7878_s24 + $0xc0] sm:$0xf]  ;;  %v8968_v60 = vld [vmem:[%s7878_s24 + $0xc4] sm:$0xf] }
  0xb4   : > { %v2457_v0 = vsel %vm7922_vm2, %v8866_v10, %v8811_v9  ;;  %v2467_v2 = vsel %vm7922_vm2, %v8869_v63, %v8836_v39  ;;  %v2565_v30 = vshrl.u32 %v6250_v50, 16  ;;  %v2491_v9 = vsel %vm7922_vm2, %v2486_v21, %v8880_v36  ;;  %v8929_v39 = vld [vmem:[%s7878_s24 + $0xa4] sm:$0x1]  ;;  %v8933_v63 = vld [vmem:[%s7878_s24 + $0xb8] sm:$0xf] }
  0xb5   : > { %7434 = vmatmul.mubr.bf16.gmra.mxu1 %v8783_v19  ;;  %7464 = vmatpush3.bf16.msra.mxu0 %v7744_v33  ;;  %v2523_v33 = vor.u32 %v2522_v5, %v2519_v16  ;;  %v6253_v16 = vld [vmem:[%s7878_s24 + $0xb4] sm:$0xf]  ;;  %v7750_v5 = vld [vmem:[%s10541_s1 + $0x158] sm:$0xff]   ;;  %v2574_v10 = vshll.u32 %v8898_v42, 16  ;;  %10570 = vst [vmem:[#allocation7_spill] sm:$0xff] %v8933_v63  ;;  %v8943_v36 = vrot.slane %v2533_v51, 4 }
  0xb6   : > { %7437 = vmatprep.mubr.bf16.mxu1 %v8790_v23  ;;  %7514 = vmatpush3.bf16.msra.mxu1 %v7747_v45  ;;  %v8888_v45 = vrot.slane %v2512_v34, 5  ;;  %v2546_v34 = vrot.slane %v2544_v62, 5  ;;  %v8945_v21 = vrot.slane %v2550_v18, 5  ;;  %v7755_v18 = vld [vmem:[%s10541_s1 + $0x188] sm:$0xff]   ;;  %v2592_v4 = vshll.u32 %v6253_v16, 16 }
  0xb7   : > { %7515 = vmatprep.subr.bf16.mxu1 %v7749_v40  ;;  %7465 = vmatprep.subr.bf16.mxu0 %v7746_v56  ;;  %v8955_v51 = vrot.slane %v2574_v10, 5  ;;  %v2613_v10 = vshrl.u32 %v6256_v24, 16 }
  0xb8   : > { %7386 = vmatmul.mubr.bf16.gmra.mxu0 %v8783_v19  ;;  %v2481_v19 = vsel %vm7922_vm2, %v8878_v48, %v8817_v28  ;;  %v8939_v28 = vrot.slane %v2536_v13, 5  ;;  %v2578_v48 = vshrl.u32 %v8898_v42, 16  ;;  %v2547_v62 = vor.u32 %v2546_v34, %v2543_v43  ;;  %v8965_v42 = vld [vmem:[%s7878_s24 + $0xbc] sm:$0x1] }
  0xb9   : > { %7389 = vmatprep.mubr.bf16.mxu0 %v8790_v23  ;;  %7466 = vmatpush3.bf16.msra.mxu0 %v7746_v56  ;;  %v8935_v23 = vrot.slane %v2509_v1, 4  ;;  %v8937_v56 = vrot.slane %v2523_v33, 4  ;;  %v7752_v1 = vld [vmem:[%s10541_s1 + $0x150] sm:$0xff]   ;;  %v2567_v13 = vrot.slane %v2565_v30, 4  ;;  %v8960_v43 = vcombine.low %v2457_v0, %v2467_v2  ;;  %10571 = vst [vmem:[#allocation8_spill] sm:$0xff] %v8965_v42 }
  0xba   : > { %7516 = vmatpush3.bf16.msra.mxu1 %v7749_v40  ;;  %v2568_v40 = vshll.u32 %v6250_v50, 16  ;;  %7467 = vmatprep.subr.bf16.mxu0 %v7748_v49  ;;  %v2556_v50 = vrot.slane %v2554_v11, 4  ;;  %v8953_v33 = vld [vmem:[%s7878_s24 + $0xb0] sm:$0x1]  ;;  %v2589_v11 = vshrl.u32 %v6253_v16, 16  ;;  %v8962_v34 = vcombine.low %v2481_v19, %v2491_v9 }
  0xbb   : > { %7517 = vmatprep.subr.bf16.mxu1 %v7751_v29  ;;  %v2505_v30 = vsel %vm7922_vm2, %v8885_v57, %v8853_v32  ;;  %v2560_v0 = vshll.u32 %v8929_v39, 16  ;;  %v2598_v2 = vshll.u32 %v8933_v63, 16  ;;  %v2594_v9 = vrot.slane %v2592_v4, 5  ;;  %v7754_v57 = vld [vmem:[%s10541_s1 + $0x148] sm:$0xff]   ;;  %v7757_v4 = vld [vmem:[%s10541_s1 + $0x180] sm:$0xff]  }
  0xbc   : > { %v2570_v27 = vrot.slane %v2568_v40, 5  ;;  %v2557_v19 = vor.u32 %v2556_v50, %v8945_v21  ;;  %v2591_v16 = vrot.slane %v2589_v11, 4  ;;  %v2602_v40 = vshrl.u32 %v8933_v63, 16  ;;  %v8998_v11 = vld [vmem:[%s7878_s24 + $0xc8] sm:$0x1] }
  0xbd   : > { %7438 = vmatmul.mubr.bf16.gmra.mxu1 %v8792_v55  ;;  %7468 = vmatpush3.bf16.msra.mxu0 %v7748_v49  ;;  %v2515_v49 = vsel %vm7922_vm2, %v8935_v23, %v8888_v45  ;;  %v8983_v32 = vrot.slane %v2547_v62, 4  ;;  %v8988_v45 = vrot.slane %v2598_v2, 5  ;;  %v2616_v23 = vshll.u32 %v6256_v24, 16 }
  0xbe   : > { %7441 = vmatprep.mubr.bf16.mxu1 %v8798_v46  ;;  %7518 = vmatpush3.bf16.msra.mxu1 %v7751_v29  ;;  %v2580_v29 = vrot.slane %v2578_v48, 4  ;;  %v2584_v48 = vshll.u32 %v8953_v33, 16  ;;  %v2604_v62 = vrot.slane %v2602_v40, 4  ;;  %v2608_v50 = vshll.u32 %v8965_v42, 16 }
  0xbf   : > { %7519 = vmatprep.subr.bf16.mxu1 %v7753_v26  ;;  %7469 = vmatprep.subr.bf16.mxu0 %v7750_v5  ;;  %v2615_v24 = vrot.slane %v2613_v10, 4  ;;  %v2618_v2 = vrot.slane %v2616_v23, 5  ;;  %v2622_v63 = vshll.u32 %v8968_v60, 16  ;;  %v2558_v40 = vrot.slane %v2557_v19, 4 }
  0xc0   : > { %7390 = vmatmul.mubr.bf16.gmra.mxu0 %v8792_v55  ;;  %v2571_v55 = vor.u32 %v2570_v27, %v2567_v13  ;;  %v2595_v27 = vor.u32 %v2594_v9, %v2591_v16  ;;  %v2626_v13 = vshrl.u32 %v8968_v60, 16  ;;  %v9017_v16 = vld [vmem:[%s10541_s1 + $0x238] sm:$0xff]   ;;  %v9021_v19 = vrot.slane %v2584_v48, 5  ;;  %v6309_v48 = vld [vmem:[%s7878_s24 + $0x24] sm:$0xe] }
  0xc1   : > { %7393 = vmatprep.mubr.bf16.mxu0 %v8798_v46  ;;  %7470 = vmatpush3.bf16.msra.mxu0 %v7750_v5  ;;  %v2562_v46 = vrot.slane %v2560_v0, 5  ;;  %v2605_v5 = vor.u32 %v2604_v62, %v8988_v45  ;;  %v2619_v10 = vor.u32 %v2618_v2, %v2615_v24  ;;  %v9009_v23 = vrot.slane %v2622_v63, 5  ;;  %v7756_v0 = vld [vmem:[%s10541_s1 + $0x140] sm:$0xff]  }
  0xc2   : > { %7520 = vmatpush3.bf16.msra.mxu1 %v7753_v26  ;;  %v2581_v26 = vor.u32 %v2580_v29, %v8955_v51  ;;  %7471 = vmatprep.subr.bf16.mxu0 %v7752_v1  ;;  %v9005_v29 = vld [vmem:[%s7878_s24 + $0xc] sm:$0xe]  ;;  %v9019_v9 = vrot.slane %v2571_v55, 4  ;;  %v2632_v62 = vshll.u32 %v8998_v11, 16  ;;  %v2529_v63 = vsel %vm7922_vm2, %v8937_v56, %v8872_v22  ;;  %v6310_v56 = vld [vmem:[%s7878_s24 + $0x30] sm:$0xe] }
  0xc3   : > { %7521 = vmatprep.subr.bf16.mxu1 %v7755_v18  ;;  %v2539_v24 = vsel %vm7922_vm2, %v8943_v36, %v8939_v28  ;;  %v9034_v55 = vrot.slane %v2608_v50, 5  ;;  %v6285_v2 = vcombine.low %v2505_v30, %v2515_v49  ;;  %v9041_v42 = vrot.slane %v2595_v27, 4  ;;  %v6311_v50 = vld [vmem:[%s7878_s24 + $0x3c] sm:$0xe] }
  0xc4   : > { %v9043_v22 = vrot.slane %v2605_v5, 4  ;;  %v2563_v28 = vsel %vm7922_vm2, %v2558_v40, %v2562_v46  ;;  %v9049_v36 = vrot.slane %v2619_v10, 4  ;;  %v6323_v49 = vrot.slane %v9005_v29, 9  ;;  %v6312_v46 = vld [vmem:[%s7878_s24 + $0x48] sm:$0xe] }
  0xc5   : > { %7442 = vmatmul.mubr.bf16.gmra.mxu1 %v8900_v61  ;;  %7472 = vmatpush3.bf16.msra.mxu0 %v7752_v1  ;;  %v9032_v1 = vrot.slane %v2581_v26, 4  ;;  %v3249_v26 = vrot.slane %v8540_v14, 5  ;;  %v6325_v27 = vrot.slane %v6309_v48, 9  ;;  %v3263_v5 = vrot.slane %v8578_v31, 5 }
  0xc6   : > { %7445 = vmatprep.mubr.bf16.mxu1 %v8960_v43  ;;  %7522 = vmatpush3.bf16.msra.mxu1 %v7755_v18  ;;  %v2628_v18 = vrot.slane %v2626_v13, 4  ;;  %v2553_v13 = vsel %vm7922_vm2, %v8983_v32, %v8945_v21  ;;  %v9056_v21 = vld [vmem:[%s10541_s1 + $0x1f8] sm:$0xff]   ;;  %v9059_v32 = vcombine.low %v2529_v63, %v2539_v24  ;;  %v3266_v40 = vrot.slane %v8598_v25, 5 }
  0xc7   : > { %7523 = vmatprep.subr.bf16.mxu1 %v7757_v4  ;;  %7473 = vmatprep.subr.bf16.mxu0 %v7754_v57  ;;  %v3256_v10 = vrot.slane %v8554_v59, 5  ;;  %v2587_v31 = vsel %vm7922_vm2, %v9032_v1, %v9021_v19  ;;  %v3265_v63 = vrot.slane %v3263_v5, 4  ;;  %v6327_v24 = vrot.slane %v6311_v50, 9  ;;  %v10572_v50 = vld [vmem:[#allocation2_spill] sm:$0xff] }
  0xc8   : > { %7394 = vmatmul.mubr.bf16.gmra.mxu0 %v8900_v61  ;;  %v2629_v30 = vor.u32 %v2628_v18, %v9009_v23  ;;  %v9061_v61 = vrot.slane %v2632_v62, 5  ;;  %v6326_v18 = vrot.slane %v6310_v56, 9  ;;  %v9086_v62 = vsel %vm8276_vm5, %v6325_v27, %v3263_v5  ;;  %v6314_v27 = vld [vmem:[%s7878_s24 + $0x60] sm:$0xe] }
  0xc9   : > { %7397 = vmatprep.mubr.bf16.mxu0 %v8960_v43  ;;  %7474 = vmatpush3.bf16.msra.mxu0 %v7754_v57  ;;  %v9071_v43 = vcombine.low %v2553_v13, %v2563_v28  ;;  %v2577_v57 = vsel %vm7922_vm2, %v9019_v9, %v8955_v51  ;;  %v3270_v51 = vrot.slane %v8605_v52, 5  ;;  %v3273_v9 = vrot.slane %v8608_v53, 5 }
  0xca   : > { %7524 = vmatpush3.bf16.msra.mxu1 %v7757_v4  ;;  %7475 = vmatprep.subr.bf16.mxu0 %v7756_v0  ;;  %v3252_v4 = vrot.slane %v8543_v8, 5  ;;  %v9082_v25 = vrot.slane %v2629_v30, 4  ;;  %v3277_v48 = vrot.slane %v8627_v3, 5  ;;  %v9094_v19 = vsel %vm8276_vm5, %v3265_v63, %v3266_v40 }
  0xcb   : > { %7605 = vmatprep.subr.bf16.mxu1 %v9017_v16  ;;  %v3280_v1 = vrot.slane %v8662_v20, 5  ;;  %v6328_v13 = vrot.slane %v6312_v46, 9  ;;  %v3284_v56 = vrot.slane %v8650_v44, 5  ;;  %v6357_v52 = vcombine.low %v9086_v62, %v9094_v19  ;;  %v7768_v62 = vld [vmem:[%s10541_s1 + $0x1e8] sm:$0xff]  }
  0xcc   : > { %v9103_v53 = vsel %vm8276_vm5, %v6326_v18, %v3270_v51  ;;  %v3272_v3 = vrot.slane %v3270_v51, 4  ;;  %v9107_v28 = vsel %vm8276_vm5, %v6327_v24, %v3277_v48  ;;  %v3279_v30 = vrot.slane %v3277_v48, 4  ;;  %v10573_v18 = vld [vmem:[#allocation3_spill] sm:$0xff] }
  0xcd   : > { %7446 = vmatmul.mubr.bf16.gmra.mxu1 %v8962_v34  ;;  %7476 = vmatpush3.bf16.msra.mxu0 %v7756_v0  ;;  %v6313_v0 = vld [vmem:[%s7878_s24 + $0x54] sm:$0xe]  ;;  %v9112_v20 = vsel %vm8276_vm5, %v6328_v13, %v3284_v56  ;;  %v3286_v44 = vrot.slane %v3284_v56, 4  ;;  %v3287_v46 = vrot.slane %v10572_v50, 5  ;;  %v3291_v63 = vrot.slane %v10573_v18, 5 }
  0xce   : > { %7449 = vmatprep.mubr.bf16.mxu1 %v6285_v2  ;;  %7557 = vmatprep.subr.bf16.mxu0 %v9056_v21  ;;  %v9118_v5 = vsel %vm8276_vm5, %v3272_v3, %v3273_v9  ;;  %v6329_v40 = vrot.slane %v6313_v0, 9  ;;  %v9126_v24 = vsel %vm8276_vm5, %v3279_v30, %v3280_v1  ;;  %v6330_v48 = vrot.slane %v6314_v27, 9 }
  0xcf   : > { %v3293_v1 = vrot.slane %v3291_v63, 4  ;;  %v2601_v56 = vsel %vm7922_vm2, %v9041_v42, %v8988_v45  ;;  %v2611_v0 = vsel %vm7922_vm2, %v9043_v22, %v9034_v55  ;;  %v3298_v3 = vrot.slane %v8707_v54, 5 }
  0xd0   : > { %7398 = vmatmul.mubr.bf16.gmra.mxu0 %v8962_v34  ;;  %v3294_v34 = vrot.slane %v8695_v15, 5  ;;  %v9139_v13 = vsel %vm8276_vm5, %v6329_v40, %v3291_v63  ;;  %v3301_v30 = vrot.slane %v8712_v17, 5  ;;  %v3305_v27 = vrot.slane %v8758_v41, 5  ;;  %v6316_v17 = vld [vmem:[%s7878_s24 + $0x78] sm:$0xe] }
  0xd1   : > { %7401 = vmatprep.mubr.bf16.mxu0 %v6285_v2  ;;  %v9130_v2 = vsel %vm8276_vm5, %v3286_v44, %v3287_v46  ;;  %v6315_v44 = vld [vmem:[%s7878_s24 + $0x6c] sm:$0xe]  ;;  %v3308_v40 = vrot.slane %v8780_v37, 5  ;;  %v9163_v45 = vsel %vm8276_vm5, %v6330_v48, %v3298_v3  ;;  %v3300_v54 = vrot.slane %v3298_v3, 4  ;;  %v6540_v15 = vld [vmem:[%s7878_s24 + $0x24] sm:$0xe] }
  0xd2   : > { %v9155_v50 = vsel %vm8276_vm5, %v3293_v1, %v3294_v34  ;;  %v6331_v46 = vrot.slane %v6315_v44, 9  ;;  %v3312_v55 = vrot.slane %v8775_v35, 5  ;;  %v6288_v22 = vcombine.low %v2577_v57, %v2587_v31  ;;  %v6317_v31 = vld [vmem:[%s7878_s24 + $0x84] sm:$0xe]  ;;  %v7766_v35 = vld [vmem:[%s7878_s24 + $0x48] sm:$0xff]  }
  0xd3   : > { %v3307_v41 = vrot.slane %v3305_v27, 4  ;;  %v6332_v63 = vrot.slane %v6316_v17, 9  ;;  %v6289_v37 = vcombine.low %v2601_v56, %v2611_v0  ;;  %v9174_v34 = vsel %vm8276_vm5, %v3300_v54, %v3301_v30  ;;  %v6308_v54 = vld [vmem:[%s7878_s24 + $0x18] sm:$0xe] }
  0xd4   : > { %v9169_v18 = vsel %vm8276_vm5, %v6331_v46, %v3305_v27  ;;  %v3314_v48 = vrot.slane %v3312_v55, 4  ;;  %v3319_v1 = vrot.slane %v8808_v58, 5  ;;  %v10574_v58 = vrot.slane %v8814_v7, 5  ;;  %v6318_v46 = vld [vmem:[%s7878_s24 + $0x90] sm:$0xe] }
  0xd5   : > { %7450 = vmatmul.mubr.bf16.gmra.mxu1 %v9059_v32  ;;  %v9182_v57 = vsel %vm8276_vm5, %v3307_v41, %v3308_v40  ;;  %v6333_v0 = vrot.slane %v6317_v31, 9  ;;  %v3322_v44 = vrot.slane %v8839_v47, 5  ;;  %v3326_v27 = vrot.slane %v8824_v6, 5  ;;  %v6320_v41 = vld [vmem:[%s7878_s24 + $0xa8] sm:$0xe] }
  0xd6   : > { %7453 = vmatprep.mubr.bf16.mxu1 %v9071_v43  ;;  %v3321_v3 = vrot.slane %v3319_v1, 4  ;;  %v2625_v7 = vsel %vm7922_vm2, %v9049_v36, %v9009_v23  ;;  %v2635_v40 = vsel %vm7922_vm2, %v9082_v25, %v9061_v61  ;;  %v6334_v47 = vrot.slane %v6318_v46, 9  ;;  %v7758_v36 = vld [vmem:[%s7878_s24 + $0x18] sm:$0xff]  }
  0xd7   : > { %v9213_v17 = vsel %vm8276_vm5, %v6333_v0, %v3319_v1  ;;  %v3251_v6 = vrot.slane %v3249_v26, 4  ;;  %v3328_v23 = vrot.slane %v3326_v27, 4  ;;  %v6319_v25 = vld [vmem:[%s7878_s24 + $0x9c] sm:$0xe]  ;;  %v3336_v1 = vrot.slane %v8929_v39, 5  ;;  %v10576_v0 = vld [vmem:[#allocation4_spill] sm:$0xff] }
  0xd8   : > { %7402 = vmatmul.mubr.bf16.gmra.mxu0 %v9059_v32  ;;  %v9186_v32 = vsel %vm8276_vm5, %v6332_v63, %v3312_v55  ;;  %v9219_v55 = vsel %vm8276_vm5, %v3321_v3, %v3322_v44  ;;  %v9226_v61 = vsel %vm8276_vm5, %v6334_v47, %v3326_v27  ;;  %v10575_v63 = vld [vmem:[#allocation5_spill] sm:$0xff]  ;;  %v6290_v31 = vcombine.low %v2625_v7, %v2635_v40 }
  0xd9   : > { %7405 = vmatprep.mubr.bf16.mxu0 %v9071_v43  ;;  %v9195_v43 = vsel %vm8276_vm5, %v3314_v48, %v10574_v58  ;;  %v3333_v48 = vrot.slane %v10575_v63, 5  ;;  %v3357_v58 = vrot.slane %v8998_v11, 5  ;;  %v10577_v3 = vrot.slane %v10576_v0, 5  ;;  %v10578_v63 = vld [vmem:[#allocation6_spill] sm:$0xff]  ;;  %v10581_v0 = vld [vmem:[#allocation8_spill] sm:$0xff] }
  0xda   : > { %v6335_v46 = vrot.slane %v6319_v25, 9  ;;  %v3340_v39 = vrot.slane %v10578_v63, 5  ;;  %v3250_v11 = vsel %vm8276_vm5, %v6323_v49, %v3249_v26  ;;  %v6324_v7 = vrot.slane %v6308_v54, 9  ;;  %v7790_v26 = vld [vmem:[%s7878_s24 + $0x20] sm:$0x1] }
  0xdb   : > { %v9236_v44 = vsel %vm8276_vm5, %v3328_v23, %v10577_v3  ;;  %v3335_v47 = vrot.slane %v3333_v48, 4  ;;  %v6336_v40 = vrot.slane %v6320_v41, 9  ;;  %v3253_v23 = vsel %vm8276_vm5, %v3251_v6, %v3252_v4  ;;  %v6321_v54 = vld [vmem:[%s7878_s24 + $0xb4] sm:$0xe]  ;;  %v10579_v6 = vld [vmem:[#allocation7_spill] sm:$0xff] }
  0xdc   : > { %v3258_v14 = vrot.slane %v3256_v10, 4  ;;  %v3342_v49 = vrot.slane %v3340_v39, 4  ;;  %v3347_v41 = vrot.slane %v10579_v6, 5  ;;  %v10580_v25 = vrot.slane %v8953_v33, 5  ;;  %v7762_v33 = vld [vmem:[%s7878_s24 + $0x30] sm:$0xff]  }
  0xdd   : > { %7454 = vmatmul.mubr.bf16.gmra.mxu1 %v6288_v22  ;;  %v9260_v29 = vsel %vm8276_vm5, %v3335_v47, %v3336_v1  ;;  %v9267_v4 = vsel %vm8276_vm5, %v6336_v40, %v3340_v39  ;;  %v6337_v1 = vrot.slane %v6321_v54, 9  ;;  %v3350_v3 = vrot.slane %v10581_v0, 5  ;;  %v7759_v47 = vld [vmem:[%s7878_s24 + $0x24] sm:$0xff]   ;;  %v6322_v40 = vld [vmem:[%s7878_s24 + $0xc0] sm:$0xe]  ;;  %v7765_v54 = vld [vmem:[%s10541_s1 + $0x230] sm:$0xff]  }
  0xde   : > { %7457 = vmatprep.mubr.bf16.mxu1 %v6289_v37  ;;  %v3349_v39 = vrot.slane %v3347_v41, 4  ;;  %v6454_v63 = vld [vmem:[%s7878_s24 + $0x24] sm:$0xf] }
  0xe0   : > { %7406 = vmatmul.mubr.bf16.gmra.mxu0 %v6288_v22  ;;  %v9250_v22 = vsel %vm8276_vm5, %v6335_v46, %v3333_v48  ;;  %v9275_v48 = vsel %vm8276_vm5, %v3342_v49, %v10580_v25  ;;  %v6355_v46 = vcombine.low %v3250_v11, %v3253_v23  ;;  %v9286_v49 = vsel %vm8276_vm5, %v6337_v1, %v3347_v41  ;;  %v6453_v41 = vld [vmem:[%s7878_s24 + $0x20] sm:$0x1] }
  0xe1   : > { %7409 = vmatprep.mubr.bf16.mxu0 %v6289_v37  ;;  %v3259_v37 = vrot.slane %v7790_v26, 5  ;;  %v6338_v26 = vrot.slane %v6322_v40, 9  ;;  %v3257_v11 = vsel %vm8276_vm5, %v6324_v7, %v3256_v10  ;;  %v6451_v7 = vld [vmem:[%s7878_s24 + $0x18] sm:$0xf] }
  0xe2   : > { %v4117_v25 = vshrl.u32 %v6451_v7, 16  ;;  %v4120_v1 = vshll.u32 %v6451_v7, 16 }
  0xe3   : > { %v3260_v23 = vsel %vm8276_vm5, %v3258_v14, %v3259_v37  ;;  %v6452_v37 = vld [vmem:[%s7878_s24 + $0x1c] sm:$0xf] }
  0xe4   : > { %v4130_v40 = vshrl.u32 %v6452_v37, 16  ;;  %v4122_v59 = vrot.slane %v4120_v1, 5 }
  0xe5   : > { %7458 = vmatmul.mubr.bf16.gmra.mxu1 %v6290_v31 }
  0xe6   : > { %7525 = vmatprep.mubr.bf16.mxu1 %v7758_v36  ;;  %v3354_v36 = vrot.slane %v8968_v60, 5  ;;  %v9299_v60 = vsel %vm8276_vm5, %v3349_v39, %v3350_v3  ;;  %v4126_v39 = vshll.u32 %v6452_v37, 16  ;;  %v9324_v3 = vld [vmem:[%s7878_s24 + $0x28] sm:$0xf] }
  0xe8   : > { %v3356_v6 = vrot.slane %v3354_v36, 4  ;;  %7410 = vmatmul.mubr.bf16.gmra.mxu0 %v6290_v31  ;;  %v9305_v10 = vsel %vm8276_vm5, %v6338_v26, %v3354_v36  ;;  %v6356_v31 = vcombine.low %v3257_v11, %v3260_v23  ;;  %v6539_v36 = vld [vmem:[%s7878_s24 + $0x18] sm:$0xe]  ;;  %v9321_v11 = vrot.slane %v4126_v39, 5 }
  0xe9   : > { %7477 = vmatprep.mubr.bf16.mxu0 %v6355_v46  ;;  %v4119_v46 = vrot.slane %v4117_v25, 4  ;;  %v4132_v23 = vrot.slane %v4130_v40, 4  ;;  %v6555_v7 = vrot.slane %v6539_v36, 9  ;;  %v4141_v40 = vshrl.u32 %v6454_v63, 16 }
  0xea   : > { %v9310_v14 = vsel %vm8276_vm5, %v3356_v6, %v3357_v58  ;;  %v4136_v58 = vshll.u32 %v6453_v41, 16  ;;  %v4888_v6 = vrot.slane %v6452_v37, 5  ;;  %v4891_v37 = vrot.slane %v6453_v41, 5  ;;  %v9337_v41 = vld [vmem:[%s7878_s24 + $0x2c] sm:$0x1] }
  0xeb   : > { %v4123_v25 = vor.u32 %v4122_v59, %v4119_v46  ;;  %v4133_v39 = vor.u32 %v4132_v23, %v9321_v11  ;;  %v4144_v36 = vshll.u32 %v6454_v63, 16  ;;  %v4154_v46 = vshrl.u32 %v9324_v3, 16 }
  0xec   : > { %v7191_v0 = vpop.f32.mrf.mxu0  ;;  %v4890_v1 = vrot.slane %v4888_v6, 4  ;;  %v9344_v42 = vrot.slane %v4136_v58, 5  ;;  %v9348_v63 = vsel %vm8276_vm5, %v6555_v7, %v4888_v6  ;;  %v4143_v23 = vrot.slane %v4141_v40, 4 }
  0xed   : > { %v7239_v26 = vpop.f32.mrf.mxu1  ;;  %7526 = vmatmul.mubr.bf16.vlgmr.msra.gmra.mxu1 %v7759_v47  ;;  %v4146_v58 = vrot.slane %v4144_v36, 5  ;;  %v4156_v7 = vrot.slane %v4154_v46, 4  ;;  %v9370_v19 = vrot.slane %v4123_v25, 4 }
  0xee   : > { %v9318_v8 = vadd.f32 %v7239_v26, %v7191_v0  ;;  %v900_v27 = vpop.f32.mrf.mxu0  ;;  %7606 = vmatpush3.bf16.msra.mxu1 %v9017_v16  ;;  %7529 = vmatprep.mubr.bf16.mxu1 %v7762_v33  ;;  %v7764_v16 = vld [vmem:[%s10541_s1 + $0x1f0] sm:$0xff]   ;;  %v7769_v33 = vld [vmem:[%s10541_s1 + $0x228] sm:$0xff]   ;;  %v7763_v26 = vld [vmem:[%s7878_s24 + $0x3c] sm:$0xff]  }
  0xef   : > { %v1205_v47 = vpop.f32.mrf.mxu1  ;;  %7607 = vmatprep.subr.bf16.mxu1 %v7765_v54  ;;  %v4147_v36 = vor.u32 %v4146_v58, %v4143_v23 }
  0xf0   : > { %v9326_v30 = vadd.f32 %v1205_v47, %v900_v27  ;;  %v7192_v0 = vpop.f32.mrf.mxu0  ;;  %v4150_v27 = vshll.u32 %v9324_v3, 16  ;;  %7478 = vmatmul.mubr.bf16.vlgmr.msra.gmra.mxu0 %v6356_v31  ;;  %v9360_v31 = vsel %vm8276_vm5, %v4890_v1, %v4891_v37  ;;  %v4160_v1 = vshll.u32 %v9337_v41, 16 }
  0xf1   : > { %v7240_v59 = vpop.f32.mrf.mxu1  ;;  %7558 = vmatpush3.bf16.msra.mxu0 %v9056_v21  ;;  %7481 = vmatprep.mubr.bf16.mxu0 %v6357_v52  ;;  %v9372_v52 = vrot.slane %v4133_v39, 4 }
  0xf2   : > { %v9341_v47 = vadd.f32 %v7240_v59, %v7192_v0  ;;  %v903_v56 = vpop.f32.mrf.mxu0  ;;  %7608 = vmatpush3.bf16.msra.mxu1 %v7765_v54  ;;  %v7773_v54 = vld [vmem:[%s10541_s1 + $0x220] sm:$0xff]   ;;  %v9362_v6 = vrot.slane %v4150_v27, 5  ;;  %v6457_v0 = vld [vmem:[%s7878_s24 + $0x30] sm:$0xf]  ;;  %7559 = vmatprep.subr.bf16.mxu0 %v7764_v16  ;;  %v9378_v27 = vld [vmem:[%s7878_s24 + $0x34] sm:$0xf] }
  0xf3   : > { %v1208_v9 = vpop.f32.mrf.mxu1  ;;  %7609 = vmatprep.subr.bf16.mxu1 %v7769_v33  ;;  %v9384_v39 = vrot.slane %v4160_v1, 5  ;;  %v9400_v1 = vld [vmem:[%s7878_s24 + $0x38] sm:$0x1] }
  0xf4   : > { %v9365_v21 = vadd.f32 %v1208_v9, %v903_v56  ;;  %v7195_v40 = vpop.f32.mrf.mxu0  ;;  %v4157_v59 = vor.u32 %v4156_v7, %v9362_v6  ;;  %v6556_v9 = vrot.slane %v6540_v15, 9  ;;  %v4895_v56 = vrot.slane %v9324_v3, 5  ;;  %v7772_v15 = vld [vmem:[%s10541_s1 + $0x1e0] sm:$0xff]  }
  0xf5   : > { %v7243_v37 = vpop.f32.mrf.mxu1  ;;  %7530 = vmatmul.mubr.bf16.gmra.mxu1 %v7763_v26  ;;  %v4165_v26 = vshrl.u32 %v6457_v0, 16  ;;  %7560 = vmatpush3.bf16.msra.mxu0 %v7764_v16  ;;  %v9389_v3 = vrot.slane %v4147_v36, 4  ;;  %v7777_v16 = vld [vmem:[%s10541_s1 + $0x218] sm:$0xff]   ;;  %v4168_v36 = vshll.u32 %v6457_v0, 16  ;;  %v4178_v0 = vshrl.u32 %v9378_v27, 16 }
  0xf6   : > { %10582 = vst [vmem:[#allocation2_spill] sm:$0xff] %v9365_v21  ;;  %v9380_v46 = vadd.f32 %v7243_v37, %v7195_v40  ;;  %v916_v51 = vpop.f32.mrf.mxu0  ;;  %7533 = vmatprep.mubr.bf16.mxu1 %v7766_v35  ;;  %7610 = vmatpush3.bf16.msra.mxu1 %v7769_v33  ;;  %v9391_v58 = vrot.slane %v4157_v59, 4  ;;  %v4897_v35 = vrot.slane %v4895_v56, 4  ;;  %v4898_v33 = vrot.slane %v9337_v41, 5 }
  0xf7   : > { %v1221_v23 = vpop.f32.mrf.mxu1  ;;  %7611 = vmatprep.subr.bf16.mxu1 %v7773_v54  ;;  %7561 = vmatprep.subr.bf16.mxu0 %v7768_v62  ;;  %v4167_v37 = vrot.slane %v4165_v26, 4  ;;  %v4174_v59 = vshll.u32 %v9378_v27, 16  ;;  %v4139_v41 = vsel %vm7922_vm2, %v9372_v52, %v9344_v42  ;;  %v6541_v26 = vld [vmem:[%s7878_s24 + $0x30] sm:$0xe]  ;;  %v4153_v42 = vsel %vm7922_vm2, %v9389_v3, %v9362_v6 }
  0xf8   : > { %10583 = vst [vmem:[#allocation3_spill] sm:$0xff] %v9380_v46  ;;  %v9394_v7 = vadd.f32 %v1221_v23, %v916_v51  ;;  %v7196_v40 = vpop.f32.mrf.mxu0  ;;  %v7767_v46 = vld [vmem:[%s7878_s24 + $0x54] sm:$0xff]   ;;  %v4129_v51 = vsel %vm7922_vm2, %v9370_v19, %v9321_v11  ;;  %v9414_v23 = vsel %vm8276_vm5, %v6556_v9, %v4895_v56  ;;  %v7770_v19 = vld [vmem:[%s7878_s24 + $0x60] sm:$0xff]   ;;  %v4163_v52 = vsel %vm7922_vm2, %v9391_v58, %v9384_v39  ;;  %v6460_v56 = vld [vmem:[%s7878_s24 + $0x3c] sm:$0xf] }
  0xf9   : > { %v7244_v25 = vpop.f32.mrf.mxu1  ;;  %v4170_v9 = vrot.slane %v4168_v36, 5  ;;  %7562 = vmatpush3.bf16.msra.mxu0 %v7768_v62  ;;  %v9441_v6 = vsel %vm8276_vm5, %v4897_v35, %v4898_v33  ;;  %v4180_v3 = vrot.slane %v4178_v0, 4  ;;  %v4184_v39 = vshll.u32 %v9400_v1, 16  ;;  %v9447_v58 = vld [vmem:[%s7878_s24 + $0x40] sm:$0xf] }
  0xfa   : > { %10584 = vst [vmem:[#allocation5_spill] sm:$0xff] %v9394_v7  ;;  %v10585_v7 = vcombine.low %v9103_v53, %v9118_v5  ;;  %v9421_v21 = vadd.f32 %v7244_v25, %v7196_v40  ;;  %v919_v11 = vpop.f32.mrf.mxu0  ;;  %7612 = vmatpush3.bf16.msra.mxu1 %v7773_v54  ;;  %v10587_v5 = vcombine.low %v9107_v28, %v9126_v24  ;;  %v7781_v54 = vld [vmem:[%s10541_s1 + $0x210] sm:$0xff]   ;;  %v9443_v25 = vrot.slane %v4174_v59, 5  ;;  %v7776_v28 = vld [vmem:[%s10541_s1 + $0x1d8] sm:$0xff]  }
  0xfb   : > { %v1224_v53 = vpop.f32.mrf.mxu1  ;;  %7563 = vmatprep.subr.bf16.mxu0 %v7772_v15  ;;  %7613 = vmatprep.subr.bf16.mxu1 %v7777_v16  ;;  %v4171_v24 = vor.u32 %v4170_v9, %v4167_v37  ;;  %v6557_v62 = vrot.slane %v6541_v26, 9  ;;  %v4902_v35 = vrot.slane %v9378_v27, 5  ;;  %v4905_v36 = vrot.slane %v9400_v1, 5  ;;  %v9467_v1 = vld [vmem:[%s7878_s24 + $0x44] sm:$0x1] }
  0xfc   : > { %7482 = vmatmul.mubr.bf16.gmra.mxu0 %v10585_v7  ;;  %10586 = vst [vmem:[#allocation4_spill] sm:$0xff] %v9421_v21  ;;  %v9449_v7 = vadd.f32 %v1224_v53, %v919_v11  ;;  %v4181_v40 = vor.u32 %v4180_v3, %v9443_v25  ;;  %v4189_v59 = vshrl.u32 %v6460_v56, 16  ;;  %v4192_v0 = vshll.u32 %v6460_v56, 16  ;;  %v7199_v11 = vpop.f32.mrf.mxu0  ;;  %v7780_v3 = vld [vmem:[%s10541_s1 + $0x1d0] sm:$0xff]  }
  0xfd   : > { %7485 = vmatprep.mubr.bf16.mxu0 %v10587_v5  ;;  %v7247_v33 = vpop.f32.mrf.mxu1  ;;  %7534 = vmatmul.mubr.bf16.gmra.mxu1 %v7767_v46  ;;  %v9457_v53 = vrot.slane %v4171_v24, 4  ;;  %v9459_v5 = vrot.slane %v4184_v39, 5  ;;  %v4904_v37 = vrot.slane %v4902_v35, 4  ;;  %v4198_v26 = vshll.u32 %v9447_v58, 16 }
  0xfe   : > { %10588 = vst [vmem:[#allocation6_spill] sm:$0xff] %v9449_v7  ;;  %7537 = vmatprep.mubr.bf16.mxu1 %v7770_v19  ;;  %7614 = vmatpush3.bf16.msra.mxu1 %v7777_v16  ;;  %v9462_v27 = vadd.f32 %v7247_v33, %v7199_v11  ;;  %v9464_v9 = vrot.slane %v4181_v40, 4  ;;  %v4191_v56 = vrot.slane %v4189_v59, 4  ;;  %v4194_v16 = vrot.slane %v4192_v0, 5  ;;  %v932_v19 = vpop.f32.mrf.mxu0  ;;  %v7771_v11 = vld [vmem:[%s7878_s24 + $0x6c] sm:$0xff]  }
  0xff   : > { %v1237_v46 = vpop.f32.mrf.mxu1  ;;  %7564 = vmatpush3.bf16.msra.mxu0 %v7772_v15  ;;  %7615 = vmatprep.subr.bf16.mxu1 %v7781_v54  ;;  %v7785_v15 = vld [vmem:[%s10541_s1 + $0x208] sm:$0xff]   ;;  %v9475_v39 = vcombine.low %v4129_v51, %v4139_v41  ;;  %v9477_v24 = vcombine.low %v4153_v42, %v4163_v52  ;;  %v9479_v33 = vrot.slane %v4198_v26, 5  ;;  %v4202_v40 = vshrl.u32 %v9447_v58, 16  ;;  %v6542_v51 = vld [vmem:[%s7878_s24 + $0x3c] sm:$0xe] }
 0x100   : > { %10589 = vst [vmem:[#allocation7_spill] sm:$0xff] %v9462_v27  ;;  %7565 = vmatprep.subr.bf16.mxu0 %v7776_v28  ;;  %v9482_v59 = vadd.f32 %v1237_v46, %v932_v19  ;;  %v9489_v7 = vsel %vm8276_vm5, %v6557_v62, %v4902_v35  ;;  %v4195_v21 = vor.u32 %v4194_v16, %v4191_v56  ;;  %v6463_v41 = vld [vmem:[%s7878_s24 + $0x48] sm:$0xf]  ;;  %v7200_v52 = vpop.f32.mrf.mxu0  ;;  %v7774_v26 = vld [vmem:[%s7878_s24 + $0x78] sm:$0xff]   ;;  %v4208_v56 = vshll.u32 %v9467_v1, 16 }
 0x101   : > { %v7248_v0 = vpop.f32.mrf.mxu1  ;;  %v10591_v42 = vcombine.low %v9112_v20, %v9130_v2  ;;  %v9503_v62 = vsel %vm8276_vm5, %v4904_v37, %v4905_v36  ;;  %v4204_v35 = vrot.slane %v4202_v40, 4  ;;  %v10593_v2 = vcombine.low %v9139_v13, %v9155_v50  ;;  %v9522_v40 = vld [vmem:[%s7878_s24 + $0x4c] sm:$0xf]  ;;  %v9534_v36 = vld [vmem:[%s7878_s24 + $0x50] sm:$0x1] }
 0x102   : > { %10590 = vst [vmem:[#allocation8_spill] sm:$0xff] %v9482_v59  ;;  %7616 = vmatpush3.bf16.msra.mxu1 %v7781_v54  ;;  %v9506_v16 = vadd.f32 %v7248_v0, %v7200_v52  ;;  %v7789_v54 = vld [vmem:[%s10541_s1 + $0x200] sm:$0xff]   ;;  %v9518_v37 = vrot.slane %v4195_v21, 4  ;;  %v4909_v19 = vrot.slane %v9447_v58, 5  ;;  %v935_v0 = vpop.f32.mrf.mxu0  ;;  %v7784_v13 = vld [vmem:[%s10541_s1 + $0x1c8] sm:$0xff]   ;;  %v4216_v52 = vshll.u32 %v6463_v41, 16 }
 0x103   : > { %v1240_v20 = vpop.f32.mrf.mxu1  ;;  %7566 = vmatpush3.bf16.msra.mxu0 %v7776_v28  ;;  %7617 = vmatprep.subr.bf16.mxu1 %v7785_v15  ;;  %v4205_v50 = vor.u32 %v4204_v35, %v9479_v33  ;;  %v6558_v28 = vrot.slane %v6542_v51, 9  ;;  %v9530_v58 = vrot.slane %v4208_v56, 5  ;;  %v4912_v46 = vrot.slane %v9467_v1, 5  ;;  %v6543_v56 = vld [vmem:[%s7878_s24 + $0x48] sm:$0xe] }
 0x104   : > { %7486 = vmatmul.mubr.bf16.gmra.mxu0 %v10591_v42  ;;  %10592 = vst [vmem:[#allocation9_spill] sm:$0xff] %v9506_v16  ;;  %7567 = vmatprep.subr.bf16.mxu0 %v7780_v3  ;;  %v4213_v42 = vshrl.u32 %v6463_v41, 16  ;;  %v4911_v27 = vrot.slane %v4909_v19, 4  ;;  %v7203_v16 = vpop.f32.mrf.mxu0  ;;  %v4218_v51 = vrot.slane %v4216_v52, 5  ;;  %v4222_v41 = vshll.u32 %v9522_v40, 16  ;;  %v7775_v1 = vld [vmem:[%s7878_s24 + $0x84] sm:$0xff]  }
 0x105   : > { %7489 = vmatprep.mubr.bf16.mxu0 %v10593_v2  ;;  %v9528_v2 = vadd.f32 %v1240_v20, %v935_v0  ;;  %v7251_v21 = vpop.f32.mrf.mxu1  ;;  %7538 = vmatmul.mubr.bf16.gmra.mxu1 %v7771_v11  ;;  %v4206_v59 = vrot.slane %v4205_v50, 4 }
 0x106   : > { %7541 = vmatprep.mubr.bf16.mxu1 %v7774_v26  ;;  %7618 = vmatpush3.bf16.msra.mxu1 %v7785_v15  ;;  %v4215_v35 = vrot.slane %v4213_v42, 4  ;;  %v9537_v20 = vadd.f32 %v7251_v21, %v7203_v16  ;;  %v4201_v15 = vsel %vm7922_vm2, %v9518_v37, %v9479_v33  ;;  %v4226_v26 = vshrl.u32 %v9522_v40, 16  ;;  %v948_v0 = vpop.f32.mrf.mxu0  ;;  %v6466_v37 = vld [vmem:[%s7878_s24 + $0x54] sm:$0xf] }
 0x107   : > { %10594 = vst [vmem:[#allocation10_spill] sm:$0xff] %v9528_v2  ;;  %v1253_v11 = vpop.f32.mrf.mxu1  ;;  %7568 = vmatpush3.bf16.msra.mxu0 %v7780_v3  ;;  %7619 = vmatprep.subr.bf16.mxu1 %v7789_v54  ;;  %v7788_v3 = vld [vmem:[%s10541_s1 + $0x1c0] sm:$0xff]   ;;  %v9552_v16 = vsel %vm8276_vm5, %v6558_v28, %v4909_v19  ;;  %v9554_v42 = vrot.slane %v4222_v41, 5  ;;  %v4232_v33 = vshll.u32 %v9534_v36, 16  ;;  %v9566_v2 = vsel %vm8276_vm5, %v4911_v27, %v4912_v46  ;;  %v9569_v28 = vld [vmem:[%s7878_s24 + $0x58] sm:$0xf] }
 0x108   : > { %10595 = vst [vmem:[#allocation11_spill] sm:$0xff] %v9537_v20  ;;  %7569 = vmatprep.subr.bf16.mxu0 %v7784_v13  ;;  %v4219_v50 = vor.u32 %v4218_v51, %v4215_v35  ;;  %v9558_v52 = vadd.f32 %v1253_v11, %v948_v0  ;;  %v4211_v20 = vsel %vm7922_vm2, %v4206_v59, %v9530_v58  ;;  %v4228_v19 = vrot.slane %v4226_v26, 4  ;;  %v7204_v51 = vpop.f32.mrf.mxu0  ;;  %v7778_v41 = vld [vmem:[%s7878_s24 + $0x90] sm:$0xff]  }
 0x109   : > { %v7252_v21 = vpop.f32.mrf.mxu1  ;;  %v10596_v35 = vcombine.low %v9163_v45, %v9174_v34  ;;  %v6559_v0 = vrot.slane %v6543_v56, 9  ;;  %v4916_v59 = vrot.slane %v9522_v40, 5  ;;  %v4919_v58 = vrot.slane %v9534_v36, 5  ;;  %v6468_v56 = vld [vmem:[%s7878_s24 + $0x5c] sm:$0x1] }
 0x10a   : > { %7620 = vmatpush3.bf16.msra.mxu1 %v7789_v54  ;;  %v9575_v11 = vrot.slane %v4219_v50, 4  ;;  %v9579_v27 = vadd.f32 %v7252_v21, %v7204_v51  ;;  %v10597_v26 = vcombine.low %v9169_v18, %v9182_v57  ;;  %v4229_v45 = vor.u32 %v4228_v19, %v9554_v42  ;;  %v951_v50 = vpop.f32.mrf.mxu0 }
 0x10b   : > { %v1256_v46 = vpop.f32.mrf.mxu1  ;;  %7570 = vmatpush3.bf16.msra.mxu0 %v7784_v13  ;;  %v4237_v34 = vshrl.u32 %v6466_v37, 16  ;;  %v4240_v54 = vshll.u32 %v6466_v37, 16  ;;  %v10598_v36 = vsel %vm7922_vm2, %v9464_v9, %v9459_v5  ;;  %v10599_v40 = vsel %vm7922_vm2, %v9457_v53, %v9443_v25  ;;  %v6544_v9 = vld [vmem:[%s7878_s24 + $0x54] sm:$0xe] }
 0x10c   : > { %7490 = vmatmul.mubr.bf16.gmra.mxu0 %v10596_v35  ;;  %7571 = vmatprep.subr.bf16.mxu0 %v7788_v3  ;;  %v9595_v18 = vcombine.low %v10599_v40, %v10598_v36  ;;  %v4234_v57 = vrot.slane %v4232_v33, 5  ;;  %v4918_v13 = vrot.slane %v4916_v59, 4  ;;  %v4246_v37 = vshll.u32 %v9569_v28, 16  ;;  %v9624_v36 = vld [vmem:[%s7878_s24 + $0x64] sm:$0xf] }
 0x10d   : > { %7493 = vmatprep.mubr.bf16.mxu0 %v10597_v26  ;;  %v9599_v21 = vadd.f32 %v1256_v46, %v951_v50  ;;  %v7255_v19 = vpop.f32.mrf.mxu1  ;;  %7542 = vmatmul.mubr.bf16.gmra.mxu1 %v7775_v1  ;;  %v4230_v35 = vrot.slane %v4229_v45, 4  ;;  %v4239_v51 = vrot.slane %v4237_v34, 4  ;;  %v4242_v5 = vrot.slane %v4240_v54, 5  ;;  %v6469_v1 = vld [vmem:[%s7878_s24 + $0x60] sm:$0xf]  ;;  %v7207_v34 = vpop.f32.mrf.mxu0 }
 0x10e   : > { %7545 = vmatprep.mubr.bf16.mxu1 %v7778_v41  ;;  %v9602_v26 = vcombine.low %v4201_v15, %v4211_v20  ;;  %v4225_v53 = vsel %vm7922_vm2, %v9575_v11, %v9554_v42  ;;  %v4250_v33 = vshrl.u32 %v9569_v28, 16  ;;  %v9614_v41 = vsel %vm8276_vm5, %v6559_v0, %v4916_v59  ;;  %v7779_v59 = vld [vmem:[%s7878_s24 + $0x9c] sm:$0xff]  }
 0x10f   : > { %10600 = vst [vmem:[#allocation12_spill] sm:$0xff] %v9599_v21  ;;  %v1269_v46 = vpop.f32.mrf.mxu1  ;;  %7572 = vmatpush3.bf16.msra.mxu0 %v7788_v3  ;;  %v9618_v20 = vsel %vm8276_vm5, %v4918_v13, %v4919_v58  ;;  %v4243_v15 = vor.u32 %v4242_v5, %v4239_v51  ;;  %v9620_v45 = vrot.slane %v4246_v37, 5  ;;  %v4256_v11 = vshll.u32 %v6468_v56, 16  ;;  %v964_v51 = vpop.f32.mrf.mxu0  ;;  %v7782_v5 = vld [vmem:[%s7878_s24 + $0xa8] sm:$0xff]  }
 0x110   : > { %v4252_v42 = vrot.slane %v4250_v33, 4  ;;  %v6560_v54 = vrot.slane %v6544_v9, 9  ;;  %v4923_v50 = vrot.slane %v9569_v28, 5  ;;  %v9626_v3 = vadd.f32 %v7255_v19, %v7207_v34 }
 0x111   : > { %v7256_v0 = vpop.f32.mrf.mxu1  ;;  %v4235_v58 = vsel %vm7922_vm2, %v4230_v35, %v4234_v57  ;;  %v4926_v40 = vrot.slane %v6468_v56, 5  ;;  %v4261_v13 = vshrl.u32 %v6469_v1, 16  ;;  %v10602_v37 = vcombine.low %v9186_v32, %v9195_v43  ;;  %v9646_v43 = vld [vmem:[%s7878_s24 + $0x68] sm:$0x1] }
 0x112   : > { %10601 = vst [vmem:[#allocation13_spill] sm:$0xff] %v9626_v3  ;;  %v9637_v9 = vrot.slane %v4243_v15, 4  ;;  %v4925_v19 = vrot.slane %v4923_v50, 4  ;;  %v4264_v33 = vshll.u32 %v6469_v1, 16  ;;  %v9639_v34 = vadd.f32 %v1269_v46, %v964_v51  ;;  %v7208_v15 = vpop.f32.mrf.mxu0  ;;  %v7786_v3 = vld [vmem:[%s7878_s24 + $0xc0] sm:$0xff]  }
 0x113   : > { %v1272_v25 = vpop.f32.mrf.mxu1  ;;  %v10604_v57 = vcombine.low %v9213_v17, %v9219_v55  ;;  %v4253_v32 = vor.u32 %v4252_v42, %v9620_v45  ;;  %v4263_v56 = vrot.slane %v4261_v13, 4  ;;  %v4270_v35 = vshll.u32 %v9624_v36, 16 }
 0x114   : > { %7494 = vmatmul.mubr.bf16.gmra.mxu0 %v10602_v37  ;;  %10603 = vst [vmem:[#allocation14_spill] sm:$0xff] %v9639_v34  ;;  %v9651_v1 = vsel %vm8276_vm5, %v6560_v54, %v4923_v50  ;;  %v9655_v46 = vsel %vm8276_vm5, %v4925_v19, %v4926_v40  ;;  %v4266_v17 = vrot.slane %v4264_v33, 5  ;;  %v4274_v55 = vshrl.u32 %v9624_v36, 16  ;;  %v6545_v54 = vld [vmem:[%s7878_s24 + $0x60] sm:$0xe]  ;;  %v967_v28 = vpop.f32.mrf.mxu0 }
 0x115   : > { %7497 = vmatprep.mubr.bf16.mxu0 %v10604_v57  ;;  %v9658_v37 = vadd.f32 %v7256_v0, %v7208_v15  ;;  %v7259_v42 = vpop.f32.mrf.mxu1  ;;  %7546 = vmatmul.mubr.bf16.gmra.mxu1 %v7779_v59  ;;  %v9660_v51 = vcombine.low %v4225_v53, %v4235_v58  ;;  %v9662_v13 = vrot.slane %v4256_v11, 5  ;;  %v9664_v57 = vrot.slane %v4270_v35, 5  ;;  %v6472_v50 = vld [vmem:[%s7878_s24 + $0x6c] sm:$0xf]  ;;  %v9679_v35 = vld [vmem:[%s7878_s24 + $0x70] sm:$0xf] }
 0x116   : > { %7549 = vmatprep.mubr.bf16.mxu1 %v7782_v5  ;;  %v4267_v0 = vor.u32 %v4266_v17, %v4263_v56  ;;  %v4276_v19 = vrot.slane %v4274_v55, 4  ;;  %v4280_v53 = vshll.u32 %v9646_v43, 16  ;;  %v9673_v59 = vadd.f32 %v1272_v25, %v967_v28  ;;  %v7211_v15 = vpop.f32.mrf.mxu0  ;;  %v9689_v33 = vld [vmem:[%s7878_s24 + $0x74] sm:$0x1] }
 0x117   : > { %10605 = vst [vmem:[#allocation15_spill] sm:$0xff] %v9658_v37  ;;  %v1285_v11 = vpop.f32.mrf.mxu1  ;;  %v4254_v58 = vrot.slane %v4253_v32, 4  ;;  %v4930_v5 = vrot.slane %v9624_v36, 5  ;;  %v6561_v17 = vrot.slane %v6545_v54, 9  ;;  %v4285_v55 = vshrl.u32 %v6472_v50, 16 }
 0x118   : > { %10606 = vst [vmem:[#allocation16_spill] sm:$0xff] %v9673_v59  ;;  %v9681_v40 = vrot.slane %v4267_v0, 4  ;;  %v4277_v56 = vor.u32 %v4276_v19, %v9664_v57  ;;  %v9684_v25 = vadd.f32 %v7259_v42, %v7211_v15  ;;  %v7783_v59 = vld [vmem:[%s7878_s24 + $0xb4] sm:$0xff]   ;;  %v4933_v37 = vrot.slane %v9646_v43, 5  ;;  %v980_v0 = vpop.f32.mrf.mxu0 }
 0x119   : > { %v7260_v28 = vpop.f32.mrf.mxu1  ;;  %v4932_v32 = vrot.slane %v4930_v5, 4  ;;  %v4288_v36 = vshll.u32 %v6472_v50, 16  ;;  %v10608_v34 = vcombine.low %v9226_v61, %v9236_v44  ;;  %v4282_v54 = vrot.slane %v4280_v53, 5  ;;  %v6546_v50 = vld [vmem:[%s7878_s24 + $0x6c] sm:$0xe] }
 0x11a   : > { %10607 = vst [vmem:[#allocation17_spill] sm:$0xff] %v9684_v25  ;;  %v4278_v19 = vrot.slane %v4277_v56, 4  ;;  %v4287_v42 = vrot.slane %v4285_v55, 4  ;;  %v4294_v15 = vshll.u32 %v9679_v35, 16  ;;  %v9696_v25 = vadd.f32 %v1285_v11, %v980_v0  ;;  %v7212_v53 = vpop.f32.mrf.mxu0 }
 0x11b   : > { %v1288_v21 = vpop.f32.mrf.mxu1  ;;  %v10610_v43 = vcombine.low %v9250_v22, %v9260_v29  ;;  %v4259_v61 = vsel %vm7922_vm2, %v4254_v58, %v9662_v13  ;;  %v4290_v44 = vrot.slane %v4288_v36, 5  ;;  %v4273_v11 = vsel %vm7922_vm2, %v9681_v40, %v9664_v57  ;;  %v6475_v13 = vld [vmem:[%s7878_s24 + $0x78] sm:$0xf]  ;;  %v9725_v40 = vld [vmem:[%s7878_s24 + $0x7c] sm:$0xf] }
 0x11c   : > { %7498 = vmatmul.mubr.bf16.gmra.mxu0 %v10608_v34  ;;  %10609 = vst [vmem:[#allocation18_spill] sm:$0xff] %v9696_v25  ;;  %v4298_v34 = vshrl.u32 %v9679_v35, 16  ;;  %v9712_v56 = vsel %vm8276_vm5, %v6561_v17, %v4930_v5  ;;  %v9714_v22 = vrot.slane %v4294_v15, 5  ;;  %v4304_v29 = vshll.u32 %v9689_v33, 16  ;;  %v983_v5 = vpop.f32.mrf.mxu0 }
 0x11d   : > { %7501 = vmatprep.mubr.bf16.mxu0 %v10610_v43  ;;  %v9718_v58 = vadd.f32 %v7260_v28, %v7212_v53  ;;  %v7263_v55 = vpop.f32.mrf.mxu1  ;;  %7550 = vmatmul.mubr.bf16.gmra.mxu1 %v7783_v59  ;;  %v9722_v36 = vsel %vm8276_vm5, %v4932_v32, %v4933_v37  ;;  %v4291_v0 = vor.u32 %v4290_v44, %v4287_v42  ;;  %v6562_v28 = vrot.slane %v6546_v50, 9  ;;  %v7787_v50 = vld [vmem:[%s7878_s24 + $0xcc] sm:$0xff]  }
 0x11e   : > { %v4300_v57 = vrot.slane %v4298_v34, 4  ;;  %7553 = vmatprep.mubr.bf16.mxu1 %v7786_v3  ;;  %v4283_v17 = vsel %vm7922_vm2, %v4278_v19, %v4282_v54  ;;  %v9729_v15 = vrot.slane %v4304_v29, 5  ;;  %v4937_v59 = vrot.slane %v9679_v35, 5  ;;  %v9737_v3 = vld [vmem:[%s7878_s24 + $0x80] sm:$0x1] }
 0x11f   : > { %10611 = vst [vmem:[#allocation19_spill] sm:$0xff] %v9718_v58  ;;  %v9732_v43 = vadd.f32 %v1288_v21, %v983_v5  ;;  %v1301_v37 = vpop.f32.mrf.mxu1  ;;  %v4940_v42 = vrot.slane %v9689_v33, 5  ;;  %v4309_v44 = vshrl.u32 %v6475_v13, 16  ;;  %v4292_v34 = vrot.slane %v4291_v0, 4 }
 0x120   : > { %v4301_v32 = vor.u32 %v4300_v57, %v9714_v22  ;;  %v4939_v53 = vrot.slane %v4937_v59, 4  ;;  %v4312_v58 = vshll.u32 %v6475_v13, 16  ;;  %v4318_v19 = vshll.u32 %v9725_v40, 16  ;;  %v7215_v57 = vpop.f32.mrf.mxu0 }
 0x121   : > { %10612 = vst [vmem:[#allocation20_spill] sm:$0xff] %v9732_v43  ;;  %v7264_v54 = vpop.f32.mrf.mxu1  ;;  %v10613_v21 = vsel %vm7922_vm2, %v9637_v9, %v9620_v45  ;;  %v4311_v33 = vrot.slane %v4309_v44, 4  ;;  %v4322_v0 = vshrl.u32 %v9725_v40, 16  ;;  %v10614_v13 = vcombine.low %v9267_v4, %v9275_v48  ;;  %v6547_v9 = vld [vmem:[%s7878_s24 + $0x78] sm:$0xe] }
 0x122   : > { %v9746_v35 = vcombine.low %v10613_v21, %v4259_v61  ;;  %v4302_v29 = vrot.slane %v4301_v32, 4  ;;  %v9752_v5 = vcombine.low %v4273_v11, %v4283_v17  ;;  %v4314_v25 = vrot.slane %v4312_v58, 5  ;;  %v6478_v17 = vld [vmem:[%s7878_s24 + $0x84] sm:$0xf]  ;;  %v9771_v21 = vld [vmem:[%s7878_s24 + $0x88] sm:$0xf]  ;;  %v996_v58 = vpop.f32.mrf.mxu0 }
 0x123   : > { %v9756_v45 = vrot.slane %v4318_v19, 5  ;;  %v9759_v61 = vadd.f32 %v7263_v55, %v7215_v57  ;;  %v1304_v32 = vpop.f32.mrf.mxu1  ;;  %v10615_v44 = vcombine.low %v9286_v49, %v9299_v60  ;;  %v9766_v4 = vsel %vm8276_vm5, %v6562_v28, %v4937_v59 }
 0x124   : > { %7502 = vmatmul.mubr.bf16.gmra.mxu0 %v10614_v13  ;;  %v4324_v48 = vrot.slane %v4322_v0, 4  ;;  %v4328_v11 = vshll.u32 %v9737_v3, 16  ;;  %v4297_v55 = vsel %vm7922_vm2, %v4292_v34, %v9714_v22  ;;  %v4307_v49 = vsel %vm7922_vm2, %v4302_v29, %v9729_v15  ;;  %v7216_v22 = vpop.f32.mrf.mxu0 }
 0x125   : > { %7505 = vmatprep.mubr.bf16.mxu0 %v10615_v44  ;;  %v9781_v60 = vsel %vm8276_vm5, %v4939_v53, %v4940_v42  ;;  %v4315_v28 = vor.u32 %v4314_v25, %v4311_v33  ;;  %v9783_v59 = vadd.f32 %v1301_v37, %v996_v58  ;;  %v7267_v19 = vpop.f32.mrf.mxu1  ;;  %7554 = vmatmul.mubr.bf16.gmra.mxu1 %v7787_v50  ;;  %v6563_v57 = vrot.slane %v6547_v9, 9  ;;  %v6480_v9 = vld [vmem:[%s7878_s24 + $0x8c] sm:$0x1]  ;;  %v6548_v50 = vld [vmem:[%s7878_s24 + $0x84] sm:$0xe] }
 0x126   : > { %v4325_v0 = vor.u32 %v4324_v48, %v9756_v45  ;;  %v4944_v13 = vrot.slane %v9725_v40, 5  ;;  %v10616_v34 = vcombine.low %v9348_v63, %v9360_v31  ;;  %v4333_v29 = vshrl.u32 %v6478_v17, 16  ;;  %v999_v44 = vpop.f32.mrf.mxu0 }
 0x127   : > { %v4316_v15 = vrot.slane %v4315_v28, 4  ;;  %v4336_v42 = vshll.u32 %v6478_v17, 16  ;;  %v4342_v25 = vshll.u32 %v9771_v21, 16  ;;  %v9791_v37 = vadd.f32 %v7264_v54, %v7216_v22  ;;  %v1317_v53 = vpop.f32.mrf.mxu1 }
 0x128   : > { %7621 = vmatprep.mubr.bf16.mxu1 %v10616_v34  ;;  %v4326_v33 = vrot.slane %v4325_v0, 4  ;;  %v4330_v40 = vrot.slane %v4328_v11, 5  ;;  %v4946_v48 = vrot.slane %v4944_v13, 4  ;;  %v4947_v63 = vrot.slane %v9737_v3, 5  ;;  %v6481_v0 = vld [vmem:[%s7878_s24 + $0x90] sm:$0xf]  ;;  %v7219_v11 = vpop.f32.mrf.mxu0 }
 0x129   : > { %v4335_v31 = vrot.slane %v4333_v29, 4  ;;  %v4338_v58 = vrot.slane %v4336_v42, 5  ;;  %v9797_v17 = vadd.f32 %v1304_v32, %v999_v44  ;;  %v7268_v28 = vpop.f32.mrf.mxu1  ;;  %v9799_v54 = vcombine.low %v4297_v55, %v4307_v49 }
 0x12a   : > { %v9801_v22 = vrot.slane %v4342_v25, 5  ;;  %v4346_v34 = vshrl.u32 %v9771_v21, 16  ;;  %v10617_v43 = vcombine.low %v9305_v10, %v9310_v14  ;;  %v4321_v3 = vsel %vm7922_vm2, %v4316_v15, %v9756_v45  ;;  %v9823_v25 = vld [vmem:[%s7878_s24 + $0x94] sm:$0xf]  ;;  %v1012_v45 = vpop.f32.mrf.mxu0 }
 0x12b   : > { %v9814_v32 = vsel %vm8276_vm5, %v6563_v57, %v4944_v13  ;;  %v4339_v55 = vor.u32 %v4338_v58, %v4335_v31  ;;  %v4352_v49 = vshll.u32 %v6480_v9, 16  ;;  %v9816_v29 = vadd.f32 %v7267_v19, %v7219_v11  ;;  %v1320_v42 = vpop.f32.mrf.mxu1  ;;  %v6483_v58 = vld [vmem:[%s7878_s24 + $0x98] sm:$0x1] }
 0x12c   : > { %7506 = vmatmul.mubr.bf16.gmra.mxu0 %v10617_v43  ;;  %v4331_v10 = vsel %vm7922_vm2, %v4326_v33, %v4330_v40  ;;  %v4348_v14 = vrot.slane %v4346_v34, 4  ;;  %v4951_v43 = vrot.slane %v9771_v21, 5  ;;  %v9827_v57 = vsel %vm8276_vm5, %v4946_v48, %v4947_v63  ;;  %v7220_v34 = vpop.f32.mrf.mxu0 }
 0x12d   : > { %7573 = vmatprep.mubr.bf16.mxu0 %v9475_v39  ;;  %v9829_v13 = vrot.slane %v4339_v55, 4  ;;  %v6564_v19 = vrot.slane %v6548_v50, 9  ;;  %v4357_v15 = vshrl.u32 %v6481_v0, 16  ;;  %v9831_v44 = vadd.f32 %v1317_v53, %v1012_v45  ;;  %v7335_v39 = vpop.f32.mrf.mxu1  ;;  %v6549_v45 = vld [vmem:[%s7878_s24 + $0x90] sm:$0xe] }
 0x12e   : > { %v10618_v33 = vcombine.low %v9414_v23, %v9441_v6  ;;  %v4349_v21 = vor.u32 %v4348_v14, %v9801_v22  ;;  %v4953_v40 = vrot.slane %v4951_v43, 4  ;;  %v4954_v31 = vrot.slane %v6480_v9, 5 }
 0x12f   : > { %v10619_v48 = vcombine.low %v9489_v7, %v9503_v62  ;;  %v4354_v50 = vrot.slane %v4352_v49, 5  ;;  %v4359_v53 = vrot.slane %v4357_v15, 4  ;;  %v4360_v63 = vshll.u32 %v6481_v0, 16  ;;  %v2045_v23 = vpop.f32.mrf.mxu1  ;;  %v6484_v15 = vld [vmem:[%s7878_s24 + $0x9c] sm:$0xf] }
 0x130   : > { %7622 = vmatmul.mubr.bf16.vlgmr.msra.gmra.mxu1 %v10618_v33  ;;  %v4366_v11 = vshll.u32 %v9823_v25, 16  ;;  %v9842_v55 = vadd.f32 %v7268_v28, %v7220_v34  ;;  %v9844_v6 = vcombine.low %v4321_v3, %v4331_v10  ;;  %v4350_v14 = vrot.slane %v4349_v21, 4  ;;  %v1015_v33 = vpop.f32.mrf.mxu0 }
 0x131   : > { %7625 = vmatprep.mubr.bf16.mxu1 %v10619_v48  ;;  %v4370_v9 = vshrl.u32 %v9823_v25, 16  ;;  %v9850_v7 = vsel %vm8276_vm5, %v6564_v19, %v4951_v43  ;;  %v4362_v62 = vrot.slane %v4360_v63, 5  ;;  %v4376_v0 = vshll.u32 %v6483_v58, 16  ;;  %v7336_v28 = vpop.f32.mrf.mxu1 }
 0x132   : > { %v9852_v49 = vrot.slane %v4366_v11, 5  ;;  %v9855_v48 = vadd.f32 %v1320_v42, %v1015_v33  ;;  %v4345_v3 = vsel %vm7922_vm2, %v9829_v13, %v9801_v22  ;;  %v9863_v10 = vsel %vm8276_vm5, %v4953_v40, %v4954_v31  ;;  %v7287_v19 = vpop.f32.mrf.mxu0  ;;  %v9873_v40 = vld [vmem:[%s7878_s24 + $0xa0] sm:$0xf] }
 0x133   : > { %v4372_v43 = vrot.slane %v4370_v9, 4  ;;  %v4355_v21 = vsel %vm7922_vm2, %v4350_v14, %v4354_v50  ;;  %v4363_v42 = vor.u32 %v4362_v62, %v4359_v53  ;;  %v6565_v34 = vrot.slane %v6549_v45, 9  ;;  %v2048_v33 = vpop.f32.mrf.mxu1 }
 0x134   : > { %10620 = vst [vmem:[#allocation21_spill] sm:$0xff] %v9855_v48  ;;  %7574 = vmatmul.mubr.bf16.vlgmr.msra.gmra.mxu0 %v9477_v24  ;;  %v4958_v63 = vrot.slane %v9823_v25, 5  ;;  %v1787_v11 = vadd.f32 %v7287_v19, %v9318_v8  ;;  %v4961_v13 = vrot.slane %v6483_v58, 5  ;;  %v4381_v31 = vshrl.u32 %v6484_v15, 16  ;;  %v1658_v9 = vpop.f32.mrf.mxu0 }
 0x135   : > { %7577 = vmatprep.mubr.bf16.mxu0 %v9595_v18  ;;  %v4373_v22 = vor.u32 %v4372_v43, %v9852_v49  ;;  %v9875_v24 = vrot.slane %v4363_v42, 4  ;;  %v9877_v48 = vrot.slane %v4376_v0, 5  ;;  %v4384_v53 = vshll.u32 %v6484_v15, 16  ;;  %v7339_v25 = vpop.f32.mrf.mxu1  ;;  %v6486_v42 = vld [vmem:[%s7878_s24 + $0xa4] sm:$0x1] }
 0x136   : > { %v4960_v50 = vrot.slane %v4958_v63, 4  ;;  %v9879_v14 = vadd.f32 %v7335_v39, %v1787_v11  ;;  %v1785_v8 = vadd.f32 %v1658_v9, %v9326_v30  ;;  %v10621_v18 = vcombine.low %v9552_v16, %v9566_v2  ;;  %v7288_v62 = vpop.f32.mrf.mxu0 }
 0x137   : > { %v9885_v58 = vrot.slane %v4373_v22, 4  ;;  %v4383_v45 = vrot.slane %v4381_v31, 4  ;;  %v10622_v0 = vcombine.low %v9614_v41, %v9618_v20  ;;  %v4386_v15 = vrot.slane %v4384_v53, 5  ;;  %v2061_v19 = vpop.f32.mrf.mxu1 }
 0x138   : > { %7626 = vmatmul.mubr.bf16.gmra.mxu1 %v10621_v18  ;;  %v4390_v43 = vshll.u32 %v9873_v40, 16  ;;  %v9895_v2 = vadd.f32 %v2045_v23, %v1785_v8  ;;  %v1788_v16 = vadd.f32 %v7288_v62, %v9341_v47  ;;  %v9900_v41 = vsel %vm8276_vm5, %v6565_v34, %v4958_v63  ;;  %v1661_v11 = vpop.f32.mrf.mxu0  ;;  %v6487_v47 = vld [vmem:[%s7878_s24 + $0xa8] sm:$0xf]  ;;  %v10623_v8 = vld [vmem:[#allocation2_spill] sm:$0xff] }
 0x139   : > { %7629 = vmatprep.mubr.bf16.mxu1 %v10622_v0  ;;  %v9904_v20 = vsel %vm8276_vm5, %v4960_v50, %v4961_v13  ;;  %v9907_v22 = vcombine.low %v4345_v3, %v4355_v21  ;;  %v4387_v31 = vor.u32 %v4386_v15, %v4383_v45  ;;  %v4394_v23 = vshrl.u32 %v9873_v40, 16  ;;  %v7340_v34 = vpop.f32.mrf.mxu1  ;;  %v6550_v21 = vld [vmem:[%s7878_s24 + $0x9c] sm:$0xe]  ;;  %v10625_v15 = vld [vmem:[#allocation3_spill] sm:$0xff] }
 0x13a   : > { %v9909_v9 = vrot.slane %v4390_v43, 5  ;;  %v9913_v53 = vadd.f32 %v7336_v28, %v1788_v16  ;;  %v1786_v18 = vadd.f32 %v1661_v11, %v10623_v8  ;;  %v7291_v13 = vpop.f32.mrf.mxu0  ;;  %v4400_v45 = vshll.u32 %v6486_v42, 16  ;;  %v9936_v8 = vld [vmem:[%s7878_s24 + $0xac] sm:$0xf] }
 0x13b   : > { %v4396_v50 = vrot.slane %v4394_v23, 4  ;;  %v4965_v62 = vrot.slane %v9873_v40, 5  ;;  %v1791_v43 = vadd.f32 %v7291_v13, %v10625_v15  ;;  %v2064_v16 = vpop.f32.mrf.mxu1  ;;  %v9933_v11 = vrot.slane %v4387_v31, 4 }
 0x13c   : > { %7578 = vmatmul.mubr.bf16.gmra.mxu0 %v9602_v26  ;;  %v9929_v0 = vadd.f32 %v2048_v33, %v1786_v18  ;;  %v4405_v26 = vshrl.u32 %v6487_v47, 16  ;;  %v1674_v30 = vpop.f32.mrf.mxu0  ;;  %v6566_v23 = vrot.slane %v6550_v21, 9  ;;  %v4968_v63 = vrot.slane %v6486_v42, 5  ;;  %v10626_v33 = vld [vmem:[#allocation5_spill] sm:$0xff] }
 0x13d   : > { %7581 = vmatprep.mubr.bf16.mxu0 %v9660_v51  ;;  %v4397_v28 = vor.u32 %v4396_v50, %v9909_v9  ;;  %v4967_v39 = vrot.slane %v4965_v62, 4  ;;  %v9939_v40 = vadd.f32 %v7339_v25, %v1791_v43  ;;  %v1789_v18 = vadd.f32 %v1674_v30, %v10626_v33  ;;  %v7343_v3 = vpop.f32.mrf.mxu1  ;;  %v9946_v51 = vld [vmem:[%s7878_s24 + $0xb0] sm:$0x1] }
 0x13e   : > { %10624 = vst [vmem:[#allocation2_spill] sm:$0xff] %v9929_v0  ;;  %v10627_v13 = vcombine.low %v9651_v1, %v9655_v46  ;;  %v4407_v31 = vrot.slane %v4405_v26, 4  ;;  %v4408_v15 = vshll.u32 %v6487_v47, 16  ;;  %v7292_v0 = vpop.f32.mrf.mxu0  ;;  %v10628_v50 = vcombine.low %v9712_v56, %v9722_v36  ;;  %v10630_v1 = vld [vmem:[#allocation4_spill] sm:$0xff] }
 0x13f   : > { %v4398_v42 = vrot.slane %v4397_v28, 4  ;;  %v4402_v25 = vrot.slane %v4400_v45, 5  ;;  %v4414_v21 = vshll.u32 %v9936_v8, 16  ;;  %v4418_v30 = vshrl.u32 %v9936_v8, 16  ;;  %v2077_v33 = vpop.f32.mrf.mxu1 }
 0x140   : > { %7630 = vmatmul.mubr.bf16.gmra.mxu1 %v10627_v13  ;;  %v9953_v43 = vadd.f32 %v2061_v19, %v1789_v18  ;;  %v1792_v46 = vadd.f32 %v7292_v0, %v10630_v1  ;;  %v4393_v47 = vsel %vm7922_vm2, %v9933_v11, %v9909_v9  ;;  %v4410_v56 = vrot.slane %v4408_v15, 5  ;;  %v1677_v36 = vpop.f32.mrf.mxu0  ;;  %v6551_v18 = vld [vmem:[%s7878_s24 + $0xa8] sm:$0xe]  ;;  %v10632_v0 = vld [vmem:[#allocation6_spill] sm:$0xff]  ;;  %v6490_v15 = vld [vmem:[%s7878_s24 + $0xb4] sm:$0xf] }
 0x141   : > { %7633 = vmatprep.mubr.bf16.mxu1 %v10628_v50  ;;  %v9962_v28 = vsel %vm8276_vm5, %v6566_v23, %v4965_v62  ;;  %v9964_v45 = vrot.slane %v4414_v21, 5  ;;  %v4420_v26 = vrot.slane %v4418_v30, 4  ;;  %v4424_v19 = vshll.u32 %v9946_v51, 16  ;;  %v7344_v1 = vpop.f32.mrf.mxu1 }
 0x142   : > { %10629 = vst [vmem:[#allocation3_spill] sm:$0xff] %v9953_v43  ;;  %v9968_v13 = vadd.f32 %v7340_v34, %v1792_v46  ;;  %v1790_v50 = vadd.f32 %v1677_v36, %v10632_v0  ;;  %v9973_v9 = vsel %vm8276_vm5, %v4967_v39, %v4968_v63  ;;  %v4411_v11 = vor.u32 %v4410_v56, %v4407_v31  ;;  %v7295_v62 = vpop.f32.mrf.mxu0  ;;  %v10633_v36 = vld [vmem:[#allocation7_spill] sm:$0xff]  ;;  %v9986_v31 = vld [vmem:[%s7878_s24 + $0xb8] sm:$0xf] }
 0x143   : > { %v4403_v23 = vsel %vm7922_vm2, %v4398_v42, %v4402_v25  ;;  %v4421_v21 = vor.u32 %v4420_v26, %v9964_v45  ;;  %v4426_v34 = vrot.slane %v4424_v19, 5  ;;  %v4972_v30 = vrot.slane %v9936_v8, 5  ;;  %v10634_v8 = vld [vmem:[#allocation8_spill] sm:$0xff] }
 0x144   : > { %10631 = vst [vmem:[#allocation5_spill] sm:$0xff] %v9968_v13  ;;  %7582 = vmatmul.mubr.bf16.gmra.mxu0 %v9746_v35  ;;  %v9981_v46 = vadd.f32 %v2064_v16, %v1790_v50  ;;  %v1795_v0 = vadd.f32 %v7295_v62, %v10633_v36  ;;  %v2080_v13 = vpop.f32.mrf.mxu1  ;;  %v4412_v39 = vrot.slane %v4411_v11, 4  ;;  %v6567_v63 = vrot.slane %v6551_v18, 9  ;;  %v1690_v35 = vpop.f32.mrf.mxu0  ;;  %v10639_v36 = vld [vmem:[#allocation9_spill] sm:$0xff] }
 0x145   : > { %7585 = vmatprep.mubr.bf16.mxu0 %v9752_v5  ;;  %v4422_v56 = vrot.slane %v4421_v21, 4  ;;  %v4974_v43 = vrot.slane %v4972_v30, 4  ;;  %v4975_v42 = vrot.slane %v9946_v51, 5  ;;  %v4429_v25 = vshrl.u32 %v6490_v15, 16 }
 0x146   : > { %v9989_v26 = vadd.f32 %v7343_v3, %v1795_v0  ;;  %v1793_v16 = vadd.f32 %v1690_v35, %v10634_v8  ;;  %v7347_v19 = vpop.f32.mrf.mxu1  ;;  %v10635_v50 = vcombine.low %v9766_v4, %v9781_v60  ;;  %v10636_v5 = vsel %vm7922_vm2, %v9885_v58, %v9877_v48  ;;  %v7296_v11 = vpop.f32.mrf.mxu0 }
 0x147   : > { %v10637_v3 = vsel %vm7922_vm2, %v9875_v24, %v9852_v49  ;;  %v4432_v18 = vshll.u32 %v6490_v15, 16  ;;  %v10638_v62 = vcombine.low %v9814_v32, %v9827_v57  ;;  %v10010_v4 = vcombine.low %v4393_v47, %v4403_v23  ;;  %v6492_v57 = vld [vmem:[%s7878_s24 + $0xbc] sm:$0x1]  ;;  %v6552_v47 = vld [vmem:[%s7878_s24 + $0xb4] sm:$0xe] }
 0x148   : > { %7634 = vmatmul.mubr.bf16.gmra.mxu1 %v10635_v50  ;;  %v10005_v51 = vcombine.low %v10637_v3, %v10636_v5  ;;  %v6598_v60 = vcombine.low %v9962_v28, %v9973_v9  ;;  %v4431_v21 = vrot.slane %v4429_v25, 4  ;;  %v4438_v48 = vshll.u32 %v9986_v31, 16  ;;  %v2093_v24 = vpop.f32.mrf.mxu1  ;;  %v1693_v23 = vpop.f32.mrf.mxu0  ;;  %v6493_v50 = vld [vmem:[%s7878_s24 + $0xc0] sm:$0xf]  ;;  %v10043_v3 = vld [vmem:[%s7878_s24 + $0xc4] sm:$0xf] }
 0x149   : > { %7637 = vmatprep.mubr.bf16.mxu1 %v10638_v62  ;;  %v10015_v58 = vadd.f32 %v2077_v33, %v1793_v16  ;;  %v1796_v49 = vadd.f32 %v7296_v11, %v10639_v36  ;;  %v4417_v15 = vsel %vm7922_vm2, %v4412_v39, %v9964_v45  ;;  %v10023_v32 = vsel %vm8276_vm5, %v6567_v63, %v4972_v30  ;;  %v10640_v45 = vld [vmem:[#allocation10_spill] sm:$0xff]  ;;  %v6498_v9 = vld [vmem:[%s7878_s24 + $0xd4] sm:$0x1] }
 0x14a   : > { %v4427_v0 = vsel %vm7922_vm2, %v4422_v56, %v4426_v34  ;;  %v10031_v33 = vsel %vm8276_vm5, %v4974_v43, %v4975_v42  ;;  %v4434_v35 = vrot.slane %v4432_v18, 5  ;;  %v4442_v25 = vshrl.u32 %v9986_v31, 16  ;;  %v7348_v30 = vpop.f32.mrf.mxu1  ;;  %v7299_v5 = vpop.f32.mrf.mxu0 }
 0x14b   : > { %v10034_v8 = vadd.f32 %v7344_v1, %v1796_v49  ;;  %v1794_v39 = vadd.f32 %v1693_v23, %v10640_v45  ;;  %v10037_v63 = vrot.slane %v4438_v48, 5  ;;  %v4979_v16 = vrot.slane %v9986_v31, 5  ;;  %v10641_v1 = vld [vmem:[#allocation11_spill] sm:$0xff] }
 0x14c   : > { %7586 = vmatmul.mubr.bf16.gmra.mxu0 %v9799_v54  ;;  %v4435_v34 = vor.u32 %v4434_v35, %v4431_v21  ;;  %v4444_v56 = vrot.slane %v4442_v25, 4  ;;  %v4448_v43 = vshll.u32 %v6492_v57, 16  ;;  %v6568_v42 = vrot.slane %v6552_v47, 9  ;;  %v2096_v62 = vpop.f32.mrf.mxu1  ;;  %v1706_v36 = vpop.f32.mrf.mxu0 }
 0x14d   : > { %v10045_v18 = vadd.f32 %v2080_v13, %v1794_v39  ;;  %v1799_v11 = vadd.f32 %v7299_v5, %v10641_v1  ;;  %7589 = vmatprep.mubr.bf16.mxu0 %v9844_v6  ;;  %v4981_v48 = vrot.slane %v4979_v16, 4  ;;  %v4982_v31 = vrot.slane %v6492_v57, 5  ;;  %v6495_v57 = vld [vmem:[%s7878_s24 + $0xc8] sm:$0x1]  ;;  %v6553_v39 = vld [vmem:[%s7878_s24 + $0xc0] sm:$0xe] }
 0x14e   : > { %v10049_v49 = vcombine.low %v4417_v15, %v4427_v0  ;;  %v10051_v54 = vrot.slane %v4435_v34, 4  ;;  %v4453_v21 = vshrl.u32 %v6493_v50, 16  ;;  %v4456_v47 = vshll.u32 %v6493_v50, 16  ;;  %v7351_v35 = vpop.f32.mrf.mxu1  ;;  %v7300_v0 = vpop.f32.mrf.mxu0 }
 0x14f   : > { %v10053_v23 = vadd.f32 %v7347_v19, %v1799_v11  ;;  %v1797_v13 = vadd.f32 %v1706_v36, %v9558_v52  ;;  %v10642_v25 = vcombine.low %v9850_v7, %v9863_v10  ;;  %v6599_v6 = vcombine.low %v10023_v32, %v10031_v33 }
 0x150   : > { %v4462_v15 = vshll.u32 %v10043_v3, 16  ;;  %v10643_v45 = vcombine.low %v9900_v41, %v9904_v20  ;;  %v4445_v19 = vor.u32 %v4444_v56, %v10037_v63  ;;  %v10067_v52 = vrot.slane %v4448_v43, 5  ;;  %v2109_v50 = vpop.f32.mrf.mxu1  ;;  %v1709_v5 = vpop.f32.mrf.mxu0  ;;  %v6496_v43 = vld [vmem:[%s7878_s24 + $0xcc] sm:$0xf] }
 0x151   : > { %7638 = vmatmul.mubr.bf16.gmra.mxu1 %v10642_v25  ;;  %v10071_v7 = vsel %vm8276_vm5, %v6568_v42, %v4979_v16  ;;  %v4455_v10 = vrot.slane %v4453_v21, 4  ;;  %v10074_v32 = vadd.f32 %v2093_v24, %v1797_v13  ;;  %v1800_v33 = vadd.f32 %v7300_v0, %v9579_v27  ;;  %v10644_v27 = vld [vmem:[#allocation12_spill] sm:$0xff]  ;;  %v10645_v0 = vld [vmem:[#allocation13_spill] sm:$0xff] }
 0x152   : > { %7641 = vmatprep.mubr.bf16.mxu1 %v10643_v45  ;;  %v10079_v41 = vsel %vm8276_vm5, %v4981_v48, %v4982_v31  ;;  %v4458_v20 = vrot.slane %v4456_v47, 5  ;;  %v10085_v16 = vrot.slane %v4462_v15, 5  ;;  %v4466_v56 = vshrl.u32 %v10043_v3, 16  ;;  %v7352_v11 = vpop.f32.mrf.mxu1  ;;  %v7303_v36 = vpop.f32.mrf.mxu0 }
 0x153   : > { %v4472_v24 = vshll.u32 %v6495_v57, 16  ;;  %v10089_v42 = vadd.f32 %v7348_v30, %v1800_v33  ;;  %v1798_v1 = vadd.f32 %v1709_v5, %v10644_v27  ;;  %v6569_v31 = vrot.slane %v6553_v39, 9  ;;  %v6497_v5 = vld [vmem:[%s7878_s24 + $0xd0] sm:$0xf] }
 0x154   : > { %v4459_v48 = vor.u32 %v4458_v20, %v4455_v10  ;;  %7590 = vmatmul.mubr.bf16.gmra.mxu0 %v9907_v22  ;;  %v10093_v21 = vrot.slane %v4445_v19, 4  ;;  %v4468_v47 = vrot.slane %v4466_v56, 4  ;;  %v4986_v13 = vrot.slane %v10043_v3, 5  ;;  %v2112_v45 = vpop.f32.mrf.mxu1  ;;  %v1722_v39 = vpop.f32.mrf.mxu0  ;;  %v10646_v3 = vld [vmem:[#allocation14_spill] sm:$0xff] }
 0x155   : > { %v4989_v25 = vrot.slane %v6495_v57, 5  ;;  %v10096_v15 = vadd.f32 %v2096_v62, %v1798_v1  ;;  %v1803_v30 = vadd.f32 %v7303_v36, %v10645_v0  ;;  %7593 = vmatprep.mubr.bf16.mxu0 %v10005_v51  ;;  %v4474_v33 = vrot.slane %v4472_v24, 5  ;;  %v10647_v0 = vld [vmem:[#allocation15_spill] sm:$0xff] }
 0x156   : > { %v4477_v10 = vshrl.u32 %v6496_v43, 16  ;;  %v4460_v20 = vrot.slane %v4459_v48, 4  ;;  %v4469_v22 = vor.u32 %v4468_v47, %v10085_v16  ;;  %v4988_v19 = vrot.slane %v4986_v13, 4  ;;  %v7355_v57 = vpop.f32.mrf.mxu1  ;;  %v7304_v1 = vpop.f32.mrf.mxu0 }
 0x157   : > { %v4480_v27 = vshll.u32 %v6496_v43, 16  ;;  %v10102_v56 = vadd.f32 %v7351_v35, %v1803_v30  ;;  %v1801_v62 = vadd.f32 %v1722_v39, %v10646_v3  ;;  %v4987_v51 = vsel %vm8276_vm5, %v6569_v31, %v4986_v13  ;;  %v6554_v31 = vld [vmem:[%s7878_s24 + $0xcc] sm:$0xe]  ;;  %s6677_s24 = sshll.u32 %s10719_s22, 7 }
 0x158   : > { %v4479_v24 = vrot.slane %v4477_v10, 4  ;;  %v4470_v48 = vrot.slane %v4469_v22, 4  ;;  %v4990_v35 = vsel %vm8276_vm5, %v4988_v19, %v4989_v25  ;;  %v4486_v36 = vshll.u32 %v6497_v5, 16  ;;  %v2125_v39 = vpop.f32.mrf.mxu1  ;;  %v1725_v13 = vpop.f32.mrf.mxu0  ;;  %v10648_v19 = vld [vmem:[#allocation16_spill] sm:$0xff]  ;;  %s10188_s17 = scalar_lea.vmem %s10544_s4, %s6677_s24  ;;  %s10449_s27 = scalar_lea.vmem %s10543_s3, %s6677_s24 }
 0x159   : > { %7642 = vmatmul.mubr.bf16.gmra.mxu1 %v6598_v60  ;;  %v4482_v43 = vrot.slane %v4480_v27, 5  ;;  %v10112_v47 = vadd.f32 %v2109_v50, %v1801_v62  ;;  %v1804_v30 = vadd.f32 %v7304_v1, %v10647_v0  ;;  %v6600_v28 = vcombine.low %v10071_v7, %v10079_v41 }
 0x15a   : > { %7645 = vmatprep.mubr.bf16.mxu1 %v6599_v6  ;;  %v4490_v60 = vshrl.u32 %v6497_v5, 16  ;;  %v4451_v6 = vsel %vm7922_vm2, %v10093_v21, %v10067_v52  ;;  %v4465_v50 = vsel %vm7922_vm2, %v4460_v20, %v10085_v16  ;;  %v6601_v25 = vcombine.low %v4987_v51, %v4990_v35  ;;  %v7356_v7 = vpop.f32.mrf.mxu1  ;;  %v7307_v62 = vpop.f32.mrf.mxu0  ;;  %v10649_v16 = vld [vmem:[#allocation17_spill] sm:$0xff] }
 0x15b   : > { %v4488_v10 = vrot.slane %v4486_v36, 5  ;;  %v10126_v22 = vadd.f32 %v7352_v11, %v1804_v30  ;;  %v1802_v27 = vadd.f32 %v1725_v13, %v10648_v19  ;;  %v4475_v41 = vsel %vm7922_vm2, %v4470_v48, %v4474_v33  ;;  %v10650_v48 = vld [vmem:[#allocation18_spill] sm:$0xff]  ;;  %v10652_v13 = vld [vmem:[#allocation19_spill] sm:$0xff] }
 0x15c   : > { %v4492_v3 = vrot.slane %v4490_v60, 4  ;;  %7594 = vmatmul.mubr.bf16.gmra.mxu0 %v10010_v4  ;;  %v4483_v1 = vor.u32 %v4482_v43, %v4479_v24  ;;  %v4496_v52 = vshll.u32 %v6498_v9, 16  ;;  %v6570_v21 = vrot.slane %v6554_v31, 9  ;;  %v2128_v11 = vpop.f32.mrf.mxu1  ;;  %v1738_v36 = vpop.f32.mrf.mxu0 }
 0x15d   : > { %v4993_v0 = vrot.slane %v6497_v5, 5  ;;  %v10132_v34 = vadd.f32 %v2112_v45, %v1802_v27  ;;  %v1807_v20 = vadd.f32 %v7307_v62, %v10649_v16  ;;  %7597 = vmatprep.mubr.bf16.mxu0 %v10049_v49  ;;  %v4996_v35 = vrot.slane %v6498_v9, 5 }
 0x15e   : > { %v4493_v51 = vor.u32 %v4492_v3, %v4488_v10  ;;  %v1805_v60 = vadd.f32 %v1738_v36, %v10650_v48  ;;  %v7359_v4 = vpop.f32.mrf.mxu1  ;;  %v10651_v45 = vsel %vm7922_vm2, %v10051_v54, %v10037_v63  ;;  %v7308_v24 = vpop.f32.mrf.mxu0  ;;  %v6529_v43 = vcombine.low %v4465_v50, %v4475_v41 }
 0x15f   : > { %v4995_v30 = vrot.slane %v4993_v0, 4  ;;  %v10136_v33 = vadd.f32 %v7355_v57, %v1807_v20  ;;  %v6528_v5 = vcombine.low %v10651_v45, %v4451_v6  ;;  %v4484_v49 = vrot.slane %v4483_v1, 4 }
 0x160   : > { %v4994_v9 = vsel %vm8276_vm5, %v6570_v21, %v4993_v0  ;;  %v10148_v31 = vadd.f32 %v2125_v39, %v1805_v60  ;;  %v1808_v19 = vadd.f32 %v7308_v24, %v10652_v13  ;;  %v2141_v27 = vpop.f32.mrf.mxu1  ;;  %v4494_v3 = vrot.slane %v4493_v51, 4  ;;  %v1741_v63 = vpop.f32.mrf.mxu0 }
 0x161   : > { %7646 = vmatmul.mubr.bf16.gmra.mxu1 %v6600_v28  ;;  %v4997_v57 = vsel %vm8276_vm5, %v4995_v30, %v4996_v35  ;;  %v4498_v62 = vrot.slane %v4496_v52, 5  ;;  %v10653_v28 = vld [vmem:[#allocation20_spill] sm:$0xff]  ;;  %v4489_v21 = vsel %vm7922_vm2, %v4484_v49, %v4488_v10 }
 0x162   : > { %7649 = vmatprep.mubr.bf16.mxu1 %v6601_v25  ;;  %v10151_v54 = vadd.f32 %v7356_v7, %v1808_v19  ;;  %v1806_v6 = vadd.f32 %v1741_v63, %v10653_v28  ;;  %v7360_v50 = vpop.f32.mrf.mxu1  ;;  %v6602_v25 = vcombine.low %v4994_v9, %v4997_v57  ;;  %v7311_v41 = vpop.f32.mrf.mxu0 }
 0x163   : > { %v1811_v12 = vadd.f32 %v7311_v41, %v9759_v61  ;;  %v4499_v52 = vsel %vm7922_vm2, %v4494_v3, %v4498_v62 }
 0x164   : > { %7598 = vmatmul.mubr.bf16.gmra.mxu0 %v6528_v5  ;;  %v10154_v1 = vadd.f32 %v2128_v11, %v1806_v6  ;;  %v2144_v39 = vpop.f32.mrf.mxu1  ;;  %v1754_v7 = vpop.f32.mrf.mxu0  ;;  %v6530_v11 = vcombine.low %v4489_v21, %v4499_v52 }
 0x165   : > { %7601 = vmatprep.mubr.bf16.mxu0 %v6529_v43  ;;  %v10161_v0 = vadd.f32 %v7359_v4, %v1811_v12  ;;  %v1809_v16 = vadd.f32 %v1754_v7, %v9783_v59 }
 0x166   : > { %v7363_v20 = vpop.f32.mrf.mxu1  ;;  %v7312_v51 = vpop.f32.mrf.mxu0 }
 0x167   : > { %v10164_v35 = vadd.f32 %v2141_v27, %v1809_v16  ;;  %v1812_v61 = vadd.f32 %v7312_v51, %v9791_v37  ;;  %v10654_v27 = vld [vmem:[#allocation21_spill] sm:$0xff] }
 0x168   : > { %v2157_v36 = vpop.f32.mrf.mxu1  ;;  %v1757_v30 = vpop.f32.mrf.mxu0 }
 0x169   : > { %7650 = vmatmul.mubr.bf16.gmra.mxu1 %v6602_v25  ;;  %v10167_v10 = vadd.f32 %v7360_v50, %v1812_v61  ;;  %v1810_v38 = vadd.f32 %v1757_v30, %v9797_v17 }
 0x16a   : > { %v7364_v48 = vpop.f32.mrf.mxu1  ;;  %v7315_v60 = vpop.f32.mrf.mxu0 }
 0x16b   : > { %v10170_v59 = vadd.f32 %v2144_v39, %v1810_v38  ;;  %v1815_v4 = vadd.f32 %v7315_v60, %v9816_v29  ;;  %v10655_v38 = vld [vmem:[#allocation2_spill] sm:$0xff] }
 0x16c   : > { %7602 = vmatmul.mubr.bf16.gmra.mxu0 %v6530_v11  ;;  %v2160_v45 = vpop.f32.mrf.mxu1  ;;  %v1770_v5 = vpop.f32.mrf.mxu0 }
 0x16d   : > { %v10173_v24 = vadd.f32 %v7363_v20, %v1815_v4  ;;  %v1813_v37 = vadd.f32 %v1770_v5, %v9831_v44 }
 0x16e   : > { %v7431_v43 = vpop.f32.mrf.mxu1  ;;  %v7316_v49 = vpop.f32.mrf.mxu0 }
 0x16f   : > { %v10177_v9 = vadd.f32 %v2157_v36, %v1813_v37  ;;  %v1816_v17 = vadd.f32 %v7316_v49, %v9842_v55  ;;  %v5788_v52 = vmul.f32 %v7431_v43, %v7431_v43 }
 0x170   : > { %v3056_v57 = vpop.f32.mrf.mxu1  ;;  %v1773_v13 = vpop.f32.mrf.mxu0 }
 0x171   : > { %v10180_v19 = vadd.f32 %v7364_v48, %v1816_v17  ;;  %v1814_v3 = vadd.f32 %v1773_v13, %v10654_v27  ;;  %v5786_v50 = vmul.f32 %v3056_v57, %v3056_v57 }
 0x172   : > { %v7432_v29 = vpop.f32.mrf.mxu1  ;;  %v7383_v44 = vpop.f32.mrf.mxu0 }
 0x173   : > { %v6831_v62 = vpack.c.bf16 %v7432_v29, %v7431_v43  ;;  %v10190_v63 = vadd.f32 %v2160_v45, %v1814_v3  ;;  %v10193_v55 = vadd.f32 %v7383_v44, %v9879_v14  ;;  %v5789_v11 = vmul.f32 %v7432_v29, %v7432_v29  ;;  %v10656_v3 = vld [vmem:[#allocation3_spill] sm:$0xff] }
 0x174   : > { %v3059_v28 = vpop.f32.mrf.mxu1  ;;  %v2799_v6 = vpop.f32.mrf.mxu0 }
 0x175   : > { %6918 = vst [vmem:[%s10188_s17 + $0x8] sm:$0xff] %v6831_v62   ;;  %v6826_v25 = vpack.c.bf16 %v3059_v28, %v3056_v57  ;;  %v5749_v41 = vadd.f32 %v3059_v28, %v3056_v57  ;;  %v5787_v12 = vmul.f32 %v3059_v28, %v3059_v28  ;;  %v10197_v39 = vadd.f32 %v2799_v6, %v9895_v2 }
 0x176   : > { %v7435_v21 = vpop.f32.mrf.mxu1  ;;  %v7384_v7 = vpop.f32.mrf.mxu0 }
 0x177   : > { %6827 = vst [vmem:[%s10188_s17] sm:$0xff] %v6826_v25   ;;  %v5750_v16 = vadd.f32 %v7431_v43, %v5749_v41  ;;  %v5818_v20 = vadd.f32 %v5787_v12, %v5786_v50  ;;  %v10201_v51 = vadd.f32 %v7384_v7, %v9913_v53  ;;  %v5792_v62 = vmul.f32 %v7435_v21, %v7435_v21  ;;  %v10657_v25 = vld [vmem:[#allocation5_spill] sm:$0xff] }
 0x178   : > { %v3072_v14 = vpop.f32.mrf.mxu1  ;;  %v2802_v61 = vpop.f32.mrf.mxu0 }
 0x179   : > { %v5819_v36 = vadd.f32 %v5818_v20, %v5788_v52  ;;  %v5751_v30 = vadd.f32 %v7432_v29, %v5750_v16  ;;  %v10204_v48 = vadd.f32 %v2802_v61, %v10655_v38  ;;  %v5790_v45 = vmul.f32 %v3072_v14, %v3072_v14 }
 0x17a   : > { %v7436_v2 = vpop.f32.mrf.mxu1  ;;  %v7387_v60 = vpop.f32.mrf.mxu0 }
 0x17b   : > { %v5752_v4 = vadd.f32 %v5751_v30, %v3072_v14  ;;  %v5820_v5 = vadd.f32 %v5819_v36, %v5789_v11  ;;  %v6841_v37 = vpack.c.bf16 %v7436_v2, %v7435_v21  ;;  %v10207_v43 = vadd.f32 %v7387_v60, %v9939_v40 }
 0x17c   : > { %v3075_v53 = vpop.f32.mrf.mxu1  ;;  %v2815_v49 = vpop.f32.mrf.mxu0  ;;  %v5793_v12 = vmul.f32 %v7436_v2, %v7436_v2 }
 0x17d   : > { %v5821_v17 = vadd.f32 %v5820_v5, %v5790_v45  ;;  %6920 = vst [vmem:[%s10188_s17 + $0x18] sm:$0xff] %v6841_v37   ;;  %v6836_v57 = vpack.c.bf16 %v3075_v53, %v3072_v14  ;;  %v5753_v13 = vadd.f32 %v5752_v4, %v3075_v53  ;;  %v5791_v27 = vmul.f32 %v3075_v53, %v3075_v53 }
 0x17e   : > { %v10211_v29 = vadd.f32 %v2815_v49, %v10656_v3  ;;  %v7439_v44 = vpop.f32.mrf.mxu1  ;;  %v7388_v28 = vpop.f32.mrf.mxu0 }
 0x17f   : > { %6919 = vst [vmem:[%s10188_s17 + $0x10] sm:$0xff] %v6836_v57   ;;  %v5754_v6 = vadd.f32 %v7435_v21, %v5753_v13  ;;  %v5822_v50 = vadd.f32 %v5821_v17, %v5791_v27  ;;  %v10215_v41 = vadd.f32 %v7388_v28, %v10657_v25  ;;  %v5796_v49 = vmul.f32 %v7439_v44, %v7439_v44 }
 0x180   : > { %v3088_v40 = vpop.f32.mrf.mxu1  ;;  %v2818_v52 = vpop.f32.mrf.mxu0 }
 0x181   : > { %v5823_v7 = vadd.f32 %v5822_v50, %v5792_v62  ;;  %v5755_v16 = vadd.f32 %v7436_v2, %v5754_v6  ;;  %v10218_v20 = vadd.f32 %v2818_v52, %v9981_v46  ;;  %v5794_v36 = vmul.f32 %v3088_v40, %v3088_v40 }
 0x182   : > { %v7440_v14 = vpop.f32.mrf.mxu1  ;;  %v7391_v11 = vpop.f32.mrf.mxu0 }
 0x183   : > { %v5756_v61 = vadd.f32 %v5755_v16, %v3088_v40  ;;  %v5824_v30 = vadd.f32 %v5823_v7, %v5793_v12  ;;  %v6851_v21 = vpack.c.bf16 %v7440_v14, %v7439_v44  ;;  %v10221_v38 = vadd.f32 %v7391_v11, %v9989_v26 }
 0x184   : > { %v3091_v60 = vpop.f32.mrf.mxu1  ;;  %v2831_v4 = vpop.f32.mrf.mxu0  ;;  %v5797_v3 = vmul.f32 %v7440_v14, %v7440_v14 }
 0x185   : > { %v5825_v45 = vadd.f32 %v5824_v30, %v5794_v36  ;;  %6922 = vst [vmem:[%s10188_s17 + $0x28] sm:$0xff] %v6851_v21   ;;  %v6846_v5 = vpack.c.bf16 %v3091_v60, %v3088_v40  ;;  %v5757_v37 = vadd.f32 %v5756_v61, %v3091_v60  ;;  %v5795_v2 = vmul.f32 %v3091_v60, %v3091_v60 }
 0x186   : > { %v10225_v46 = vadd.f32 %v2831_v4, %v10015_v58  ;;  %v7443_v53 = vpop.f32.mrf.mxu1  ;;  %v7392_v17 = vpop.f32.mrf.mxu0 }
 0x187   : > { %6921 = vst [vmem:[%s10188_s17 + $0x20] sm:$0xff] %v6846_v5   ;;  %v5758_v57 = vadd.f32 %v7439_v44, %v5757_v37  ;;  %v5826_v13 = vadd.f32 %v5825_v45, %v5795_v2  ;;  %v10229_v27 = vadd.f32 %v7392_v17, %v10034_v8  ;;  %v5800_v21 = vmul.f32 %v7443_v53, %v7443_v53 }
 0x188   : > { %v3104_v26 = vpop.f32.mrf.mxu1  ;;  %v2834_v62 = vpop.f32.mrf.mxu0 }
 0x189   : > { %v5827_v28 = vadd.f32 %v5826_v13, %v5796_v49  ;;  %v5759_v6 = vadd.f32 %v7440_v14, %v5758_v57  ;;  %v10232_v50 = vadd.f32 %v2834_v62, %v10045_v18  ;;  %v5798_v12 = vmul.f32 %v3104_v26, %v3104_v26 }
 0x18a   : > { %v7444_v58 = vpop.f32.mrf.mxu1  ;;  %v7395_v25 = vpop.f32.mrf.mxu0 }
 0x18b   : > { %v5760_v40 = vadd.f32 %v5759_v6, %v3104_v26  ;;  %v5828_v52 = vadd.f32 %v5827_v28, %v5797_v3  ;;  %v6861_v44 = vpack.c.bf16 %v7444_v58, %v7443_v53  ;;  %v10235_v7 = vadd.f32 %v7395_v25, %v10053_v23 }
 0x18c   : > { %v3107_v8 = vpop.f32.mrf.mxu1  ;;  %v2847_v16 = vpop.f32.mrf.mxu0  ;;  %v5801_v37 = vmul.f32 %v7444_v58, %v7444_v58 }
 0x18d   : > { %v5829_v11 = vadd.f32 %v5828_v52, %v5798_v12  ;;  %6924 = vst [vmem:[%s10188_s17 + $0x38] sm:$0xff] %v6861_v44   ;;  %v6856_v61 = vpack.c.bf16 %v3107_v8, %v3104_v26  ;;  %v5761_v36 = vadd.f32 %v5760_v40, %v3107_v8  ;;  %v5799_v14 = vmul.f32 %v3107_v8, %v3107_v8 }
 0x18e   : > { %v10239_v18 = vadd.f32 %v2847_v16, %v10074_v32  ;;  %v7447_v30 = vpop.f32.mrf.mxu1  ;;  %v7396_v60 = vpop.f32.mrf.mxu0 }
 0x18f   : > { %6923 = vst [vmem:[%s10188_s17 + $0x30] sm:$0xff] %v6856_v61   ;;  %v5762_v4 = vadd.f32 %v7443_v53, %v5761_v36  ;;  %v5830_v45 = vadd.f32 %v5829_v11, %v5799_v14  ;;  %v10243_v5 = vadd.f32 %v7396_v60, %v10089_v42  ;;  %v5804_v44 = vmul.f32 %v7447_v30, %v7447_v30 }
 0x190   : > { %v3120_v23 = vpop.f32.mrf.mxu1  ;;  %v2850_v2 = vpop.f32.mrf.mxu0 }
 0x191   : > { %v5831_v49 = vadd.f32 %v5830_v45, %v5800_v21  ;;  %v5763_v17 = vadd.f32 %v7444_v58, %v5762_v4  ;;  %v10246_v57 = vadd.f32 %v2850_v2, %v10096_v15  ;;  %v5802_v3 = vmul.f32 %v3120_v23, %v3120_v23 }
 0x192   : > { %v7448_v32 = vpop.f32.mrf.mxu1  ;;  %v7399_v13 = vpop.f32.mrf.mxu0 }
 0x193   : > { %v5764_v26 = vadd.f32 %v5763_v17, %v3120_v23  ;;  %v5832_v62 = vadd.f32 %v5831_v49, %v5801_v37  ;;  %v6871_v53 = vpack.c.bf16 %v7448_v32, %v7447_v30  ;;  %v10249_v28 = vadd.f32 %v7399_v13, %v10102_v56 }
 0x194   : > { %v3123_v42 = vpop.f32.mrf.mxu1  ;;  %v2863_v6 = vpop.f32.mrf.mxu0  ;;  %v5805_v36 = vmul.f32 %v7448_v32, %v7448_v32 }
 0x195   : > { %v5833_v25 = vadd.f32 %v5832_v62, %v5802_v3  ;;  %6926 = vst [vmem:[%s10188_s17 + $0x48] sm:$0xff] %v6871_v53   ;;  %v6866_v40 = vpack.c.bf16 %v3123_v42, %v3120_v23  ;;  %v5765_v12 = vadd.f32 %v5764_v26, %v3123_v42  ;;  %v5803_v58 = vmul.f32 %v3123_v42, %v3123_v42 }
 0x196   : > { %v10253_v15 = vadd.f32 %v2863_v6, %v10112_v47  ;;  %v7451_v52 = vpop.f32.mrf.mxu1  ;;  %v7400_v8 = vpop.f32.mrf.mxu0 }
 0x197   : > { %6925 = vst [vmem:[%s10188_s17 + $0x40] sm:$0xff] %v6866_v40   ;;  %v5766_v16 = vadd.f32 %v7447_v30, %v5765_v12  ;;  %v5834_v11 = vadd.f32 %v5833_v25, %v5803_v58  ;;  %v10257_v61 = vadd.f32 %v7400_v8, %v10126_v22  ;;  %v5808_v53 = vmul.f32 %v7451_v52, %v7451_v52 }
 0x198   : > { %v3136_v56 = vpop.f32.mrf.mxu1  ;;  %v2866_v14 = vpop.f32.mrf.mxu0 }
 0x199   : > { %v5835_v21 = vadd.f32 %v5834_v11, %v5804_v44  ;;  %v5767_v60 = vadd.f32 %v7448_v32, %v5766_v16  ;;  %v10260_v4 = vadd.f32 %v2866_v14, %v10132_v34  ;;  %v5806_v37 = vmul.f32 %v3136_v56, %v3136_v56 }
 0x19a   : > { %v7452_v47 = vpop.f32.mrf.mxu1  ;;  %v7403_v45 = vpop.f32.mrf.mxu0 }
 0x19b   : > { %v5768_v23 = vadd.f32 %v5767_v60, %v3136_v56  ;;  %v5836_v2 = vadd.f32 %v5835_v21, %v5805_v36  ;;  %v6881_v30 = vpack.c.bf16 %v7452_v47, %v7451_v52  ;;  %v10263_v49 = vadd.f32 %v7403_v45, %v10136_v33 }
 0x19c   : > { %v3139_v22 = vpop.f32.mrf.mxu1  ;;  %v2879_v17 = vpop.f32.mrf.mxu0  ;;  %v5809_v12 = vmul.f32 %v7452_v47, %v7452_v47 }
 0x19d   : > { %v5837_v13 = vadd.f32 %v5836_v2, %v5806_v37  ;;  %6928 = vst [vmem:[%s10188_s17 + $0x58] sm:$0xff] %v6881_v30   ;;  %v6876_v26 = vpack.c.bf16 %v3139_v22, %v3136_v56  ;;  %v5769_v3 = vadd.f32 %v5768_v23, %v3139_v22  ;;  %v5807_v32 = vmul.f32 %v3139_v22, %v3139_v22 }
 0x19e   : > { %v10267_v34 = vadd.f32 %v2879_v17, %v10148_v31  ;;  %v7455_v62 = vpop.f32.mrf.mxu1  ;;  %v7404_v42 = vpop.f32.mrf.mxu0 }
 0x19f   : > { %6927 = vst [vmem:[%s10188_s17 + $0x50] sm:$0xff] %v6876_v26   ;;  %v5770_v6 = vadd.f32 %v7451_v52, %v5769_v3  ;;  %v5838_v25 = vadd.f32 %v5837_v13, %v5807_v32  ;;  %v10271_v40 = vadd.f32 %v7404_v42, %v10151_v54  ;;  %v5812_v30 = vmul.f32 %v7455_v62, %v7455_v62 }
 0x1a0   : > { %10658 = vst [vmem:[#allocation4_spill] sm:$0xff] %v10267_v34  ;;  %v3152_v33 = vpop.f32.mrf.mxu1  ;;  %v2882_v58 = vpop.f32.mrf.mxu0 }
 0x1a1   : > { %10659 = vst [vmem:[#allocation6_spill] sm:$0xff] %v10271_v40  ;;  %v5839_v44 = vadd.f32 %v5838_v25, %v5808_v53  ;;  %v5771_v8 = vadd.f32 %v7452_v47, %v5770_v6  ;;  %v10274_v16 = vadd.f32 %v2882_v58, %v10154_v1  ;;  %v5810_v36 = vmul.f32 %v3152_v33, %v3152_v33 }
 0x1a2   : > { %v7456_v31 = vpop.f32.mrf.mxu1  ;;  %v7407_v11 = vpop.f32.mrf.mxu0 }
 0x1a3   : > { %10660 = vst [vmem:[#allocation7_spill] sm:$0xff] %v10274_v16  ;;  %v5772_v56 = vadd.f32 %v5771_v8, %v3152_v33  ;;  %v5840_v14 = vadd.f32 %v5839_v44, %v5809_v12  ;;  %v6891_v52 = vpack.c.bf16 %v7456_v31, %v7455_v62  ;;  %v10277_v21 = vadd.f32 %v7407_v11, %v10161_v0 }
 0x1a4   : > { %v3155_v54 = vpop.f32.mrf.mxu1  ;;  %v2895_v60 = vpop.f32.mrf.mxu0  ;;  %v5813_v3 = vmul.f32 %v7456_v31, %v7456_v31 }
 0x1a5   : > { %v5841_v45 = vadd.f32 %v5840_v14, %v5810_v36  ;;  %6930 = vst [vmem:[%s10188_s17 + $0x68] sm:$0xff] %v6891_v52   ;;  %v6886_v23 = vpack.c.bf16 %v3155_v54, %v3152_v33  ;;  %v5773_v37 = vadd.f32 %v5772_v56, %v3155_v54  ;;  %v5811_v47 = vmul.f32 %v3155_v54, %v3155_v54 }
 0x1a6   : > { %v10281_v1 = vadd.f32 %v2895_v60, %v10164_v35  ;;  %v7459_v2 = vpop.f32.mrf.mxu1  ;;  %v7408_v22 = vpop.f32.mrf.mxu0 }
 0x1a7   : > { %6929 = vst [vmem:[%s10188_s17 + $0x60] sm:$0xff] %v6886_v23   ;;  %v5774_v17 = vadd.f32 %v7455_v62, %v5773_v37  ;;  %v5842_v13 = vadd.f32 %v5841_v45, %v5811_v47  ;;  %v10285_v26 = vadd.f32 %v7408_v22, %v10167_v10  ;;  %v5816_v52 = vmul.f32 %v7459_v2, %v7459_v2 }
 0x1a8   : > { %10661 = vst [vmem:[#allocation8_spill] sm:$0xff] %v10281_v1  ;;  %v3168_v0 = vpop.f32.mrf.mxu1  ;;  %v2898_v32 = vpop.f32.mrf.mxu0 }
 0x1a9   : > { %10662 = vst [vmem:[#allocation9_spill] sm:$0xff] %v10285_v26  ;;  %v5843_v53 = vadd.f32 %v5842_v13, %v5812_v30  ;;  %v5775_v42 = vadd.f32 %v7456_v31, %v5774_v17  ;;  %v10288_v6 = vadd.f32 %v2898_v32, %v10170_v59  ;;  %v5814_v12 = vmul.f32 %v3168_v0, %v3168_v0 }
 0x1aa   : > { %v7460_v35 = vpop.f32.mrf.mxu1  ;;  %v7411_v25 = vpop.f32.mrf.mxu0 }
 0x1ab   : > { %10663 = vst [vmem:[#allocation10_spill] sm:$0xff] %v10288_v6  ;;  %v5776_v33 = vadd.f32 %v5775_v42, %v3168_v0  ;;  %v5844_v58 = vadd.f32 %v5843_v53, %v5813_v3  ;;  %v6901_v62 = vpack.c.bf16 %v7460_v35, %v7459_v2  ;;  %v10291_v44 = vadd.f32 %v7411_v25, %v10173_v24 }
 0x1ac   : > { %v3171_v10 = vpop.f32.mrf.mxu1  ;;  %v2911_v8 = vpop.f32.mrf.mxu0  ;;  %v5817_v37 = vmul.f32 %v7460_v35, %v7460_v35 }
 0x1ad   : > { %v5845_v11 = vadd.f32 %v5844_v58, %v5814_v12  ;;  %6932 = vst [vmem:[%s10188_s17 + $0x78] sm:$0xff] %v6901_v62   ;;  %v6896_v56 = vpack.c.bf16 %v3171_v10, %v3168_v0  ;;  %v5777_v36 = vadd.f32 %v5776_v33, %v3171_v10  ;;  %v5815_v31 = vmul.f32 %v3171_v10, %v3171_v10 }
 0x1ae   : > { %v10295_v59 = vadd.f32 %v2911_v8, %v10177_v9  ;;  %v7527_v14 = vpop.f32.mrf.mxu1  ;;  %v7412_v54 = vpop.f32.mrf.mxu0 }
 0x1af   : > { %6931 = vst [vmem:[%s10188_s17 + $0x70] sm:$0xff] %v6896_v56   ;;  %v5778_v60 = vadd.f32 %v7459_v2, %v5777_v36  ;;  %v5846_v45 = vadd.f32 %v5845_v11, %v5815_v31  ;;  %v10299_v23 = vadd.f32 %v7412_v54, %v10180_v19 }
 0x1b0   : > { %10664 = vst [vmem:[#allocation11_spill] sm:$0xff] %v10295_v59  ;;  %v3909_v24 = vpop.f32.mrf.mxu1  ;;  %v2914_v47 = vpop.f32.mrf.mxu0 }
 0x1b1   : > { %10665 = vst [vmem:[#allocation12_spill] sm:$0xff] %v10299_v23  ;;  %v5779_v30 = vadd.f32 %v7460_v35, %v5778_v60  ;;  %v5847_v22 = vadd.f32 %v5846_v45, %v5816_v52  ;;  %v10302_v17 = vadd.f32 %v2914_v47, %v10190_v63 }
 0x1b2   : > { %v10304_v13 = vpop.f32.mrf.mxu1  ;;  %v7479_v3 = vpop.f32.mrf.mxu0 }
 0x1b3   : > { %10666 = vst [vmem:[#allocation13_spill] sm:$0xff] %v10302_v17  ;;  %v5780_v9 = vrot.slane %v5779_v30, 4  ;;  %v5848_v0 = vadd.f32 %v5847_v22, %v5817_v37  ;;  %v3651_v32 = vadd.f32 %v7479_v3, %v10193_v55 }
 0x1b4   : > { %v10307_v2 = vpop.f32.mrf.mxu1  ;;  %v3522_v42 = vpop.f32.mrf.mxu0 }
 0x1b5   : > { %v5781_v53 = vadd.f32 %v5780_v9, %v5779_v30  ;;  %v5849_v19 = vrot.slane %v5848_v0, 4  ;;  %v10309_v25 = vadd.f32 %v7527_v14, %v3651_v32  ;;  %v3649_v35 = vadd.f32 %v3522_v42, %v10197_v39 }
 0x1b6   : > { %v7531_v33 = vpop.f32.mrf.mxu1  ;;  %v10312_v58 = vpop.f32.mrf.mxu0 }
 0x1b7   : > { %v5782_v63 = vrot.slane %v5781_v53, 2  ;;  %v5850_v12 = vadd.f32 %v5849_v19, %v5848_v0  ;;  %v10314_v62 = vadd.f32 %v3909_v24, %v3649_v35 }
 0x1b8   : > { %v10316_v10 = vpop.f32.mrf.mxu1  ;;  %v10318_v11 = vpop.f32.mrf.mxu0 }
 0x1b9   : > { %v5783_v55 = vadd.f32 %v5782_v63, %v5781_v53  ;;  %v5851_v8 = vrot.slane %v5850_v12, 2 }
 0x1ba   : > { %v10320_v56 = vpop.f32.mrf.mxu1 }
 0x1bb   : > { %v5784_v36 = vrot.slane %v5783_v55, 1  ;;  %v5852_v31 = vadd.f32 %v5851_v8, %v5850_v12 }
 0x1bc   : > { %v7483_v14 = vpop.f32.mrf.mxu0  ;;  %v10324_v52 = vpop.f32.mrf.mxu1 }
 0x1bd   : > { %v3655_v39 = vadd.f32 %v7483_v14, %v10207_v43  ;;  %v5853_v54 = vrot.slane %v5852_v31, 1  ;;  %v5785_v37 = vadd.f32 %v5784_v36, %v5783_v55 }
 0x1be   : > { %v10326_v60 = vpop.f32.mrf.mxu0  ;;  %v7535_v24 = vpop.f32.mrf.mxu1 }
 0x1bf   : > { %v10328_v45 = vadd.f32 %v7531_v33, %v3655_v39  ;;  %v5854_v47 = vadd.f32 %v5853_v54, %v5852_v31 }
 0x1c0   : > { %v10335_v30 = vpop.f32.mrf.mxu0  ;;  %v10337_v22 = vpop.f32.mrf.mxu1 }
 0x1c1   : > { %v5855_v43 = vsel %vm5586_vm6, %v5785_v37, %v5854_v47 }
 0x1c2   : > { %v10340_v9 = vpop.f32.mrf.mxu0  ;;  %5856 = vst [vmem:[%s284_s23] sm:$0x3] %v5855_v43  ;;  %v10342_v0 = vpop.f32.mrf.mxu1 }
 0x1c4   : > { %v7487_v3 = vpop.f32.mrf.mxu0  ;;  %v10345_v53 = vpop.f32.mrf.mxu1 }
 0x1c5   : > { %v3659_v32 = vadd.f32 %v7487_v3, %v10221_v38 }
 0x1c6   : > { %v10347_v19 = vpop.f32.mrf.mxu0  ;;  %v7539_v35 = vpop.f32.mrf.mxu1 }
 0x1c7   : > { %v10349_v42 = vadd.f32 %v7535_v24, %v3659_v32 }
 0x1c8   : > { %v10351_v33 = vpop.f32.mrf.mxu0  ;;  %v10353_v63 = vpop.f32.mrf.mxu1 }
 0x1ca   : > { %v10355_v12 = vpop.f32.mrf.mxu0  ;;  %v10357_v55 = vpop.f32.mrf.mxu1 }
 0x1cc   : > { %v7491_v8 = vpop.f32.mrf.mxu0  ;;  %v10360_v31 = vpop.f32.mrf.mxu1 }
 0x1cd   : > { %v3663_v36 = vadd.f32 %v7491_v8, %v10235_v7 }
 0x1ce   : > { %v10362_v38 = vpop.f32.mrf.mxu0  ;;  %v7543_v39 = vpop.f32.mrf.mxu1 }
 0x1cf   : > { %v10364_v14 = vadd.f32 %v7539_v35, %v3663_v36 }
 0x1d0   : > { %v10366_v54 = vpop.f32.mrf.mxu0  ;;  %v10368_v24 = vpop.f32.mrf.mxu1 }
 0x1d2   : > { %v10370_v37 = vpop.f32.mrf.mxu0  ;;  %v10372_v47 = vpop.f32.mrf.mxu1 }
 0x1d4   : > { %v7495_v43 = vpop.f32.mrf.mxu0  ;;  %v10375_v32 = vpop.f32.mrf.mxu1 }
 0x1d5   : > { %v3667_v3 = vadd.f32 %v7495_v43, %v10249_v28  ;;  %10667 = vst [vmem:[#allocation14_spill] sm:$0xff] %v10375_v32 }
 0x1d6   : > { %v10377_v7 = vpop.f32.mrf.mxu0  ;;  %v7547_v35 = vpop.f32.mrf.mxu1 }
 0x1d7   : > { %v10379_v8 = vadd.f32 %v7543_v39, %v3667_v3 }
 0x1d8   : > { %v10381_v36 = vpop.f32.mrf.mxu0  ;;  %v10383_v17 = vpop.f32.mrf.mxu1 }
 0x1d9   : > { %10668 = vst [vmem:[#allocation15_spill] sm:$0xff] %v10383_v17 }
 0x1da   : > { %v10385_v23 = vpop.f32.mrf.mxu0  ;;  %v10387_v59 = vpop.f32.mrf.mxu1 }
 0x1db   : > { %10669 = vst [vmem:[#allocation16_spill] sm:$0xff] %v10387_v59 }
 0x1dc   : > { %v7499_v6 = vpop.f32.mrf.mxu0  ;;  %v10390_v1 = vpop.f32.mrf.mxu1 }
 0x1dd   : > { %v3671_v26 = vadd.f32 %v7499_v6, %v10263_v49  ;;  %10670 = vst [vmem:[#allocation17_spill] sm:$0xff] %v10390_v1 }
 0x1de   : > { %v10392_v28 = vpop.f32.mrf.mxu0  ;;  %v7551_v39 = vpop.f32.mrf.mxu1 }
 0x1df   : > { %v10394_v43 = vadd.f32 %v7547_v35, %v3671_v26 }
 0x1e0   : > { %v10396_v3 = vpop.f32.mrf.mxu0  ;;  %v10398_v16 = vpop.f32.mrf.mxu1 }
 0x1e1   : > { %10671 = vst [vmem:[#allocation18_spill] sm:$0xff] %v10394_v43  ;;  %10672 = vst [vmem:[#allocation19_spill] sm:$0xff] %v10396_v3 }
 0x1e2   : > { %10673 = vst [vmem:[#allocation20_spill] sm:$0xff] %v10398_v16  ;;  %v10400_v40 = vpop.f32.mrf.mxu0  ;;  %v10402_v17 = vpop.f32.mrf.mxu1 }
 0x1e3   : > { %10674 = vst [vmem:[#allocation21_spill] sm:$0xff] %v10400_v40  ;;  %10675 = vst [vmem:[#allocation2_spill] sm:$0xff] %v10402_v17 }
 0x1e4   : > { %v7503_v34 = vpop.f32.mrf.mxu0  ;;  %v10405_v32 = vpop.f32.mrf.mxu1 }
 0x1e5   : > { %v3675_v59 = vadd.f32 %v7503_v34, %v10277_v21  ;;  %10676 = vst [vmem:[#allocation3_spill] sm:$0xff] %v10405_v32 }
 0x1e6   : > { %v10407_v49 = vpop.f32.mrf.mxu0  ;;  %v7555_v26 = vpop.f32.mrf.mxu1 }
 0x1e7   : > { %10677 = vst [vmem:[#allocation5_spill] sm:$0xff] %v10407_v49  ;;  %v10409_v6 = vadd.f32 %v7551_v39, %v3675_v59 }
 0x1e8   : > { %v10411_v35 = vpop.f32.mrf.mxu0  ;;  %v10413_v1 = vpop.f32.mrf.mxu1 }
 0x1e9   : > { %10678 = vst [vmem:[#allocation22_spill] sm:$0xff] %v10409_v6  ;;  %10679 = vst [vmem:[#allocation23_spill] sm:$0xff] %v10411_v35 }
 0x1ea   : > { %10680 = vst [vmem:[#allocation24_spill] sm:$0xff] %v10413_v1  ;;  %v10415_v43 = vpop.f32.mrf.mxu0  ;;  %v10417_v16 = vpop.f32.mrf.mxu1  ;;  %v3652_v1 = vadd.f32 %v10312_v58, %v10201_v51  ;;  %v3653_v58 = vadd.f32 %v10326_v60, %v10211_v29 }
 0x1eb   : > { %10681 = vst [vmem:[#allocation25_spill] sm:$0xff] %v10415_v43  ;;  %10682 = vst [vmem:[#allocation26_spill] sm:$0xff] %v10417_v16 }
 0x1ec   : > { %v7507_v40 = vpop.f32.mrf.mxu0  ;;  %v10420_v3 = vpop.f32.mrf.mxu1 }
 0x1ed   : > { %v3679_v17 = vadd.f32 %v7507_v40, %v10291_v44  ;;  %10683 = vst [vmem:[#allocation27_spill] sm:$0xff] %v10420_v3  ;;  %v3650_v40 = vadd.f32 %v10318_v11, %v10204_v48  ;;  %v3656_v48 = vadd.f32 %v10335_v30, %v10215_v41  ;;  %v4040_v30 = vadd.f32 %v10316_v10, %v3653_v58 }
 0x1ee   : > { %v10422_v34 = vpop.f32.mrf.mxu0  ;;  %v3660_v58 = vadd.f32 %v10351_v33, %v10229_v27 }
 0x1ef   : > { %10684 = vst [vmem:[#allocation28_spill] sm:$0xff] %v10422_v34  ;;  %v10424_v21 = vadd.f32 %v7555_v26, %v3679_v17  ;;  %v4039_v34 = vadd.f32 %v10304_v13, %v3652_v1 }
 0x1f0   : > { %v7623_v59 = vpop.f32.mrf.mxu1  ;;  %v10426_v39 = vpop.f32.mrf.mxu0 }
 0x1f1   : > { %10685 = vst [vmem:[#allocation29_spill] sm:$0xff] %v10424_v21  ;;  %10686 = vst [vmem:[#allocation30_spill] sm:$0xff] %v10426_v39 }
 0x1f2   : > { %v5161_v32 = vpop.f32.mrf.mxu1  ;;  %v10428_v6 = vpop.f32.mrf.mxu0 }
 0x1f3   : > { %10687 = vst [vmem:[#allocation31_spill] sm:$0xff] %v10428_v6  ;;  %v4037_v6 = vadd.f32 %v10307_v2, %v3650_v40 }
 0x1f4   : > { %v7624_v43 = vpop.f32.mrf.mxu1  ;;  %v7575_v16 = vpop.f32.mrf.mxu0 }
 0x1f5   : > { %v4792_v17 = vadd.f32 %v7575_v16, %v10309_v25 }
 0x1f6   : > { %v5164_v44 = vpop.f32.mrf.mxu1  ;;  %v4663_v3 = vpop.f32.mrf.mxu0 }
 0x1f7   : > { %v4790_v26 = vadd.f32 %v4663_v3, %v10314_v62  ;;  %v5290_v49 = vadd.f32 %v7623_v59, %v4792_v17  ;;  %v3654_v62 = vadd.f32 %v10340_v9, %v10218_v20 }
 0x1f8   : > { %v7627_v21 = vpop.f32.mrf.mxu1  ;;  %v7576_v39 = vpop.f32.mrf.mxu0 }
 0x1f9   : > { %v4793_v35 = vadd.f32 %v7576_v39, %v4039_v34  ;;  %v5288_v1 = vadd.f32 %v5161_v32, %v4790_v26  ;;  %v4043_v32 = vadd.f32 %v10320_v56, %v3656_v48  ;;  %v4041_v59 = vadd.f32 %v10324_v52, %v3654_v62 }
 0x1fa   : > { %v5177_v51 = vpop.f32.mrf.mxu1  ;;  %v4666_v11 = vpop.f32.mrf.mxu0  ;;  %v3657_v39 = vadd.f32 %v10347_v19, %v10225_v46  ;;  %v5519_v17 = vmul.f32 %v5290_v49, %v5290_v49 }
 0x1fb   : > { %v5291_v13 = vadd.f32 %v7624_v43, %v4793_v35  ;;  %v4791_v16 = vadd.f32 %v4666_v11, %v4037_v6  ;;  %v5517_v20 = vmul.f32 %v5288_v1, %v5288_v1 }
 0x1fc   : > { %v7628_v25 = vpop.f32.mrf.mxu1  ;;  %v7579_v29 = vpop.f32.mrf.mxu0 }
 0x1fd   : > { %v6751_v2 = vpack.c.bf16 %v5291_v13, %v5290_v49  ;;  %v5289_v60 = vadd.f32 %v5164_v44, %v4791_v16  ;;  %v4796_v43 = vadd.f32 %v7579_v29, %v10328_v45  ;;  %v5520_v48 = vmul.f32 %v5291_v13, %v5291_v13 }
 0x1fe   : > { %v5180_v41 = vpop.f32.mrf.mxu1  ;;  %v4679_v3 = vpop.f32.mrf.mxu0 }
 0x1ff   : > { %6903 = vst [vmem:[%s10449_s27 + $0x8] sm:$0xff] %v6751_v2   ;;  %v6746_v9 = vpack.c.bf16 %v5289_v60, %v5288_v1  ;;  %v5480_v6 = vadd.f32 %v5289_v60, %v5288_v1  ;;  %v5518_v35 = vmul.f32 %v5289_v60, %v5289_v60  ;;  %v4794_v40 = vadd.f32 %v4679_v3, %v4040_v30 }
 0x200   : > { %v7631_v34 = vpop.f32.mrf.mxu1  ;;  %v7580_v44 = vpop.f32.mrf.mxu0  ;;  %v5294_v11 = vadd.f32 %v7627_v21, %v4796_v43  ;;  %v4044_v2 = vadd.f32 %v10337_v22, %v3657_v39  ;;  %v4047_v43 = vadd.f32 %v10342_v0, %v3660_v58 }
 0x201   : > { %6747 = vst [vmem:[%s10449_s27] sm:$0xff] %v6746_v9   ;;  %v5481_v10 = vadd.f32 %v5480_v6, %v5290_v49  ;;  %v5549_v56 = vadd.f32 %v5518_v35, %v5517_v20  ;;  %v4797_v26 = vadd.f32 %v7580_v44, %v4043_v32  ;;  %v5292_v1 = vadd.f32 %v5177_v51, %v4794_v40 }
 0x202   : > { %v5193_v45 = vpop.f32.mrf.mxu1  ;;  %v4682_v16 = vpop.f32.mrf.mxu0  ;;  %v3658_v49 = vadd.f32 %v10355_v12, %v10232_v50  ;;  %v5523_v40 = vmul.f32 %v5294_v11, %v5294_v11 }
 0x203   : > { %v5550_v29 = vadd.f32 %v5549_v56, %v5519_v17  ;;  %v5482_v52 = vadd.f32 %v5481_v10, %v5291_v13  ;;  %v5295_v62 = vadd.f32 %v7628_v25, %v4797_v26  ;;  %v4795_v46 = vadd.f32 %v4682_v16, %v4041_v59 }
 0x204   : > { %v7632_v19 = vpop.f32.mrf.mxu1  ;;  %v7583_v60 = vpop.f32.mrf.mxu0  ;;  %v5521_v32 = vmul.f32 %v5292_v1, %v5292_v1  ;;  %v4045_v35 = vadd.f32 %v10345_v53, %v3658_v49  ;;  %v3661_v59 = vadd.f32 %v10362_v38, %v10239_v18 }
 0x205   : > { %v5483_v30 = vadd.f32 %v5482_v52, %v5292_v1  ;;  %v5551_v3 = vadd.f32 %v5550_v29, %v5520_v48  ;;  %v6761_v27 = vpack.c.bf16 %v5295_v62, %v5294_v11  ;;  %v5293_v21 = vadd.f32 %v5180_v41, %v4795_v46 }
 0x206   : > { %v5196_v33 = vpop.f32.mrf.mxu1  ;;  %v4695_v51 = vpop.f32.mrf.mxu0  ;;  %v4800_v25 = vadd.f32 %v7583_v60, %v10349_v42  ;;  %v3664_v41 = vadd.f32 %v10366_v54, %v10243_v5  ;;  %v5524_v53 = vmul.f32 %v5295_v62, %v5295_v62  ;;  %v4048_v38 = vadd.f32 %v10353_v63, %v3661_v59 }
 0x207   : > { %v5552_v13 = vadd.f32 %v5551_v3, %v5521_v32  ;;  %6905 = vst [vmem:[%s10449_s27 + $0x18] sm:$0xff] %v6761_v27   ;;  %v4798_v20 = vadd.f32 %v4695_v51, %v4044_v2  ;;  %v6756_v9 = vpack.c.bf16 %v5293_v21, %v5292_v1  ;;  %v5484_v6 = vadd.f32 %v5483_v30, %v5293_v21 }
 0x208   : > { %v7635_v22 = vpop.f32.mrf.mxu1  ;;  %v5522_v50 = vmul.f32 %v5293_v21, %v5293_v21  ;;  %v7584_v12 = vpop.f32.mrf.mxu0  ;;  %v5298_v56 = vadd.f32 %v7631_v34, %v4800_v25  ;;  %v3662_v5 = vadd.f32 %v10370_v37, %v10246_v57  ;;  %v3668_v3 = vadd.f32 %v10381_v36, %v10257_v61 }
 0x209   : > { %v4801_v0 = vadd.f32 %v7584_v12, %v4047_v43  ;;  %6904 = vst [vmem:[%s10449_s27 + $0x10] sm:$0xff] %v6756_v9   ;;  %v5485_v44 = vadd.f32 %v5484_v6, %v5294_v11  ;;  %v5296_v17 = vadd.f32 %v5193_v45, %v4798_v20  ;;  %v4051_v45 = vadd.f32 %v10357_v55, %v3664_v41 }
 0x20a   : > { %v5209_v39 = vpop.f32.mrf.mxu1  ;;  %v5553_v42 = vadd.f32 %v5552_v13, %v5522_v50  ;;  %v4698_v10 = vpop.f32.mrf.mxu0  ;;  %v4049_v37 = vadd.f32 %v10360_v31, %v3662_v5  ;;  %v3665_v55 = vadd.f32 %v10377_v7, %v10253_v15  ;;  %v5527_v21 = vmul.f32 %v5298_v56, %v5298_v56 }
 0x20b   : > { %v5299_v26 = vadd.f32 %v7632_v19, %v4801_v0  ;;  %v4799_v58 = vadd.f32 %v4698_v10, %v4045_v35  ;;  %v5486_v16 = vadd.f32 %v5485_v44, %v5295_v62  ;;  %v5525_v34 = vmul.f32 %v5296_v17, %v5296_v17 }
 0x20c   : > { %v7636_v48 = vpop.f32.mrf.mxu1  ;;  %v5554_v1 = vadd.f32 %v5553_v42, %v5523_v40  ;;  %v7587_v18 = vpop.f32.mrf.mxu0  ;;  %v4052_v7 = vadd.f32 %v10368_v24, %v3665_v55  ;;  %v3666_v61 = vadd.f32 %v10385_v23, %v10260_v4  ;;  %v4055_v41 = vadd.f32 %v10372_v47, %v3668_v3  ;;  %v10688_v23 = vld [vmem:[#allocation14_spill] sm:$0xff] }
 0x20d   : > { %v6771_v54 = vpack.c.bf16 %v5299_v26, %v5298_v56  ;;  %v5297_v29 = vadd.f32 %v5196_v33, %v4799_v58  ;;  %v5487_v52 = vadd.f32 %v5486_v16, %v5296_v17  ;;  %v4804_v62 = vadd.f32 %v7587_v18, %v10364_v14 }
 0x20e   : > { %v5212_v11 = vpop.f32.mrf.mxu1  ;;  %v5555_v46 = vadd.f32 %v5554_v1, %v5524_v53  ;;  %v4711_v19 = vpop.f32.mrf.mxu0  ;;  %v5528_v31 = vmul.f32 %v5299_v26, %v5299_v26  ;;  %v4053_v58 = vadd.f32 %v10688_v23, %v3666_v61  ;;  %v10690_v53 = vld [vmem:[#allocation6_spill] sm:$0xff]  ;;  %v10691_v1 = vld [vmem:[#allocation19_spill] sm:$0xff]  ;;  %v10698_v61 = vld [vmem:[#allocation8_spill] sm:$0xff] }
 0x20f   : > { %6907 = vst [vmem:[%s10449_s27 + $0x28] sm:$0xff] %v6771_v54   ;;  %v6766_v2 = vpack.c.bf16 %v5297_v29, %v5296_v17  ;;  %v5526_v49 = vmul.f32 %v5297_v29, %v5297_v29  ;;  %v4802_v60 = vadd.f32 %v4711_v19, %v4048_v38  ;;  %v5488_v32 = vadd.f32 %v5487_v52, %v5297_v29 }
 0x210   : > { %v5556_v30 = vadd.f32 %v5555_v46, %v5525_v34  ;;  %v7588_v57 = vpop.f32.mrf.mxu0  ;;  %v5302_v25 = vadd.f32 %v7635_v22, %v4804_v62  ;;  %v3672_v16 = vadd.f32 %v10691_v1, %v10690_v53  ;;  %v10692_v62 = vld [vmem:[#allocation15_spill] sm:$0xff]  ;;  %v10702_v1 = vld [vmem:[#allocation20_spill] sm:$0xff] }
 0x211   : > { %v7639_v63 = vpop.f32.mrf.mxu1  ;;  %6906 = vst [vmem:[%s10449_s27 + $0x20] sm:$0xff] %v6766_v2   ;;  %v4805_v27 = vadd.f32 %v7588_v57, %v4051_v45  ;;  %v5489_v51 = vadd.f32 %v5488_v32, %v5298_v56  ;;  %v5300_v14 = vadd.f32 %v5209_v39, %v4802_v60  ;;  %v10694_v32 = vld [vmem:[#allocation21_spill] sm:$0xff] }
 0x212   : > { %v5557_v43 = vadd.f32 %v5556_v30, %v5526_v49  ;;  %v4714_v13 = vpop.f32.mrf.mxu0  ;;  %v5531_v5 = vmul.f32 %v5302_v25, %v5302_v25  ;;  %v10693_v30 = vld [vmem:[#allocation7_spill] sm:$0xff] }
 0x213   : > { %v5225_v33 = vpop.f32.mrf.mxu1  ;;  %v5303_v20 = vadd.f32 %v7636_v48, %v4805_v27  ;;  %v4803_v9 = vadd.f32 %v4714_v13, %v4049_v37  ;;  %v5490_v12 = vadd.f32 %v5489_v51, %v5299_v26  ;;  %v5529_v22 = vmul.f32 %v5300_v14, %v5300_v14  ;;  %v10689_v48 = vld [vmem:[#allocation4_spill] sm:$0xff] }
 0x214   : > { %v5558_v50 = vadd.f32 %v5557_v43, %v5527_v21  ;;  %v7591_v15 = vpop.f32.mrf.mxu0  ;;  %v3669_v47 = vadd.f32 %v10392_v28, %v10689_v48  ;;  %v3670_v57 = vadd.f32 %v10694_v32, %v10693_v30  ;;  %v10695_v27 = vld [vmem:[#allocation16_spill] sm:$0xff] }
 0x215   : > { %v7640_v6 = vpop.f32.mrf.mxu1  ;;  %v6781_v36 = vpack.c.bf16 %v5303_v20, %v5302_v25  ;;  %v5301_v35 = vadd.f32 %v5212_v11, %v4803_v9  ;;  %v5491_v0 = vadd.f32 %v5490_v12, %v5300_v14  ;;  %v4808_v17 = vadd.f32 %v7591_v15, %v10379_v8  ;;  %v10697_v15 = vld [vmem:[#allocation17_spill] sm:$0xff] }
 0x216   : > { %v5559_v39 = vadd.f32 %v5558_v50, %v5528_v31  ;;  %v4727_v40 = vpop.f32.mrf.mxu0  ;;  %v5532_v19 = vmul.f32 %v5303_v20, %v5303_v20  ;;  %v4056_v60 = vadd.f32 %v10692_v62, %v3669_v47 }
 0x217   : > { %v5228_v59 = vpop.f32.mrf.mxu1  ;;  %6909 = vst [vmem:[%s10449_s27 + $0x38] sm:$0xff] %v6781_v36   ;;  %v6776_v44 = vpack.c.bf16 %v5301_v35, %v5300_v14  ;;  %v5530_v42 = vmul.f32 %v5301_v35, %v5301_v35  ;;  %v4806_v10 = vadd.f32 %v4727_v40, %v4052_v7  ;;  %v5492_v26 = vadd.f32 %v5491_v0, %v5301_v35  ;;  %v10699_v36 = vld [vmem:[#allocation5_spill] sm:$0xff] }
 0x218   : > { %v5560_v56 = vadd.f32 %v5559_v39, %v5529_v22  ;;  %v7592_v4 = vpop.f32.mrf.mxu0  ;;  %v5306_v45 = vadd.f32 %v7639_v63, %v4808_v17  ;;  %v4057_v7 = vadd.f32 %v10697_v15, %v3670_v57  ;;  %v3673_v35 = vadd.f32 %v10699_v36, %v10698_v61 }
 0x219   : > { %v7643_v24 = vpop.f32.mrf.mxu1  ;;  %6908 = vst [vmem:[%s10449_s27 + $0x30] sm:$0xff] %v6776_v44   ;;  %v4809_v18 = vadd.f32 %v7592_v4, %v4055_v41  ;;  %v5493_v54 = vadd.f32 %v5492_v26, %v5302_v25  ;;  %v5304_v8 = vadd.f32 %v5225_v33, %v4806_v10  ;;  %v4059_v33 = vadd.f32 %v10695_v27, %v3672_v16  ;;  %v10696_v25 = vld [vmem:[#allocation18_spill] sm:$0xff]  ;;  %v10701_v41 = vld [vmem:[#allocation23_spill] sm:$0xff]  ;;  %v10709_v27 = vld [vmem:[#allocation28_spill] sm:$0xff] }
 0x21a   : > { %v5561_v29 = vadd.f32 %v5560_v56, %v5530_v42  ;;  %v4730_v11 = vpop.f32.mrf.mxu0  ;;  %v5535_v40 = vmul.f32 %v5306_v45, %v5306_v45  ;;  %v4060_v16 = vadd.f32 %v10702_v1, %v3673_v35 }
 0x21b   : > { %v5241_v38 = vpop.f32.mrf.mxu1  ;;  %v5307_v52 = vadd.f32 %v7640_v6, %v4809_v18  ;;  %v4807_v34 = vadd.f32 %v4730_v11, %v4053_v58  ;;  %v5494_v49 = vadd.f32 %v5493_v54, %v5303_v20  ;;  %v5533_v63 = vmul.f32 %v5304_v8, %v5304_v8  ;;  %v10703_v18 = vld [vmem:[#allocation10_spill] sm:$0xff] }
 0x21c   : > { %v5562_v2 = vadd.f32 %v5561_v29, %v5531_v5  ;;  %v7595_v28 = vpop.f32.mrf.mxu0  ;;  %v10704_v5 = vld [vmem:[#allocation25_spill] sm:$0xff] }
 0x21d   : > { %v7644_v46 = vpop.f32.mrf.mxu1  ;;  %v6791_v37 = vpack.c.bf16 %v5307_v52, %v5306_v45  ;;  %v5305_v55 = vadd.f32 %v5228_v59, %v4807_v34  ;;  %v5495_v21 = vadd.f32 %v5494_v49, %v5304_v8  ;;  %v4812_v20 = vadd.f32 %v7595_v28, %v10696_v25  ;;  %v10700_v59 = vld [vmem:[#allocation9_spill] sm:$0xff] }
 0x21e   : > { %v5563_v51 = vadd.f32 %v5562_v2, %v5532_v19  ;;  %v4743_v43 = vpop.f32.mrf.mxu0  ;;  %v3676_v0 = vadd.f32 %v10701_v41, %v10700_v59  ;;  %v5536_v58 = vmul.f32 %v5307_v52, %v5307_v52  ;;  %v3674_v54 = vadd.f32 %v10704_v5, %v10703_v18  ;;  %v10712_v59 = vld [vmem:[#allocation24_spill] sm:$0xff]  ;;  %v10717_v5 = vld [vmem:[#allocation27_spill] sm:$0xff] }
 0x21f   : > { %v5244_v3 = vpop.f32.mrf.mxu1  ;;  %6911 = vst [vmem:[%s10449_s27 + $0x48] sm:$0xff] %v6791_v37   ;;  %v6786_v14 = vpack.c.bf16 %v5305_v55, %v5304_v8  ;;  %v5534_v13 = vmul.f32 %v5305_v55, %v5305_v55  ;;  %v4810_v9 = vadd.f32 %v4743_v43, %v4056_v60  ;;  %v5496_v50 = vadd.f32 %v5495_v21, %v5305_v55  ;;  %v10707_v37 = vld [vmem:[#allocation3_spill] sm:$0xff]  ;;  %v10710_v21 = vld [vmem:[#allocation12_spill] sm:$0xff] }
 0x220   : > { %v5564_v31 = vadd.f32 %v5563_v51, %v5533_v63  ;;  %v7596_v12 = vpop.f32.mrf.mxu0  ;;  %v5310_v56 = vadd.f32 %v7643_v24, %v4812_v20  ;;  %v4061_v55 = vadd.f32 %v10707_v37, %v3674_v54  ;;  %v10711_v63 = vld [vmem:[#allocation30_spill] sm:$0xff] }
 0x221   : > { %v7647_v6 = vpop.f32.mrf.mxu1  ;;  %6910 = vst [vmem:[%s10449_s27 + $0x40] sm:$0xff] %v6786_v14   ;;  %v4813_v22 = vadd.f32 %v7596_v12, %v4059_v33  ;;  %v5497_v44 = vadd.f32 %v5496_v50, %v5306_v45  ;;  %v5308_v17 = vadd.f32 %v5241_v38, %v4810_v9  ;;  %v10705_v45 = vld [vmem:[#allocation2_spill] sm:$0xff]  ;;  %v3680_v51 = vadd.f32 %v10711_v63, %v10710_v21 }
 0x222   : > { %v5565_v42 = vadd.f32 %v5564_v31, %v5534_v13  ;;  %v4746_v10 = vpop.f32.mrf.mxu0  ;;  %v4063_v38 = vadd.f32 %v10705_v45, %v3676_v0  ;;  %v5539_v14 = vmul.f32 %v5310_v56, %v5310_v56  ;;  %v10713_v0 = vld [vmem:[#allocation13_spill] sm:$0xff] }
 0x223   : > { %v5257_v39 = vpop.f32.mrf.mxu1  ;;  %v5311_v26 = vadd.f32 %v7644_v46, %v4813_v22  ;;  %v4811_v4 = vadd.f32 %v4746_v10, %v4057_v7  ;;  %v5498_v47 = vadd.f32 %v5497_v44, %v5307_v52  ;;  %v5537_v24 = vmul.f32 %v5308_v17, %v5308_v17  ;;  %v10706_v52 = vld [vmem:[#allocation22_spill] sm:$0xff]  ;;  %v10714_v22 = vld [vmem:[#allocation31_spill] sm:$0xff] }
 0x224   : > { %v5566_v48 = vadd.f32 %v5565_v42, %v5535_v40  ;;  %v7599_v53 = vpop.f32.mrf.mxu0  ;;  %v3678_v40 = vadd.f32 %v10714_v22, %v10713_v0 }
 0x225   : > { %v7648_v23 = vpop.f32.mrf.mxu1  ;;  %v6801_v29 = vpack.c.bf16 %v5311_v26, %v5310_v56  ;;  %v5309_v8 = vadd.f32 %v5244_v3, %v4811_v4  ;;  %v5499_v34 = vadd.f32 %v5498_v47, %v5308_v17  ;;  %v4816_v28 = vadd.f32 %v7599_v53, %v10706_v52  ;;  %v10708_v3 = vld [vmem:[#allocation11_spill] sm:$0xff] }
 0x226   : > { %v5567_v46 = vadd.f32 %v5566_v48, %v5536_v58  ;;  %v4759_v19 = vpop.f32.mrf.mxu0  ;;  %v3677_v33 = vadd.f32 %v10709_v27, %v10708_v3  ;;  %v5540_v15 = vmul.f32 %v5311_v26, %v5311_v26  ;;  %v4065_v54 = vadd.f32 %v10717_v5, %v3678_v40 }
 0x227   : > { %v5260_v11 = vpop.f32.mrf.mxu1  ;;  %6913 = vst [vmem:[%s10449_s27 + $0x58] sm:$0xff] %v6801_v29   ;;  %v6796_v2 = vpack.c.bf16 %v5309_v8, %v5308_v17  ;;  %v5538_v49 = vmul.f32 %v5309_v8, %v5309_v8  ;;  %v4814_v62 = vadd.f32 %v4759_v19, %v4060_v16  ;;  %v5500_v30 = vadd.f32 %v5499_v34, %v5309_v8  ;;  %v10715_v17 = vld [vmem:[#allocation26_spill] sm:$0xff] }
 0x228   : > { %v5568_v60 = vadd.f32 %v5567_v46, %v5537_v24  ;;  %v7600_v32 = vpop.f32.mrf.mxu0  ;;  %v5314_v31 = vadd.f32 %v7647_v6, %v4816_v28  ;;  %v4064_v41 = vadd.f32 %v10712_v59, %v3677_v33 }
 0x229   : > { %v7651_v57 = vpop.f32.mrf.mxu1  ;;  %6912 = vst [vmem:[%s10449_s27 + $0x50] sm:$0xff] %v6796_v2   ;;  %v4817_v43 = vadd.f32 %v7600_v32, %v4063_v38  ;;  %v5501_v13 = vadd.f32 %v5500_v30, %v5310_v56  ;;  %v5312_v20 = vadd.f32 %v5257_v39, %v4814_v62  ;;  %v4067_v39 = vadd.f32 %v10715_v17, %v3680_v51 }
 0x22a   : > { %v5569_v25 = vadd.f32 %v5568_v60, %v5538_v49  ;;  %v4762_v9 = vpop.f32.mrf.mxu0  ;;  %v5543_v8 = vmul.f32 %v5314_v31, %v5314_v31 }
 0x22b   : > { %v5315_v50 = vadd.f32 %v7648_v23, %v4817_v43  ;;  %v4815_v12 = vadd.f32 %v4762_v9, %v4061_v55  ;;  %v5502_v61 = vadd.f32 %v5501_v13, %v5311_v26  ;;  %v5273_v35 = vpop.f32.mrf.mxu1  ;;  %v5541_v6 = vmul.f32 %v5312_v20, %v5312_v20  ;;  %v10716_v26 = vld [vmem:[#allocation29_spill] sm:$0xff] }
 0x22c   : > { %v5570_v7 = vadd.f32 %v5569_v25, %v5539_v14  ;;  %v7603_v36 = vpop.f32.mrf.mxu0 }
 0x22d   : > { %v6811_v44 = vpack.c.bf16 %v5315_v50, %v5314_v31  ;;  %v5313_v42 = vadd.f32 %v5260_v11, %v4815_v12  ;;  %v5503_v10 = vadd.f32 %v5502_v61, %v5312_v20  ;;  %v4820_v48 = vadd.f32 %v7603_v36, %v10716_v26  ;;  %v7652_v18 = vpop.f32.mrf.mxu1 }
 0x22e   : > { %v5571_v56 = vadd.f32 %v5570_v7, %v5540_v15  ;;  %v4775_v4 = vpop.f32.mrf.mxu0  ;;  %v5544_v2 = vmul.f32 %v5315_v50, %v5315_v50 }
 0x22f   : > { %6915 = vst [vmem:[%s10449_s27 + $0x68] sm:$0xff] %v6811_v44   ;;  %v6806_v23 = vpack.c.bf16 %v5313_v42, %v5312_v20  ;;  %v5542_v58 = vmul.f32 %v5313_v42, %v5313_v42  ;;  %v4818_v47 = vadd.f32 %v4775_v4, %v4064_v41  ;;  %v5504_v1 = vadd.f32 %v5503_v10, %v5313_v42  ;;  %v5276_v28 = vpop.f32.mrf.mxu1 }
 0x230   : > { %v5572_v53 = vadd.f32 %v5571_v56, %v5541_v6  ;;  %v7604_v16 = vpop.f32.mrf.mxu0  ;;  %v5318_v24 = vadd.f32 %v7651_v57, %v4820_v48 }
 0x231   : > { %6914 = vst [vmem:[%s10449_s27 + $0x60] sm:$0xff] %v6806_v23   ;;  %v4821_v29 = vadd.f32 %v7604_v16, %v4067_v39  ;;  %v5505_v11 = vadd.f32 %v5504_v1, %v5314_v31  ;;  %v5316_v38 = vadd.f32 %v5273_v35, %v4818_v47 }
 0x232   : > { %v5573_v45 = vadd.f32 %v5572_v53, %v5542_v58  ;;  %v4778_v34 = vpop.f32.mrf.mxu0  ;;  %v5547_v21 = vmul.f32 %v5318_v24, %v5318_v24 }
 0x233   : > { %v5319_v46 = vadd.f32 %v7652_v18, %v4821_v29  ;;  %v4819_v19 = vadd.f32 %v4778_v34, %v4065_v54  ;;  %v5506_v52 = vadd.f32 %v5505_v11, %v5315_v50  ;;  %v5545_v32 = vmul.f32 %v5316_v38, %v5316_v38 }
 0x234   : > { %v5574_v49 = vadd.f32 %v5573_v45, %v5543_v8 }
 0x235   : > { %v6821_v62 = vpack.c.bf16 %v5319_v46, %v5318_v24  ;;  %v5317_v60 = vadd.f32 %v5276_v28, %v4819_v19  ;;  %v5507_v30 = vadd.f32 %v5506_v52, %v5316_v38  ;;  %v5548_v51 = vmul.f32 %v5319_v46, %v5319_v46 }
 0x236   : > { %v5575_v37 = vadd.f32 %v5574_v49, %v5544_v2 }
 0x237   : > { %6917 = vst [vmem:[%s10449_s27 + $0x78] sm:$0xff] %v6821_v62   ;;  %v6816_v55 = vpack.c.bf16 %v5317_v60, %v5316_v38  ;;  %v5546_v3 = vmul.f32 %v5317_v60, %v5317_v60  ;;  %v5508_v33 = vadd.f32 %v5507_v30, %v5317_v60 }
 0x238   : > { %v5576_v27 = vadd.f32 %v5575_v37, %v5545_v32 }
 0x239   : > { %6916 = vst [vmem:[%s10449_s27 + $0x70] sm:$0xff] %v6816_v55   ;;  %v5509_v57 = vadd.f32 %v5508_v33, %v5318_v24 }
 0x23a   : > { %v5577_v63 = vadd.f32 %v5576_v27, %v5546_v3 }
 0x23b   : > { %v5510_v43 = vadd.f32 %v5509_v57, %v5319_v46 }
 0x23c   : > { %v5578_v14 = vadd.f32 %v5577_v63, %v5547_v21 }
 0x23d   : > { %v5511_v13 = vrot.slane %v5510_v43, 4 }
 0x23e   : > { %v5579_v25 = vadd.f32 %v5578_v14, %v5548_v51 }
 0x23f   : > { %v5512_v20 = vadd.f32 %v5511_v13, %v5510_v43 }
 0x240   : > { %v5580_v9 = vrot.slane %v5579_v25, 4 }
 0x241   : > { %v5513_v31 = vrot.slane %v5512_v20, 2 }
 0x242   : > { %v5581_v50 = vadd.f32 %v5580_v9, %v5579_v25 }
 0x243   : > { %v5514_v12 = vadd.f32 %v5513_v31, %v5512_v20 }
 0x244   : > { %v5582_v15 = vrot.slane %v5581_v50, 2 }
 0x245   : > { %v5515_v7 = vrot.slane %v5514_v12, 1 }
 0x246   : > { %v5583_v61 = vadd.f32 %v5582_v15, %v5581_v50 }
 0x247   : > { %v5516_v35 = vadd.f32 %v5515_v7, %v5514_v12 }
 0x248   : > { %v5584_v36 = vrot.slane %v5583_v61, 1 }
 0x24a   : > { %v5585_v59 = vadd.f32 %v5584_v36, %v5583_v61 }
 0x24c   : > { %v5587_v41 = vsel %vm5586_vm6, %v5516_v35, %v5585_v59 }
 0x24d   : > { %5588 = vst [vmem:[%s280_s30] sm:$0x3] %v5587_v41 }
 0x24e PF: > { %s17_s21 = sadd.s32 1, %s7797_s21  }
 0x24f   : > { %p14_p4 = scmp.ge.s32.totalorder %s17_s21, 4  }
 0x251   :  { %16 = sbr.rel (!%p14_p4) target bundleno = 1 (0x1), region = 108 }

// kernel: basic_block_forward.4
= control target key start
LH: loop header
LB: loop body
LE: loop exit
PB: predicated region body
PF: predicated region fallthrough
CT: control target
= control target key end

     0   :  { %s6932_s12 = smov 0   ;;  %s9587_s0 = inlined_call_operand.vmem [shape: bf16[2,18,18,128], index: 0, kind: input, shape index: {}]   ;;  %s9588_s1 = inlined_call_operand.vmem [shape: bf16[9,128,128], index: 1, kind: input, shape index: {}]   ;;  %s9589_s2 = inlined_call_operand.vmem [shape: bf16[2,256,128], index: 2, kind: output, shape index: {0}]   ;;  %s9590_s3 = inlined_call_operand.vmem [shape: f32[2,2,128], index: 3, kind: output, shape index: {1}]  }
   0x1 LB: > { %s5347_s13 = sadd.s32 4294967295, %s6910_s12   ;;  %p5351_p0 = scmp.ge.s32.totalorder %s6910_s12, 1  ;;  %s6910_s12 = sphi %s6932_s12, %s14_s12  }
   0x2   : > { %p140_p1 = scmp.lt.s32.totalorder %s6910_s12, 3 }
   0x4   : > { %p141_p2 = pnand %p5351_p0, %p140_p1 }
   0x6   : > { %144 = sbr.rel (%p141_p2) target bundleno = 574 (0x23e), region = 28 }
   0xb   : > { %v6775_v0 = vld [vmem:[%s9588_s1 + $0x78] sm:$0xff]   ;;  %p168_p3 = scmp.lt.s32.totalorder %s5347_s13, 1  ;;  %v6776_v1 = vld [vmem:[%s9588_s1 + $0x70] sm:$0xff]   ;;  %v6777_v2 = vld [vmem:[%s9588_s1 + $0x68] sm:$0xff]   ;;  %vm247_vm0 = vsmask.f32 3328 }
   0xc   : > { %6318 = vmatprep.subr.bf16.mxu0 %v6775_v0  ;;  %6750 = vmatprep.subr.bf16.mxu1 %v6775_v0  ;;  %v6778_v3 = vld [vmem:[%s9588_s1 + $0x60] sm:$0xff]   ;;  %vm248_vm1 = vsmask.f32 7440  ;;  %v6779_v17 = vld [vmem:[%s9588_s1 + $0x58] sm:$0xff]   ;;  %v6780_v33 = vld [vmem:[%s9588_s1 + $0x50] sm:$0xff]   ;;  %vm1277_vm3 = vcmask 1042432  }
   0xd   : > { %s9811_s13 = smov (!%p168_p3, %s5347_s13), 1  ;;  %6319 = vmatpush3.bf16.msra.mxu0 %v6775_v0  ;;  %6758 = vmatpush3.bf16.msra.mxu1 %v6775_v0  ;;  %vm6986_vm2 = vmor %vm247_vm0, %vm248_vm1  ;;  %v6781_v58 = vld [vmem:[%s9588_s1 + $0x48] sm:$0xff]   ;;  %vm1278_vm4 = vcmask 1046532   ;;  %vm5258_vm6 = vcmask 1040384  }
   0xe   : > { %6320 = vmatprep.subr.bf16.mxu0 %v6776_v1  ;;  %6751 = vmatprep.subr.bf16.mxu1 %v6776_v1  ;;  %s6766_s20 = smul.u32 216, %s9811_s13  ;;  %vm7297_vm5 = vmor %vm1277_vm3, %vm1278_vm4 }
  0x10   : > { %s6955_s23 = scalar_lea.vmem %s9587_s0, %s6766_s20  ;;  %s5355_s20 = sshll.u32 %s9811_s13, 1 }
  0x11   : > { %6321 = vmatpush3.bf16.msra.mxu0 %v6776_v1  ;;  %6759 = vmatpush3.bf16.msra.mxu1 %v6776_v1  ;;  %v6961_v4 = vld [vmem:[%s6955_s23] sm:$0xf]  ;;  %v6964_v5 = vld [vmem:[%s6955_s23 + $0x4] sm:$0xf]  ;;  %v6967_v6 = vld [vmem:[%s6955_s23 + $0x8] sm:$0x1]  ;;  %s181_s24 = scalar_lea.vmem %s9590_s3, %s5355_s20 }
  0x12   : > { %6322 = vmatprep.subr.bf16.mxu0 %v6777_v2  ;;  %6752 = vmatprep.subr.bf16.mxu1 %v6777_v2  ;;  %v251_v7 = vshrl.u32 %v6961_v4, 16  ;;  %v254_v8 = vshll.u32 %v6961_v4, 16  ;;  %v260_v9 = vshll.u32 %v6964_v5, 16  ;;  %v264_v10 = vshrl.u32 %v6964_v5, 16  ;;  %v199_v12 = vld [vmem:[%s6955_s23 + $0x60] sm:$0xf] }
  0x13   : > { %v270_v11 = vshll.u32 %v6967_v6, 16  ;;  %v200_v15 = vld [vmem:[%s6955_s23 + $0x64] sm:$0xf]  ;;  %v239_v16 = vld [vmem:[%s6955_s23 + $0x68] sm:$0x1]  ;;  %v443_v21 = vshrl.u32 %v199_v12, 16 }
  0x14   : > { %v253_v13 = vrot.slane %v251_v7, 4  ;;  %v256_v14 = vrot.slane %v254_v8, 5  ;;  %v262_v18 = vrot.slane %v260_v9, 5  ;;  %v266_v19 = vrot.slane %v264_v10, 4  ;;  %v6982_v26 = vld [vmem:[%s6955_s23 + $0xc] sm:$0xf] }
  0x15   : > { %6323 = vmatpush3.bf16.msra.mxu0 %v6777_v2  ;;  %6760 = vmatpush3.bf16.msra.mxu1 %v6777_v2  ;;  %v446_v23 = vshll.u32 %v199_v12, 16  ;;  %v452_v24 = vshll.u32 %v200_v15, 16  ;;  %v456_v25 = vshrl.u32 %v200_v15, 16  ;;  %v272_v29 = vrot.slane %v270_v11, 5  ;;  %v6991_v32 = vld [vmem:[%s6955_s23 + $0x10] sm:$0xf] }
  0x16   : > { %6324 = vmatprep.subr.bf16.mxu0 %v6778_v3  ;;  %6753 = vmatprep.subr.bf16.mxu1 %v6778_v3  ;;  %v257_v22 = vor.u32 %v256_v14, %v253_v13  ;;  %v267_v28 = vor.u32 %v266_v19, %v262_v18  ;;  %v445_v30 = vrot.slane %v443_v21, 4  ;;  %v462_v31 = vshll.u32 %v239_v16, 16  ;;  %v6997_v40 = vld [vmem:[%s6955_s23 + $0x14] sm:$0x1]  ;;  %v201_v47 = vld [vmem:[%s6955_s23 + $0x6c] sm:$0xf] }
  0x17   : > { %v448_v35 = vrot.slane %v446_v23, 5  ;;  %v454_v36 = vrot.slane %v452_v24, 5  ;;  %v458_v37 = vrot.slane %v456_v25, 4  ;;  %v275_v41 = vshrl.u32 %v6982_v26, 16  ;;  %v202_v52 = vld [vmem:[%s6955_s23 + $0x70] sm:$0xf] }
  0x18   : > { %v258_v34 = vrot.slane %v257_v22, 4  ;;  %v268_v38 = vrot.slane %v267_v28, 4  ;;  %v464_v39 = vrot.slane %v462_v31, 5  ;;  %v278_v42 = vshll.u32 %v6982_v26, 16  ;;  %v240_v57 = vld [vmem:[%s6955_s23 + $0x74] sm:$0x1] }
  0x19   : > { %6325 = vmatpush3.bf16.msra.mxu0 %v6778_v3  ;;  %6761 = vmatpush3.bf16.msra.mxu1 %v6778_v3  ;;  %v449_v44 = vor.u32 %v448_v35, %v445_v30  ;;  %v459_v45 = vor.u32 %v458_v37, %v454_v36  ;;  %v284_v46 = vshll.u32 %v6991_v32, 16  ;;  %v277_v49 = vrot.slane %v275_v41, 4  ;;  %v7020_v14 = vld [vmem:[%s6955_s23 + $0x18] sm:$0xf]  ;;  %v6782_v15 = vld [vmem:[%s9588_s1 + $0x40] sm:$0xff]  }
  0x1a   : > { %6326 = vmatprep.subr.bf16.mxu0 %v6779_v17  ;;  %6754 = vmatprep.subr.bf16.mxu1 %v6779_v17  ;;  %v263_v43 = vsel %vm6986_vm2, %v258_v34, %v262_v18  ;;  %v273_v48 = vsel %vm6986_vm2, %v268_v38, %v272_v29  ;;  %v280_v50 = vrot.slane %v278_v42, 5  ;;  %v288_v51 = vshrl.u32 %v6991_v32, 16  ;;  %v7028_v19 = vld [vmem:[%s6955_s23 + $0x1c] sm:$0xf]  ;;  %v7033_v25 = vld [vmem:[%s6955_s23 + $0x20] sm:$0x1] }
  0x1b   : > { %v5372_v53 = vcombine.low %v263_v43, %v273_v48  ;;  %v450_v54 = vrot.slane %v449_v44, 4  ;;  %v460_v55 = vrot.slane %v459_v45, 4  ;;  %v286_v56 = vrot.slane %v284_v46, 5  ;;  %v203_v34 = vld [vmem:[%s6955_s23 + $0x78] sm:$0xf] }
  0x1c   : > { %v281_v59 = vor.u32 %v280_v50, %v277_v49  ;;  %v290_v60 = vrot.slane %v288_v51, 4  ;;  %v294_v61 = vshll.u32 %v6997_v40, 16  ;;  %v467_v1 = vshrl.u32 %v201_v47, 16  ;;  %v6783_v41 = vld [vmem:[%s9588_s1 + $0x38] sm:$0xff]   ;;  %v241_v49 = vld [vmem:[%s6955_s23 + $0x80] sm:$0x1] }
  0x1d   : > { %6327 = vmatpush3.bf16.msra.mxu0 %v6779_v17  ;;  %6762 = vmatpush3.bf16.msra.mxu1 %v6779_v17  ;;  %v455_v63 = vsel %vm6986_vm2, %v450_v54, %v454_v36  ;;  %v465_v0 = vsel %vm6986_vm2, %v460_v55, %v464_v39  ;;  %v470_v2 = vshll.u32 %v201_v47, 16  ;;  %v476_v12 = vshll.u32 %v202_v52, 16  ;;  %v7042_v39 = vld [vmem:[%s6955_s23 + $0x7c] sm:$0xf] }
  0x1e   : > { %6328 = vmatprep.subr.bf16.mxu0 %v6780_v33  ;;  %6755 = vmatprep.subr.bf16.mxu1 %v6780_v33  ;;  %v5380_v3 = vcombine.low %v455_v63, %v465_v0  ;;  %v282_v7 = vrot.slane %v281_v59, 4  ;;  %v291_v8 = vor.u32 %v290_v60, %v286_v56  ;;  %v296_v9 = vrot.slane %v294_v61, 5  ;;  %v6784_v42 = vld [vmem:[%s9588_s1 + $0xb8] sm:$0xff]   ;;  %v6786_v59 = vld [vmem:[%s9588_s1 + $0xb0] sm:$0xff]   ;;  %v7069_v0 = vld [vmem:[%s6955_s23 + $0x28] sm:$0xf] }
  0x1f   : > { %6334 = vmatprep.mubr.bf16.mxu0 %v5372_v53  ;;  %v469_v10 = vrot.slane %v467_v1, 4  ;;  %v472_v11 = vrot.slane %v470_v2, 5  ;;  %v480_v13 = vshrl.u32 %v202_v52, 16  ;;  %v486_v18 = vshll.u32 %v240_v57, 16  ;;  %v6785_v52 = vld [vmem:[%s9588_s1 + $0x30] sm:$0xff]  }
  0x20   : > { %v287_v16 = vsel %vm6986_vm2, %v282_v7, %v286_v56  ;;  %v292_v17 = vrot.slane %v291_v8, 4  ;;  %6350 = vmatprep.mubr.bf16.mxu1 %v5380_v3  ;;  %v478_v23 = vrot.slane %v476_v12, 5  ;;  %v299_v28 = vshrl.u32 %v7020_v14, 16  ;;  %v7060_v57 = vld [vmem:[%s6955_s23 + $0x24] sm:$0xf] }
  0x21   : > { %6329 = vmatpush3.bf16.msra.mxu0 %v6780_v33  ;;  %6763 = vmatpush3.bf16.msra.mxu1 %v6780_v33  ;;  %v473_v22 = vor.u32 %v472_v11, %v469_v10  ;;  %v482_v24 = vrot.slane %v480_v13, 4  ;;  %v488_v30 = vrot.slane %v486_v18, 5  ;;  %v302_v31 = vshll.u32 %v7020_v14, 16  ;;  %v7072_v8 = vld [vmem:[%s6955_s23 + $0x2c] sm:$0x1] }
  0x22   : > { %6330 = vmatprep.subr.bf16.mxu0 %v6781_v58  ;;  %6756 = vmatprep.subr.bf16.mxu1 %v6781_v58  ;;  %v297_v29 = vsel %vm6986_vm2, %v292_v17, %v296_v9  ;;  %v308_v33 = vshll.u32 %v7028_v19, 16  ;;  %v301_v38 = vrot.slane %v299_v28, 4  ;;  %v312_v45 = vshrl.u32 %v7028_v19, 16  ;;  %v7076_v13 = vld [vmem:[%s6955_s23 + $0x84] sm:$0xf] }
  0x23   : > { %v5373_v35 = vcombine.low %v287_v16, %v297_v29  ;;  %v474_v36 = vrot.slane %v473_v22, 4  ;;  %v483_v37 = vor.u32 %v482_v24, %v478_v23  ;;  %v304_v43 = vrot.slane %v302_v31, 5  ;;  %v7083_v22 = vld [vmem:[%s6955_s23 + $0x88] sm:$0xf] }
  0x24   : > { %v310_v44 = vrot.slane %v308_v33, 5  ;;  %v318_v46 = vshll.u32 %v7033_v25, 16  ;;  %v491_v50 = vshrl.u32 %v203_v34, 16  ;;  %v494_v51 = vshll.u32 %v203_v34, 16 }
  0x25   : > { %6331 = vmatpush3.bf16.msra.mxu0 %v6781_v58  ;;  %6764 = vmatpush3.bf16.msra.mxu1 %v6781_v58  ;;  %v479_v47 = vsel %vm6986_vm2, %v474_v36, %v478_v23  ;;  %v484_v48 = vrot.slane %v483_v37, 4  ;;  %v305_v53 = vor.u32 %v304_v43, %v301_v38  ;;  %v314_v54 = vrot.slane %v312_v45, 4  ;;  %v7092_v36 = vld [vmem:[%s6955_s23 + $0x8c] sm:$0x1] }
  0x26   : > { %6332 = vmatprep.subr.bf16.mxu0 %v6782_v15  ;;  %6757 = vmatprep.subr.bf16.mxu1 %v6782_v15  ;;  %v320_v55 = vrot.slane %v318_v46, 5  ;;  %v500_v56 = vshll.u32 %v7042_v39, 16  ;;  %v493_v60 = vrot.slane %v491_v50, 4  ;;  %v496_v61 = vrot.slane %v494_v51, 5  ;;  %v6788_v37 = vld [vmem:[%s9588_s1 + $0xa8] sm:$0xff]  }
  0x27   : > { %v489_v58 = vsel %vm6986_vm2, %v484_v48, %v488_v30  ;;  %v504_v63 = vshrl.u32 %v7042_v39, 16  ;;  %v306_v2 = vrot.slane %v305_v53, 4  ;;  %v315_v3 = vor.u32 %v314_v54, %v310_v44  ;;  %v6787_v30 = vld [vmem:[%s9588_s1 + $0x28] sm:$0xff]   ;;  %v7107_v53 = vld [vmem:[%s6955_s23 + $0x30] sm:$0xf] }
  0x28   : > { %v5381_v1 = vcombine.low %v479_v47, %v489_v58  ;;  %v502_v7 = vrot.slane %v500_v56, 5  ;;  %v497_v9 = vor.u32 %v496_v61, %v493_v60  ;;  %v510_v11 = vshll.u32 %v241_v49, 16  ;;  %v7116_v60 = vld [vmem:[%s6955_s23 + $0x34] sm:$0xf] }
  0x29   : > { %6333 = vmatpush3.bf16.msra.mxu0 %v6782_v15  ;;  %6765 = vmatpush3.bf16.msra.mxu1 %v6782_v15  ;;  %v506_v10 = vrot.slane %v504_v63, 4  ;;  %v323_v12 = vshrl.u32 %v7060_v57, 16  ;;  %v311_v15 = vsel %vm6986_vm2, %v306_v2, %v310_v44  ;;  %v316_v16 = vrot.slane %v315_v3, 4 }
  0x2a   : > { %6366 = vmatprep.subr.bf16.mxu1 %v6783_v41  ;;  %6414 = vmatprep.subr.bf16.mxu0 %v6784_v42  ;;  %v326_v17 = vshll.u32 %v7060_v57, 16  ;;  %v332_v18 = vshll.u32 %v7069_v0, 16  ;;  %v498_v23 = vrot.slane %v497_v9, 4  ;;  %v512_v28 = vrot.slane %v510_v11, 5 }
  0x2b   : > { %v507_v24 = vor.u32 %v506_v10, %v502_v7  ;;  %v325_v29 = vrot.slane %v323_v12, 4  ;;  %v321_v31 = vsel %vm6986_vm2, %v316_v16, %v320_v55  ;;  %v342_v43 = vshll.u32 %v7072_v8, 16  ;;  %v7124_v16 = vld [vmem:[%s6955_s23 + $0x38] sm:$0x1] }
  0x2c   : > { %6335 = vmatmul.mubr.bf16.vlgmr.msra.gmra.mxu0 %v5373_v35  ;;  %6351 = vmatmul.mubr.bf16.vlgmr.msra.gmra.mxu1 %v5381_v1  ;;  %v328_v33 = vrot.slane %v326_v17, 5  ;;  %v334_v34 = vrot.slane %v332_v18, 5  ;;  %v336_v35 = vshrl.u32 %v7069_v0, 16  ;;  %v5374_v38 = vcombine.low %v311_v15, %v321_v31  ;;  %v7128_v18 = vld [vmem:[%s6955_s23 + $0x90] sm:$0xf] }
  0x2d   : > { %6367 = vmatpush3.bf16.msra.mxu1 %v6783_v41  ;;  %6415 = vmatpush3.bf16.msra.mxu0 %v6784_v42  ;;  %v503_v41 = vsel %vm6986_vm2, %v498_v23, %v502_v7  ;;  %v508_v42 = vrot.slane %v507_v24, 4  ;;  %v515_v46 = vshrl.u32 %v7076_v13, 16  ;;  %v518_v47 = vshll.u32 %v7076_v13, 16  ;;  %v7134_v31 = vld [vmem:[%s6955_s23 + $0x94] sm:$0xf] }
  0x2e   : > { %6368 = vmatprep.subr.bf16.mxu1 %v6785_v52  ;;  %6416 = vmatprep.subr.bf16.mxu0 %v6786_v59  ;;  %v329_v44 = vor.u32 %v328_v33, %v325_v29  ;;  %v338_v45 = vrot.slane %v336_v35, 4  ;;  %v344_v49 = vrot.slane %v342_v43, 5  ;;  %v524_v50 = vshll.u32 %v7083_v22, 16 }
  0x2f   : > { %v513_v48 = vsel %vm6986_vm2, %v508_v42, %v512_v28  ;;  %v528_v51 = vshrl.u32 %v7083_v22, 16  ;;  %6338 = vmatprep.mubr.bf16.mxu0 %v5374_v38  ;;  %v517_v58 = vrot.slane %v515_v46, 4  ;;  %v520_v61 = vrot.slane %v518_v47, 5  ;;  %v6792_v38 = vld [vmem:[%s9588_s1 + $0x98] sm:$0xff]   ;;  %v6793_v46 = vld [vmem:[%s9588_s1 + $0x10] sm:$0xff]  }
  0x30   : > { %v5382_v54 = vcombine.low %v503_v41, %v513_v48  ;;  %v330_v55 = vrot.slane %v329_v44, 4  ;;  %v339_v56 = vor.u32 %v338_v45, %v334_v34  ;;  %v526_v63 = vrot.slane %v524_v50, 5  ;;  %v7144_v44 = vld [vmem:[%s6955_s23 + $0x98] sm:$0x1] }
  0x31   : > { %6369 = vmatpush3.bf16.msra.mxu1 %v6785_v52  ;;  %6417 = vmatpush3.bf16.msra.mxu0 %v6786_v59  ;;  %v6789_v52 = vld [vmem:[%s9588_s1 + $0x20] sm:$0xff]   ;;  %v530_v1 = vrot.slane %v528_v51, 4  ;;  %v534_v2 = vshll.u32 %v7092_v36, 16  ;;  %v347_v9 = vshrl.u32 %v7107_v53, 16  ;;  %v350_v10 = vshll.u32 %v7107_v53, 16 }
  0x32   : > { %6370 = vmatprep.subr.bf16.mxu1 %v6787_v30  ;;  %v6790_v59 = vld [vmem:[%s9588_s1 + $0xa0] sm:$0xff]   ;;  %6418 = vmatprep.subr.bf16.mxu0 %v6788_v37  ;;  %v335_v3 = vsel %vm6986_vm2, %v330_v55, %v334_v34  ;;  %v340_v7 = vrot.slane %v339_v56, 4  ;;  %v521_v11 = vor.u32 %v520_v61, %v517_v58  ;;  %v356_v17 = vshll.u32 %v7116_v60, 16  ;;  %v7157_v51 = vld [vmem:[%s6955_s23 + $0x3c] sm:$0xf]  ;;  %v6794_v55 = vld [vmem:[%s9588_s1 + $0x90] sm:$0xff]  }
  0x33   : > { %6354 = vmatprep.mubr.bf16.mxu1 %v5382_v54  ;;  %v531_v12 = vor.u32 %v530_v1, %v526_v63  ;;  %v536_v15 = vrot.slane %v534_v2, 5  ;;  %v349_v24 = vrot.slane %v347_v9, 4  ;;  %v352_v28 = vrot.slane %v350_v10, 5  ;;  %v7160_v54 = vld [vmem:[%s6955_s23 + $0x40] sm:$0xf] }
  0x34   : > { %v345_v23 = vsel %vm6986_vm2, %v340_v7, %v344_v49  ;;  %v360_v29 = vshrl.u32 %v7116_v60, 16  ;;  %v522_v34 = vrot.slane %v521_v11, 4  ;;  %v366_v43 = vshll.u32 %v7124_v16, 16  ;;  %v7167_v7 = vld [vmem:[%s6955_s23 + $0x44] sm:$0x1] }
  0x35   : > { %6371 = vmatpush3.bf16.msra.mxu1 %v6787_v30  ;;  %6419 = vmatpush3.bf16.msra.mxu0 %v6788_v37  ;;  %v6791_v30 = vld [vmem:[%s9588_s1 + $0x18] sm:$0xff]   ;;  %v5375_v33 = vcombine.low %v335_v3, %v345_v23  ;;  %v532_v35 = vrot.slane %v531_v12, 4  ;;  %v358_v37 = vrot.slane %v356_v17, 5  ;;  %v353_v41 = vor.u32 %v352_v28, %v349_v24  ;;  %v7179_v28 = vld [vmem:[%s6955_s23 + $0xa0] sm:$0xf] }
  0x36   : > { %6372 = vmatprep.subr.bf16.mxu1 %v6789_v52  ;;  %6420 = vmatprep.subr.bf16.mxu0 %v6790_v59  ;;  %v362_v42 = vrot.slane %v360_v29, 4  ;;  %v539_v45 = vshrl.u32 %v7128_v18, 16  ;;  %v527_v47 = vsel %vm6986_vm2, %v522_v34, %v526_v63  ;;  %v542_v49 = vshll.u32 %v7128_v18, 16  ;;  %v7170_v9 = vld [vmem:[%s6955_s23 + $0x9c] sm:$0xf]  ;;  %v6795_v29 = vld [vmem:[%s9588_s1 + $0x8] sm:$0xff]  }
  0x37   : > { %6339 = vmatmul.mubr.bf16.gmra.mxu0 %v5375_v33  ;;  %v537_v48 = vsel %vm6986_vm2, %v532_v35, %v536_v15  ;;  %v548_v50 = vshll.u32 %v7134_v31, 16  ;;  %v354_v58 = vrot.slane %v353_v41, 4  ;;  %v368_v63 = vrot.slane %v366_v43, 5  ;;  %v6796_v41 = vld [vmem:[%s9588_s1 + $0x88] sm:$0xff]  }
  0x38   : > { %v5383_v56 = vcombine.low %v527_v47, %v537_v48  ;;  %v363_v61 = vor.u32 %v362_v42, %v358_v37  ;;  %v544_v1 = vrot.slane %v542_v49, 5  ;;  %v552_v3 = vshrl.u32 %v7134_v31, 16 }
  0x39   : > { %6373 = vmatpush3.bf16.msra.mxu1 %v6789_v52  ;;  %6421 = vmatpush3.bf16.msra.mxu0 %v6790_v59  ;;  %v541_v52 = vrot.slane %v539_v45, 4  ;;  %v550_v2 = vrot.slane %v548_v50, 5  ;;  %v359_v10 = vsel %vm6986_vm2, %v354_v58, %v358_v37  ;;  %v558_v11 = vshll.u32 %v7144_v44, 16 }
  0x3a   : > { %6374 = vmatprep.subr.bf16.mxu1 %v6791_v30  ;;  %6422 = vmatprep.subr.bf16.mxu0 %v6792_v38  ;;  %v364_v59 = vrot.slane %v363_v61, 4  ;;  %v371_v12 = vshrl.u32 %v7157_v51, 16  ;;  %v554_v17 = vrot.slane %v552_v3, 4  ;;  %v374_v23 = vshll.u32 %v7157_v51, 16  ;;  %v7195_v61 = vld [vmem:[%s6955_s23 + $0xa4] sm:$0x1] }
  0x3b   : > { %6355 = vmatmul.mubr.bf16.gmra.mxu1 %v5383_v56  ;;  %v545_v15 = vor.u32 %v544_v1, %v541_v52  ;;  %v380_v24 = vshll.u32 %v7160_v54, 16  ;;  %v560_v34 = vrot.slane %v558_v11, 5  ;;  %v384_v37 = vshrl.u32 %v7160_v54, 16 }
  0x3c   : > { %v369_v33 = vsel %vm6986_vm2, %v364_v59, %v368_v63  ;;  %v373_v35 = vrot.slane %v371_v12, 4  ;;  %v555_v43 = vor.u32 %v554_v17, %v550_v2  ;;  %v376_v45 = vrot.slane %v374_v23, 5  ;;  %v7200_v59 = vld [vmem:[%s6955_s23 + $0x48] sm:$0xf]  ;;  %v7209_v17 = vld [vmem:[%s6955_s23 + $0x4c] sm:$0xf] }
  0x3d   : > { %6375 = vmatpush3.bf16.msra.mxu1 %v6791_v30  ;;  %6423 = vmatpush3.bf16.msra.mxu0 %v6792_v38  ;;  %v5376_v42 = vcombine.low %v359_v10, %v369_v33  ;;  %v546_v30 = vrot.slane %v545_v15, 4  ;;  %v382_v47 = vrot.slane %v380_v24, 5  ;;  %v386_v48 = vrot.slane %v384_v37, 4 }
  0x3e   : > { %6376 = vmatprep.subr.bf16.mxu1 %v6793_v46  ;;  %6424 = vmatprep.subr.bf16.mxu0 %v6794_v55  ;;  %v390_v49 = vshll.u32 %v7167_v7, 16  ;;  %v563_v50 = vshrl.u32 %v7170_v9, 16  ;;  %v556_v56 = vrot.slane %v555_v43, 4  ;;  %v377_v58 = vor.u32 %v376_v45, %v373_v35 }
  0x3f   : > { %6342 = vmatprep.mubr.bf16.mxu0 %v5376_v42  ;;  %v551_v38 = vsel %vm6986_vm2, %v546_v30, %v550_v2  ;;  %v566_v63 = vshll.u32 %v7170_v9, 16  ;;  %v387_v52 = vor.u32 %v386_v48, %v382_v47  ;;  %v572_v10 = vshll.u32 %v7179_v28, 16  ;;  %v6797_v2 = vld [vmem:[%s9588_s1] sm:$0xff]   ;;  %v7218_v30 = vld [vmem:[%s6955_s23 + $0x50] sm:$0x1] }
  0x40   : > { %v392_v1 = vrot.slane %v390_v49, 5  ;;  %v565_v3 = vrot.slane %v563_v50, 4  ;;  %v561_v11 = vsel %vm6986_vm2, %v556_v56, %v560_v34  ;;  %v378_v12 = vrot.slane %v377_v58, 4 }
  0x41   : > { %6377 = vmatpush3.bf16.msra.mxu1 %v6793_v46  ;;  %6425 = vmatpush3.bf16.msra.mxu0 %v6794_v55  ;;  %v568_v15 = vrot.slane %v566_v63, 5  ;;  %v576_v46 = vshrl.u32 %v7179_v28, 16  ;;  %v6798_v55 = vld [vmem:[%s9588_s1 + $0x80] sm:$0xff]   ;;  %v5384_v23 = vcombine.low %v551_v38, %v561_v11  ;;  %v388_v24 = vrot.slane %v387_v52, 4  ;;  %v7226_v38 = vld [vmem:[%s6955_s23 + $0xa8] sm:$0xf] }
  0x42   : > { %6378 = vmatprep.subr.bf16.mxu1 %v6795_v29  ;;  %6426 = vmatprep.subr.bf16.mxu0 %v6796_v41  ;;  %v574_v33 = vrot.slane %v572_v10, 5  ;;  %v582_v35 = vshll.u32 %v7195_v61, 16  ;;  %v383_v34 = vsel %vm6986_vm2, %v378_v12, %v382_v47  ;;  %v395_v43 = vshrl.u32 %v7200_v59, 16  ;;  %9617 = vst [vmem:[#allocation2_spill] sm:$0xff] %v7226_v38  ;;  %v7231_v47 = vld [vmem:[%s9588_s1 + $0xf8] sm:$0xff]  }
  0x43   : > { %v569_v37 = vor.u32 %v568_v15, %v565_v3  ;;  %v578_v42 = vrot.slane %v576_v46, 4  ;;  %6358 = vmatprep.mubr.bf16.mxu1 %v5384_v23  ;;  %v393_v45 = vsel %vm6986_vm2, %v388_v24, %v392_v1  ;;  %v398_v49 = vshll.u32 %v7200_v59, 16  ;;  %v7234_v52 = vld [vmem:[%s6955_s23 + $0xac] sm:$0xf]  ;;  %v7239_v1 = vld [vmem:[%s9588_s1 + $0x138] sm:$0xff]  }
  0x44   : > { %v584_v48 = vrot.slane %v582_v35, 5  ;;  %v404_v50 = vshll.u32 %v7209_v17, 16  ;;  %v397_v63 = vrot.slane %v395_v43, 4  ;;  %v408_v10 = vshrl.u32 %v7209_v17, 16  ;;  %v7244_v12 = vld [vmem:[%s6955_s23 + $0xb0] sm:$0x1] }
  0x45   : > { %6379 = vmatpush3.bf16.msra.mxu1 %v6795_v29  ;;  %6427 = vmatpush3.bf16.msra.mxu0 %v6796_v41  ;;  %v5377_v29 = vcombine.low %v383_v34, %v393_v45  ;;  %v570_v56 = vrot.slane %v569_v37, 4  ;;  %v579_v58 = vor.u32 %v578_v42, %v574_v33  ;;  %v400_v41 = vrot.slane %v398_v49, 5  ;;  %9618 = vst [vmem:[#allocation3_spill] sm:$0xff] %v7244_v12  ;;  %v7247_v15 = vld [vmem:[%s6955_s23 + $0x54] sm:$0xf] }
  0x46   : > { %6380 = vmatprep.subr.bf16.mxu1 %v6797_v2  ;;  %6428 = vmatprep.subr.bf16.mxu0 %v6798_v55  ;;  %v406_v3 = vrot.slane %v404_v50, 5  ;;  %v414_v11 = vshll.u32 %v7218_v30, 16  ;;  %v587_v24 = vshrl.u32 %v7226_v38, 16  ;;  %v590_v35 = vshll.u32 %v7226_v38, 16  ;;  %v7254_v34 = vld [vmem:[%s6955_s23 + $0x58] sm:$0xf] }
  0x47   : > { %6343 = vmatmul.mubr.bf16.gmra.mxu0 %v5377_v29  ;;  %v575_v46 = vsel %vm6986_vm2, %v570_v56, %v574_v33  ;;  %v580_v23 = vrot.slane %v579_v58, 4  ;;  %v401_v37 = vor.u32 %v400_v41, %v397_v63  ;;  %v410_v42 = vrot.slane %v408_v10, 4 }
  0x48   : > { %v416_v43 = vrot.slane %v414_v11, 5  ;;  %v596_v45 = vshll.u32 %v7234_v52, 16  ;;  %v589_v49 = vrot.slane %v587_v24, 4  ;;  %v592_v50 = vrot.slane %v590_v35, 5 }
  0x49   : > { %6381 = vmatpush3.bf16.msra.mxu1 %v6797_v2  ;;  %6429 = vmatpush3.bf16.msra.mxu0 %v6798_v55  ;;  %v585_v33 = vsel %vm6986_vm2, %v580_v23, %v584_v48  ;;  %v600_v29 = vshrl.u32 %v7234_v52, 16  ;;  %v402_v56 = vrot.slane %v401_v37, 4  ;;  %v411_v58 = vor.u32 %v410_v42, %v406_v3  ;;  %v7263_v55 = vld [vmem:[%s6955_s23 + $0x5c] sm:$0x1]  ;;  %v7268_v48 = vld [vmem:[%s6955_s23 + $0xb4] sm:$0xf] }
  0x4a   : > { %6462 = vmatprep.subr.bf16.mxu1 %v7231_v47  ;;  %6510 = vmatprep.subr.bf16.mxu0 %v7239_v1  ;;  %v5385_v2 = vcombine.low %v575_v46, %v585_v33  ;;  %v598_v63 = vrot.slane %v596_v45, 5  ;;  %v593_v41 = vor.u32 %v592_v50, %v589_v49  ;;  %v606_v11 = vshll.u32 %v7244_v12, 16  ;;  %9619 = vst [vmem:[#allocation4_spill] sm:$0xff] %v7268_v48  ;;  %v7275_v37 = vld [vmem:[%s6955_s23 + $0xb8] sm:$0xf] }
  0x4b   : > { %v602_v10 = vrot.slane %v600_v29, 4  ;;  %v419_v21 = vshrl.u32 %v7247_v15, 16  ;;  %v407_v23 = vsel %vm6986_vm2, %v402_v56, %v406_v3  ;;  %v412_v24 = vrot.slane %v411_v58, 4  ;;  %9620 = vst [vmem:[#allocation5_spill] sm:$0xff] %v7275_v37  ;;  %v7281_v3 = vld [vmem:[%s6955_s23 + $0xbc] sm:$0x1] }
  0x4c   : > { %6359 = vmatmul.mubr.bf16.gmra.mxu1 %v5385_v2  ;;  %v422_v46 = vshll.u32 %v7247_v15, 16  ;;  %v428_v35 = vshll.u32 %v7254_v34, 16  ;;  %v594_v42 = vrot.slane %v593_v41, 4  ;;  %v608_v33 = vrot.slane %v606_v11, 5  ;;  %9621 = vst [vmem:[#allocation6_spill] sm:$0xff] %v7281_v3 }
  0x4d   : > { %v603_v45 = vor.u32 %v602_v10, %v598_v63  ;;  %v421_v49 = vrot.slane %v419_v21, 4  ;;  %v417_v50 = vsel %vm6986_vm2, %v412_v24, %v416_v43  ;;  %v432_v62 = vshrl.u32 %v7254_v34, 16  ;;  %v1229_v10 = vld [vmem:[%s6955_s23] sm:$0xe] }
  0x4e   : > { %v424_v29 = vrot.slane %v422_v46, 5  ;;  %v430_v2 = vrot.slane %v428_v35, 5  ;;  %v5378_v56 = vcombine.low %v407_v23, %v417_v50  ;;  %v599_v58 = vsel %vm6986_vm2, %v594_v42, %v598_v63 }
  0x4f   : > { %v604_v20 = vrot.slane %v603_v45, 4  ;;  %v438_v41 = vshll.u32 %v7263_v55, 16  ;;  %v434_v21 = vrot.slane %v432_v62, 4  ;;  %v611_v12 = vshrl.u32 %v7268_v48, 16 }
  0x50   : > { %v425_v11 = vor.u32 %v424_v29, %v421_v49  ;;  %v614_v43 = vshll.u32 %v7268_v48, 16  ;;  %6346 = vmatprep.mubr.bf16.mxu0 %v5378_v56  ;;  %v620_v46 = vshll.u32 %v7275_v37, 16  ;;  %v624_v63 = vshrl.u32 %v7275_v37, 16  ;;  %v1230_v49 = vld [vmem:[%s6955_s23 + $0xc] sm:$0xe] }
  0x51   : > { %v609_v24 = vsel %vm6986_vm2, %v604_v20, %v608_v33  ;;  %v440_v23 = vrot.slane %v438_v41, 5  ;;  %v435_v45 = vor.u32 %v434_v21, %v430_v2  ;;  %v613_v50 = vrot.slane %v611_v12, 4  ;;  %v1231_v20 = vld [vmem:[%s6955_s23 + $0x18] sm:$0xe] }
  0x52   : > { %v5386_v35 = vcombine.low %v599_v58, %v609_v24  ;;  %v426_v42 = vrot.slane %v425_v11, 4  ;;  %v616_v62 = vrot.slane %v614_v43, 5  ;;  %v622_v29 = vrot.slane %v620_v46, 5 }
  0x53   : > { %v626_v38 = vrot.slane %v624_v63, 4  ;;  %v630_v48 = vshll.u32 %v7281_v3, 16  ;;  %v436_v58 = vrot.slane %v435_v45, 4  ;;  %v5420_v41 = vrot.slane %v1229_v10, 9 }
  0x54   : > { %6362 = vmatprep.mubr.bf16.mxu1 %v5386_v35  ;;  %v431_v33 = vsel %vm6986_vm2, %v426_v42, %v430_v2  ;;  %v1282_v12 = vrot.slane %v6964_v5, 5  ;;  %v617_v11 = vor.u32 %v616_v62, %v613_v50  ;;  %v5421_v24 = vrot.slane %v1230_v49, 9 }
  0x55   : > { %v627_v21 = vor.u32 %v626_v38, %v622_v29  ;;  %v632_v43 = vrot.slane %v630_v48, 5  ;;  %v441_v46 = vsel %vm6986_vm2, %v436_v58, %v440_v23  ;;  %v1289_v35 = vrot.slane %v6991_v32, 5 }
  0x56   : > { %v1283_v63 = vsel %vm7297_vm5, %v5420_v41, %v1282_v12  ;;  %v1284_v3 = vrot.slane %v1282_v12, 4  ;;  %v5379_v37 = vcombine.low %v431_v33, %v441_v46  ;;  %v618_v2 = vrot.slane %v617_v11, 4  ;;  %v1233_v12 = vld [vmem:[%s6955_s23 + $0x30] sm:$0xe]  ;;  %v1235_v46 = vld [vmem:[%s6955_s23 + $0x48] sm:$0xe] }
  0x57   : > { %v628_v42 = vrot.slane %v627_v21, 4  ;;  %v5396_v10 = vcombine.low %v6961_v4, %v6964_v5  ;;  %v9624_v38 = vrot.slane %v6967_v6, 5  ;;  %v1291_v45 = vrot.slane %v1289_v35, 4 }
  0x58   : > { %v5422_v23 = vrot.slane %v1231_v20, 9  ;;  %6347 = vmatmul.mubr.bf16.gmra.mxu0 %v5379_v37  ;;  %v623_v50 = vsel %vm6986_vm2, %v618_v2, %v622_v29  ;;  %v1296_v33 = vrot.slane %v7028_v19, 5  ;;  %v1290_v4 = vsel %vm7297_vm5, %v5421_v24, %v1289_v35  ;;  %v1234_v24 = vld [vmem:[%s6955_s23 + $0x3c] sm:$0xe] }
  0x59   : > { %v1286_v48 = vsel %vm7297_vm5, %v1284_v3, %v9624_v38  ;;  %v633_v49 = vsel %vm6986_vm2, %v628_v42, %v632_v43  ;;  %v9625_v5 = vrot.slane %v6997_v40, 5  ;;  %v1299_v37 = vrot.slane %v7033_v25, 5  ;;  %v1232_v3 = vld [vmem:[%s6955_s23 + $0x24] sm:$0xe]  ;;  %v6806_v25 = vld [vmem:[%s9588_s1 + $0x130] sm:$0xff]  }
  0x5a   : > { %v5452_v62 = vcombine.low %v1283_v63, %v1286_v48  ;;  %v5387_v58 = vcombine.low %v623_v50, %v633_v49  ;;  %v1297_v29 = vsel %vm7297_vm5, %v5422_v23, %v1296_v33  ;;  %v1298_v20 = vrot.slane %v1296_v33, 4  ;;  %v6805_v23 = vld [vmem:[%s9588_s1 + $0xf0] sm:$0xff]  }
  0x5b   : > { %v1293_v6 = vsel %vm7297_vm5, %v1291_v45, %v9625_v5  ;;  %v1303_v41 = vrot.slane %v7069_v0, 5  ;;  %v5423_v21 = vrot.slane %v1232_v3, 9  ;;  %v1310_v43 = vrot.slane %v7116_v60, 5  ;;  %v7372_v3 = vld [vmem:[%s6955_s23 + $0x68] sm:$0x1] }
  0x5c   : > { %6430 = vmatprep.mubr.bf16.mxu0 %v5452_v62  ;;  %6363 = vmatmul.mubr.bf16.gmra.mxu1 %v5387_v58  ;;  %v5453_v11 = vcombine.low %v1290_v4, %v1293_v6  ;;  %v1300_v40 = vsel %vm7297_vm5, %v1298_v20, %v1299_v37  ;;  %v1306_v2 = vrot.slane %v7072_v8, 5  ;;  %v5424_v42 = vrot.slane %v1233_v12, 9  ;;  %v1236_v37 = vld [vmem:[%s6955_s23 + $0x54] sm:$0xe]  ;;  %v7396_v12 = vld [vmem:[%s6955_s23 + $0x60] sm:$0xe] }
  0x5d   : > { %6382 = vmatprep.mubr.bf16.mxu1 %v5396_v10  ;;  %v5454_v63 = vcombine.low %v1297_v29, %v1300_v40  ;;  %v1305_v35 = vrot.slane %v1303_v41, 4  ;;  %v1312_v38 = vrot.slane %v1310_v43, 4  ;;  %v1313_v10 = vrot.slane %v7124_v16, 5 }
  0x5e   : > { %v1317_v48 = vrot.slane %v7160_v54, 5  ;;  %v5398_v45 = vcombine.low %v7020_v14, %v7028_v19  ;;  %v1324_v50 = vrot.slane %v7209_v17, 5  ;;  %v5425_v49 = vrot.slane %v1234_v24, 9  ;;  %v6814_v24 = vld [vmem:[%s9588_s1 + $0x120] sm:$0xff]  }
  0x5f   : > { %v1320_v8 = vrot.slane %v7167_v7, 5  ;;  %v5426_v33 = vrot.slane %v1235_v46, 9  ;;  %v1304_v14 = vsel %vm7297_vm5, %v5423_v21, %v1303_v41  ;;  %v1307_v19 = vsel %vm7297_vm5, %v1305_v35, %v1306_v2  ;;  %v7408_v46 = vld [vmem:[%s6955_s23 + $0x78] sm:$0xe]  ;;  %v6813_v2 = vld [vmem:[%s9588_s1 + $0xe0] sm:$0xff]  }
  0x60   : > { %6431 = vmatmul.mubr.bf16.vlgmr.msra.gmra.mxu0 %v5453_v11  ;;  %v1319_v62 = vrot.slane %v1317_v48, 4  ;;  %v1326_v16 = vrot.slane %v1324_v50, 4  ;;  %v1327_v58 = vrot.slane %v7218_v30, 5  ;;  %v1311_v4 = vsel %vm7297_vm5, %v5424_v42, %v1310_v43  ;;  %v7399_v11 = vld [vmem:[%s6955_s23 + $0x6c] sm:$0xe] }
  0x61   : > { %6511 = vmatpush3.bf16.msra.mxu0 %v7239_v1  ;;  %6434 = vmatprep.mubr.bf16.mxu0 %v5454_v63  ;;  %v1314_v7 = vsel %vm7297_vm5, %v1312_v38, %v1313_v10  ;;  %v6810_v1 = vld [vmem:[%s9588_s1 + $0x128] sm:$0xff]   ;;  %v1331_v5 = vrot.slane %v7254_v34, 5  ;;  %v9626_v6 = vcombine.low %v6982_v26, %v6991_v32  ;;  %v5399_v30 = vcombine.low %v7060_v57, %v7069_v0  ;;  %v1240_v63 = vld [vmem:[%s6955_s23 + $0x84] sm:$0xe]  ;;  %v1241_v42 = vld [vmem:[%s6955_s23 + $0x90] sm:$0xe] }
  0x62   : > { %6512 = vmatprep.subr.bf16.mxu0 %v6806_v25  ;;  %v1341_v29 = vrot.slane %v7372_v3, 5  ;;  %v5455_v20 = vcombine.low %v1304_v14, %v1307_v19  ;;  %v7378_v41 = vsel %vm7297_vm5, %v5425_v49, %v1317_v48  ;;  %v7382_v26 = vsel %vm7297_vm5, %v1319_v62, %v1320_v8  ;;  %v6809_v32 = vld [vmem:[%s9588_s1 + $0xe8] sm:$0xff]   ;;  %v7427_v48 = vld [vmem:[%s6955_s23 + $0x64] sm:$0xf]  ;;  %v1242_v49 = vld [vmem:[%s6955_s23 + $0x9c] sm:$0xe] }
  0x63   : > { %v5456_v57 = vcombine.low %v1311_v4, %v1314_v7  ;;  %v7389_v0 = vsel %vm7297_vm5, %v5426_v33, %v1324_v50  ;;  %v5400_v40 = vcombine.low %v7107_v53, %v7116_v60  ;;  %v5427_v21 = vrot.slane %v1236_v37, 9  ;;  %v7449_v4 = vld [vmem:[%s6955_s23 + $0x74] sm:$0x1] }
  0x64   : > { %6383 = vmatmul.mubr.bf16.vlgmr.msra.gmra.mxu1 %v9626_v6  ;;  %v1334_v43 = vrot.slane %v7263_v55, 5  ;;  %v5401_v35 = vcombine.low %v7157_v51, %v7160_v54  ;;  %v5457_v53 = vcombine.low %v7378_v41, %v7382_v26  ;;  %v5402_v60 = vcombine.low %v7200_v59, %v7209_v17  ;;  %v6899_v54 = vld [vmem:[%s6955_s23 + $0x80] sm:$0x1] }
  0x65   : > { %6463 = vmatpush3.bf16.msra.mxu1 %v7231_v47  ;;  %6386 = vmatprep.mubr.bf16.mxu1 %v5398_v45  ;;  %v7393_v47 = vsel %vm7297_vm5, %v1326_v16, %v1327_v58  ;;  %v5403_v55 = vcombine.low %v7247_v15, %v7254_v34  ;;  %v5428_v10 = vrot.slane %v7396_v12, 9  ;;  %v1338_v45 = vrot.slane %v7427_v48, 5  ;;  %v7445_v16 = vld [vmem:[%s6955_s23 + $0x70] sm:$0xf]  ;;  %v6900_v17 = vld [vmem:[%s6955_s23 + $0x60] sm:$0xf] }
  0x66   : > { %6464 = vmatprep.subr.bf16.mxu1 %v6805_v23  ;;  %6513 = vmatpush3.bf16.msra.mxu0 %v6806_v25  ;;  %v1333_v25 = vrot.slane %v1331_v5, 4  ;;  %v5458_v38 = vcombine.low %v7389_v0, %v7393_v47  ;;  %v5429_v62 = vrot.slane %v7399_v11, 9  ;;  %v1359_v8 = vrot.slane %v7083_v22, 5  ;;  %v1243_v0 = vld [vmem:[%s6955_s23 + $0xa8] sm:$0xe]  ;;  %v7629_v15 = vld [vmem:[%s9588_s1 + $0x1b8] sm:$0xff]  }
  0x67   : > { %6514 = vmatprep.subr.bf16.mxu0 %v6810_v1  ;;  %v1362_v33 = vrot.slane %v7092_v36, 5  ;;  %v7438_v14 = vsel %vm7297_vm5, %v5427_v21, %v1331_v5  ;;  %v1345_v58 = vrot.slane %v7445_v16, 5  ;;  %v1348_v7 = vrot.slane %v7449_v4, 5  ;;  %v6817_v36 = vld [vmem:[%s9588_s1 + $0xd8] sm:$0xff]  }
  0x68   : > { %6435 = vmatmul.mubr.bf16.gmra.mxu0 %v5455_v20  ;;  %v7442_v19 = vsel %vm7297_vm5, %v1333_v25, %v1334_v43  ;;  %v5430_v5 = vrot.slane %v7408_v46, 9  ;;  %v1361_v37 = vrot.slane %v1359_v8, 4  ;;  %v5432_v41 = vrot.slane %v1241_v42, 9  ;;  %v5548_v42 = vld [vmem:[%s6955_s23 + $0xc] sm:$0xf] }
  0x69   : > { %6465 = vmatpush3.bf16.msra.mxu1 %v6805_v23  ;;  %6438 = vmatprep.mubr.bf16.mxu0 %v5456_v57  ;;  %v5431_v23 = vrot.slane %v1240_v63, 9  ;;  %v1366_v26 = vrot.slane %v7134_v31, 5  ;;  %v1369_v57 = vrot.slane %v7144_v44, 5  ;;  %v1352_v47 = vrot.slane %v7042_v39, 5 }
  0x6a   : > { %6466 = vmatprep.subr.bf16.mxu1 %v6809_v32  ;;  %6515 = vmatpush3.bf16.msra.mxu0 %v6810_v1  ;;  %v6818_v1 = vld [vmem:[%s9588_s1 + $0x118] sm:$0xff]   ;;  %v7473_v21 = vsel %vm7297_vm5, %v1361_v37, %v1362_v33  ;;  %v1373_v63 = vrot.slane %v7179_v28, 5  ;;  %v5434_v33 = vrot.slane %v1243_v0, 9  ;;  %v1380_v37 = vrot.slane %v7234_v52, 5  ;;  %v6821_v0 = vld [vmem:[%s9588_s1 + $0xd0] sm:$0xff]  }
  0x6b   : > { %6516 = vmatprep.subr.bf16.mxu0 %v6814_v24  ;;  %v7461_v6 = vsel %vm7297_vm5, %v5431_v23, %v1359_v8  ;;  %v7481_v44 = vsel %vm7297_vm5, %v5432_v41, %v1366_v26  ;;  %v1368_v43 = vrot.slane %v1366_v26, 4  ;;  %v6822_v23 = vld [vmem:[%s9588_s1 + $0x110] sm:$0xff]   ;;  %v1376_v8 = vrot.slane %v7195_v61, 5  ;;  %v9628_v61 = vld [vmem:[#allocation3_spill] sm:$0xff] }
  0x6c   : > { %6387 = vmatmul.mubr.bf16.gmra.mxu1 %v5399_v30  ;;  %v1340_v30 = vrot.slane %v1338_v45, 4  ;;  %v1375_v20 = vrot.slane %v1373_v63, 4  ;;  %v1383_v50 = vrot.slane %v9628_v61, 5  ;;  %v1339_v61 = vsel %vm7297_vm5, %v5428_v10, %v1338_v45  ;;  %v5551_v45 = vld [vmem:[%s6955_s23 + $0x18] sm:$0xf] }
  0x6d   : > { %6390 = vmatprep.mubr.bf16.mxu1 %v5400_v40  ;;  %6467 = vmatpush3.bf16.msra.mxu1 %v6809_v32  ;;  %v5433_v40 = vrot.slane %v1242_v49, 9  ;;  %v7493_v32 = vld [vmem:[%s6955_s23 + $0x10] sm:$0xf]  ;;  %v7497_v41 = vsel %vm7297_vm5, %v1368_v43, %v1369_v57  ;;  %v1382_v57 = vrot.slane %v1380_v37, 4  ;;  %v2150_v12 = vshrl.u32 %v5548_v42, 16 }
  0x6e   : > { %6468 = vmatprep.subr.bf16.mxu1 %v6813_v2  ;;  %6517 = vmatpush3.bf16.msra.mxu0 %v6814_v24  ;;  %v9627_v24 = vld [vmem:[#allocation2_spill] sm:$0xff]  ;;  %v9630_v43 = vld [vmem:[#allocation4_spill] sm:$0xff]  ;;  %v2153_v10 = vshll.u32 %v5548_v42, 16  ;;  %v1347_v51 = vrot.slane %v1345_v58, 4  ;;  %v2159_v59 = vshll.u32 %v7493_v32, 16  ;;  %v1353_v4 = vsel %vm7297_vm5, %v5430_v5, %v1352_v47 }
  0x6f   : > { %6518 = vmatprep.subr.bf16.mxu0 %v6818_v1  ;;  %v7501_v26 = vsel %vm7297_vm5, %v5433_v40, %v1373_v63  ;;  %v9629_v40 = vld [vmem:[#allocation5_spill] sm:$0xff]  ;;  %v7567_v42 = vld [vmem:[%s6955_s23 + $0x14] sm:$0x1]  ;;  %v2152_v63 = vrot.slane %v2150_v12, 4  ;;  %v9632_v5 = vld [vmem:[#allocation6_spill] sm:$0xff] }
  0x70   : > { %6439 = vmatmul.mubr.bf16.gmra.mxu0 %v5457_v53  ;;  %v2155_v49 = vrot.slane %v2153_v10, 5  ;;  %v5554_v53 = vld [vmem:[%s6955_s23 + $0x24] sm:$0xf]  ;;  %v1349_v11 = vsel %vm7297_vm5, %v1347_v51, %v1348_v7 }
  0x71   : > { %6469 = vmatpush3.bf16.msra.mxu1 %v6813_v2  ;;  %6442 = vmatprep.mubr.bf16.mxu0 %v5458_v38  ;;  %v7511_v2 = vsel %vm7297_vm5, %v5434_v33, %v1380_v37  ;;  %v5459_v38 = vcombine.low %v7438_v14, %v7442_v19  ;;  %v1342_v33 = vsel %vm7297_vm5, %v1340_v30, %v1341_v29  ;;  %v6826_v14 = vld [vmem:[%s9588_s1 + $0x108] sm:$0xff]   ;;  %v6830_v30 = vld [vmem:[%s9588_s1 + $0x100] sm:$0xff]   ;;  %v7586_v19 = vrot.slane %v2159_v59, 5 }
  0x72   : > { %6470 = vmatprep.subr.bf16.mxu1 %v6817_v36  ;;  %6519 = vmatpush3.bf16.msra.mxu0 %v6818_v1  ;;  %v7529_v37 = vsel %vm7297_vm5, %v1375_v20, %v1376_v8  ;;  %v7541_v29 = vsel %vm7297_vm5, %v1382_v57, %v1383_v50  ;;  %v6825_v50 = vld [vmem:[%s9588_s1 + $0xc8] sm:$0xff]   ;;  %v7556_v1 = vld [vmem:[%s6955_s23 + $0xb4] sm:$0xe]  ;;  %v5460_v20 = vcombine.low %v1339_v61, %v1342_v33  ;;  %v2163_v8 = vshrl.u32 %v7493_v32, 16  ;;  %v7584_v61 = vld [vmem:[%s6955_s23 + $0x1c] sm:$0xf] }
  0x73   : > { %6520 = vmatprep.subr.bf16.mxu0 %v6822_v23  ;;  %v7571_v57 = vld [vmem:[%s6955_s23 + $0x6c] sm:$0xf]  ;;  %v2174_v33 = vshrl.u32 %v5551_v45, 16  ;;  %v2183_v51 = vshll.u32 %v7584_v61, 16  ;;  %v2187_v39 = vshrl.u32 %v7584_v61, 16  ;;  %v2198_v59 = vshrl.u32 %v5554_v53, 16 }
  0x74   : > { %6391 = vmatmul.mubr.bf16.gmra.mxu1 %v5401_v35  ;;  %v1355_v35 = vrot.slane %v6899_v54, 5  ;;  %v5405_v54 = vcombine.low %v7571_v57, %v7445_v16  ;;  %v2165_v3 = vrot.slane %v2163_v8, 4  ;;  %v2201_v46 = vshll.u32 %v5554_v53, 16  ;;  %v6903_v8 = vld [vmem:[%s6955_s23 + $0x7c] sm:$0xf] }
  0x75   : > { %6394 = vmatprep.mubr.bf16.mxu1 %v5402_v60  ;;  %6471 = vmatpush3.bf16.msra.mxu1 %v6817_v36  ;;  %v5404_v60 = vcombine.low %v6900_v17, %v7427_v48  ;;  %v1354_v36 = vrot.slane %v1352_v47, 4  ;;  %v7581_v48 = vsel %vm7297_vm5, %v5429_v62, %v1345_v58  ;;  %v2177_v17 = vshll.u32 %v5551_v45, 16  ;;  %v6829_v58 = vld [vmem:[%s9588_s1 + $0xc0] sm:$0xff]   ;;  %v7611_v45 = vld [vmem:[%s6955_s23 + $0x28] sm:$0xf] }
  0x76   : > { %6472 = vmatprep.subr.bf16.mxu1 %v6821_v0  ;;  %6521 = vmatpush3.bf16.msra.mxu0 %v6822_v23  ;;  %v9600_v62 = vrot.slane %v9629_v40, 5  ;;  %v7598_v23 = vld [vmem:[%s6955_s23 + $0x20] sm:$0x1]  ;;  %v2176_v12 = vrot.slane %v2174_v33, 4  ;;  %9631 = vst [vmem:[#allocation2_spill] sm:$0xff] %v7611_v45  ;;  %v5461_v34 = vcombine.low %v7581_v48, %v1349_v11  ;;  %v2207_v53 = vshll.u32 %v7611_v45, 16 }
  0x77   : > { %6522 = vmatprep.subr.bf16.mxu0 %v6826_v14  ;;  %v2179_v10 = vrot.slane %v2177_v17, 5  ;;  %v1356_v7 = vsel %vm7297_vm5, %v1354_v36, %v1355_v35  ;;  %v2156_v35 = vor.u32 %v2155_v49, %v2152_v63  ;;  %v7624_v36 = vld [vmem:[%s9588_s1 + $0x178] sm:$0xff]   ;;  %v5557_v63 = vld [vmem:[%s6955_s23 + $0x30] sm:$0xf]  ;;  %v7645_v48 = vld [vmem:[%s6955_s23 + $0x34] sm:$0xf] }
  0x78   : > { %6443 = vmatmul.mubr.bf16.gmra.mxu0 %v5459_v38  ;;  %v2169_v38 = vshll.u32 %v7567_v42, 16  ;;  %v5462_v17 = vcombine.low %v1353_v4, %v1356_v7  ;;  %9634 = vst [vmem:[#allocation5_spill] sm:$0xff] %v7645_v48  ;;  %v7647_v11 = vrot.slane %v2183_v51, 5  ;;  %v2203_v47 = vrot.slane %v2201_v46, 5  ;;  %v7666_v46 = vld [vmem:[%s6955_s23 + $0x40] sm:$0xf] }
  0x79   : > { %6473 = vmatpush3.bf16.msra.mxu1 %v6821_v0  ;;  %6446 = vmatprep.mubr.bf16.mxu0 %v5460_v20  ;;  %v2166_v20 = vor.u32 %v2165_v3, %v7586_v19  ;;  %v2180_v49 = vor.u32 %v2179_v10, %v2176_v12  ;;  %v6902_v3 = vld [vmem:[%s6955_s23 + $0x78] sm:$0xf]  ;;  %v2189_v12 = vrot.slane %v2187_v39, 4  ;;  %v2200_v10 = vrot.slane %v2198_v59, 4  ;;  %9635 = vst [vmem:[#allocation4_spill] sm:$0xff] %v7666_v46 }
  0x7a   : > { %6474 = vmatprep.subr.bf16.mxu1 %v6825_v50  ;;  %6523 = vmatpush3.bf16.msra.mxu0 %v6826_v14  ;;  %v2193_v14 = vshll.u32 %v7598_v23, 16  ;;  %v5406_v33 = vcombine.low %v6902_v3, %v6903_v8  ;;  %v7638_v25 = vrot.slane %v2169_v38, 5  ;;  %v7650_v0 = vld [vmem:[%s6955_s23 + $0x38] sm:$0x1]  ;;  %v7652_v4 = vrot.slane %v2156_v35, 4 }
  0x7b   : > { %6524 = vmatprep.subr.bf16.mxu0 %v6830_v30  ;;  %v7654_v7 = vrot.slane %v2166_v20, 4  ;;  %v2222_v3 = vshrl.u32 %v5557_v63, 16  ;;  %v5560_v8 = vld [vmem:[%s6955_s23 + $0x3c] sm:$0xf]  ;;  %v7662_v51 = vrot.slane %v2207_v53, 5  ;;  %v2225_v39 = vshll.u32 %v5557_v63, 16 }
  0x7c   : > { %6395 = vmatmul.mubr.bf16.gmra.mxu1 %v5403_v55  ;;  %v1389_v55 = vrot.slane %v9600_v62, 4  ;;  %v7656_v38 = vrot.slane %v2193_v14, 5  ;;  %v2231_v59 = vshll.u32 %v7645_v48, 16  ;;  %v2235_v20 = vshrl.u32 %v7645_v48, 16 }
  0x7d   : > { %6398 = vmatprep.mubr.bf16.mxu1 %v5404_v60  ;;  %6475 = vmatpush3.bf16.msra.mxu1 %v6825_v50  ;;  %v7641_v60 = vld [vmem:[%s6955_s23 + $0x2c] sm:$0x1]  ;;  %v2211_v50 = vshrl.u32 %v7611_v45, 16  ;;  %v2190_v14 = vor.u32 %v2189_v12, %v7647_v11  ;;  %v2224_v53 = vrot.slane %v2222_v3, 4  ;;  %v2227_v63 = vrot.slane %v2225_v39, 5 }
  0x7e   : > { %6476 = vmatprep.subr.bf16.mxu1 %v6829_v58  ;;  %9633 = vst [vmem:[#allocation3_spill] sm:$0xff] %v7641_v60  ;;  %6525 = vmatpush3.bf16.msra.mxu0 %v6830_v30  ;;  %v7660_v30 = vrot.slane %v2180_v49, 4  ;;  %v2246_v49 = vshrl.u32 %v5560_v8, 16  ;;  %v2249_v62 = vshll.u32 %v5560_v8, 16  ;;  %v2237_v48 = vrot.slane %v2235_v20, 4 }
  0x7f   : > { %6606 = vmatprep.subr.bf16.mxu0 %v7629_v15  ;;  %v2213_v35 = vrot.slane %v2211_v50, 4  ;;  %v7676_v50 = vrot.slane %v2231_v59, 5  ;;  %v7679_v45 = vld [vmem:[%s6955_s23 + $0x44] sm:$0x1]  ;;  %v2259_v12 = vshrl.u32 %v7666_v46, 16  ;;  %v9636_v16 = vrot.slane %v9629_v40, 5 }
  0x80   : > { %6447 = vmatmul.mubr.bf16.gmra.mxu0 %v5461_v34  ;;  %v2217_v34 = vshll.u32 %v7641_v60, 16  ;;  %v9637_v57 = vrot.slane %v7556_v1, 9  ;;  %v7700_v39 = vld [vmem:[%s6955_s23 + $0x4c] sm:$0xf]  ;;  %v2248_v59 = vrot.slane %v2246_v49, 4  ;;  %v2251_v20 = vrot.slane %v2249_v62, 5 }
  0x81   : > { %6477 = vmatpush3.bf16.msra.mxu1 %v6829_v58  ;;  %6450 = vmatprep.mubr.bf16.mxu0 %v5462_v17  ;;  %v2204_v58 = vor.u32 %v2203_v47, %v2200_v10  ;;  %v2241_v17 = vshll.u32 %v7650_v0, 16  ;;  %v2255_v47 = vshll.u32 %v7666_v46, 16  ;;  %v5563_v10 = vld [vmem:[%s6955_s23 + $0x48] sm:$0xf]  ;;  %v2214_v8 = vor.u32 %v2213_v35, %v7662_v51 }
  0x82   : > { %6558 = vmatprep.subr.bf16.mxu1 %v7624_v36  ;;  %v2261_v1 = vrot.slane %v2259_v12, 4  ;;  %v7704_v46 = vrot.slane %v2190_v14, 4  ;;  %v2162_v62 = vsel %vm6986_vm2, %v7652_v4, %v7586_v19  ;;  %v2172_v35 = vsel %vm6986_vm2, %v7654_v7, %v7638_v25  ;;  %v5566_v4 = vld [vmem:[%s6955_s23 + $0x54] sm:$0xf] }
  0x83   : > { %v7702_v60 = vrot.slane %v2255_v47, 5  ;;  %v2273_v14 = vshll.u32 %v5563_v10, 16  ;;  %v2265_v49 = vshll.u32 %v7679_v45, 16  ;;  %v2283_v19 = vshrl.u32 %v7700_v39, 16 }
  0x84   : > { %6399 = vmatmul.mubr.bf16.gmra.mxu1 %v5405_v54  ;;  %v7690_v54 = vsel %vm7297_vm5, %v9637_v57, %v9636_v16  ;;  %v7706_v16 = vrot.slane %v2204_v58, 4  ;;  %v7708_v57 = vrot.slane %v2217_v34, 5  ;;  %v2279_v58 = vshll.u32 %v7700_v39, 16 }
  0x85   : > { %6402 = vmatprep.mubr.bf16.mxu1 %v5406_v33  ;;  %v9638_v33 = vrot.slane %v9632_v5, 5  ;;  %v2270_v5 = vshrl.u32 %v5563_v10, 16  ;;  %v9640_v34 = vcombine.low %v7481_v44, %v7497_v41  ;;  %v7729_v47 = vrot.slane %v2214_v8, 4  ;;  %v7735_v10 = vld [vmem:[%s6955_s23 + $0x58] sm:$0xf] }
  0x86   : > { %v7731_v12 = vrot.slane %v2241_v17, 5  ;;  %v2252_v25 = vor.u32 %v2251_v20, %v2248_v59  ;;  %v2262_v7 = vor.u32 %v2261_v1, %v7702_v60  ;;  %v9641_v44 = vcombine.low %v7076_v13, %v7083_v22  ;;  %v7741_v41 = vld [vmem:[%s6955_s23 + $0x50] sm:$0x1] }
  0x87   : > { %v7696_v3 = vsel %vm7297_vm5, %v1389_v55, %v9638_v33  ;;  %v9639_v55 = vcombine.low %v7461_v6, %v7473_v21  ;;  %v2228_v6 = vor.u32 %v2227_v63, %v2224_v53  ;;  %v2238_v21 = vor.u32 %v2237_v48, %v7676_v50 }
  0x88   : > { %v2272_v48 = vrot.slane %v2270_v5, 4  ;;  %v2275_v53 = vrot.slane %v2273_v14, 5  ;;  %v7743_v63 = vrot.slane %v2279_v58, 5  ;;  %v2285_v17 = vrot.slane %v2283_v19, 4  ;;  %v5569_v5 = vld [vmem:[%s6955_s23 + $0x60] sm:$0xf] }
  0x89   : > { %6451 = vmatmul.mubr.bf16.gmra.mxu0 %v9639_v55  ;;  %v9642_v33 = vcombine.low %v7128_v18, %v7134_v31  ;;  %v2294_v8 = vshrl.u32 %v5566_v4, 16  ;;  %v2297_v59 = vshll.u32 %v5566_v4, 16  ;;  %v7748_v20 = vrot.slane %v2228_v6, 4  ;;  %v7765_v31 = vld [vmem:[%s6955_s23 + $0x64] sm:$0xf] }
  0x8a   : > { %6454 = vmatprep.mubr.bf16.mxu0 %v9640_v34  ;;  %v7750_v1 = vrot.slane %v2238_v21, 4  ;;  %v7752_v13 = vrot.slane %v2265_v49, 5  ;;  %v2303_v22 = vshll.u32 %v7735_v10, 16  ;;  %v5467_v55 = vcombine.low %v7690_v54, %v7696_v3  ;;  %v7761_v34 = vld [vmem:[%s6955_s23 + $0x5c] sm:$0x1] }
  0x8b   : > { %v5612_v14 = vcombine.low %v2162_v62, %v2172_v35  ;;  %v7758_v58 = vrot.slane %v2252_v25, 4  ;;  %v2307_v18 = vshrl.u32 %v7735_v10, 16  ;;  %v7767_v6 = vrot.slane %v2262_v7, 4 }
  0x8c   : > { %6403 = vmatmul.mubr.bf16.gmra.mxu1 %v9641_v44  ;;  %v2289_v21 = vshll.u32 %v7741_v41, 16  ;;  %v2318_v49 = vshrl.u32 %v5569_v5, 16  ;;  %v2321_v19 = vshll.u32 %v5569_v5, 16  ;;  %v9643_v4 = vcombine.low %v7501_v26, %v7529_v37 }
  0x8d   : > { %6406 = vmatprep.mubr.bf16.mxu1 %v9642_v33  ;;  %v2276_v54 = vor.u32 %v2275_v53, %v2272_v48  ;;  %v2286_v3 = vor.u32 %v2285_v17, %v7743_v63  ;;  %v2296_v62 = vrot.slane %v2294_v8, 4  ;;  %v2299_v35 = vrot.slane %v2297_v59, 5  ;;  %v7805_v8 = vld [vmem:[%s6955_s23 + $0x70] sm:$0xf] }
  0x8e   : > { %v9644_v25 = vcombine.low %v7511_v2, %v7541_v29  ;;  %v7777_v7 = vrot.slane %v2303_v22, 5  ;;  %v2309_v44 = vrot.slane %v2307_v18, 4  ;;  %v2313_v33 = vshll.u32 %v7761_v34, 16 }
  0x8f   : > { %v2327_v26 = vshll.u32 %v7765_v31, 16  ;;  %v2186_v37 = vsel %vm6986_vm2, %v7660_v30, %v7647_v11  ;;  %v2196_v2 = vsel %vm6986_vm2, %v7704_v46, %v7656_v38  ;;  %v2320_v29 = vrot.slane %v2318_v49, 4  ;;  %v5572_v46 = vld [vmem:[%s6955_s23 + $0x6c] sm:$0xf] }
  0x90   : > { %v2323_v48 = vrot.slane %v2321_v19, 5  ;;  %v9645_v53 = vcombine.low %v7170_v9, %v7179_v28  ;;  %v2210_v17 = vsel %vm6986_vm2, %v7706_v16, %v7662_v51  ;;  %v2220_v11 = vsel %vm6986_vm2, %v7729_v47, %v7708_v57  ;;  %v7813_v16 = vld [vmem:[%s6955_s23 + $0x68] sm:$0x1] }
  0x91   : > { %6455 = vmatmul.mubr.bf16.gmra.mxu0 %v9643_v4  ;;  %v7800_v30 = vrot.slane %v2289_v21, 5  ;;  %v2331_v38 = vshrl.u32 %v7765_v31, 16  ;;  %v9646_v9 = vcombine.low %v9627_v24, %v7234_v52  ;;  %v7810_v28 = vrot.slane %v2276_v54, 4  ;;  %v6831_v52 = vld [vmem:[%s6955_s23 + $0xc] sm:$0xff]  }
  0x92   : > { %6458 = vmatprep.mubr.bf16.mxu0 %v9644_v25  ;;  %v2300_v51 = vor.u32 %v2299_v35, %v2296_v62  ;;  %v2342_v59 = vshrl.u32 %v5572_v46, 16  ;;  %v2345_v57 = vshll.u32 %v5572_v46, 16  ;;  %v7815_v47 = vrot.slane %v2286_v3, 4  ;;  %v7826_v62 = vld [vmem:[%s6955_s23 + $0x74] sm:$0x1] }
  0x93   : > { %v2310_v22 = vor.u32 %v2309_v44, %v7777_v7  ;;  %v7818_v5 = vrot.slane %v2313_v33, 5  ;;  %v2351_v18 = vshll.u32 %v7805_v8, 16  ;;  %v2324_v24 = vor.u32 %v2323_v48, %v2320_v29  ;;  %v5575_v25 = vld [vmem:[%s6955_s23 + $0x78] sm:$0xf]  ;;  %v7830_v44 = vld [vmem:[%s6955_s23 + $0x7c] sm:$0xf] }
  0x94   : > { %6407 = vmatmul.mubr.bf16.gmra.mxu1 %v9645_v53  ;;  %v7822_v21 = vrot.slane %v2327_v26, 5  ;;  %v2333_v49 = vrot.slane %v2331_v38, 4  ;;  %v2355_v19 = vshrl.u32 %v7805_v8, 16  ;;  %v5613_v4 = vcombine.low %v2186_v37, %v2196_v2  ;;  %v7837_v26 = vld [vmem:[%s6955_s23 + $0x80] sm:$0x1] }
  0x95   : > { %6410 = vmatprep.mubr.bf16.mxu1 %v9646_v9  ;;  %v5614_v54 = vcombine.low %v2210_v17, %v2220_v11  ;;  %v2344_v3 = vrot.slane %v2342_v59, 4  ;;  %v2347_v35 = vrot.slane %v2345_v57, 5  ;;  %v7832_v33 = vrot.slane %v2300_v51, 4 }
  0x96   : > { %v7834_v53 = vrot.slane %v2351_v18, 5  ;;  %v2357_v29 = vrot.slane %v2355_v19, 4  ;;  %v2366_v48 = vshrl.u32 %v5575_v25, 16  ;;  %v2337_v37 = vshll.u32 %v7813_v16, 16  ;;  %v5578_v19 = vld [vmem:[%s6955_s23 + $0x84] sm:$0xf] }
  0x97   : > { %v2369_v2 = vshll.u32 %v5575_v25, 16  ;;  %v2375_v17 = vshll.u32 %v7830_v44, 16  ;;  %v2379_v11 = vshrl.u32 %v7830_v44, 16  ;;  %v7842_v38 = vrot.slane %v2310_v22, 4  ;;  %v6835_v25 = vld [vmem:[%s6955_s23 + $0x24] sm:$0xff]  }
  0x98   : > { %v7844_v46 = vrot.slane %v2324_v24, 4  ;;  %v2368_v9 = vrot.slane %v2366_v48, 4  ;;  %v9647_v51 = vcombine.low %v9630_v43, %v9629_v40  ;;  %v2234_v22 = vsel %vm6986_vm2, %v7748_v20, %v7676_v50 }
  0x99   : > { %6459 = vmatmul.mubr.bf16.gmra.mxu0 %v5467_v55  ;;  %v2334_v55 = vor.u32 %v2333_v49, %v7822_v21  ;;  %v2371_v59 = vrot.slane %v2369_v2, 5  ;;  %v7850_v57 = vrot.slane %v2375_v17, 5  ;;  %v2381_v18 = vrot.slane %v2379_v11, 4  ;;  %v7899_v17 = vld [vmem:[%s6955_s23 + $0x8c] sm:$0x1] }
  0x9a   : > { %6526 = vmatprep.mubr.bf16.mxu0 %v5612_v14  ;;  %v2348_v14 = vor.u32 %v2347_v35, %v2344_v3  ;;  %v2358_v24 = vor.u32 %v2357_v29, %v7834_v53  ;;  %v2361_v49 = vshll.u32 %v7826_v62, 16  ;;  %v2385_v40 = vshll.u32 %v7837_v26, 16  ;;  %v7873_v3 = vld [vmem:[%s6955_s23 + $0x88] sm:$0xf]  ;;  %v6832_v35 = vld [vmem:[%s6955_s23 + $0x18] sm:$0xff]  }
  0x9b   : > { %v2244_v43 = vsel %vm6986_vm2, %v7750_v1, %v7731_v12  ;;  %v2268_v50 = vsel %vm6986_vm2, %v7767_v6, %v7752_v13  ;;  %v2372_v20 = vor.u32 %v2371_v59, %v2368_v9  ;;  %v6838_v12 = vld [vmem:[%s9588_s1 + $0x1b0] sm:$0xff]   ;;  %v7880_v1 = vrot.slane %v2337_v37, 5  ;;  %v7904_v11 = vld [vmem:[%s9588_s1 + $0x1a8] sm:$0xff]  }
  0x9c   : > { %6411 = vmatmul.mubr.bf16.gmra.mxu1 %v9647_v51  ;;  %v2393_v29 = vshll.u32 %v5578_v19, 16  ;;  %v6837_v13 = vld [vmem:[%s9588_s1 + $0x170] sm:$0xff]   ;;  %v2282_v6 = vsel %vm6986_vm2, %v7810_v28, %v7743_v63  ;;  %v2292_v48 = vsel %vm6986_vm2, %v7815_v47, %v7800_v30  ;;  %v7894_v37 = vrot.slane %v2334_v55, 4 }
  0x9d   : > { %6478 = vmatprep.mubr.bf16.mxu1 %v6831_v52  ;;  %v2258_v52 = vsel %vm6986_vm2, %v7758_v58, %v7702_v60  ;;  %v2382_v60 = vor.u32 %v2381_v18, %v7850_v57  ;;  %v2390_v58 = vshrl.u32 %v5578_v19, 16  ;;  %v7896_v2 = vrot.slane %v2348_v14, 4  ;;  %v5581_v14 = vld [vmem:[%s6955_s23 + $0x90] sm:$0xf]  ;;  %v7927_v59 = vld [vmem:[%s6955_s23 + $0x94] sm:$0xf] }
  0x9e   : > { %v7906_v63 = vrot.slane %v2358_v24, 4  ;;  %v7908_v28 = vrot.slane %v2361_v49, 5  ;;  %v2399_v30 = vshll.u32 %v7873_v3, 16  ;;  %v2403_v47 = vshrl.u32 %v7873_v3, 16  ;;  %9648 = vst [vmem:[#allocation6_spill] sm:$0xff] %v7927_v59 }
  0x9f   : > { %v2316_v55 = vsel %vm6986_vm2, %v7842_v38, %v7818_v5  ;;  %v7921_v9 = vrot.slane %v2372_v20, 4  ;;  %v7923_v51 = vrot.slane %v2385_v40, 5  ;;  %v2395_v18 = vrot.slane %v2393_v29, 5  ;;  %v6841_v5 = vld [vmem:[%s9588_s1 + $0x168] sm:$0xff]  }
  0xa0   : > { %v2417_v38 = vshll.u32 %v5581_v14, 16  ;;  %v2423_v24 = vshll.u32 %v7927_v59, 16  ;;  %v2427_v49 = vshrl.u32 %v7927_v59, 16  ;;  %v5615_v40 = vcombine.low %v2234_v22, %v2244_v43 }
  0xa1   : > { %6527 = vmatmul.mubr.bf16.vlgmr.msra.gmra.mxu0 %v5613_v4  ;;  %v2306_v4 = vsel %vm6986_vm2, %v7832_v33, %v7777_v7  ;;  %v2409_v7 = vshll.u32 %v7899_v17, 16  ;;  %v2414_v33 = vshrl.u32 %v5581_v14, 16  ;;  %v5616_v20 = vcombine.low %v2258_v52, %v2268_v50 }
  0xa2   : > { %6607 = vmatpush3.bf16.msra.mxu0 %v7629_v15  ;;  %6530 = vmatprep.mubr.bf16.mxu0 %v5614_v54  ;;  %v7929_v15 = vrot.slane %v2382_v60, 4  ;;  %v2392_v54 = vrot.slane %v2390_v58, 4  ;;  %v7938_v19 = vrot.slane %v2399_v30, 5  ;;  %v6836_v60 = vld [vmem:[%s6955_s23 + $0x30] sm:$0xff]   ;;  %v6846_v58 = vld [vmem:[%s9588_s1 + $0x1a0] sm:$0xff]   ;;  %v2419_v14 = vrot.slane %v2417_v38, 5 }
  0xa3   : > { %6608 = vmatprep.subr.bf16.mxu0 %v6838_v12  ;;  %v2416_v29 = vrot.slane %v2414_v33, 4  ;;  %v2429_v22 = vrot.slane %v2427_v49, 4  ;;  %v7946_v43 = vcombine.low %v2282_v6, %v2292_v48  ;;  %v7949_v52 = vcombine.low %v2306_v4, %v2316_v55  ;;  %v5584_v30 = vld [vmem:[%s6955_s23 + $0x9c] sm:$0xf]  ;;  %v7971_v4 = vld [vmem:[%s6955_s23 + $0xa4] sm:$0x1] }
  0xa4   : > { %6479 = vmatmul.mubr.bf16.vlgmr.msra.gmra.mxu1 %v6832_v35  ;;  %v2405_v35 = vrot.slane %v2403_v47, 4  ;;  %v2396_v48 = vor.u32 %v2395_v18, %v2392_v54  ;;  %v7968_v47 = vld [vmem:[%s6955_s23 + $0xa0] sm:$0xf]  ;;  %9651 = vst [vmem:[#allocation9_spill] sm:$0xff] %v7971_v4  ;;  %v2438_v55 = vshrl.u32 %v5584_v30, 16  ;;  %v2441_v33 = vshll.u32 %v5584_v30, 16 }
  0xa5   : > { %6559 = vmatpush3.bf16.msra.mxu1 %v7624_v36  ;;  %6482 = vmatprep.mubr.bf16.mxu1 %v6835_v25  ;;  %v7944_v36 = vrot.slane %v2423_v24, 5  ;;  %v2340_v25 = vsel %vm6986_vm2, %v7894_v37, %v7880_v1  ;;  %9650 = vst [vmem:[#allocation8_spill] sm:$0xff] %v7968_v47  ;;  %v6839_v38 = vld [vmem:[%s6955_s23 + $0x3c] sm:$0xff]   ;;  %v2447_v37 = vshll.u32 %v7968_v47, 16  ;;  %v2451_v24 = vshrl.u32 %v7968_v47, 16 }
  0xa6   : > { %6560 = vmatprep.subr.bf16.mxu1 %v6837_v13  ;;  %6609 = vmatpush3.bf16.msra.mxu0 %v6838_v12  ;;  %v7960_v12 = vld [vmem:[%s6955_s23 + $0x98] sm:$0x1]  ;;  %v2406_v1 = vor.u32 %v2405_v35, %v7938_v19  ;;  %v6845_v54 = vld [vmem:[%s9588_s1 + $0x160] sm:$0xff]   ;;  %v2420_v18 = vor.u32 %v2419_v14, %v2416_v29  ;;  %v2440_v30 = vrot.slane %v2438_v55, 4  ;;  %v2443_v49 = vrot.slane %v2441_v33, 5 }
  0xa7   : > { %6610 = vmatprep.subr.bf16.mxu0 %v7904_v11  ;;  %9649 = vst [vmem:[#allocation7_spill] sm:$0xff] %v7960_v12  ;;  %v2433_v35 = vshll.u32 %v7960_v12, 16  ;;  %v2453_v6 = vrot.slane %v2451_v24, 4  ;;  %v2457_v50 = vshll.u32 %v7971_v4, 16  ;;  %v5587_v47 = vld [vmem:[%s6955_s23 + $0xa8] sm:$0xf] }
  0xa8   : > { %v6849_v29 = vld [vmem:[%s9588_s1 + $0x158] sm:$0xff]   ;;  %v7994_v14 = vrot.slane %v2396_v48, 4  ;;  %v2462_v55 = vshrl.u32 %v5587_v47, 16  ;;  %v2465_v33 = vshll.u32 %v5587_v47, 16  ;;  %v8007_v4 = vld [vmem:[%s6955_s23 + $0xb0] sm:$0x1] }
  0xa9   : > { %6531 = vmatmul.mubr.bf16.gmra.mxu0 %v5615_v40  ;;  %6561 = vmatpush3.bf16.msra.mxu1 %v6837_v13  ;;  %v6850_v13 = vld [vmem:[%s9588_s1 + $0x198] sm:$0xff]   ;;  %v2430_v40 = vor.u32 %v2429_v22, %v7944_v36  ;;  %v7996_v22 = vrot.slane %v2409_v7, 5  ;;  %v6840_v48 = vld [vmem:[%s6955_s23 + $0x48] sm:$0xff]   ;;  %v8010_v7 = vrot.slane %v2406_v1, 4  ;;  %v8012_v12 = vrot.slane %v2420_v18, 4 }
  0xaa   : > { %6534 = vmatprep.mubr.bf16.mxu0 %v5616_v20  ;;  %6562 = vmatprep.subr.bf16.mxu1 %v6841_v5  ;;  %v7987_v20 = vrot.slane %v2447_v37, 5  ;;  %v2444_v37 = vor.u32 %v2443_v49, %v2440_v30  ;;  %v8014_v59 = vrot.slane %v2433_v35, 5  ;;  %v6853_v49 = vld [vmem:[%s9588_s1 + $0x150] sm:$0xff]   ;;  %v8031_v18 = vrot.slane %v2465_v33, 5 }
  0xab   : > { %6611 = vmatpush3.bf16.msra.mxu0 %v7904_v11  ;;  %v7999_v11 = vld [vmem:[%s6955_s23 + $0xac] sm:$0xf]  ;;  %v2481_v35 = vshll.u32 %v8007_v4, 16 }
  0xac   : > { %6483 = vmatmul.mubr.bf16.gmra.mxu1 %v6836_v60  ;;  %6612 = vmatprep.subr.bf16.mxu0 %v6846_v58  ;;  %9652 = vst [vmem:[#allocation10_spill] sm:$0xff] %v7999_v11  ;;  %v2364_v60 = vsel %vm6986_vm2, %v7906_v63, %v7908_v28  ;;  %v2454_v24 = vor.u32 %v2453_v6, %v7987_v20  ;;  %v2471_v47 = vshll.u32 %v7999_v11, 16  ;;  %v6843_v63 = vld [vmem:[%s6955_s23 + $0x54] sm:$0xff]   ;;  %v8021_v28 = vrot.slane %v2430_v40, 4 }
  0xad   : > { %6486 = vmatprep.mubr.bf16.mxu1 %v6839_v38  ;;  %6563 = vmatpush3.bf16.msra.mxu1 %v6841_v5  ;;  %v6854_v5 = vld [vmem:[%s9588_s1 + $0x190] sm:$0xff]   ;;  %v8023_v6 = vrot.slane %v2457_v50, 5  ;;  %v8025_v38 = vrot.slane %v2462_v55, 4  ;;  %v2475_v1 = vshrl.u32 %v7999_v11, 16  ;;  %v8040_v40 = vrot.slane %v2444_v37, 4 }
  0xae   : > { %6564 = vmatprep.subr.bf16.mxu1 %v6845_v54  ;;  %v8042_v30 = vrot.slane %v2454_v24, 4  ;;  %v5590_v55 = vld [vmem:[%s6955_s23 + $0xb4] sm:$0xf]  ;;  %v8046_v11 = vld [vmem:[%s6955_s23 + $0xb8] sm:$0xf]  ;;  %v6857_v24 = vld [vmem:[%s9588_s1 + $0x148] sm:$0xff]  }
  0xaf   : > { %6613 = vmatpush3.bf16.msra.mxu0 %v6846_v58  ;;  %v9653_v58 = vsel %vm6986_vm2, %v7844_v46, %v7822_v21  ;;  %9654 = vst [vmem:[#allocation11_spill] sm:$0xff] %v8046_v11  ;;  %v2378_v21 = vsel %vm6986_vm2, %v7921_v9, %v7850_v57  ;;  %v8058_v46 = vrot.slane %v2471_v47, 5  ;;  %v5593_v37 = vld [vmem:[%s6955_s23 + $0xc0] sm:$0xf]  ;;  %v2388_v57 = vsel %vm6986_vm2, %v7929_v15, %v7923_v51  ;;  %v8085_v47 = vld [vmem:[%s6955_s23 + $0xc4] sm:$0xf] }
  0xb0   : > { %6614 = vmatprep.subr.bf16.mxu0 %v6850_v13  ;;  %v5619_v50 = vcombine.low %v9653_v58, %v2340_v25  ;;  %v2486_v25 = vshrl.u32 %v5590_v55, 16  ;;  %v2402_v9 = vsel %vm6986_vm2, %v7994_v14, %v7938_v19  ;;  %9657 = vst [vmem:[#allocation13_spill] sm:$0xff] %v8085_v47  ;;  %v8088_v51 = vld [vmem:[%s6955_s23 + $0xc8] sm:$0x1]  ;;  %v2519_v58 = vshll.u32 %v8085_v47, 16 }
  0xb1   : > { %6535 = vmatmul.mubr.bf16.gmra.mxu0 %v7946_v43  ;;  %6565 = vmatpush3.bf16.msra.mxu1 %v6845_v54  ;;  %v9655_v43 = vsel %vm6986_vm2, %v7896_v2, %v7834_v53  ;;  %v2477_v54 = vrot.slane %v2475_v1, 4  ;;  %v2489_v53 = vshll.u32 %v5590_v55, 16  ;;  %v2495_v2 = vshll.u32 %v8046_v11, 16 }
  0xb2   : > { %6538 = vmatprep.mubr.bf16.mxu0 %v7949_v52  ;;  %v5620_v33 = vcombine.low %v9655_v43, %v2364_v60  ;;  %6566 = vmatprep.subr.bf16.mxu1 %v6849_v29  ;;  %v6858_v52 = vld [vmem:[%s9588_s1 + $0x188] sm:$0xff]   ;;  %v2499_v60 = vshrl.u32 %v8046_v11, 16  ;;  %v2488_v15 = vrot.slane %v2486_v25, 4  ;;  %v9658_v55 = vrot.slane %v7493_v32, 5 }
  0xb3   : > { %6615 = vmatpush3.bf16.msra.mxu0 %v6850_v13  ;;  %v2412_v13 = vsel %vm6986_vm2, %v8010_v7, %v7996_v22  ;;  %v2491_v19 = vrot.slane %v2489_v53, 5  ;;  %v8090_v14 = vrot.slane %v2495_v2, 5  ;;  %v2510_v22 = vshrl.u32 %v5593_v37, 16  ;;  %v6844_v2 = vld [vmem:[%s6955_s23 + $0x60] sm:$0xff]  }
  0xb4   : > { %6487 = vmatmul.mubr.bf16.gmra.mxu1 %v6840_v48  ;;  %6616 = vmatprep.subr.bf16.mxu0 %v6854_v5  ;;  %v8082_v48 = vld [vmem:[%s6955_s23 + $0xbc] sm:$0x1]  ;;  %v2501_v1 = vrot.slane %v2499_v60, 4  ;;  %v2513_v7 = vshll.u32 %v5593_v37, 16  ;;  %v8095_v43 = vrot.slane %v9658_v55, 4  ;;  %v8100_v25 = vrot.slane %v2481_v35, 5 }
  0xb5   : > { %9656 = vst [vmem:[#allocation12_spill] sm:$0xff] %v8082_v48  ;;  %6490 = vmatprep.mubr.bf16.mxu1 %v6843_v63  ;;  %6567 = vmatpush3.bf16.msra.mxu1 %v6849_v29  ;;  %v2468_v63 = vor.u32 %v8031_v18, %v8025_v38  ;;  %v2478_v29 = vor.u32 %v2477_v54, %v8058_v46  ;;  %v2523_v53 = vshrl.u32 %v8085_v47, 16  ;;  %v2505_v60 = vshll.u32 %v8082_v48, 16  ;;  %v6847_v38 = vld [vmem:[%s6955_s23 + $0x6c] sm:$0xff]   ;;  %v8120_v48 = vld [vmem:[%s6955_s23 + $0x18] sm:$0xe] }
  0xb6   : > { %6568 = vmatprep.subr.bf16.mxu1 %v6853_v49  ;;  %v2512_v37 = vrot.slane %v2510_v22, 4  ;;  %v2515_v11 = vrot.slane %v2513_v7, 5  ;;  %v8105_v55 = vrot.slane %v2519_v58, 5  ;;  %v2492_v18 = vor.u32 %v2491_v19, %v2488_v15  ;;  %v6861_v22 = vld [vmem:[%s9588_s1 + $0x140] sm:$0xff]   ;;  %v8117_v58 = vld [vmem:[%s6955_s23 + $0xc] sm:$0xe] }
  0xb7   : > { %6617 = vmatpush3.bf16.msra.mxu0 %v6854_v5  ;;  %v6862_v5 = vld [vmem:[%s9588_s1 + $0x180] sm:$0xff]   ;;  %v2502_v35 = vor.u32 %v2501_v1, %v8090_v14  ;;  %v2525_v54 = vrot.slane %v2523_v53, 4  ;;  %v2529_v47 = vshll.u32 %v8088_v51, 16  ;;  %v5621_v15 = vcombine.low %v2378_v21, %v2388_v57 }
  0xb8   : > { %6618 = vmatprep.subr.bf16.mxu0 %v6858_v52  ;;  %v2516_v7 = vor.u32 %v2515_v11, %v2512_v37  ;;  %v5622_v19 = vcombine.low %v2402_v9, %v2412_v13  ;;  %v8128_v1 = vrot.slane %v2468_v63, 4  ;;  %v8130_v11 = vrot.slane %v2478_v29, 4  ;;  %v6848_v9 = vld [vmem:[%s6955_s23 + $0x78] sm:$0xff]   ;;  %v6851_v37 = vld [vmem:[%s6955_s23 + $0x84] sm:$0xff]  }
  0xb9   : > { %6539 = vmatmul.mubr.bf16.gmra.mxu0 %v5619_v50  ;;  %6569 = vmatpush3.bf16.msra.mxu1 %v6853_v49  ;;  %v8125_v49 = vld [vmem:[%s9588_s1 + $0x238] sm:$0xff]   ;;  %v2526_v50 = vor.u32 %v2525_v54, %v8105_v55  ;;  %v8139_v53 = vrot.slane %v2502_v35, 4  ;;  %v8141_v21 = vrot.slane %v2505_v60, 5  ;;  %v8147_v63 = vrot.slane %v2529_v47, 5  ;;  %v5639_v60 = vld [vmem:[%s6955_s23 + $0x30] sm:$0xe] }
  0xba   : > { %6542 = vmatprep.mubr.bf16.mxu0 %v5620_v33  ;;  %6570 = vmatprep.subr.bf16.mxu1 %v6857_v24  ;;  %v8135_v33 = vld [vmem:[%s9588_s1 + $0x1f8] sm:$0xff]   ;;  %v8145_v13 = vrot.slane %v2516_v7, 4  ;;  %v2924_v29 = vrot.slane %v7567_v42, 5  ;;  %v9659_v35 = vld [vmem:[#allocation2_spill] sm:$0xff]  ;;  %v5655_v47 = vrot.slane %v5639_v60, 9  ;;  %v9662_v60 = vld [vmem:[#allocation3_spill] sm:$0xff] }
  0xbb   : > { %6619 = vmatpush3.bf16.msra.mxu0 %v6858_v52  ;;  %v8137_v52 = vrot.slane %v2492_v18, 4  ;;  %v9660_v7 = vld [vmem:[#allocation5_spill] sm:$0xff]  ;;  %v2945_v18 = vrot.slane %v7650_v0, 5  ;;  %v2460_v0 = vsel %vm6986_vm2, %v8042_v30, %v8023_v6  ;;  %v2959_v30 = vrot.slane %v7741_v41, 5 }
  0xbc   : > { %6491 = vmatmul.mubr.bf16.gmra.mxu1 %v6844_v2  ;;  %6620 = vmatprep.subr.bf16.mxu0 %v6862_v5  ;;  %v2942_v57 = vrot.slane %v9660_v7, 5  ;;  %v9661_v2 = vld [vmem:[#allocation4_spill] sm:$0xff] }
  0xbd   : > { %6494 = vmatprep.mubr.bf16.mxu1 %v6847_v38  ;;  %6571 = vmatpush3.bf16.msra.mxu1 %v6857_v24  ;;  %v8152_v24 = vrot.slane %v2526_v50, 4  ;;  %v2928_v38 = vrot.slane %v7584_v61, 5  ;;  %v2426_v50 = vsel %vm6986_vm2, %v8012_v12, %v7944_v36  ;;  %v2949_v54 = vrot.slane %v9661_v2, 5  ;;  %v5640_v12 = vld [vmem:[%s6955_s23 + $0x3c] sm:$0xe] }
  0xbe   : > { %6572 = vmatprep.subr.bf16.mxu1 %v6861_v22  ;;  %v8174_v7 = vsel %vm7297_vm5, %v5655_v47, %v2942_v57  ;;  %v2944_v36 = vrot.slane %v2942_v57, 4  ;;  %v5656_v2 = vrot.slane %v5640_v12, 9  ;;  %v6852_v47 = vld [vmem:[%s6955_s23 + $0x90] sm:$0xff]   ;;  %v2966_v12 = vrot.slane %v7761_v34, 5 }
  0xbf   : > { %6621 = vmatpush3.bf16.msra.mxu0 %v6862_v5  ;;  %v2436_v5 = vsel %vm6986_vm2, %v8021_v28, %v8014_v59  ;;  %v2450_v59 = vsel %vm6986_vm2, %v8040_v40, %v7987_v20  ;;  %v2951_v28 = vrot.slane %v2949_v54, 4  ;;  %v2956_v20 = vrot.slane %v7700_v39, 5 }
  0xc0   : > { %6702 = vmatprep.subr.bf16.mxu0 %v8125_v49  ;;  %v8188_v57 = vsel %vm7297_vm5, %v2944_v36, %v2945_v18  ;;  %v5624_v18 = vcombine.low %v2450_v59, %v2460_v0  ;;  %v8203_v39 = vsel %vm7297_vm5, %v5656_v2, %v2949_v54  ;;  %v2474_v36 = vsel %vm6986_vm2, %v8128_v1, %v8058_v46  ;;  %v5642_v54 = vld [vmem:[%s6955_s23 + $0x54] sm:$0xe] }
  0xc1   : > { %6543 = vmatmul.mubr.bf16.gmra.mxu0 %v5621_v15  ;;  %6573 = vmatpush3.bf16.msra.mxu1 %v6861_v22  ;;  %v2938_v15 = vrot.slane %v9662_v60, 5  ;;  %v2952_v22 = vrot.slane %v7679_v45, 5  ;;  %v5687_v40 = vcombine.low %v8174_v7, %v8188_v57  ;;  %v5641_v45 = vld [vmem:[%s6955_s23 + $0x48] sm:$0xe]  ;;  %v2484_v46 = vsel %vm6986_vm2, %v8130_v11, %v8100_v25  ;;  %v6872_v7 = vld [vmem:[%s6955_s23 + $0x54] sm:$0xff]  }
  0xc2   : > { %6546 = vmatprep.mubr.bf16.mxu0 %v5622_v19  ;;  %6654 = vmatprep.subr.bf16.mxu1 %v8135_v33  ;;  %v5623_v19 = vcombine.low %v2426_v50, %v2436_v5  ;;  %v2958_v50 = vrot.slane %v2956_v20, 4  ;;  %v6855_v5 = vld [vmem:[%s6955_s23 + $0x9c] sm:$0xff]   ;;  %v2970_v2 = vrot.slane %v7765_v31, 5  ;;  %v2498_v34 = vsel %vm6986_vm2, %v8137_v52, %v8090_v14 }
  0xc3   : > { %v8195_v6 = vsel %vm7297_vm5, %v2951_v28, %v2952_v22  ;;  %v5658_v28 = vrot.slane %v5642_v54, 9  ;;  %v5643_v22 = vld [vmem:[%s6955_s23 + $0x60] sm:$0xe]  ;;  %v2973_v25 = vrot.slane %v7813_v16, 5  ;;  %v2508_v11 = vsel %vm6986_vm2, %v8139_v53, %v8141_v21 }
  0xc4   : > { %6495 = vmatmul.mubr.bf16.gmra.mxu1 %v6848_v9  ;;  %v2963_v9 = vrot.slane %v7735_v10, 5  ;;  %v5688_v41 = vcombine.low %v8203_v39, %v8195_v6  ;;  %v8218_v59 = vsel %vm7297_vm5, %v2958_v50, %v2959_v30  ;;  %v2977_v14 = vrot.slane %v7805_v8, 5  ;;  %v5869_v6 = vld [vmem:[%s6955_s23 + $0x24] sm:$0xe] }
  0xc5   : > { %6498 = vmatprep.mubr.bf16.mxu1 %v6851_v37  ;;  %v5657_v37 = vrot.slane %v5641_v45, 9  ;;  %v2972_v45 = vrot.slane %v2970_v2, 4  ;;  %v5625_v52 = vcombine.low %v2474_v36, %v2484_v46  ;;  %v2980_v8 = vrot.slane %v7826_v62, 5  ;;  %v5645_v36 = vld [vmem:[%s6955_s23 + $0x78] sm:$0xe] }
  0xc6   : > { %v2965_v0 = vrot.slane %v2963_v9, 4  ;;  %v8245_v31 = vsel %vm7297_vm5, %v5658_v28, %v2963_v9  ;;  %v2979_v9 = vrot.slane %v2977_v14, 4  ;;  %v2984_v54 = vrot.slane %v7830_v44, 5 }
  0xc7   : > { %v8214_v10 = vsel %vm7297_vm5, %v5657_v37, %v2956_v20  ;;  %v5659_v20 = vrot.slane %v5643_v22, 9  ;;  %v8257_v53 = vsel %vm7297_vm5, %v2972_v45, %v2973_v25  ;;  %v5626_v37 = vcombine.low %v2498_v34, %v2508_v11 }
  0xc8   : > { %v8273_v46 = vsel %vm7297_vm5, %v2979_v9, %v2980_v8  ;;  %v5661_v62 = vrot.slane %v5645_v36, 9  ;;  %v2991_v28 = vrot.slane %v7873_v3, 5  ;;  %v2986_v44 = vrot.slane %v2984_v54, 4  ;;  %v6863_v8 = vld [vmem:[%s6955_s23 + $0x18] sm:$0xff]   ;;  %v9667_v36 = vld [vmem:[#allocation8_spill] sm:$0xff] }
  0xc9   : > { %6547 = vmatmul.mubr.bf16.gmra.mxu0 %v5623_v19  ;;  %v8236_v19 = vsel %vm7297_vm5, %v2965_v0, %v2966_v12  ;;  %v8252_v16 = vsel %vm7297_vm5, %v5659_v20, %v2970_v2  ;;  %v2987_v0 = vrot.slane %v7837_v26, 5  ;;  %v2994_v26 = vrot.slane %v7899_v17, 5  ;;  %v5646_v20 = vld [vmem:[%s6955_s23 + $0x84] sm:$0xe] }
  0xca   : > { %6550 = vmatprep.mubr.bf16.mxu0 %v5624_v18  ;;  %v5644_v18 = vld [vmem:[%s6955_s23 + $0x6c] sm:$0xe]  ;;  %v2522_v2 = vsel %vm6986_vm2, %v8145_v13, %v8105_v55  ;;  %v8285_v34 = vsel %vm7297_vm5, %v5661_v62, %v2984_v54  ;;  %v2532_v3 = vsel %vm6986_vm2, %v8152_v24, %v8147_v63  ;;  %v5662_v25 = vrot.slane %v5646_v20, 9  ;;  %v9665_v63 = vld [vmem:[#allocation6_spill] sm:$0xff] }
  0xcb   : > { %v5660_v21 = vrot.slane %v5644_v18, 9  ;;  %v8294_v17 = vsel %vm7297_vm5, %v2986_v44, %v2987_v0  ;;  %v2993_v11 = vrot.slane %v2991_v28, 4  ;;  %v9663_v45 = vrot.slane %v7493_v32, 5  ;;  %v5647_v18 = vld [vmem:[%s6955_s23 + $0x90] sm:$0xe]  ;;  %v6875_v62 = vld [vmem:[%s6955_s23 + $0x60] sm:$0xff]  }
  0xcc   : > { %6499 = vmatmul.mubr.bf16.gmra.mxu1 %v6852_v47  ;;  %v6856_v47 = vld [vmem:[%s6955_s23 + $0xa8] sm:$0xff]   ;;  %v9664_v55 = vrot.slane %v8117_v58, 9  ;;  %v2998_v24 = vrot.slane %v9665_v63, 5  ;;  %v8311_v32 = vsel %vm7297_vm5, %v5662_v25, %v2991_v28  ;;  %v3005_v54 = vrot.slane %v9667_v36, 5 }
  0xcd   : > { %6502 = vmatprep.mubr.bf16.mxu1 %v6855_v5  ;;  %v6859_v5 = vld [vmem:[%s6955_s23 + $0xb4] sm:$0xff]   ;;  %v8269_v12 = vsel %vm7297_vm5, %v5660_v21, %v2977_v14  ;;  %v5638_v14 = vld [vmem:[%s6955_s23 + $0x24] sm:$0xe]  ;;  %v9666_v21 = vld [vmem:[#allocation7_spill] sm:$0xff]  ;;  %v8315_v58 = vsel %vm7297_vm5, %v2993_v11, %v2994_v26  ;;  %v5627_v0 = vcombine.low %v2522_v2, %v2532_v3  ;;  %v2925_v28 = vsel %vm7297_vm5, %v8095_v43, %v2924_v29 }
  0xce   : > { %v2922_v13 = vsel %vm7297_vm5, %v9664_v55, %v9663_v45  ;;  %v3001_v9 = vrot.slane %v9666_v21, 5  ;;  %v3000_v44 = vrot.slane %v2998_v24, 4  ;;  %v6860_v45 = vld [vmem:[%s6955_s23 + $0xc0] sm:$0xff]   ;;  %v2930_v26 = vrot.slane %v2928_v38, 4  ;;  %v5648_v2 = vld [vmem:[%s6955_s23 + $0x9c] sm:$0xe] }
  0xcf   : > { %v3007_v3 = vrot.slane %v3005_v54, 4  ;;  %v5664_v11 = vrot.slane %v5648_v2, 9  ;;  %v9669_v55 = vld [vmem:[#allocation10_spill] sm:$0xff]  ;;  %v5649_v63 = vld [vmem:[%s6955_s23 + $0xa8] sm:$0xe]  ;;  %v5684_v21 = vcombine.low %v2922_v13, %v2925_v28  ;;  %v9673_v28 = vrot.slane %v8120_v48, 9 }
  0xd0   : > { %v8336_v25 = vsel %vm7297_vm5, %v3000_v44, %v3001_v9  ;;  %v3012_v42 = vrot.slane %v9669_v55, 5  ;;  %v8459_v43 = vld [vmem:[%s6955_s23 + $0x34] sm:$0xf] }
  0xd1   : > { %6551 = vmatmul.mubr.bf16.gmra.mxu0 %v5625_v52  ;;  %v8349_v9 = vsel %vm7297_vm5, %v5664_v11, %v3005_v54  ;;  %v5650_v54 = vld [vmem:[%s6955_s23 + $0xb4] sm:$0xe]  ;;  %v3846_v39 = vshll.u32 %v8459_v43, 16 }
  0xd2   : > { %6554 = vmatprep.mubr.bf16.mxu0 %v5626_v37  ;;  %v5663_v37 = vrot.slane %v5647_v18, 9  ;;  %v5654_v18 = vrot.slane %v5638_v14, 9  ;;  %v3014_v36 = vrot.slane %v3012_v42, 4  ;;  %v9670_v14 = vrot.slane %v9659_v35, 5 }
  0xd3   : > { %v5666_v55 = vrot.slane %v5650_v54, 9 }
  0xd4   : > { %6503 = vmatmul.mubr.bf16.gmra.mxu1 %v6856_v47  ;;  %v9668_v47 = vld [vmem:[#allocation9_spill] sm:$0xff]  ;;  %v2937_v44 = vrot.slane %v9670_v14, 4  ;;  %v9675_v61 = vmov %v9670_v14  ;;  %v3029_v14 = vrot.slane %v8088_v51, 5  ;;  %v5786_v51 = vld [vmem:[%s6955_s23 + $0x30] sm:$0xf] }
  0xd5   : > { %6506 = vmatprep.mubr.bf16.mxu1 %v6859_v5  ;;  %v3008_v20 = vrot.slane %v9668_v47, 5  ;;  %v8331_v5 = vsel %vm7297_vm5, %v5663_v37, %v2998_v24  ;;  %v3015_v24 = vrot.slane %v8007_v4, 5  ;;  %v5665_v37 = vrot.slane %v5649_v63, 9 }
  0xd6   : > { %v9674_v63 = vrot.slane %v7598_v23, 5  ;;  %v2936_v48 = vsel %vm7297_vm5, %v5654_v18, %v9675_v61  ;;  %v2939_v23 = vsel %vm7297_vm5, %v2937_v44, %v2938_v15  ;;  %v8429_v61 = vld [vmem:[%s6955_s23 + $0x28] sm:$0xf] }
  0xd7   : > { %v8343_v29 = vsel %vm7297_vm5, %v3007_v3, %v3008_v20  ;;  %v9671_v20 = vld [vmem:[#allocation11_spill] sm:$0xff]  ;;  %v8358_v4 = vsel %vm7297_vm5, %v5665_v37, %v3012_v42  ;;  %v8362_v13 = vsel %vm7297_vm5, %v3014_v36, %v3015_v24  ;;  %v2929_v3 = vsel %vm7297_vm5, %v9673_v28, %v2928_v38  ;;  %v5651_v37 = vld [vmem:[%s6955_s23 + $0xc0] sm:$0xe]  ;;  %v9676_v38 = vld [vmem:[#allocation13_spill] sm:$0xff] }
  0xd8   : > { %v3019_v2 = vrot.slane %v9671_v20, 5  ;;  %v2932_v24 = vsel %vm7297_vm5, %v2930_v26, %v9674_v63  ;;  %v3026_v36 = vrot.slane %v9676_v38, 5  ;;  %v5667_v18 = vrot.slane %v5651_v37, 9  ;;  %v6870_v20 = vld [vmem:[%s9588_s1 + $0x230] sm:$0xff]   ;;  %v5783_v63 = vld [vmem:[%s6955_s23 + $0x24] sm:$0xf] }
  0xd9   : > { %6555 = vmatmul.mubr.bf16.gmra.mxu0 %v5627_v0  ;;  %v5685_v15 = vcombine.low %v2929_v3, %v2932_v24  ;;  %v5686_v54 = vcombine.low %v2936_v48, %v2939_v23  ;;  %v6869_v28 = vld [vmem:[%s9588_s1 + $0x1f0] sm:$0xff]   ;;  %v6868_v48 = vld [vmem:[%s6955_s23 + $0x3c] sm:$0xff]   ;;  %v3813_v37 = vshrl.u32 %v5783_v63, 16  ;;  %v6871_v38 = vld [vmem:[%s6955_s23 + $0x48] sm:$0xff]   ;;  %v3822_v23 = vshll.u32 %v8429_v61, 16 }
  0xda   : > { %6622 = vmatprep.mubr.bf16.mxu0 %v6863_v8  ;;  %v9672_v8 = vld [vmem:[#allocation12_spill] sm:$0xff]  ;;  %v3021_v42 = vrot.slane %v3019_v2, 4  ;;  %v8393_v26 = vsel %vm7297_vm5, %v5666_v55, %v3019_v2  ;;  %v3028_v60 = vrot.slane %v3026_v36, 4  ;;  %v8406_v44 = vsel %vm7297_vm5, %v5667_v18, %v3026_v36  ;;  %v5780_v2 = vld [vmem:[%s6955_s23 + $0x18] sm:$0xf]  ;;  %v6874_v55 = vld [vmem:[%s9588_s1 + $0x228] sm:$0xff]  }
  0xdb   : > { %v3022_v0 = vrot.slane %v9672_v8, 5  ;;  %v3792_v24 = vshll.u32 %v5780_v2, 16  ;;  %v6873_v36 = vld [vmem:[%s9588_s1 + $0x1e8] sm:$0xff]   ;;  %v5782_v18 = vld [vmem:[%s6955_s23 + $0x20] sm:$0x1]  ;;  %v3815_v11 = vrot.slane %v3813_v37, 4 }
  0xdc   : > { %6507 = vmatmul.mubr.bf16.gmra.mxu1 %v6860_v45  ;;  %v6864_v45 = vld [vmem:[%s6955_s23 + $0x24] sm:$0xff]   ;;  %v8411_v8 = vsel %vm7297_vm5, %v3028_v60, %v3029_v14  ;;  %v3816_v14 = vshll.u32 %v5783_v63, 16  ;;  %v8449_v63 = vld [vmem:[%s6955_s23 + $0x2c] sm:$0x1]  ;;  %v3837_v37 = vshrl.u32 %v5786_v51, 16 }
  0xdd   : > { %6574 = vmatprep.mubr.bf16.mxu1 %v5684_v21  ;;  %v6867_v21 = vld [vmem:[%s6955_s23 + $0x30] sm:$0xff]   ;;  %v8397_v35 = vsel %vm7297_vm5, %v3021_v42, %v3022_v0  ;;  %v8414_v0 = vld [vmem:[%s6955_s23 + $0x1c] sm:$0xf]  ;;  %v3789_v42 = vshrl.u32 %v5780_v2, 16 }
  0xde   : > { %v4560_v3 = vrot.slane %v8414_v0, 5  ;;  %v3818_v47 = vrot.slane %v3816_v14, 5 }
  0xdf   : > { %v3791_v60 = vrot.slane %v3789_v42, 4  ;;  %v6877_v42 = vld [vmem:[%s9588_s1 + $0x1e0] sm:$0xff]  }
  0xe1   : > { %6623 = vmatmul.mubr.bf16.vlgmr.msra.gmra.mxu0 %v6864_v45  ;;  %v3802_v45 = vshrl.u32 %v8414_v0, 16 }
  0xe2   : > { %6703 = vmatpush3.bf16.msra.mxu0 %v8125_v49  ;;  %6626 = vmatprep.mubr.bf16.mxu0 %v6867_v21  ;;  %v3798_v49 = vshll.u32 %v8414_v0, 16  ;;  %v3826_v21 = vshrl.u32 %v8429_v61, 16 }
  0xe3   : > { %6704 = vmatprep.subr.bf16.mxu0 %v6870_v20 }
  0xe4   : > { %6575 = vmatmul.mubr.bf16.vlgmr.msra.gmra.mxu1 %v5685_v15  ;;  %v5868_v15 = vld [vmem:[%s6955_s23 + $0x18] sm:$0xe]  ;;  %v8444_v2 = vrot.slane %v3798_v49, 5  ;;  %v3808_v49 = vshll.u32 %v5782_v18, 16  ;;  %v3828_v0 = vrot.slane %v3826_v21, 4 }
  0xe5   : > { %6655 = vmatpush3.bf16.msra.mxu1 %v8135_v33  ;;  %6578 = vmatprep.mubr.bf16.mxu1 %v5686_v54  ;;  %v6878_v33 = vld [vmem:[%s9588_s1 + $0x220] sm:$0xff]   ;;  %v3804_v54 = vrot.slane %v3802_v45, 4  ;;  %v8456_v45 = vrot.slane %v3822_v23, 5  ;;  %v6882_v23 = vld [vmem:[%s9588_s1 + $0x218] sm:$0xff]  }
  0xe6   : > { %6656 = vmatprep.subr.bf16.mxu1 %v6869_v28  ;;  %6705 = vmatpush3.bf16.msra.mxu0 %v6870_v20  ;;  %v3794_v20 = vrot.slane %v3792_v24, 5 }
  0xe7   : > { %6706 = vmatprep.subr.bf16.mxu0 %v6874_v55  ;;  %v3805_v21 = vor.u32 %v3804_v54, %v8444_v2  ;;  %v3829_v54 = vor.u32 %v3828_v0, %v8456_v45 }
  0xe9   : > { %6627 = vmatmul.mubr.bf16.gmra.mxu0 %v6868_v48  ;;  %6657 = vmatpush3.bf16.msra.mxu1 %v6869_v28  ;;  %v5884_v48 = vrot.slane %v5868_v15, 9  ;;  %v4563_v28 = vrot.slane %v5782_v18, 5  ;;  %v4562_v18 = vrot.slane %v4560_v3, 4  ;;  %v3832_v15 = vshll.u32 %v8449_v63, 16 }
  0xea   : > { %6630 = vmatprep.mubr.bf16.mxu0 %v6871_v38  ;;  %6658 = vmatprep.subr.bf16.mxu1 %v6873_v36  ;;  %v3840_v38 = vshll.u32 %v5786_v51, 16  ;;  %v4567_v51 = vrot.slane %v8429_v61, 5  ;;  %v3850_v61 = vshrl.u32 %v8459_v43, 16 }
  0xeb   : > { %6707 = vmatpush3.bf16.msra.mxu0 %v6874_v55  ;;  %v3795_v55 = vor.u32 %v3794_v20, %v3791_v60  ;;  %v6881_v60 = vld [vmem:[%s9588_s1 + $0x1d8] sm:$0xff]   ;;  %v8482_v20 = vrot.slane %v3808_v49, 5  ;;  %v6886_v49 = vld [vmem:[%s9588_s1 + $0x210] sm:$0xff]  }
  0xec   : > { %v8454_v24 = vpop.f32.mrf.mxu0  ;;  %6579 = vmatmul.mubr.bf16.gmra.mxu1 %v5687_v40  ;;  %6708 = vmatprep.subr.bf16.mxu0 %v6878_v33  ;;  %v8464_v14 = vpop.f32.mrf.mxu1  ;;  %v3819_v40 = vor.u32 %v3818_v47, %v3815_v11  ;;  %v3839_v47 = vrot.slane %v3837_v37, 4  ;;  %v3842_v11 = vrot.slane %v3840_v38, 5  ;;  %v8509_v37 = vld [vmem:[%s6955_s23 + $0x40] sm:$0xf]  ;;  %v4569_v50 = vrot.slane %v4567_v51, 4 }
  0xed   : > { %9677 = vst [vmem:[#allocation2_spill] sm:$0xff] %v8464_v14  ;;  %6582 = vmatprep.mubr.bf16.mxu1 %v5688_v41  ;;  %6659 = vmatpush3.bf16.msra.mxu1 %v6873_v36  ;;  %v8489_v41 = vsel %vm7297_vm5, %v5884_v48, %v4560_v3  ;;  %v5789_v36 = vld [vmem:[%s6955_s23 + $0x3c] sm:$0xf]  ;;  %v8498_v0 = vrot.slane %v3795_v55, 4  ;;  %v8504_v3 = vsel %vm7297_vm5, %v4562_v18, %v4563_v28  ;;  %v8506_v48 = vrot.slane %v3832_v15, 5  ;;  %v6885_v55 = vld [vmem:[%s9588_s1 + $0x1d0] sm:$0xff]  }
  0xee   : > { %v8475_v57 = vpop.f32.mrf.mxu0  ;;  %6660 = vmatprep.subr.bf16.mxu1 %v6877_v42  ;;  %v8493_v52 = vpop.f32.mrf.mxu1  ;;  %v8516_v22 = vrot.slane %v3819_v40, 4  ;;  %v4570_v28 = vrot.slane %v8449_v63, 5  ;;  %v3830_v18 = vrot.slane %v3829_v54, 4  ;;  %v8520_v15 = vld [vmem:[%s6955_s23 + $0x38] sm:$0x1]  ;;  %v3864_v30 = vshll.u32 %v5789_v36, 16 }
  0xef   : > { %6709 = vmatpush3.bf16.msra.mxu0 %v6878_v33  ;;  %9678 = vst [vmem:[#allocation5_spill] sm:$0xff] %v8493_v52  ;;  %v8500_v33 = vrot.slane %v3805_v21, 4  ;;  %v5885_v21 = vrot.slane %v5869_v6, 9  ;;  %v3843_v1 = vor.u32 %v3842_v11, %v3839_v47  ;;  %v8524_v52 = vrot.slane %v3850_v61, 4  ;;  %v5870_v40 = vld [vmem:[%s6955_s23 + $0x30] sm:$0xe] }
  0xf0   : > { %6710 = vmatprep.subr.bf16.mxu0 %v6882_v23  ;;  %v8511_v38 = vpop.f32.mrf.mxu0  ;;  %v3870_v6 = vshll.u32 %v8509_v37, 16  ;;  %v3874_v63 = vshrl.u32 %v8509_v37, 16  ;;  %v8532_v54 = vpop.f32.mrf.mxu1  ;;  %v9681_v11 = vcombine.low %v8245_v31, %v8236_v19  ;;  %v6876_v61 = vld [vmem:[%s6955_s23 + $0x6c] sm:$0xff]   ;;  %v8565_v19 = vsel %vm7297_vm5, %v4569_v50, %v4570_v28  ;;  %v8583_v28 = vld [vmem:[%s6955_s23 + $0x44] sm:$0x1] }
  0xf1   : > { %6631 = vmatmul.mubr.bf16.gmra.mxu0 %v6872_v7  ;;  %6661 = vmatpush3.bf16.msra.mxu1 %v6877_v42  ;;  %v8522_v7 = vrot.slane %v3846_v39, 5  ;;  %v3861_v42 = vshrl.u32 %v5789_v36, 16  ;;  %9680 = vst [vmem:[#allocation4_spill] sm:$0xff] %v8532_v54  ;;  %v3801_v39 = vsel %vm6986_vm2, %v8498_v0, %v8444_v2  ;;  %v3811_v47 = vsel %vm6986_vm2, %v8500_v33, %v8482_v20  ;;  %v6879_v36 = vld [vmem:[%s6955_s23 + $0x78] sm:$0xff]   ;;  %v8576_v33 = vld [vmem:[%s6955_s23 + $0x4c] sm:$0xf] }
  0xf2   : > { %6634 = vmatprep.mubr.bf16.mxu0 %v6875_v62  ;;  %6662 = vmatprep.subr.bf16.mxu1 %v6881_v60  ;;  %v9679_v62 = vcombine.low %v8214_v10, %v8218_v59  ;;  %v4574_v59 = vrot.slane %v8459_v43, 5  ;;  %v3825_v2 = vsel %vm6986_vm2, %v8516_v22, %v8456_v45  ;;  %v8561_v20 = vsel %vm7297_vm5, %v5885_v21, %v4567_v51  ;;  %v5792_v43 = vld [vmem:[%s6955_s23 + $0x48] sm:$0xf]  ;;  %v8587_v54 = vpop.f32.mrf.mxu1  ;;  %v5871_v14 = vld [vmem:[%s6955_s23 + $0x3c] sm:$0xe] }
  0xf3   : > { %6711 = vmatpush3.bf16.msra.mxu0 %v6882_v23  ;;  %v6890_v23 = vld [vmem:[%s9588_s1 + $0x208] sm:$0xff]   ;;  %v3856_v31 = vshll.u32 %v8520_v15, 16  ;;  %v3835_v22 = vsel %vm6986_vm2, %v3830_v18, %v8506_v48  ;;  %v5886_v45 = vrot.slane %v5870_v40, 9  ;;  %v3863_v0 = vrot.slane %v3861_v42, 4  ;;  %9683 = vst [vmem:[#allocation6_spill] sm:$0xff] %v8587_v54  ;;  %v6893_v42 = vld [vmem:[%s9588_s1 + $0x1c0] sm:$0xff]  }
  0xf4   : > { %6583 = vmatmul.mubr.bf16.gmra.mxu1 %v9679_v62  ;;  %6712 = vmatprep.subr.bf16.mxu0 %v6886_v49  ;;  %v8553_v62 = vpop.f32.mrf.mxu0  ;;  %v3866_v51 = vrot.slane %v3864_v30, 5  ;;  %v8578_v50 = vrot.slane %v3843_v1, 4  ;;  %v3853_v21 = vor.u32 %v8524_v52, %v8522_v7  ;;  %v3876_v10 = vrot.slane %v3874_v63, 4  ;;  %v6894_v30 = vld [vmem:[%s9588_s1 + $0x200] sm:$0xff]  }
  0xf5   : > { %6586 = vmatprep.mubr.bf16.mxu1 %v9681_v11  ;;  %6663 = vmatpush3.bf16.msra.mxu1 %v6881_v60  ;;  %9682 = vst [vmem:[#allocation3_spill] sm:$0xff] %v8553_v62  ;;  %v6889_v60 = vld [vmem:[%s9588_s1 + $0x1c8] sm:$0xff]   ;;  %v8585_v11 = vrot.slane %v3870_v6, 5  ;;  %v4576_v48 = vrot.slane %v4574_v59, 4  ;;  %v3885_v1 = vshrl.u32 %v5792_v43, 16  ;;  %v3888_v18 = vshll.u32 %v5792_v43, 16 }
  0xf6   : > { %6664 = vmatprep.subr.bf16.mxu1 %v6885_v55  ;;  %v8598_v40 = vcombine.low %v3801_v39, %v3811_v47  ;;  %v3898_v63 = vshrl.u32 %v8576_v33, 16  ;;  %v8606_v43 = vrot.slane %v3856_v31, 5  ;;  %v3880_v54 = vshll.u32 %v8583_v28, 16  ;;  %v5795_v39 = vld [vmem:[%s6955_s23 + $0x54] sm:$0xf]  ;;  %v6880_v6 = vld [vmem:[%s6955_s23 + $0x84] sm:$0xff]  }
  0xf7   : > { %6713 = vmatpush3.bf16.msra.mxu0 %v6886_v49  ;;  %v4577_v49 = vrot.slane %v8520_v15, 5  ;;  %v8593_v52 = vpop.f32.mrf.mxu0  ;;  %v3894_v15 = vshll.u32 %v8576_v33, 16  ;;  %v4581_v31 = vrot.slane %v8509_v37, 5  ;;  %v9687_v37 = vcombine.low %v8269_v12, %v8273_v46  ;;  %v6883_v47 = vld [vmem:[%s6955_s23 + $0x90] sm:$0xff]  }
  0xf8   : > { %6714 = vmatprep.subr.bf16.mxu0 %v6890_v23  ;;  %9684 = vst [vmem:[#allocation7_spill] sm:$0xff] %v8593_v52 }
  0xf9   : > { %6635 = vmatmul.mubr.bf16.gmra.mxu0 %v6876_v61  ;;  %6665 = vmatpush3.bf16.msra.mxu1 %v6885_v55  ;;  %v8604_v61 = vcombine.low %v3825_v2, %v3835_v22  ;;  %v3867_v55 = vor.u32 %v3866_v51, %v3863_v0  ;;  %v3877_v2 = vor.u32 %v3876_v10, %v8585_v11  ;;  %v8622_v22 = vld [vmem:[%s6955_s23 + $0x58] sm:$0xf]  ;;  %v8629_v51 = vrot.slane %v3853_v21, 4 }
  0xfa   : > { %6638 = vmatprep.mubr.bf16.mxu0 %v6879_v36  ;;  %6666 = vmatprep.subr.bf16.mxu1 %v6889_v60  ;;  %v8617_v36 = vsel %vm7297_vm5, %v5886_v45, %v4574_v59  ;;  %v9685_v0 = vcombine.low %v8252_v16, %v8257_v53  ;;  %v8633_v59 = vsel %vm7297_vm5, %v4576_v48, %v4577_v49  ;;  %v3887_v45 = vrot.slane %v3885_v1, 4  ;;  %v8640_v16 = vpop.f32.mrf.mxu0  ;;  %v5794_v1 = vld [vmem:[%s6955_s23 + $0x50] sm:$0x1] }
  0xfb   : > { %6715 = vmatpush3.bf16.msra.mxu0 %v6890_v23  ;;  %v8627_v23 = vpop.f32.mrf.mxu1  ;;  %v3890_v10 = vrot.slane %v3888_v18, 5  ;;  %9688 = vst [vmem:[#allocation9_spill] sm:$0xff] %v8640_v16  ;;  %v5887_v53 = vrot.slane %v5871_v14, 9  ;;  %v3900_v21 = vrot.slane %v3898_v63, 4  ;;  %v3868_v48 = vrot.slane %v3867_v55, 4 }
  0xfc   : > { %6587 = vmatmul.mubr.bf16.gmra.mxu1 %v9685_v0  ;;  %9686 = vst [vmem:[#allocation8_spill] sm:$0xff] %v8627_v23  ;;  %6716 = vmatprep.subr.bf16.mxu0 %v6894_v30  ;;  %v8642_v0 = vrot.slane %v3894_v15, 5  ;;  %v3909_v23 = vshrl.u32 %v5795_v39, 16  ;;  %v3882_v49 = vrot.slane %v3880_v54, 5  ;;  %v3912_v18 = vshll.u32 %v5795_v39, 16  ;;  %v8658_v39 = vpop.f32.mrf.mxu0 }
  0xfd   : > { %6590 = vmatprep.mubr.bf16.mxu1 %v9687_v37  ;;  %6667 = vmatpush3.bf16.msra.mxu1 %v6889_v60  ;;  %v3918_v52 = vshll.u32 %v8622_v22, 16  ;;  %v3878_v12 = vrot.slane %v3877_v2, 4  ;;  %v4583_v46 = vrot.slane %v4581_v31, 4  ;;  %v4584_v37 = vrot.slane %v8583_v28, 5  ;;  %v8648_v60 = vpop.f32.mrf.mxu1  ;;  %v5798_v55 = vld [vmem:[%s6955_s23 + $0x60] sm:$0xf] }
  0xfe   : > { %6668 = vmatprep.subr.bf16.mxu1 %v6893_v42  ;;  %v3922_v14 = vshrl.u32 %v8622_v22, 16  ;;  %9689 = vst [vmem:[#allocation10_spill] sm:$0xff] %v8648_v60  ;;  %v3859_v15 = vsel %vm6986_vm2, %v8629_v51, %v8606_v43  ;;  %v3891_v63 = vor.u32 %v3890_v10, %v3887_v45  ;;  %v3901_v28 = vor.u32 %v3900_v21, %v8642_v0  ;;  %v5872_v60 = vld [vmem:[%s6955_s23 + $0x48] sm:$0xe] }
  0xff   : > { %6717 = vmatpush3.bf16.msra.mxu0 %v6894_v30  ;;  %v4588_v30 = vrot.slane %v8576_v33, 5  ;;  %v3904_v2 = vshll.u32 %v5794_v1, 16  ;;  %v3911_v16 = vrot.slane %v3909_v23, 4  ;;  %v3914_v62 = vrot.slane %v3912_v18, 5  ;;  %v8683_v10 = vpop.f32.mrf.mxu1 }
 0x100   : > { %v3873_v43 = vsel %vm6986_vm2, %v3868_v48, %v8585_v11  ;;  %v8667_v33 = vsel %vm7297_vm5, %v5887_v53, %v4581_v31  ;;  %v3883_v51 = vsel %vm6986_vm2, %v3878_v12, %v3882_v49  ;;  %v8675_v23 = vsel %vm7297_vm5, %v4583_v46, %v4584_v37  ;;  %9691 = vst [vmem:[#allocation11_spill] sm:$0xff] %v8683_v10  ;;  %v8686_v49 = vld [vmem:[%s6955_s23 + $0x64] sm:$0xf]  ;;  %v6884_v12 = vld [vmem:[%s6955_s23 + $0x9c] sm:$0xff]   ;;  %v8692_v46 = vpop.f32.mrf.mxu0 }
 0x101   : > { %6639 = vmatmul.mubr.bf16.gmra.mxu0 %v6880_v6  ;;  %6669 = vmatpush3.bf16.msra.mxu1 %v6893_v42  ;;  %v8669_v6 = vrot.slane %v3918_v52, 5  ;;  %v3924_v42 = vrot.slane %v3922_v14, 4  ;;  %v3933_v45 = vshrl.u32 %v5798_v55, 16  ;;  %v3936_v11 = vshll.u32 %v5798_v55, 16  ;;  %v6887_v55 = vld [vmem:[%s6955_s23 + $0xa8] sm:$0xff]  }
 0x102   : > { %6642 = vmatprep.mubr.bf16.mxu0 %v6883_v47  ;;  %v8678_v47 = vld [vmem:[%s6955_s23 + $0x5c] sm:$0x1]  ;;  %v9690_v31 = vcombine.low %v8285_v34, %v8294_v17  ;;  %v3892_v52 = vrot.slane %v3891_v63, 4  ;;  %v5888_v53 = vrot.slane %v5872_v60, 9  ;;  %v4590_v21 = vrot.slane %v4588_v30, 4 }
 0x103   : > { %v4591_v48 = vrot.slane %v5794_v1, 5  ;;  %v9692_v18 = vcombine.low %v8311_v32, %v8315_v58  ;;  %v3902_v37 = vrot.slane %v3901_v28, 4  ;;  %v3906_v14 = vrot.slane %v3904_v2, 5  ;;  %v5873_v63 = vld [vmem:[%s6955_s23 + $0x54] sm:$0xe]  ;;  %v8710_v28 = vpop.f32.mrf.mxu1 }
 0x104   : > { %6591 = vmatmul.mubr.bf16.gmra.mxu1 %v9690_v31  ;;  %v3915_v34 = vor.u32 %v3914_v62, %v3911_v16  ;;  %v4595_v17 = vrot.slane %v8622_v22, 5  ;;  %v3925_v60 = vor.u32 %v3924_v42, %v8669_v6  ;;  %v3928_v1 = vshll.u32 %v8678_v47, 16  ;;  %9694 = vst [vmem:[#allocation12_spill] sm:$0xff] %v8710_v28  ;;  %v5874_v62 = vld [vmem:[%s6955_s23 + $0x60] sm:$0xe] }
 0x105   : > { %6594 = vmatprep.mubr.bf16.mxu1 %v9692_v18  ;;  %v3935_v31 = vrot.slane %v3933_v45, 4  ;;  %v3938_v54 = vrot.slane %v3936_v11, 5  ;;  %v9693_v32 = vsel %vm6986_vm2, %v8578_v50, %v8522_v7  ;;  %v3942_v22 = vshll.u32 %v8686_v49, 16 }
 0x106   : > { %v8704_v58 = vcombine.low %v9693_v32, %v3859_v15  ;;  %v3946_v16 = vshrl.u32 %v8686_v49, 16  ;;  %v8712_v2 = vcombine.low %v3873_v43, %v3883_v51  ;;  %v3897_v42 = vsel %vm6986_vm2, %v3892_v52, %v8642_v0  ;;  %v5801_v15 = vld [vmem:[%s6955_s23 + $0x6c] sm:$0xf]  ;;  %v8730_v32 = vld [vmem:[%s6955_s23 + $0x70] sm:$0xf] }
 0x107   : > { %v8719_v7 = vsel %vm7297_vm5, %v5888_v53, %v4588_v30  ;;  %v8723_v50 = vsel %vm7297_vm5, %v4590_v21, %v4591_v48  ;;  %v8726_v45 = vpop.f32.mrf.mxu0  ;;  %v3916_v43 = vrot.slane %v3915_v34, 4  ;;  %v5889_v51 = vrot.slane %v5873_v63, 9  ;;  %v5800_v53 = vld [vmem:[%s6955_s23 + $0x68] sm:$0x1] }
 0x108   : > { %9695 = vst [vmem:[#allocation13_spill] sm:$0xff] %v8726_v45  ;;  %v4597_v11 = vrot.slane %v4595_v17, 4  ;;  %v4598_v18 = vrot.slane %v8678_v47, 5  ;;  %v3907_v0 = vsel %vm6986_vm2, %v3902_v37, %v3906_v14  ;;  %v3926_v30 = vrot.slane %v3925_v60, 4  ;;  %v5876_v45 = vld [vmem:[%s6955_s23 + $0x78] sm:$0xe] }
 0x109   : > { %6643 = vmatmul.mubr.bf16.gmra.mxu0 %v6884_v12  ;;  %v3930_v52 = vrot.slane %v3928_v1, 5  ;;  %v3939_v21 = vor.u32 %v3938_v54, %v3935_v31  ;;  %v8735_v48 = vrot.slane %v3942_v22, 5  ;;  %v3948_v12 = vrot.slane %v3946_v16, 4  ;;  %v6888_v31 = vld [vmem:[%s6955_s23 + $0xb4] sm:$0xff]  }
 0x10a   : > { %6646 = vmatprep.mubr.bf16.mxu0 %v6887_v55  ;;  %v3957_v34 = vshrl.u32 %v5801_v15, 16  ;;  %v3960_v63 = vshll.u32 %v5801_v15, 16  ;;  %v9696_v47 = vcombine.low %v8331_v5, %v8336_v25  ;;  %v4602_v14 = vrot.slane %v8686_v49, 5  ;;  %v8752_v5 = vpop.f32.mrf.mxu0 }
 0x10b   : > { %v3966_v54 = vshll.u32 %v8730_v32, 16  ;;  %v3970_v60 = vshrl.u32 %v8730_v32, 16  ;;  %v9698_v1 = vcombine.low %v8349_v9, %v8343_v29  ;;  %9699 = vst [vmem:[#allocation15_spill] sm:$0xff] %v8752_v5  ;;  %v8754_v25 = vcombine.low %v3897_v42, %v3907_v0  ;;  %v5804_v29 = vld [vmem:[%s6955_s23 + $0x78] sm:$0xf]  ;;  %v6891_v9 = vld [vmem:[%s6955_s23 + $0xc0] sm:$0xff]  }
 0x10c   : > { %6595 = vmatmul.mubr.bf16.gmra.mxu1 %v9696_v47  ;;  %v8741_v55 = vpop.f32.mrf.mxu1  ;;  %v3921_v22 = vsel %vm6986_vm2, %v3916_v43, %v8669_v6  ;;  %v8761_v49 = vsel %vm7297_vm5, %v5889_v51, %v4595_v17  ;;  %v8765_v16 = vsel %vm7297_vm5, %v4597_v11, %v4598_v18  ;;  %v3931_v15 = vsel %vm6986_vm2, %v3926_v30, %v3930_v52  ;;  %v8778_v43 = vld [vmem:[%s6955_s23 + $0x74] sm:$0x1]  ;;  %v8835_v5 = vld [vmem:[%s6955_s23 + $0x8c] sm:$0x1] }
 0x10d   : > { %9697 = vst [vmem:[#allocation14_spill] sm:$0xff] %v8741_v55  ;;  %6598 = vmatprep.mubr.bf16.mxu1 %v9698_v1  ;;  %v8771_v47 = vrot.slane %v3939_v21, 4  ;;  %v3952_v42 = vshll.u32 %v5800_v53, 16  ;;  %v5890_v0 = vrot.slane %v5874_v62, 9  ;;  %v8774_v1 = vld [vmem:[%s6955_s23 + $0x7c] sm:$0xf]  ;;  %v3949_v6 = vor.u32 %v3948_v12, %v8735_v48  ;;  %v8784_v21 = vpop.f32.mrf.mxu0 }
 0x10e   : > { %v4605_v17 = vrot.slane %v5800_v53, 5  ;;  %v3959_v51 = vrot.slane %v3957_v34, 4  ;;  %v3962_v11 = vrot.slane %v3960_v63, 5  ;;  %v8780_v18 = vpop.f32.mrf.mxu1  ;;  %v4604_v37 = vrot.slane %v4602_v14, 4  ;;  %9701 = vst [vmem:[#allocation17_spill] sm:$0xff] %v8784_v21 }
 0x10f   : > { %9700 = vst [vmem:[#allocation16_spill] sm:$0xff] %v8780_v18  ;;  %v8782_v55 = vrot.slane %v3966_v54, 5  ;;  %v3972_v30 = vrot.slane %v3970_v60, 4  ;;  %v3981_v52 = vshrl.u32 %v5804_v29, 16  ;;  %v5875_v53 = vld [vmem:[%s6955_s23 + $0x6c] sm:$0xe]  ;;  %v8791_v18 = vcombine.low %v3921_v22, %v3931_v15 }
 0x110   : > { %v3984_v12 = vshll.u32 %v5804_v29, 16  ;;  %v3990_v34 = vshll.u32 %v8774_v1, 16  ;;  %v3994_v63 = vshrl.u32 %v8774_v1, 16  ;;  %v8793_v54 = vrot.slane %v3952_v42, 5  ;;  %v5807_v62 = vld [vmem:[%s6955_s23 + $0x84] sm:$0xf]  ;;  %v8814_v42 = vpop.f32.mrf.mxu1 }
 0x111   : > { %6647 = vmatmul.mubr.bf16.gmra.mxu0 %v6888_v31  ;;  %9702 = vst [vmem:[#allocation18_spill] sm:$0xff] %v8791_v18  ;;  %v8797_v60 = vsel %vm7297_vm5, %v5890_v0, %v4602_v14  ;;  %v3976_v31 = vshll.u32 %v8778_v43, 16  ;;  %v8805_v28 = vrot.slane %v3949_v6, 4  ;;  %v4609_v22 = vrot.slane %v8730_v32, 5  ;;  %v8809_v15 = vld [vmem:[%s6955_s23 + $0x88] sm:$0xf] }
 0x112   : > { %6650 = vmatprep.mubr.bf16.mxu0 %v6891_v9  ;;  %v3963_v9 = vor.u32 %v3962_v11, %v3959_v51  ;;  %v9703_v14 = vcombine.low %v8358_v4, %v8362_v13  ;;  %9704 = vst [vmem:[#allocation19_spill] sm:$0xff] %v8814_v42  ;;  %v6892_v0 = vld [vmem:[%s6955_s23 + $0xcc] sm:$0xff]   ;;  %v8819_v10 = vsel %vm7297_vm5, %v4604_v37, %v4605_v17  ;;  %v5891_v6 = vrot.slane %v5875_v53, 9  ;;  %v8822_v11 = vpop.f32.mrf.mxu0  ;;  %v8828_v4 = vld [vmem:[%s6955_s23 + $0x80] sm:$0x1] }
 0x113   : > { %v3973_v29 = vor.u32 %v3972_v30, %v8782_v55  ;;  %v3983_v51 = vrot.slane %v3981_v52, 4  ;;  %9705 = vst [vmem:[#allocation20_spill] sm:$0xff] %v8822_v11  ;;  %v9706_v32 = vcombine.low %v8393_v26, %v8397_v35  ;;  %v3986_v13 = vrot.slane %v3984_v12, 5 }
 0x114   : > { %6599 = vmatmul.mubr.bf16.gmra.mxu1 %v9703_v14  ;;  %v8830_v14 = vrot.slane %v3990_v34, 5  ;;  %v3996_v42 = vrot.slane %v3994_v63, 4  ;;  %v4005_v21 = vshrl.u32 %v5807_v62, 16  ;;  %v3978_v37 = vrot.slane %v3976_v31, 5 }
 0x115   : > { %6602 = vmatprep.mubr.bf16.mxu1 %v9706_v32  ;;  %v4612_v17 = vrot.slane %v8778_v43, 5  ;;  %v4008_v30 = vshll.u32 %v5807_v62, 16  ;;  %v4014_v52 = vshll.u32 %v8809_v15, 16  ;;  %v3964_v53 = vrot.slane %v3963_v9, 4  ;;  %v8838_v32 = vpop.f32.mrf.mxu1 }
 0x116   : > { %v4611_v11 = vrot.slane %v4609_v22, 4  ;;  %v4007_v26 = vrot.slane %v4005_v21, 4  ;;  %v4018_v35 = vshrl.u32 %v8809_v15, 16  ;;  %v3974_v12 = vrot.slane %v3973_v29, 4 }
 0x117   : > { %v4000_v34 = vshll.u32 %v8828_v4, 16  ;;  %v4010_v63 = vrot.slane %v4008_v30, 5  ;;  %v8841_v31 = vrot.slane %v4014_v52, 5  ;;  %v3987_v62 = vor.u32 %v3986_v13, %v3983_v51  ;;  %v5877_v52 = vld [vmem:[%s6955_s23 + $0x84] sm:$0xe] }
 0x118   : > { %v8843_v43 = vpop.f32.mrf.mxu0  ;;  %v3997_v9 = vor.u32 %v3996_v42, %v8830_v14  ;;  %v4616_v21 = vrot.slane %v8774_v1, 5  ;;  %v4020_v18 = vrot.slane %v4018_v35, 4  ;;  %v9707_v29 = vcombine.low %v8489_v41, %v8504_v3 }
 0x119   : > { %6651 = vmatmul.mubr.bf16.gmra.mxu0 %v6892_v0  ;;  %v3955_v30 = vsel %vm6986_vm2, %v8805_v28, %v8793_v54  ;;  %v8859_v51 = vsel %vm7297_vm5, %v5891_v6, %v4609_v22  ;;  %v4024_v42 = vshll.u32 %v8835_v5, 16  ;;  %v3969_v41 = vsel %vm6986_vm2, %v3964_v53, %v8782_v55  ;;  %v5810_v54 = vld [vmem:[%s6955_s23 + $0x90] sm:$0xf] }
 0x11a   : > { %6718 = vmatprep.mubr.bf16.mxu0 %v9707_v29  ;;  %v8862_v1 = vpop.f32.mrf.mxu0  ;;  %v4011_v3 = vor.u32 %v4010_v63, %v4007_v26  ;;  %v4021_v13 = vor.u32 %v4020_v18, %v8841_v31  ;;  %v4623_v28 = vrot.slane %v8809_v15, 5  ;;  %v9709_v22 = vcombine.low %v8406_v44, %v8411_v8 }
 0x11b   : > { %v3979_v6 = vsel %vm6986_vm2, %v3974_v12, %v3978_v37  ;;  %v8880_v55 = vsel %vm7297_vm5, %v4611_v11, %v4612_v17  ;;  %v4002_v53 = vrot.slane %v4000_v34, 5  ;;  %v5892_v18 = vrot.slane %v5876_v45, 9  ;;  %v8889_v12 = vld [vmem:[%s6955_s23 + $0x94] sm:$0xf] }
 0x11c   : > { %v8871_v35 = vpop.f32.mrf.mxu1  ;;  %6603 = vmatmul.mubr.bf16.gmra.mxu1 %v9709_v22  ;;  %v8882_v26 = vpop.f32.mrf.mxu0  ;;  %v3988_v15 = vrot.slane %v3987_v62, 4  ;;  %v3998_v63 = vrot.slane %v3997_v9, 4  ;;  %v4618_v29 = vrot.slane %v4616_v21, 4  ;;  %v4619_v0 = vrot.slane %v8828_v4, 5 }
 0x11d   : > { %9708 = vst [vmem:[#allocation21_spill] sm:$0xff] %v8871_v35  ;;  %6670 = vmatprep.mubr.bf16.mxu1 %v8598_v40  ;;  %v4026_v8 = vrot.slane %v4024_v42, 5  ;;  %v5893_v37 = vrot.slane %v5877_v52, 9  ;;  %v4029_v11 = vshrl.u32 %v5810_v54, 16  ;;  %v4032_v17 = vshll.u32 %v5810_v54, 16 }
 0x11e   : > { %v8886_v44 = vpop.f32.mrf.mxu1  ;;  %v8891_v34 = vpop.f32.mrf.mxu0  ;;  %v4012_v45 = vrot.slane %v4011_v3, 4  ;;  %v4022_v22 = vrot.slane %v4021_v13, 4  ;;  %v4625_v40 = vrot.slane %v4623_v28, 4  ;;  %v4626_v62 = vrot.slane %v8835_v5, 5  ;;  %v8912_v54 = vld [vmem:[%s6955_s23 + $0x98] sm:$0x1] }
 0x11f   : > { %9710 = vst [vmem:[#allocation22_spill] sm:$0xff] %v8886_v44  ;;  %v9712_v4 = vsel %vm6986_vm2, %v8771_v47, %v8735_v48  ;;  %v8903_v52 = vcombine.low %v3969_v41, %v3979_v6  ;;  %v8909_v13 = vsel %vm7297_vm5, %v5892_v18, %v4616_v21  ;;  %v3993_v48 = vsel %vm6986_vm2, %v3988_v15, %v8830_v14  ;;  %v5813_v41 = vld [vmem:[%s6955_s23 + $0x9c] sm:$0xf]  ;;  %v8929_v6 = vld [vmem:[%s6955_s23 + $0xa0] sm:$0xf] }
 0x120   : > { %v8894_v9 = vpop.f32.mrf.mxu1  ;;  %v8901_v42 = vcombine.low %v9712_v4, %v3955_v30  ;;  %v6432_v5 = vpop.f32.mrf.mxu0  ;;  %v4003_v47 = vsel %vm6986_vm2, %v3998_v63, %v4002_v53  ;;  %v8924_v30 = vsel %vm7297_vm5, %v4618_v29, %v4619_v0  ;;  %v4038_v21 = vshll.u32 %v8889_v12, 16  ;;  %v9016_v35 = vld [vmem:[%s6955_s23 + $0xb0] sm:$0x1] }
 0x121   : > { %9711 = vst [vmem:[#allocation23_spill] sm:$0xff] %v8894_v9  ;;  %v9713_v9 = vcombine.low %v8561_v20, %v8565_v19  ;;  %v9715_v20 = vcombine.low %v8617_v36, %v8633_v59  ;;  %v8938_v19 = vsel %vm7297_vm5, %v5893_v37, %v4623_v28  ;;  %v4031_v14 = vrot.slane %v4029_v11, 4  ;;  %v8953_v37 = vld [vmem:[%s6955_s23 + $0x90] sm:$0xe] }
 0x122   : > { %v8931_v18 = vpop.f32.mrf.mxu1  ;;  %v4034_v53 = vrot.slane %v4032_v17, 5  ;;  %v4042_v0 = vshrl.u32 %v8889_v12, 16  ;;  %v1555_v15 = vpop.f32.mrf.mxu0  ;;  %v4017_v63 = vsel %vm6986_vm2, %v4012_v45, %v8841_v31  ;;  %v4027_v29 = vsel %vm6986_vm2, %v4022_v22, %v4026_v8 }
 0x123   : > { %6719 = vmatmul.mubr.bf16.vlgmr.msra.gmra.mxu0 %v9713_v9  ;;  %9714 = vst [vmem:[#allocation24_spill] sm:$0xff] %v8931_v18  ;;  %v8948_v36 = vsel %vm7297_vm5, %v4625_v40, %v4626_v62  ;;  %v4048_v59 = vshll.u32 %v8912_v54, 16  ;;  %v4053_v11 = vshrl.u32 %v5813_v41, 16  ;;  %v4056_v17 = vshll.u32 %v5813_v41, 16 }
 0x124   : > { %6722 = vmatprep.mubr.bf16.mxu0 %v9715_v20  ;;  %v6384_v28 = vpop.f32.mrf.mxu1  ;;  %6671 = vmatmul.mubr.bf16.vlgmr.msra.gmra.mxu1 %v8604_v61  ;;  %v4062_v9 = vshll.u32 %v8929_v6, 16  ;;  %v4066_v31 = vshrl.u32 %v8929_v6, 16  ;;  %v6433_v45 = vpop.f32.mrf.mxu0  ;;  %v8959_v22 = vcombine.low %v3993_v48, %v4003_v47  ;;  %v8963_v40 = vrot.slane %v4038_v21, 5  ;;  %v8977_v61 = vld [vmem:[%s6955_s23 + $0xa4] sm:$0x1] }
 0x125   : > { %v1111_v8 = vadd.f32 %v6384_v28, %v8454_v24  ;;  %6674 = vmatprep.mubr.bf16.mxu1 %v8704_v58  ;;  %v8965_v4 = vcombine.low %v4017_v63, %v4027_v29  ;;  %v4035_v20 = vor.u32 %v4034_v53, %v4031_v14  ;;  %v4044_v24 = vrot.slane %v4042_v0, 4  ;;  %v5816_v28 = vld [vmem:[%s6955_s23 + $0xa8] sm:$0xf]  ;;  %v8982_v14 = vld [vmem:[%s6955_s23 + $0xac] sm:$0xf] }
 0x126   : > { %v1102_v62 = vpop.f32.mrf.mxu1  ;;  %v1558_v48 = vpop.f32.mrf.mxu0  ;;  %v8973_v47 = vrot.slane %v4048_v59, 5  ;;  %v5894_v21 = vrot.slane %v8953_v37, 9  ;;  %v4055_v29 = vrot.slane %v4053_v11, 4  ;;  %v4058_v18 = vrot.slane %v4056_v17, 5 }
 0x127   : > { %v8970_v3 = vadd.f32 %v6432_v5, %v1111_v8  ;;  %v1103_v58 = vadd.f32 %v1102_v62, %v8475_v57  ;;  %v8979_v44 = vrot.slane %v4062_v9, 5  ;;  %v4068_v41 = vrot.slane %v4066_v31, 4  ;;  %v9721_v62 = vld [vmem:[#allocation3_spill] sm:$0xff] }
 0x128   : > { %v6385_v63 = vpop.f32.mrf.mxu1  ;;  %v6436_v5 = vpop.f32.mrf.mxu0  ;;  %v9718_v0 = vcombine.low %v8667_v33, %v8675_v23  ;;  %v4077_v59 = vshrl.u32 %v5816_v28, 16  ;;  %v4080_v37 = vshll.u32 %v5816_v28, 16  ;;  %v9719_v11 = vcombine.low %v8719_v7, %v8723_v50 }
 0x129   : > { %9716 = vst [vmem:[#allocation25_spill] sm:$0xff] %v8970_v3  ;;  %v8984_v53 = vadd.f32 %v1555_v15, %v1103_v58  ;;  %v1114_v57 = vadd.f32 %v6385_v63, %v8511_v38  ;;  %v8993_v17 = vrot.slane %v4035_v20, 4  ;;  %v4045_v15 = vor.u32 %v4044_v24, %v8963_v40  ;;  %v5879_v58 = vld [vmem:[%s6955_s23 + $0x9c] sm:$0xe] }
 0x12a   : > { %v1105_v8 = vpop.f32.mrf.mxu1  ;;  %v4630_v9 = vrot.slane %v8889_v12, 5  ;;  %v4072_v38 = vshll.u32 %v8977_v61, 16  ;;  %v1571_v23 = vpop.f32.mrf.mxu0  ;;  %v4633_v28 = vrot.slane %v8912_v54, 5  ;;  %v4086_v63 = vshll.u32 %v8982_v14, 16 }
 0x12b   : > { %9717 = vst [vmem:[#allocation26_spill] sm:$0xff] %v8984_v53  ;;  %6723 = vmatmul.mubr.bf16.gmra.mxu0 %v9718_v0  ;;  %v8998_v31 = vadd.f32 %v6433_v45, %v1114_v57  ;;  %v1106_v33 = vadd.f32 %v1105_v8, %v9721_v62  ;;  %v4059_v50 = vor.u32 %v4058_v18, %v4055_v29  ;;  %v4637_v12 = vrot.slane %v8929_v6, 5  ;;  %v9722_v57 = vld [vmem:[#allocation7_spill] sm:$0xff]  ;;  %v9723_v6 = vld [vmem:[#allocation9_spill] sm:$0xff] }
 0x12c   : > { %6726 = vmatprep.mubr.bf16.mxu0 %v9719_v11  ;;  %v6388_v7 = vpop.f32.mrf.mxu1  ;;  %6675 = vmatmul.mubr.bf16.gmra.mxu1 %v8712_v2  ;;  %v4069_v20 = vor.u32 %v4068_v41, %v8979_v44  ;;  %v4090_v45 = vshrl.u32 %v8982_v14, 16  ;;  %v6437_v8 = vpop.f32.mrf.mxu0  ;;  %v4079_v54 = vrot.slane %v4077_v59, 4  ;;  %v4082_v11 = vrot.slane %v4080_v37, 5 }
 0x12d   : > { %9720 = vst [vmem:[#allocation27_spill] sm:$0xff] %v8998_v31  ;;  %v9008_v24 = vadd.f32 %v1558_v48, %v1106_v33  ;;  %v1127_v0 = vadd.f32 %v6388_v7, %v9722_v57  ;;  %6678 = vmatprep.mubr.bf16.mxu1 %v8754_v25  ;;  %v4046_v31 = vrot.slane %v4045_v15, 4  ;;  %v4632_v2 = vrot.slane %v4630_v9, 4 }
 0x12e   : > { %v1118_v62 = vpop.f32.mrf.mxu1  ;;  %v4074_v18 = vrot.slane %v4072_v38, 5  ;;  %v5895_v29 = vrot.slane %v5879_v58, 9  ;;  %v1574_v3 = vpop.f32.mrf.mxu0  ;;  %v9018_v48 = vrot.slane %v4086_v63, 5  ;;  %v4092_v33 = vrot.slane %v4090_v45, 4 }
 0x12f   : > { %v9012_v41 = vadd.f32 %v6436_v5, %v1127_v0  ;;  %v1119_v53 = vadd.f32 %v1118_v62, %v9723_v6  ;;  %v4060_v57 = vrot.slane %v4059_v50, 4  ;;  %v4070_v25 = vrot.slane %v4069_v20, 4 }
 0x130   : > { %v6389_v7 = vpop.f32.mrf.mxu1  ;;  %v4639_v59 = vrot.slane %v4637_v12, 4  ;;  %v4640_v37 = vrot.slane %v8977_v61, 5  ;;  %v6440_v38 = vpop.f32.mrf.mxu0  ;;  %v9724_v58 = vcombine.low %v8761_v49, %v8765_v16  ;;  %v9029_v63 = vsel %vm7297_vm5, %v5894_v21, %v4630_v9  ;;  %v5880_v21 = vld [vmem:[%s6955_s23 + $0xa8] sm:$0xe] }
 0x131   : > { %v9021_v15 = vadd.f32 %v1571_v23, %v1119_v53  ;;  %v1130_v5 = vadd.f32 %v6389_v7, %v8658_v39  ;;  %v4083_v50 = vor.u32 %v4082_v11, %v4079_v54  ;;  %v9725_v20 = vcombine.low %v8797_v60, %v8819_v10 }
 0x132   : > { %v1121_v45 = vpop.f32.mrf.mxu1  ;;  %v4041_v39 = vsel %vm6986_vm2, %v8993_v17, %v8963_v40  ;;  %v4051_v49 = vsel %vm6986_vm2, %v4046_v31, %v8973_v47  ;;  %v9043_v16 = vsel %vm7297_vm5, %v4632_v2, %v4633_v28  ;;  %v4096_v61 = vshll.u32 %v9016_v35, 16  ;;  %v1587_v60 = vpop.f32.mrf.mxu0  ;;  %v5819_v17 = vld [vmem:[%s6955_s23 + $0xb4] sm:$0xf]  ;;  %v9726_v47 = vld [vmem:[#allocation18_spill] sm:$0xff]  ;;  %v9072_v2 = vld [vmem:[%s6955_s23 + $0xb8] sm:$0xf] }
 0x133   : > { %6727 = vmatmul.mubr.bf16.gmra.mxu0 %v9724_v58  ;;  %v9047_v53 = vadd.f32 %v6437_v8, %v1130_v5  ;;  %v1122_v10 = vadd.f32 %v1121_v45, %v8692_v46  ;;  %v4093_v9 = vor.u32 %v4092_v33, %v9018_v48  ;;  %v4644_v40 = vrot.slane %v8982_v14, 5  ;;  %v9727_v8 = vld [vmem:[#allocation13_spill] sm:$0xff] }
 0x134   : > { %6730 = vmatprep.mubr.bf16.mxu0 %v9725_v20  ;;  %v6392_v23 = vpop.f32.mrf.mxu1  ;;  %6679 = vmatmul.mubr.bf16.gmra.mxu1 %v9726_v47  ;;  %v4065_v31 = vsel %vm6986_vm2, %v4060_v57, %v8979_v44  ;;  %v4075_v28 = vsel %vm6986_vm2, %v4070_v25, %v4074_v18  ;;  %v9061_v46 = vsel %vm7297_vm5, %v5895_v29, %v4637_v12  ;;  %v6441_v11 = vpop.f32.mrf.mxu0  ;;  %v4084_v62 = vrot.slane %v4083_v50, 4  ;;  %v9728_v57 = vld [vmem:[#allocation15_spill] sm:$0xff]  ;;  %v9732_v47 = vld [vmem:[#allocation20_spill] sm:$0xff] }
 0x135   : > { %v9065_v0 = vsel %vm7297_vm5, %v4639_v59, %v4640_v37  ;;  %v9067_v14 = vadd.f32 %v1574_v3, %v1122_v10  ;;  %v1143_v54 = vadd.f32 %v6392_v23, %v9727_v8  ;;  %6682 = vmatprep.mubr.bf16.mxu1 %v8901_v42  ;;  %v5896_v44 = vrot.slane %v5880_v21, 9 }
 0x136   : > { %v1134_v18 = vpop.f32.mrf.mxu1  ;;  %v4098_v6 = vrot.slane %v4096_v61, 5  ;;  %v4647_v12 = vrot.slane %v9016_v35, 5  ;;  %v4101_v29 = vshrl.u32 %v5819_v17, 16  ;;  %v4104_v33 = vshll.u32 %v5819_v17, 16  ;;  %v1590_v25 = vpop.f32.mrf.mxu0 }
 0x137   : > { %v9075_v7 = vadd.f32 %v6440_v38, %v1143_v54  ;;  %v1135_v3 = vadd.f32 %v1134_v18, %v9728_v57  ;;  %v4094_v59 = vrot.slane %v4093_v9, 4  ;;  %v4646_v37 = vrot.slane %v4644_v40, 4  ;;  %v9729_v38 = vld [vmem:[#allocation17_spill] sm:$0xff] }
 0x138   : > { %v6393_v42 = vpop.f32.mrf.mxu1  ;;  %v9078_v5 = vcombine.low %v4041_v39, %v4051_v49  ;;  %v5926_v58 = vcombine.low %v9029_v63, %v9043_v16  ;;  %v9082_v50 = vcombine.low %v4065_v31, %v4075_v28  ;;  %v4110_v35 = vshll.u32 %v9072_v2, 16  ;;  %v6444_v61 = vpop.f32.mrf.mxu0  ;;  %v5822_v49 = vld [vmem:[%s6955_s23 + $0xc0] sm:$0xf]  ;;  %v9096_v16 = vld [vmem:[%s6955_s23 + $0xc4] sm:$0xf] }
 0x139   : > { %v9085_v45 = vadd.f32 %v1587_v60, %v1135_v3  ;;  %v1146_v20 = vadd.f32 %v6393_v42, %v9729_v38  ;;  %v9730_v21 = vcombine.low %v8859_v51, %v8880_v55  ;;  %v5927_v39 = vcombine.low %v9061_v46, %v9065_v0  ;;  %v9737_v46 = vld [vmem:[#allocation6_spill] sm:$0xff] }
 0x13a   : > { %v4114_v63 = vshrl.u32 %v9072_v2, 16  ;;  %v1137_v10 = vpop.f32.mrf.mxu1  ;;  %v9731_v60 = vcombine.low %v8909_v13, %v8924_v30  ;;  %v4089_v51 = vsel %vm6986_vm2, %v4084_v62, %v9018_v48  ;;  %v9106_v55 = vsel %vm7297_vm5, %v5896_v44, %v4644_v40  ;;  %v1603_v28 = vpop.f32.mrf.mxu0  ;;  %v9118_v30 = vld [vmem:[%s6955_s23 + $0xbc] sm:$0x1]  ;;  %v5881_v48 = vld [vmem:[%s6955_s23 + $0xb4] sm:$0xe] }
 0x13b   : > { %6731 = vmatmul.mubr.bf16.gmra.mxu0 %v9730_v21  ;;  %v4103_v9 = vrot.slane %v4101_v29, 4  ;;  %v4106_v17 = vrot.slane %v4104_v33, 5  ;;  %v9108_v23 = vadd.f32 %v6441_v11, %v1146_v20  ;;  %v1138_v31 = vadd.f32 %v1137_v10, %v9732_v47  ;;  %v9140_v20 = vld [vmem:[%s6955_s23 + $0xc8] sm:$0x1] }
 0x13c   : > { %6734 = vmatprep.mubr.bf16.mxu0 %v9731_v60  ;;  %v4099_v8 = vsel %vm6986_vm2, %v4094_v59, %v4098_v6  ;;  %v9115_v13 = vsel %vm7297_vm5, %v4646_v37, %v4647_v12  ;;  %v6396_v54 = vpop.f32.mrf.mxu1  ;;  %6683 = vmatmul.mubr.bf16.gmra.mxu1 %v8903_v52  ;;  %v9122_v40 = vrot.slane %v4110_v35, 5  ;;  %v4125_v11 = vshrl.u32 %v5822_v49, 16  ;;  %v6445_v29 = vpop.f32.mrf.mxu0 }
 0x13d   : > { %v4128_v62 = vshll.u32 %v5822_v49, 16  ;;  %v4134_v44 = vshll.u32 %v9096_v16, 16  ;;  %v9125_v18 = vadd.f32 %v1590_v25, %v1138_v31  ;;  %v1159_v6 = vadd.f32 %v6396_v54, %v8843_v43  ;;  %6686 = vmatprep.mubr.bf16.mxu1 %v8959_v22 }
 0x13e   : > { %v4116_v12 = vrot.slane %v4114_v63, 4  ;;  %v4138_v33 = vshrl.u32 %v9096_v16, 16  ;;  %v1150_v57 = vpop.f32.mrf.mxu1  ;;  %v4107_v3 = vor.u32 %v4106_v17, %v4103_v9  ;;  %v4120_v52 = vshll.u32 %v9118_v30, 16  ;;  %v1606_v43 = vpop.f32.mrf.mxu0  ;;  %v5825_v9 = vld [vmem:[%s6955_s23 + $0xcc] sm:$0xf] }
 0x13f   : > { %v5897_v59 = vrot.slane %v5881_v48, 9  ;;  %v4651_v37 = vrot.slane %v9072_v2, 5  ;;  %v9132_v42 = vadd.f32 %v6444_v61, %v1159_v6  ;;  %v1151_v25 = vadd.f32 %v1150_v57, %v8862_v1  ;;  %v5882_v48 = vld [vmem:[%s6955_s23 + $0xc0] sm:$0xe] }
 0x140   : > { %v9135_v35 = vcombine.low %v4089_v51, %v4099_v8  ;;  %v5928_v22 = vcombine.low %v9106_v55, %v9115_v13  ;;  %v6397_v38 = vpop.f32.mrf.mxu1  ;;  %v4127_v21 = vrot.slane %v4125_v11, 4  ;;  %v4130_v63 = vrot.slane %v4128_v62, 5  ;;  %v6448_v10 = vpop.f32.mrf.mxu0  ;;  %v9162_v8 = vld [vmem:[%s6955_s23 + $0xd0] sm:$0xf] }
 0x141   : > { %v9142_v49 = vrot.slane %v4134_v44, 5  ;;  %v4140_v2 = vrot.slane %v4138_v33, 4  ;;  %v9144_v61 = vadd.f32 %v1603_v28, %v1151_v25  ;;  %v1162_v1 = vadd.f32 %v6397_v38, %v8882_v26 }
 0x142   : > { %v9733_v60 = vcombine.low %v8938_v19, %v8948_v36  ;;  %v4117_v51 = vor.u32 %v4116_v12, %v9122_v40  ;;  %v4654_v55 = vrot.slane %v9118_v30, 5  ;;  %v1153_v17 = vpop.f32.mrf.mxu1  ;;  %v9153_v47 = vrot.slane %v4107_v3, 4  ;;  %v1619_v13 = vpop.f32.mrf.mxu0 }
 0x143   : > { %v9155_v31 = vrot.slane %v4120_v52, 5  ;;  %v9159_v26 = vsel %vm7297_vm5, %v5897_v59, %v4651_v37  ;;  %v4653_v28 = vrot.slane %v4651_v37, 4  ;;  %v9164_v19 = vadd.f32 %v6445_v29, %v1162_v1  ;;  %v9734_v29 = vld [vmem:[#allocation2_spill] sm:$0xff] }
 0x144   : > { %6735 = vmatmul.mubr.bf16.gmra.mxu0 %v9733_v60  ;;  %v1154_v36 = vadd.f32 %v1153_v17, %v8891_v34  ;;  %v4144_v30 = vshll.u32 %v9140_v20, 16  ;;  %v6400_v54 = vpop.f32.mrf.mxu1  ;;  %6687 = vmatmul.mubr.bf16.gmra.mxu1 %v8965_v4  ;;  %v4131_v11 = vor.u32 %v4130_v63, %v4127_v21  ;;  %v4141_v62 = vor.u32 %v4140_v2, %v9142_v49  ;;  %v6449_v57 = vpop.f32.mrf.mxu0 }
 0x145   : > { %6738 = vmatprep.mubr.bf16.mxu0 %v5926_v58  ;;  %v4658_v58 = vrot.slane %v9096_v16, 5  ;;  %v4149_v44 = vshrl.u32 %v5825_v9, 16  ;;  %v4152_v6 = vshll.u32 %v5825_v9, 16  ;;  %v1175_v33 = vadd.f32 %v6400_v54, %v9734_v29  ;;  %6690 = vmatprep.mubr.bf16.mxu1 %v9078_v5 }
 0x146   : > { %v9172_v12 = vadd.f32 %v1606_v43, %v1154_v36  ;;  %v4158_v34 = vshll.u32 %v9162_v8, 16  ;;  %v4162_v3 = vshrl.u32 %v9162_v8, 16  ;;  %v1166_v16 = vpop.f32.mrf.mxu1  ;;  %v4118_v52 = vrot.slane %v4117_v51, 4  ;;  %v9735_v43 = vld [vmem:[#allocation5_spill] sm:$0xff]  ;;  %v1622_v21 = vpop.f32.mrf.mxu0  ;;  %v9736_v36 = vld [vmem:[#allocation4_spill] sm:$0xff] }
 0x147   : > { %v4655_v4 = vsel %vm7297_vm5, %v4653_v28, %v4654_v55  ;;  %v5898_v59 = vrot.slane %v5882_v48, 9  ;;  %v4661_v37 = vrot.slane %v9140_v20, 5  ;;  %v9181_v25 = vadd.f32 %v6448_v10, %v1175_v33  ;;  %v5827_v20 = vld [vmem:[%s6955_s23 + $0xd4] sm:$0x1] }
 0x148   : > { %v1167_v38 = vadd.f32 %v1166_v16, %v9735_v43  ;;  %v4146_v63 = vrot.slane %v4144_v30, 5  ;;  %v4660_v5 = vrot.slane %v4658_v58, 4  ;;  %v6401_v2 = vpop.f32.mrf.mxu1  ;;  %v4132_v1 = vrot.slane %v4131_v11, 4 }
 0x149   : > { %v4142_v60 = vrot.slane %v4141_v62, 4  ;;  %v4151_v9 = vrot.slane %v4149_v44, 4  ;;  %v4154_v17 = vrot.slane %v4152_v6, 5  ;;  %v1178_v55 = vadd.f32 %v6401_v2, %v9736_v36  ;;  %v6452_v28 = vpop.f32.mrf.mxu0  ;;  %v5883_v6 = vld [vmem:[%s6955_s23 + $0xcc] sm:$0xe]  ;;  %s5974_s23 = sshll.u32 %s9811_s13, 7 }
 0x14a   : > { %v9184_v51 = vadd.f32 %v1619_v13, %v1167_v38  ;;  %v9191_v10 = vrot.slane %v4158_v34, 5  ;;  %v4164_v30 = vrot.slane %v4162_v3, 4  ;;  %v1169_v48 = vpop.f32.mrf.mxu1  ;;  %v4113_v13 = vsel %vm6986_vm2, %v9153_v47, %v9122_v40  ;;  %s9498_s19 = scalar_lea.vmem %s9589_s2, %s5974_s23 }
 0x14b   : > { %v4123_v54 = vsel %vm6986_vm2, %v4118_v52, %v9155_v31  ;;  %v4665_v11 = vrot.slane %v9162_v8, 5  ;;  %v9201_v62 = vadd.f32 %v6449_v57, %v1178_v55  ;;  %v1170_v0 = vadd.f32 %v1169_v48, %v9737_v46  ;;  %v9738_v57 = vld [vmem:[#allocation8_spill] sm:$0xff] }
 0x14c   : > { %6739 = vmatmul.mubr.bf16.gmra.mxu0 %v5927_v39  ;;  %v1635_v39 = vpop.f32.mrf.mxu0  ;;  %v4659_v44 = vsel %vm7297_vm5, %v5898_v59, %v4658_v58  ;;  %v6404_v29 = vpop.f32.mrf.mxu1  ;;  %6691 = vmatmul.mubr.bf16.gmra.mxu1 %v9082_v50  ;;  %v5929_v40 = vcombine.low %v9159_v26, %v4655_v4  ;;  %v4137_v47 = vsel %vm6986_vm2, %v4132_v1, %v9142_v49  ;;  %v4168_v8 = vshll.u32 %v5827_v20, 16  ;;  %v9741_v48 = vld [vmem:[#allocation12_spill] sm:$0xff] }
 0x14d   : > { %6742 = vmatprep.mubr.bf16.mxu0 %v5928_v22  ;;  %v4662_v22 = vsel %vm7297_vm5, %v4660_v5, %v4661_v37  ;;  %v4155_v31 = vor.u32 %v4154_v17, %v4151_v9  ;;  %v9214_v33 = vadd.f32 %v1622_v21, %v1170_v0  ;;  %v1191_v34 = vadd.f32 %v6404_v29, %v9738_v57  ;;  %v9739_v37 = vld [vmem:[#allocation10_spill] sm:$0xff]  ;;  %v9740_v9 = vld [vmem:[#allocation11_spill] sm:$0xff] }
 0x14e   : > { %v6453_v58 = vpop.f32.mrf.mxu0  ;;  %6694 = vmatprep.mubr.bf16.mxu1 %v9135_v35  ;;  %v4147_v3 = vsel %vm6986_vm2, %v4142_v60, %v4146_v63  ;;  %v4165_v50 = vor.u32 %v4164_v30, %v9191_v10  ;;  %v1182_v16 = vpop.f32.mrf.mxu1  ;;  %v5930_v26 = vcombine.low %v4659_v44, %v4662_v22  ;;  %v5899_v52 = vrot.slane %v5883_v6, 9  ;;  %v9742_v44 = vld [vmem:[#allocation14_spill] sm:$0xff] }
 0x14f   : > { %v4667_v4 = vrot.slane %v4665_v11, 4  ;;  %v4668_v59 = vrot.slane %v5827_v20, 5  ;;  %v9221_v49 = vadd.f32 %v6452_v28, %v1191_v34  ;;  %v1183_v43 = vadd.f32 %v1182_v16, %v9739_v37  ;;  %v9745_v37 = vld [vmem:[#allocation21_spill] sm:$0xff] }
 0x150   : > { %v1638_v38 = vpop.f32.mrf.mxu0  ;;  %v6405_v21 = vpop.f32.mrf.mxu1  ;;  %v5857_v5 = vcombine.low %v4113_v13, %v4123_v54  ;;  %v5858_v2 = vcombine.low %v4137_v47, %v4147_v3  ;;  %v4156_v1 = vrot.slane %v4155_v31, 4  ;;  %v4166_v17 = vrot.slane %v4165_v50, 4  ;;  %v9743_v47 = vld [vmem:[#allocation16_spill] sm:$0xff] }
 0x151   : > { %v9224_v35 = vadd.f32 %v1635_v39, %v1183_v43  ;;  %v1194_v63 = vadd.f32 %v6405_v21, %v9740_v9  ;;  %v4170_v36 = vrot.slane %v4168_v8, 5  ;;  %v4666_v28 = vsel %vm7297_vm5, %v5899_v52, %v4665_v11 }
 0x152   : > { %v6456_v60 = vpop.f32.mrf.mxu0  ;;  %v1185_v55 = vpop.f32.mrf.mxu1  ;;  %v4669_v20 = vsel %vm7297_vm5, %v4667_v4, %v4668_v59  ;;  %v4161_v0 = vsel %vm6986_vm2, %v4156_v1, %v9191_v10  ;;  %v9744_v10 = vld [vmem:[#allocation19_spill] sm:$0xff] }
 0x153   : > { %v9231_v30 = vadd.f32 %v6453_v58, %v1194_v63  ;;  %v1186_v13 = vadd.f32 %v1185_v55, %v9741_v48  ;;  %v4171_v56 = vsel %vm6986_vm2, %v4166_v17, %v4170_v36  ;;  %v5931_v11 = vcombine.low %v4666_v28, %v4669_v20  ;;  %v9747_v17 = vld [vmem:[#allocation23_spill] sm:$0xff]  ;;  %v9748_v20 = vld [vmem:[#allocation24_spill] sm:$0xff] }
 0x154   : > { %6743 = vmatmul.mubr.bf16.gmra.mxu0 %v5929_v40  ;;  %v1651_v54 = vpop.f32.mrf.mxu0  ;;  %v6408_v46 = vpop.f32.mrf.mxu1  ;;  %6695 = vmatmul.mubr.bf16.gmra.mxu1 %v5857_v5  ;;  %v5859_v34 = vcombine.low %v4161_v0, %v4171_v56  ;;  %v9749_v0 = vld [vmem:[#allocation25_spill] sm:$0xff] }
 0x155   : > { %6746 = vmatprep.mubr.bf16.mxu0 %v5930_v26  ;;  %v9237_v39 = vadd.f32 %v1638_v38, %v1186_v13  ;;  %v1207_v22 = vadd.f32 %v6408_v46, %v9742_v44  ;;  %6698 = vmatprep.mubr.bf16.mxu1 %v5858_v2  ;;  %v9746_v2 = vld [vmem:[#allocation22_spill] sm:$0xff] }
 0x156   : > { %v6457_v6 = vpop.f32.mrf.mxu0  ;;  %v1198_v29 = vpop.f32.mrf.mxu1 }
 0x157   : > { %v9242_v40 = vadd.f32 %v6456_v60, %v1207_v22  ;;  %v1199_v31 = vadd.f32 %v1198_v29, %v9743_v47 }
 0x158   : > { %v1654_v8 = vpop.f32.mrf.mxu0  ;;  %v6409_v57 = vpop.f32.mrf.mxu1 }
 0x159   : > { %v9245_v58 = vadd.f32 %v1651_v54, %v1199_v31  ;;  %v1210_v3 = vadd.f32 %v6409_v57, %v9744_v10  ;;  %v9751_v57 = vld [vmem:[#allocation27_spill] sm:$0xff] }
 0x15a   : > { %v6460_v50 = vpop.f32.mrf.mxu0  ;;  %v1201_v16 = vpop.f32.mrf.mxu1 }
 0x15b   : > { %v9248_v26 = vadd.f32 %v6457_v6, %v1210_v3  ;;  %v1202_v27 = vadd.f32 %v1201_v16, %v8838_v32 }
 0x15c   : > { %6747 = vmatmul.mubr.bf16.gmra.mxu0 %v5931_v11  ;;  %v1667_v52 = vpop.f32.mrf.mxu0  ;;  %v6412_v4 = vpop.f32.mrf.mxu1  ;;  %6699 = vmatmul.mubr.bf16.gmra.mxu1 %v5859_v34  ;;  %v9750_v11 = vld [vmem:[#allocation26_spill] sm:$0xff] }
 0x15d   : > { %v9251_v59 = vadd.f32 %v1654_v8, %v1202_v27  ;;  %v1223_v43 = vadd.f32 %v6412_v4, %v9745_v37 }
 0x15e   : > { %v6461_v38 = vpop.f32.mrf.mxu0  ;;  %v1214_v21 = vpop.f32.mrf.mxu1 }
 0x15f   : > { %v9254_v5 = vadd.f32 %v6460_v50, %v1223_v43  ;;  %v1215_v1 = vadd.f32 %v1214_v21, %v9746_v2 }
 0x160   : > { %v1670_v9 = vpop.f32.mrf.mxu0  ;;  %v6413_v63 = vpop.f32.mrf.mxu1 }
 0x161   : > { %v9257_v60 = vadd.f32 %v1667_v52, %v1215_v1  ;;  %v1226_v36 = vadd.f32 %v6413_v63, %v9747_v17 }
 0x162   : > { %v6528_v32 = vpop.f32.mrf.mxu0  ;;  %v1217_v55 = vpop.f32.mrf.mxu1 }
 0x163   : > { %v9260_v28 = vadd.f32 %v6461_v38, %v1226_v36  ;;  %v1218_v48 = vadd.f32 %v1217_v55, %v9748_v20 }
 0x164   : > { %v2696_v13 = vpop.f32.mrf.mxu0  ;;  %v6480_v54 = vpop.f32.mrf.mxu1 }
 0x165   : > { %v9263_v46 = vadd.f32 %v1670_v9, %v1218_v48  ;;  %v2071_v44 = vadd.f32 %v6480_v54, %v9749_v0 }
 0x166   : > { %v6529_v22 = vpop.f32.mrf.mxu0  ;;  %v1942_v6 = vpop.f32.mrf.mxu1 }
 0x167   : > { %v9266_v56 = vadd.f32 %v6528_v32, %v2071_v44  ;;  %v2069_v29 = vadd.f32 %v1942_v6, %v9750_v11 }
 0x168   : > { %v2699_v47 = vpop.f32.mrf.mxu0  ;;  %v6481_v31 = vpop.f32.mrf.mxu1 }
 0x169   : > { %v9269_v8 = vadd.f32 %v2696_v13, %v2069_v29  ;;  %v2072_v34 = vadd.f32 %v6481_v31, %v9751_v57 }
 0x16a   : > { %v6532_v10 = vpop.f32.mrf.mxu0  ;;  %v1945_v3 = vpop.f32.mrf.mxu1 }
 0x16b   : > { %v9272_v50 = vadd.f32 %v6529_v22, %v2072_v34  ;;  %v2070_v16 = vadd.f32 %v1945_v3, %v9008_v24 }
 0x16c   : > { %v2712_v27 = vpop.f32.mrf.mxu0  ;;  %v6484_v52 = vpop.f32.mrf.mxu1 }
 0x16d   : > { %v9275_v4 = vadd.f32 %v2699_v47, %v2070_v16  ;;  %v2075_v37 = vadd.f32 %v6484_v52, %v9012_v41 }
 0x16e   : > { %v6533_v43 = vpop.f32.mrf.mxu0  ;;  %v1958_v38 = vpop.f32.mrf.mxu1 }
 0x16f   : > { %v9278_v21 = vadd.f32 %v6532_v10, %v2075_v37  ;;  %v2073_v2 = vadd.f32 %v1958_v38, %v9021_v15 }
 0x170   : > { %v2715_v1 = vpop.f32.mrf.mxu0  ;;  %v6485_v9 = vpop.f32.mrf.mxu1 }
 0x171   : > { %v9281_v63 = vadd.f32 %v2712_v27, %v2073_v2  ;;  %v2076_v17 = vadd.f32 %v6485_v9, %v9047_v53 }
 0x172   : > { %v6536_v36 = vpop.f32.mrf.mxu0  ;;  %v1961_v24 = vpop.f32.mrf.mxu1 }
 0x173   : > { %v9284_v32 = vadd.f32 %v6533_v43, %v2076_v17  ;;  %v2074_v55 = vadd.f32 %v1961_v24, %v9067_v14 }
 0x174   : > { %v2728_v20 = vpop.f32.mrf.mxu0  ;;  %v6488_v41 = vpop.f32.mrf.mxu1 }
 0x175   : > { %v9287_v48 = vadd.f32 %v2715_v1, %v2074_v55  ;;  %v2079_v13 = vadd.f32 %v6488_v41, %v9075_v7 }
 0x176   : > { %v6537_v54 = vpop.f32.mrf.mxu0  ;;  %v1974_v15 = vpop.f32.mrf.mxu1 }
 0x177   : > { %v9290_v0 = vadd.f32 %v6536_v36, %v2079_v13  ;;  %v2077_v44 = vadd.f32 %v1974_v15, %v9085_v45 }
 0x178   : > { %v2731_v22 = vpop.f32.mrf.mxu0  ;;  %v6489_v53 = vpop.f32.mrf.mxu1 }
 0x179   : > { %v9293_v6 = vadd.f32 %v2728_v20, %v2077_v44  ;;  %v2080_v11 = vadd.f32 %v6489_v53, %v9108_v23 }
 0x17a   : > { %v6540_v29 = vpop.f32.mrf.mxu0  ;;  %v1977_v14 = vpop.f32.mrf.mxu1 }
 0x17b   : > { %v9296_v47 = vadd.f32 %v6537_v54, %v2080_v11  ;;  %v2078_v31 = vadd.f32 %v1977_v14, %v9125_v18 }
 0x17c   : > { %v2744_v57 = vpop.f32.mrf.mxu0  ;;  %v6492_v7 = vpop.f32.mrf.mxu1 }
 0x17d   : > { %v9299_v34 = vadd.f32 %v2731_v22, %v2078_v31  ;;  %v2083_v10 = vadd.f32 %v6492_v7, %v9132_v42 }
 0x17e   : > { %v6541_v3 = vpop.f32.mrf.mxu0  ;;  %v1990_v45 = vpop.f32.mrf.mxu1 }
 0x17f   : > { %v9302_v16 = vadd.f32 %v6540_v29, %v2083_v10  ;;  %v2081_v27 = vadd.f32 %v1990_v45, %v9144_v61 }
 0x180   : > { %v2747_v52 = vpop.f32.mrf.mxu0  ;;  %v6493_v23 = vpop.f32.mrf.mxu1 }
 0x181   : > { %v9305_v37 = vadd.f32 %v2744_v57, %v2081_v27  ;;  %v2084_v43 = vadd.f32 %v6493_v23, %v9164_v19 }
 0x182   : > { %v6544_v38 = vpop.f32.mrf.mxu0  ;;  %v1993_v18 = vpop.f32.mrf.mxu1 }
 0x183   : > { %v9308_v2 = vadd.f32 %v6541_v3, %v2084_v43  ;;  %v2082_v1 = vadd.f32 %v1993_v18, %v9172_v12 }
 0x184   : > { %v2760_v9 = vpop.f32.mrf.mxu0  ;;  %v6496_v42 = vpop.f32.mrf.mxu1 }
 0x185   : > { %v9311_v17 = vadd.f32 %v2747_v52, %v2082_v1  ;;  %v2087_v36 = vadd.f32 %v6496_v42, %v9181_v25 }
 0x186   : > { %v6545_v24 = vpop.f32.mrf.mxu0  ;;  %v2006_v61 = vpop.f32.mrf.mxu1 }
 0x187   : > { %v9314_v55 = vadd.f32 %v6544_v38, %v2087_v36  ;;  %v2085_v20 = vadd.f32 %v2006_v61, %v9184_v51 }
 0x188   : > { %v2763_v41 = vpop.f32.mrf.mxu0  ;;  %v6497_v19 = vpop.f32.mrf.mxu1 }
 0x189   : > { %v9317_v13 = vadd.f32 %v2760_v9, %v2085_v20  ;;  %v2088_v54 = vadd.f32 %v6497_v19, %v9201_v62 }
 0x18a   : > { %v6548_v15 = vpop.f32.mrf.mxu0  ;;  %v2009_v12 = vpop.f32.mrf.mxu1 }
 0x18b   : > { %v9320_v44 = vadd.f32 %v6545_v24, %v2088_v54  ;;  %v2086_v22 = vadd.f32 %v2009_v12, %v9214_v33 }
 0x18c   : > { %v2776_v53 = vpop.f32.mrf.mxu0  ;;  %v6500_v25 = vpop.f32.mrf.mxu1 }
 0x18d   : > { %v9323_v11 = vadd.f32 %v2763_v41, %v2086_v22  ;;  %v2091_v29 = vadd.f32 %v6500_v25, %v9221_v49 }
 0x18e   : > { %v6549_v14 = vpop.f32.mrf.mxu0  ;;  %v2022_v51 = vpop.f32.mrf.mxu1 }
 0x18f   : > { %v9326_v31 = vadd.f32 %v6548_v15, %v2091_v29  ;;  %v2089_v57 = vadd.f32 %v2022_v51, %v9224_v35 }
 0x190   : > { %v2779_v7 = vpop.f32.mrf.mxu0  ;;  %v6501_v62 = vpop.f32.mrf.mxu1 }
 0x191   : > { %v9329_v10 = vadd.f32 %v2776_v53, %v2089_v57  ;;  %v2092_v3 = vadd.f32 %v6501_v62, %v9231_v30 }
 0x192   : > { %v6552_v45 = vpop.f32.mrf.mxu0  ;;  %v2025_v33 = vpop.f32.mrf.mxu1 }
 0x193   : > { %9752 = vst [vmem:[#allocation3_spill] sm:$0xff] %v9329_v10  ;;  %v9332_v27 = vadd.f32 %v6549_v14, %v2092_v3  ;;  %v2090_v52 = vadd.f32 %v2025_v33, %v9237_v39 }
 0x194   : > { %v2792_v23 = vpop.f32.mrf.mxu0  ;;  %v6504_v49 = vpop.f32.mrf.mxu1 }
 0x195   : > { %9753 = vst [vmem:[#allocation7_spill] sm:$0xff] %v9332_v27  ;;  %v9335_v43 = vadd.f32 %v2779_v7, %v2090_v52  ;;  %v2095_v38 = vadd.f32 %v6504_v49, %v9242_v40 }
 0x196   : > { %v6553_v18 = vpop.f32.mrf.mxu0  ;;  %v2038_v35 = vpop.f32.mrf.mxu1 }
 0x197   : > { %9754 = vst [vmem:[#allocation9_spill] sm:$0xff] %v9335_v43  ;;  %v9338_v1 = vadd.f32 %v6552_v45, %v2095_v38  ;;  %v2093_v9 = vadd.f32 %v2038_v35, %v9245_v58 }
 0x198   : > { %v2795_v42 = vpop.f32.mrf.mxu0  ;;  %v6505_v30 = vpop.f32.mrf.mxu1 }
 0x199   : > { %v9341_v36 = vadd.f32 %v2792_v23, %v2093_v9  ;;  %v2096_v24 = vadd.f32 %v6505_v30, %v9248_v26 }
 0x19a   : > { %v6556_v61 = vpop.f32.mrf.mxu0  ;;  %v2041_v39 = vpop.f32.mrf.mxu1 }
 0x19b   : > { %9755 = vst [vmem:[#allocation18_spill] sm:$0xff] %v9341_v36  ;;  %v9344_v20 = vadd.f32 %v6553_v18, %v2096_v24  ;;  %v2094_v41 = vadd.f32 %v2041_v39, %v9251_v59 }
 0x19c   : > { %v2808_v19 = vpop.f32.mrf.mxu0  ;;  %v6508_v40 = vpop.f32.mrf.mxu1 }
 0x19d   : > { %9756 = vst [vmem:[#allocation13_spill] sm:$0xff] %v9344_v20  ;;  %v9347_v54 = vadd.f32 %v2795_v42, %v2094_v41  ;;  %v2099_v15 = vadd.f32 %v6508_v40, %v9254_v5 }
 0x19e   : > { %v6557_v12 = vpop.f32.mrf.mxu0  ;;  %v2054_v58 = vpop.f32.mrf.mxu1 }
 0x19f   : > { %9757 = vst [vmem:[#allocation15_spill] sm:$0xff] %v9347_v54  ;;  %v9350_v22 = vadd.f32 %v6556_v61, %v2099_v15  ;;  %v2097_v53 = vadd.f32 %v2054_v58, %v9257_v60 }
 0x1a0   : > { %v2811_v25 = vpop.f32.mrf.mxu0  ;;  %v6509_v26 = vpop.f32.mrf.mxu1 }
 0x1a1   : > { %v9353_v29 = vadd.f32 %v2808_v19, %v2097_v53  ;;  %v2100_v14 = vadd.f32 %v6509_v26, %v9260_v28 }
 0x1a2   : > { %v6624_v51 = vpop.f32.mrf.mxu0  ;;  %v2057_v59 = vpop.f32.mrf.mxu1 }
 0x1a3   : > { %9758 = vst [vmem:[#allocation17_spill] sm:$0xff] %v9353_v29  ;;  %v9356_v57 = vadd.f32 %v6557_v12, %v2100_v14  ;;  %v2098_v7 = vadd.f32 %v2057_v59, %v9263_v46 }
 0x1a4   : > { %v3581_v62 = vpop.f32.mrf.mxu0  ;;  %v6576_v5 = vpop.f32.mrf.mxu1 }
 0x1a5   : > { %9759 = vst [vmem:[#allocation20_spill] sm:$0xff] %v9356_v57  ;;  %v9359_v3 = vadd.f32 %v2811_v25, %v2098_v7  ;;  %v3323_v45 = vadd.f32 %v6576_v5, %v9266_v56 }
 0x1a6   : > { %v9362_v33 = vpop.f32.mrf.mxu0  ;;  %v3194_v60 = vpop.f32.mrf.mxu1 }
 0x1a7   : > { %9760 = vst [vmem:[#allocation2_spill] sm:$0xff] %v9359_v3  ;;  %v9364_v52 = vadd.f32 %v6624_v51, %v3323_v45  ;;  %v3321_v23 = vadd.f32 %v3194_v60, %v9269_v8 }
 0x1a8   : > { %v9367_v28 = vpop.f32.mrf.mxu0  ;;  %v9369_v49 = vpop.f32.mrf.mxu1 }
 0x1a9   : > { %v9371_v38 = vadd.f32 %v3581_v62, %v3321_v23 }
 0x1aa   : > { %v6628_v46 = vpop.f32.mrf.mxu0  ;;  %v9373_v18 = vpop.f32.mrf.mxu1 }
 0x1ac   : > { %v9375_v35 = vpop.f32.mrf.mxu0  ;;  %v6580_v9 = vpop.f32.mrf.mxu1 }
 0x1ad   : > { %v3327_v56 = vadd.f32 %v6580_v9, %v9278_v21 }
 0x1ae   : > { %v9378_v42 = vpop.f32.mrf.mxu0  ;;  %v9380_v30 = vpop.f32.mrf.mxu1 }
 0x1af   : > { %v9382_v24 = vadd.f32 %v6628_v46, %v3327_v56 }
 0x1b0   : > { %v9384_v8 = vpop.f32.mrf.mxu0  ;;  %v9386_v61 = vpop.f32.mrf.mxu1 }
 0x1b2   : > { %v6632_v39 = vpop.f32.mrf.mxu0  ;;  %v9388_v41 = vpop.f32.mrf.mxu1 }
 0x1b4   : > { %v9390_v19 = vpop.f32.mrf.mxu0  ;;  %v6584_v40 = vpop.f32.mrf.mxu1 }
 0x1b5   : > { %v3331_v15 = vadd.f32 %v6584_v40, %v9290_v0 }
 0x1b6   : > { %v9393_v12 = vpop.f32.mrf.mxu0  ;;  %v9395_v21 = vpop.f32.mrf.mxu1 }
 0x1b7   : > { %v9397_v58 = vadd.f32 %v6632_v39, %v3331_v15 }
 0x1b8   : > { %v9399_v53 = vpop.f32.mrf.mxu0  ;;  %v9401_v25 = vpop.f32.mrf.mxu1 }
 0x1ba   : > { %v6636_v26 = vpop.f32.mrf.mxu0  ;;  %v9403_v14 = vpop.f32.mrf.mxu1 }
 0x1bc   : > { %v9405_v51 = vpop.f32.mrf.mxu0  ;;  %v6588_v59 = vpop.f32.mrf.mxu1 }
 0x1bd   : > { %v3335_v7 = vadd.f32 %v6588_v59, %v9302_v16 }
 0x1be   : > { %v9408_v62 = vpop.f32.mrf.mxu0  ;;  %v9410_v0 = vpop.f32.mrf.mxu1 }
 0x1bf   : > { %v9412_v5 = vadd.f32 %v6636_v26, %v3335_v7 }
 0x1c0   : > { %v9414_v45 = vpop.f32.mrf.mxu0  ;;  %v9416_v60 = vpop.f32.mrf.mxu1 }
 0x1c2   : > { %v6640_v23 = vpop.f32.mrf.mxu0  ;;  %v9418_v46 = vpop.f32.mrf.mxu1 }
 0x1c4   : > { %v9420_v9 = vpop.f32.mrf.mxu0  ;;  %v6592_v56 = vpop.f32.mrf.mxu1 }
 0x1c5   : > { %v3339_v39 = vadd.f32 %v6592_v56, %v9314_v55 }
 0x1c6   : > { %v9423_v40 = vpop.f32.mrf.mxu0  ;;  %v9425_v16 = vpop.f32.mrf.mxu1 }
 0x1c7   : > { %v9427_v15 = vadd.f32 %v6640_v23, %v3339_v39 }
 0x1c8   : > { %v9429_v26 = vpop.f32.mrf.mxu0  ;;  %v9431_v59 = vpop.f32.mrf.mxu1 }
 0x1c9   : > { %9761 = vst [vmem:[#allocation5_spill] sm:$0xff] %v9429_v26 }
 0x1ca   : > { %v6644_v7 = vpop.f32.mrf.mxu0  ;;  %v9433_v3 = vpop.f32.mrf.mxu1 }
 0x1cc   : > { %v9435_v57 = vpop.f32.mrf.mxu0  ;;  %v6596_v29 = vpop.f32.mrf.mxu1 }
 0x1cd   : > { %9762 = vst [vmem:[#allocation4_spill] sm:$0xff] %v9435_v57  ;;  %v3343_v54 = vadd.f32 %v6596_v29, %v9326_v31 }
 0x1ce   : > { %v9438_v20 = vpop.f32.mrf.mxu0  ;;  %v9440_v55 = vpop.f32.mrf.mxu1 }
 0x1cf   : > { %9763 = vst [vmem:[#allocation6_spill] sm:$0xff] %v9438_v20  ;;  %v9442_v56 = vadd.f32 %v6644_v7, %v3343_v54 }
 0x1d0   : > { %v9444_v23 = vpop.f32.mrf.mxu0  ;;  %v9446_v39 = vpop.f32.mrf.mxu1 }
 0x1d1   : > { %9764 = vst [vmem:[#allocation8_spill] sm:$0xff] %v9442_v56  ;;  %9765 = vst [vmem:[#allocation10_spill] sm:$0xff] %v9444_v23 }
 0x1d2   : > { %9766 = vst [vmem:[#allocation11_spill] sm:$0xff] %v9446_v39  ;;  %v6648_v36 = vpop.f32.mrf.mxu0  ;;  %v9448_v43 = vpop.f32.mrf.mxu1 }
 0x1d3   : > { %9767 = vst [vmem:[#allocation12_spill] sm:$0xff] %v9448_v43 }
 0x1d4   : > { %v9450_v27 = vpop.f32.mrf.mxu0  ;;  %v6600_v10 = vpop.f32.mrf.mxu1 }
 0x1d5   : > { %9768 = vst [vmem:[#allocation14_spill] sm:$0xff] %v9450_v27  ;;  %v3347_v57 = vadd.f32 %v6600_v10, %v9338_v1 }
 0x1d6   : > { %v9453_v26 = vpop.f32.mrf.mxu0  ;;  %v9455_v31 = vpop.f32.mrf.mxu1 }
 0x1d7   : > { %9769 = vst [vmem:[#allocation16_spill] sm:$0xff] %v9453_v26  ;;  %v9457_v29 = vadd.f32 %v6648_v36, %v3347_v57 }
 0x1d8   : > { %v9459_v54 = vpop.f32.mrf.mxu0  ;;  %v9461_v7 = vpop.f32.mrf.mxu1 }
 0x1d9   : > { %9770 = vst [vmem:[#allocation19_spill] sm:$0xff] %v9457_v29  ;;  %9771 = vst [vmem:[#allocation21_spill] sm:$0xff] %v9459_v54 }
 0x1da   : > { %9772 = vst [vmem:[#allocation22_spill] sm:$0xff] %v9461_v7  ;;  %v6652_v23 = vpop.f32.mrf.mxu0  ;;  %v9463_v56 = vpop.f32.mrf.mxu1 }
 0x1db   : > { %9773 = vst [vmem:[#allocation23_spill] sm:$0xff] %v9463_v56 }
 0x1dc   : > { %v9465_v20 = vpop.f32.mrf.mxu0  ;;  %v6604_v43 = vpop.f32.mrf.mxu1 }
 0x1dd   : > { %9774 = vst [vmem:[#allocation24_spill] sm:$0xff] %v9465_v20  ;;  %v3351_v27 = vadd.f32 %v6604_v43, %v9350_v22  ;;  %v3324_v20 = vadd.f32 %v9369_v49, %v9272_v50  ;;  %v3322_v43 = vadd.f32 %v9373_v18, %v9275_v4  ;;  %v3325_v49 = vadd.f32 %v9380_v30, %v9281_v63 }
 0x1de   : > { %v9468_v39 = vpop.f32.mrf.mxu0  ;;  %v9470_v10 = vpop.f32.mrf.mxu1  ;;  %v3328_v4 = vadd.f32 %v9386_v61, %v9284_v32 }
 0x1df   : > { %9775 = vst [vmem:[#allocation25_spill] sm:$0xff] %v9468_v39  ;;  %9776 = vst [vmem:[#allocation26_spill] sm:$0xff] %v9470_v10  ;;  %v9472_v1 = vadd.f32 %v6652_v23, %v3351_v27  ;;  %v3711_v27 = vadd.f32 %v9362_v33, %v3324_v20  ;;  %v3712_v32 = vadd.f32 %v9375_v35, %v3325_v49 }
 0x1e0   : > { %v9474_v36 = vpop.f32.mrf.mxu0  ;;  %v9476_v57 = vpop.f32.mrf.mxu1  ;;  %v3715_v61 = vadd.f32 %v9378_v42, %v3328_v4  ;;  %v3332_v49 = vadd.f32 %v9401_v25, %v9296_v47 }
 0x1e1   : > { %9777 = vst [vmem:[#allocation27_spill] sm:$0xff] %v9472_v1  ;;  %9778 = vst [vmem:[#allocation28_spill] sm:$0xff] %v9474_v36 }
 0x1e2   : > { %9779 = vst [vmem:[#allocation29_spill] sm:$0xff] %v9476_v57  ;;  %v9478_v29 = vpop.f32.mrf.mxu1 }
 0x1e3   : > { %v6720_v54 = vpop.f32.mrf.mxu0  ;;  %9780 = vst [vmem:[#allocation30_spill] sm:$0xff] %v9478_v29  ;;  %v3709_v29 = vadd.f32 %v9367_v28, %v3322_v43 }
 0x1e4   : > { %v6672_v56 = vpop.f32.mrf.mxu1 }
 0x1e5   : > { %v4833_v26 = vpop.f32.mrf.mxu0  ;;  %v4464_v23 = vadd.f32 %v6672_v56, %v9364_v52 }
 0x1e6   : > { %v4335_v39 = vpop.f32.mrf.mxu1 }
 0x1e7   : > { %v6721_v22 = vpop.f32.mrf.mxu0  ;;  %v4462_v36 = vadd.f32 %v4335_v39, %v9371_v38  ;;  %v4962_v7 = vadd.f32 %v6720_v54, %v4464_v23  ;;  %v3326_v38 = vadd.f32 %v9388_v41, %v9287_v48 }
 0x1e8   : > { %v6673_v57 = vpop.f32.mrf.mxu1 }
 0x1e9   : > { %v4836_v1 = vpop.f32.mrf.mxu0  ;;  %v4465_v10 = vadd.f32 %v6673_v57, %v3711_v27  ;;  %v4960_v20 = vadd.f32 %v4833_v26, %v4462_v36  ;;  %v3713_v57 = vadd.f32 %v9384_v8, %v3326_v38  ;;  %v5191_v27 = vmul.f32 %v4962_v7, %v4962_v7 }
 0x1ea   : > { %v4338_v18 = vpop.f32.mrf.mxu1 }
 0x1eb   : > { %v6724_v50 = vpop.f32.mrf.mxu0  ;;  %v4963_v33 = vadd.f32 %v6721_v22, %v4465_v10  ;;  %v4463_v52 = vadd.f32 %v4338_v18, %v3709_v29  ;;  %v5189_v54 = vmul.f32 %v4960_v20, %v4960_v20 }
 0x1ec   : > { %v6676_v28 = vpop.f32.mrf.mxu1 }
 0x1ed   : > { %v4849_v56 = vpop.f32.mrf.mxu0  ;;  %v6015_v63 = vpack.c.bf16 %v4963_v33, %v4962_v7  ;;  %v4961_v30 = vadd.f32 %v4836_v1, %v4463_v52  ;;  %v4468_v26 = vadd.f32 %v6676_v28, %v9382_v24  ;;  %v3329_v1 = vadd.f32 %v9395_v21, %v9293_v6 }
 0x1ee   : > { %v4351_v29 = vpop.f32.mrf.mxu1  ;;  %v5192_v4 = vmul.f32 %v4963_v33, %v4963_v33 }
 0x1ef   : > { %v6725_v39 = vpop.f32.mrf.mxu0  ;;  %6087 = vst [vmem:[%s9498_s19 + $0x8] sm:$0xff] %v6015_v63   ;;  %v6010_v48 = vpack.c.bf16 %v4961_v30, %v4960_v20  ;;  %v5152_v41 = vadd.f32 %v4961_v30, %v4960_v20  ;;  %v5190_v10 = vmul.f32 %v4961_v30, %v4961_v30  ;;  %v4466_v43 = vadd.f32 %v4351_v29, %v3712_v32 }
 0x1f0   : > { %v6677_v22 = vpop.f32.mrf.mxu1  ;;  %v4966_v18 = vadd.f32 %v6724_v50, %v4468_v26  ;;  %v3716_v63 = vadd.f32 %v9390_v19, %v3329_v1  ;;  %v3719_v26 = vadd.f32 %v9393_v12, %v3332_v49 }
 0x1f1   : > { %v4852_v36 = vpop.f32.mrf.mxu0  ;;  %6011 = vst [vmem:[%s9498_s19] sm:$0xff] %v6010_v48   ;;  %v5153_v35 = vadd.f32 %v5152_v41, %v4962_v7  ;;  %v5221_v42 = vadd.f32 %v5190_v10, %v5189_v54  ;;  %v4469_v23 = vadd.f32 %v6677_v22, %v3715_v61  ;;  %v4964_v20 = vadd.f32 %v4849_v56, %v4466_v43 }
 0x1f2   : > { %v4354_v52 = vpop.f32.mrf.mxu1  ;;  %v3330_v7 = vadd.f32 %v9403_v14, %v9299_v34  ;;  %v5195_v43 = vmul.f32 %v4966_v18, %v4966_v18 }
 0x1f3   : > { %v6728_v24 = vpop.f32.mrf.mxu0  ;;  %v5222_v28 = vadd.f32 %v5221_v42, %v5191_v27  ;;  %v5154_v8 = vadd.f32 %v5153_v35, %v4963_v33  ;;  %v4967_v38 = vadd.f32 %v6725_v39, %v4469_v23  ;;  %v4467_v6 = vadd.f32 %v4354_v52, %v3713_v57 }
 0x1f4   : > { %v6680_v30 = vpop.f32.mrf.mxu1  ;;  %v5193_v61 = vmul.f32 %v4964_v20, %v4964_v20  ;;  %v3717_v10 = vadd.f32 %v9399_v53, %v3330_v7  ;;  %v3333_v57 = vadd.f32 %v9410_v0, %v9305_v37 }
 0x1f5   : > { %v4865_v21 = vpop.f32.mrf.mxu0  ;;  %v5155_v32 = vadd.f32 %v5154_v8, %v4964_v20  ;;  %v5223_v29 = vadd.f32 %v5222_v28, %v5192_v4  ;;  %v6025_v47 = vpack.c.bf16 %v4967_v38, %v4966_v18  ;;  %v4965_v50 = vadd.f32 %v4852_v36, %v4467_v6 }
 0x1f6   : > { %v4367_v56 = vpop.f32.mrf.mxu1  ;;  %v4472_v39 = vadd.f32 %v6680_v30, %v9397_v58  ;;  %v3336_v36 = vadd.f32 %v9416_v60, %v9308_v2  ;;  %v5196_v53 = vmul.f32 %v4967_v38, %v4967_v38  ;;  %v3720_v0 = vadd.f32 %v9405_v51, %v3333_v57 }
 0x1f7   : > { %v6729_v25 = vpop.f32.mrf.mxu0  ;;  %v5224_v33 = vadd.f32 %v5223_v29, %v5193_v61  ;;  %6089 = vst [vmem:[%s9498_s19 + $0x18] sm:$0xff] %v6025_v47   ;;  %v4470_v54 = vadd.f32 %v4367_v56, %v3716_v63  ;;  %v6020_v48 = vpack.c.bf16 %v4965_v50, %v4964_v20  ;;  %v5156_v41 = vadd.f32 %v5155_v32, %v4965_v50 }
 0x1f8   : > { %v5194_v34 = vmul.f32 %v4965_v50, %v4965_v50  ;;  %v6681_v14 = vpop.f32.mrf.mxu1  ;;  %v4970_v42 = vadd.f32 %v6728_v24, %v4472_v39  ;;  %v3334_v2 = vadd.f32 %v9418_v46, %v9311_v17  ;;  %v3723_v8 = vadd.f32 %v9408_v62, %v3336_v36 }
 0x1f9   : > { %v4868_v19 = vpop.f32.mrf.mxu0  ;;  %v4473_v12 = vadd.f32 %v6681_v14, %v3719_v26  ;;  %6088 = vst [vmem:[%s9498_s19 + $0x10] sm:$0xff] %v6020_v48   ;;  %v5157_v22 = vadd.f32 %v5156_v41, %v4966_v18  ;;  %v4968_v27 = vadd.f32 %v4865_v21, %v4470_v54  ;;  %v3337_v62 = vadd.f32 %v9425_v16, %v9317_v13 }
 0x1fa   : > { %v5225_v58 = vadd.f32 %v5224_v33, %v5194_v34  ;;  %v4370_v35 = vpop.f32.mrf.mxu1  ;;  %v3721_v46 = vadd.f32 %v9414_v45, %v3334_v2  ;;  %v3340_v47 = vadd.f32 %v9431_v59, %v9320_v44  ;;  %v5199_v56 = vmul.f32 %v4970_v42, %v4970_v42 }
 0x1fb   : > { %v6732_v1 = vpop.f32.mrf.mxu0  ;;  %v4971_v23 = vadd.f32 %v6729_v25, %v4473_v12  ;;  %v4471_v49 = vadd.f32 %v4370_v35, %v3717_v10  ;;  %v5158_v52 = vadd.f32 %v5157_v22, %v4967_v38  ;;  %v5197_v24 = vmul.f32 %v4968_v27, %v4968_v27 }
 0x1fc   : > { %v5226_v20 = vadd.f32 %v5225_v58, %v5195_v43  ;;  %v6684_v37 = vpop.f32.mrf.mxu1  ;;  %v3724_v16 = vadd.f32 %v9420_v9, %v3337_v62  ;;  %v3338_v44 = vadd.f32 %v9433_v3, %v9323_v11  ;;  %v3727_v36 = vadd.f32 %v9423_v40, %v3340_v47  ;;  %v9781_v3 = vld [vmem:[#allocation5_spill] sm:$0xff] }
 0x1fd   : > { %v4881_v4 = vpop.f32.mrf.mxu0  ;;  %v6035_v60 = vpack.c.bf16 %v4971_v23, %v4970_v42  ;;  %v4969_v28 = vadd.f32 %v4868_v19, %v4471_v49  ;;  %v5159_v6 = vadd.f32 %v5158_v52, %v4968_v27  ;;  %v4476_v38 = vadd.f32 %v6684_v37, %v9412_v5  ;;  %v9784_v52 = vld [vmem:[#allocation11_spill] sm:$0xff] }
 0x1fe   : > { %v5227_v21 = vadd.f32 %v5226_v20, %v5196_v53  ;;  %v4383_v63 = vpop.f32.mrf.mxu1  ;;  %v5200_v45 = vmul.f32 %v4971_v23, %v4971_v23  ;;  %v9782_v53 = vld [vmem:[#allocation3_spill] sm:$0xff] }
 0x1ff   : > { %v6733_v18 = vpop.f32.mrf.mxu0  ;;  %6091 = vst [vmem:[%s9498_s19 + $0x28] sm:$0xff] %v6035_v60   ;;  %v6030_v7 = vpack.c.bf16 %v4969_v28, %v4968_v27  ;;  %v5198_v30 = vmul.f32 %v4969_v28, %v4969_v28  ;;  %v4474_v32 = vadd.f32 %v4383_v63, %v3720_v0  ;;  %v5160_v29 = vadd.f32 %v5159_v6, %v4969_v28  ;;  %v9783_v20 = vld [vmem:[#allocation7_spill] sm:$0xff] }
 0x200   : > { %v5228_v61 = vadd.f32 %v5227_v21, %v5197_v24  ;;  %v6685_v17 = vpop.f32.mrf.mxu1  ;;  %v4974_v54 = vadd.f32 %v6732_v1, %v4476_v38  ;;  %v3341_v40 = vadd.f32 %v9440_v55, %v9782_v53  ;;  %v3344_v37 = vadd.f32 %v9784_v52, %v9783_v20  ;;  %v9795_v52 = vld [vmem:[#allocation15_spill] sm:$0xff] }
 0x201   : > { %v4884_v51 = vpop.f32.mrf.mxu0  ;;  %6090 = vst [vmem:[%s9498_s19 + $0x20] sm:$0xff] %v6030_v7   ;;  %v4477_v25 = vadd.f32 %v6685_v17, %v3723_v8  ;;  %v5161_v26 = vadd.f32 %v5160_v29, %v4970_v42  ;;  %v4972_v5 = vadd.f32 %v4881_v4, %v4474_v32  ;;  %v3725_v4 = vadd.f32 %v9781_v3, %v3338_v44  ;;  %v9785_v32 = vld [vmem:[#allocation4_spill] sm:$0xff] }
 0x202   : > { %v5229_v33 = vadd.f32 %v5228_v61, %v5198_v30  ;;  %v4386_v39 = vpop.f32.mrf.mxu1  ;;  %v5203_v60 = vmul.f32 %v4974_v54, %v4974_v54  ;;  %v9786_v61 = vld [vmem:[#allocation9_spill] sm:$0xff]  ;;  %v9787_v29 = vld [vmem:[#allocation12_spill] sm:$0xff] }
 0x203   : > { %v4975_v19 = vadd.f32 %v6733_v18, %v4477_v25  ;;  %v4475_v48 = vadd.f32 %v4386_v39, %v3721_v46  ;;  %v5162_v14 = vadd.f32 %v5161_v26, %v4971_v23  ;;  %v5201_v1 = vmul.f32 %v4972_v5, %v4972_v5  ;;  %v9788_v25 = vld [vmem:[#allocation6_spill] sm:$0xff] }
 0x204   : > { %v6736_v50 = vpop.f32.mrf.mxu0  ;;  %v5230_v34 = vadd.f32 %v5229_v33, %v5199_v56  ;;  %v6688_v13 = vpop.f32.mrf.mxu1  ;;  %v3342_v17 = vadd.f32 %v9787_v29, %v9786_v61  ;;  %v3731_v56 = vadd.f32 %v9788_v25, %v3344_v37  ;;  %v9796_v37 = vld [vmem:[#allocation23_spill] sm:$0xff] }
 0x205   : > { %v6045_v59 = vpack.c.bf16 %v4975_v19, %v4974_v54  ;;  %v4973_v10 = vadd.f32 %v4884_v51, %v4475_v48  ;;  %v5163_v12 = vadd.f32 %v5162_v14, %v4972_v5  ;;  %v4480_v35 = vadd.f32 %v6688_v13, %v9427_v15 }
 0x206   : > { %v4897_v41 = vpop.f32.mrf.mxu0  ;;  %v5231_v43 = vadd.f32 %v5230_v34, %v5200_v45  ;;  %v4399_v22 = vpop.f32.mrf.mxu1  ;;  %v5204_v7 = vmul.f32 %v4975_v19, %v4975_v19  ;;  %v3728_v51 = vadd.f32 %v9785_v32, %v3341_v40  ;;  %v9794_v40 = vld [vmem:[#allocation14_spill] sm:$0xff] }
 0x207   : > { %6093 = vst [vmem:[%s9498_s19 + $0x38] sm:$0xff] %v6045_v59   ;;  %v6040_v58 = vpack.c.bf16 %v4973_v10, %v4972_v5  ;;  %v5202_v27 = vmul.f32 %v4973_v10, %v4973_v10  ;;  %v4478_v42 = vadd.f32 %v4399_v22, %v3724_v16  ;;  %v5164_v49 = vadd.f32 %v5163_v12, %v4973_v10  ;;  %v9790_v16 = vld [vmem:[#allocation10_spill] sm:$0xff] }
 0x208   : > { %v6737_v57 = vpop.f32.mrf.mxu0  ;;  %v5232_v23 = vadd.f32 %v5231_v43, %v5201_v1  ;;  %v6689_v11 = vpop.f32.mrf.mxu1  ;;  %v4978_v6 = vadd.f32 %v6736_v50, %v4480_v35  ;;  %v3729_v44 = vadd.f32 %v9790_v16, %v3342_v17  ;;  %v9791_v59 = vld [vmem:[#allocation18_spill] sm:$0xff]  ;;  %v9799_v17 = vld [vmem:[#allocation21_spill] sm:$0xff] }
 0x209   : > { %6092 = vst [vmem:[%s9498_s19 + $0x30] sm:$0xff] %v6040_v58   ;;  %v4481_v0 = vadd.f32 %v6689_v11, %v3727_v36  ;;  %v5165_v28 = vadd.f32 %v5164_v49, %v4974_v54  ;;  %v4976_v15 = vadd.f32 %v4897_v41, %v4478_v42  ;;  %v3345_v10 = vadd.f32 %v9455_v31, %v9791_v59  ;;  %v9793_v36 = vld [vmem:[#allocation22_spill] sm:$0xff] }
 0x20a   : > { %v4900_v9 = vpop.f32.mrf.mxu0  ;;  %v5233_v18 = vadd.f32 %v5232_v23, %v5202_v27  ;;  %v4402_v8 = vpop.f32.mrf.mxu1  ;;  %v5207_v22 = vmul.f32 %v4978_v6, %v4978_v6 }
 0x20b   : > { %v4979_v24 = vadd.f32 %v6737_v57, %v4481_v0  ;;  %v4479_v21 = vadd.f32 %v4402_v8, %v3725_v4  ;;  %v5166_v38 = vadd.f32 %v5165_v28, %v4975_v19  ;;  %v5205_v50 = vmul.f32 %v4976_v15, %v4976_v15  ;;  %v9789_v19 = vld [vmem:[#allocation8_spill] sm:$0xff]  ;;  %v9792_v57 = vld [vmem:[#allocation13_spill] sm:$0xff] }
 0x20c   : > { %v6740_v2 = vpop.f32.mrf.mxu0  ;;  %v5234_v30 = vadd.f32 %v5233_v18, %v5203_v60  ;;  %v6692_v55 = vpop.f32.mrf.mxu1  ;;  %v3348_v12 = vadd.f32 %v9793_v36, %v9792_v57  ;;  %v3732_v20 = vadd.f32 %v9794_v40, %v3345_v10  ;;  %v3346_v0 = vadd.f32 %v9796_v37, %v9795_v52  ;;  %v9804_v57 = vld [vmem:[#allocation24_spill] sm:$0xff] }
 0x20d   : > { %v6055_v46 = vpack.c.bf16 %v4979_v24, %v4978_v6  ;;  %v4977_v62 = vadd.f32 %v4900_v9, %v4479_v21  ;;  %v5167_v26 = vadd.f32 %v5166_v38, %v4976_v15  ;;  %v4484_v48 = vadd.f32 %v6692_v55, %v9789_v19 }
 0x20e   : > { %v4913_v63 = vpop.f32.mrf.mxu0  ;;  %v5235_v33 = vadd.f32 %v5234_v30, %v5204_v7  ;;  %v4415_v5 = vpop.f32.mrf.mxu1  ;;  %v5208_v3 = vmul.f32 %v4979_v24, %v4979_v24 }
 0x20f   : > { %6095 = vst [vmem:[%s9498_s19 + $0x48] sm:$0xff] %v6055_v46   ;;  %v6050_v39 = vpack.c.bf16 %v4977_v62, %v4976_v15  ;;  %v5206_v54 = vmul.f32 %v4977_v62, %v4977_v62  ;;  %v4482_v41 = vadd.f32 %v4415_v5, %v3728_v51  ;;  %v5168_v14 = vadd.f32 %v5167_v26, %v4977_v62  ;;  %v9797_v15 = vld [vmem:[#allocation16_spill] sm:$0xff]  ;;  %v9800_v62 = vld [vmem:[#allocation17_spill] sm:$0xff] }
 0x210   : > { %v6741_v47 = vpop.f32.mrf.mxu0  ;;  %v5236_v34 = vadd.f32 %v5235_v33, %v5205_v50  ;;  %v6693_v13 = vpop.f32.mrf.mxu1  ;;  %v4982_v9 = vadd.f32 %v6740_v2, %v4484_v48  ;;  %v3735_v8 = vadd.f32 %v9797_v15, %v3348_v12  ;;  %v3733_v46 = vadd.f32 %v9799_v17, %v3346_v0  ;;  %v9803_v26 = vld [vmem:[#allocation29_spill] sm:$0xff]  ;;  %v9805_v12 = vld [vmem:[#allocation2_spill] sm:$0xff]  ;;  %v9809_v0 = vld [vmem:[#allocation28_spill] sm:$0xff] }
 0x211   : > { %6094 = vst [vmem:[%s9498_s19 + $0x40] sm:$0xff] %v6050_v39   ;;  %v4485_v1 = vadd.f32 %v6693_v13, %v3731_v56  ;;  %v5169_v58 = vadd.f32 %v5168_v14, %v4978_v6  ;;  %v4980_v35 = vadd.f32 %v4913_v63, %v4482_v41  ;;  %v9802_v56 = vld [vmem:[#allocation20_spill] sm:$0xff] }
 0x212   : > { %v4916_v45 = vpop.f32.mrf.mxu0  ;;  %v5237_v27 = vadd.f32 %v5236_v34, %v5206_v54  ;;  %v4418_v42 = vpop.f32.mrf.mxu1  ;;  %v3352_v50 = vadd.f32 %v9803_v26, %v9802_v56  ;;  %v5211_v39 = vmul.f32 %v4982_v9, %v4982_v9 }
 0x213   : > { %v4983_v23 = vadd.f32 %v6741_v47, %v4485_v1  ;;  %v4483_v49 = vadd.f32 %v4418_v42, %v3729_v44  ;;  %v5170_v53 = vadd.f32 %v5169_v58, %v4979_v24  ;;  %v5209_v2 = vmul.f32 %v4980_v35, %v4980_v35  ;;  %v9798_v24 = vld [vmem:[#allocation19_spill] sm:$0xff]  ;;  %v9801_v47 = vld [vmem:[#allocation26_spill] sm:$0xff] }
 0x214   : > { %v6744_v43 = vpop.f32.mrf.mxu0  ;;  %v5238_v4 = vadd.f32 %v5237_v27, %v5207_v22  ;;  %v6696_v31 = vpop.f32.mrf.mxu1  ;;  %v3349_v25 = vadd.f32 %v9801_v47, %v9800_v62  ;;  %v9806_v1 = vld [vmem:[#allocation30_spill] sm:$0xff] }
 0x215   : > { %v6065_v60 = vpack.c.bf16 %v4983_v23, %v4982_v9  ;;  %v4981_v28 = vadd.f32 %v4916_v45, %v4483_v49  ;;  %v5171_v6 = vadd.f32 %v5170_v53, %v4980_v35  ;;  %v4488_v38 = vadd.f32 %v6696_v31, %v9798_v24 }
 0x216   : > { %v4929_v11 = vpop.f32.mrf.mxu0  ;;  %v5239_v21 = vadd.f32 %v5238_v4, %v5208_v3  ;;  %v4431_v63 = vpop.f32.mrf.mxu1  ;;  %v5212_v13 = vmul.f32 %v4983_v23, %v4983_v23  ;;  %v3736_v36 = vadd.f32 %v9804_v57, %v3349_v25  ;;  %v3350_v22 = vadd.f32 %v9806_v1, %v9805_v12 }
 0x217   : > { %6097 = vst [vmem:[%s9498_s19 + $0x58] sm:$0xff] %v6065_v60   ;;  %v6060_v7 = vpack.c.bf16 %v4981_v28, %v4980_v35  ;;  %v5210_v30 = vmul.f32 %v4981_v28, %v4981_v28  ;;  %v4486_v55 = vadd.f32 %v4431_v63, %v3732_v20  ;;  %v5172_v61 = vadd.f32 %v5171_v6, %v4981_v28  ;;  %v9807_v35 = vld [vmem:[#allocation25_spill] sm:$0xff] }
 0x218   : > { %v6745_v18 = vpop.f32.mrf.mxu0  ;;  %v5240_v51 = vadd.f32 %v5239_v21, %v5209_v2  ;;  %v6697_v29 = vpop.f32.mrf.mxu1  ;;  %v4986_v45 = vadd.f32 %v6744_v43, %v4488_v38  ;;  %v3739_v42 = vadd.f32 %v9807_v35, %v3352_v50  ;;  %v3737_v60 = vadd.f32 %v9809_v0, %v3350_v22 }
 0x219   : > { %6096 = vst [vmem:[%s9498_s19 + $0x50] sm:$0xff] %v6060_v7   ;;  %v4489_v33 = vadd.f32 %v6697_v29, %v3735_v8  ;;  %v5173_v54 = vadd.f32 %v5172_v61, %v4982_v9  ;;  %v4984_v48 = vadd.f32 %v4929_v11, %v4486_v55 }
 0x21a   : > { %v4932_v32 = vpop.f32.mrf.mxu0  ;;  %v5241_v19 = vadd.f32 %v5240_v51, %v5210_v30  ;;  %v4434_v41 = vpop.f32.mrf.mxu1 }
 0x21b   : > { %v4987_v34 = vadd.f32 %v6745_v18, %v4489_v33  ;;  %v4487_v14 = vadd.f32 %v4434_v41, %v3733_v46  ;;  %v5174_v44 = vadd.f32 %v5173_v54, %v4983_v23  ;;  %v5213_v43 = vmul.f32 %v4984_v48, %v4984_v48  ;;  %v9808_v23 = vld [vmem:[#allocation27_spill] sm:$0xff] }
 0x21c   : > { %v6748_v5 = vpop.f32.mrf.mxu0  ;;  %v5242_v16 = vadd.f32 %v5241_v19, %v5211_v39  ;;  %v6700_v59 = vpop.f32.mrf.mxu1  ;;  %v5215_v18 = vmul.f32 %v4986_v45, %v4986_v45 }
 0x21d   : > { %v6075_v58 = vpack.c.bf16 %v4987_v34, %v4986_v45  ;;  %v4985_v27 = vadd.f32 %v4932_v32, %v4487_v14  ;;  %v5175_v9 = vadd.f32 %v5174_v44, %v4984_v48  ;;  %v4492_v53 = vadd.f32 %v6700_v59, %v9808_v23 }
 0x21e   : > { %v4945_v10 = vpop.f32.mrf.mxu0  ;;  %v5243_v49 = vadd.f32 %v5242_v16, %v5212_v13  ;;  %v4447_v11 = vpop.f32.mrf.mxu1  ;;  %v5216_v30 = vmul.f32 %v4987_v34, %v4987_v34 }
 0x21f   : > { %6099 = vst [vmem:[%s9498_s19 + $0x68] sm:$0xff] %v6075_v58   ;;  %v6070_v3 = vpack.c.bf16 %v4985_v27, %v4984_v48  ;;  %v5214_v4 = vmul.f32 %v4985_v27, %v4985_v27  ;;  %v4490_v31 = vadd.f32 %v4447_v11, %v3736_v36  ;;  %v5176_v20 = vadd.f32 %v5175_v9, %v4985_v27 }
 0x220   : > { %v5244_v40 = vadd.f32 %v5243_v49, %v5213_v43  ;;  %v6701_v52 = vpop.f32.mrf.mxu1  ;;  %v6749_v37 = vpop.f32.mrf.mxu0  ;;  %v4990_v21 = vadd.f32 %v6748_v5, %v4492_v53 }
 0x221   : > { %6098 = vst [vmem:[%s9498_s19 + $0x60] sm:$0xff] %v6070_v3   ;;  %v4493_v28 = vadd.f32 %v6701_v52, %v3739_v42  ;;  %v5177_v15 = vadd.f32 %v5176_v20, %v4986_v45  ;;  %v4988_v6 = vadd.f32 %v4945_v10, %v4490_v31 }
 0x222   : > { %v5245_v8 = vadd.f32 %v5244_v40, %v5214_v4  ;;  %v4450_v2 = vpop.f32.mrf.mxu1  ;;  %v4948_v55 = vpop.f32.mrf.mxu0  ;;  %v5219_v56 = vmul.f32 %v4990_v21, %v4990_v21 }
 0x223   : > { %v4991_v63 = vadd.f32 %v6749_v37, %v4493_v28  ;;  %v4491_v7 = vadd.f32 %v4450_v2, %v3737_v60  ;;  %v5178_v38 = vadd.f32 %v5177_v15, %v4987_v34  ;;  %v5217_v29 = vmul.f32 %v4988_v6, %v4988_v6 }
 0x224   : > { %v5246_v24 = vadd.f32 %v5245_v8, %v5215_v18 }
 0x225   : > { %v6085_v32 = vpack.c.bf16 %v4991_v63, %v4990_v21  ;;  %v4989_v51 = vadd.f32 %v4948_v55, %v4491_v7  ;;  %v5179_v61 = vadd.f32 %v5178_v38, %v4988_v6  ;;  %v5220_v33 = vmul.f32 %v4991_v63, %v4991_v63 }
 0x226   : > { %v5247_v17 = vadd.f32 %v5246_v24, %v5216_v30 }
 0x227   : > { %6101 = vst [vmem:[%s9498_s19 + $0x78] sm:$0xff] %v6085_v32   ;;  %v6080_v46 = vpack.c.bf16 %v4989_v51, %v4988_v6  ;;  %v5218_v62 = vmul.f32 %v4989_v51, %v4989_v51  ;;  %v5180_v25 = vadd.f32 %v5179_v61, %v4989_v51 }
 0x228   : > { %v5248_v47 = vadd.f32 %v5247_v17, %v5217_v29 }
 0x229   : > { %6100 = vst [vmem:[%s9498_s19 + $0x70] sm:$0xff] %v6080_v46   ;;  %v5181_v26 = vadd.f32 %v5180_v25, %v4990_v21 }
 0x22a   : > { %v5249_v50 = vadd.f32 %v5248_v47, %v5218_v62 }
 0x22b   : > { %v5182_v5 = vadd.f32 %v5181_v26, %v4991_v63 }
 0x22c   : > { %v5250_v39 = vadd.f32 %v5249_v50, %v5219_v56 }
 0x22d   : > { %v5183_v54 = vrot.slane %v5182_v5, 4 }
 0x22e   : > { %v5251_v19 = vadd.f32 %v5250_v39, %v5220_v33 }
 0x22f   : > { %v5184_v48 = vadd.f32 %v5183_v54, %v5182_v5 }
 0x230   : > { %v5252_v41 = vrot.slane %v5251_v19, 4 }
 0x231   : > { %v5185_v45 = vrot.slane %v5184_v48, 2 }
 0x232   : > { %v5253_v34 = vadd.f32 %v5252_v41, %v5251_v19 }
 0x233   : > { %v5186_v14 = vadd.f32 %v5185_v45, %v5184_v48 }
 0x234   : > { %v5254_v13 = vrot.slane %v5253_v34, 2 }
 0x235   : > { %v5187_v16 = vrot.slane %v5186_v14, 1 }
 0x236   : > { %v5255_v44 = vadd.f32 %v5254_v13, %v5253_v34 }
 0x237   : > { %v5188_v10 = vadd.f32 %v5187_v16, %v5186_v14 }
 0x238   : > { %v5256_v59 = vrot.slane %v5255_v44, 1 }
 0x23a   : > { %v5257_v57 = vadd.f32 %v5256_v59, %v5255_v44 }
 0x23c   : > { %v5259_v36 = vsel %vm5258_vm6, %v5188_v10, %v5257_v57 }
 0x23d   : > { %5260 = vst [vmem:[%s181_s24] sm:$0x3] %v5259_v36 }
 0x23e PF: > { %s14_s12 = sadd.s32 1, %s6910_s12  }
 0x23f   : > { %p11_p4 = scmp.ge.s32.totalorder %s14_s12, 4  }
 0x241   :  { %13 = sbr.rel (!%p11_p4) target bundleno = 1 (0x1), region = 80 }

</bundles_post_ra>
